<compile_context>
chip_gen: v7x
topology: tpu7x:2x2x1
jax: 0.10.0
libtpu: 0.0.40
codegen_flags: <defaults>
</compile_context>

<pallas_src>
from functools import partial

import jax
import jax.numpy as jnp
from jax.experimental import pallas as pl
from jax.experimental.pallas import tpu as pltpu


def _round_up(x, m):
    return (x + m - 1) // m * m


# ----------------------------------------------------------------------------
# Fused DoubleConv kernel: conv1 -> GN1+ReLU -> conv2 -> GN2+ReLU, one sample
# per grid step.
# ----------------------------------------------------------------------------
def _double_conv_kernel(x_ref, w1_ref, w2_ref, gm_ref, pp_ref, m_ref, o_ref,
                        slab_ref, xpad2_ref, *,
                        taps, l_pad, lead2, data_start, cin, cout, eps):
    """Refs:
      x_ref:     (1, Cin, Lp)  bf16  padded-flat input volume (zeros at halo)
      w1_ref:    (Cout, 27*Cin)  bf16 lane-dense conv1 weights
      w2_ref:    (Cout, 27*Cout) bf16 lane-dense conv2 weights
      gm_ref:    (Cout, Cout) f32   block-diag group-averaging matrix (1/count)
      pp_ref:    (Cout, 8) f32      packed [b1, g1, be1, b2, g2, be2, 0, 0]
      m_ref:     (1, L) f32         validity mask (1 = real voxel)
      o_ref:     (1, Cout, L) f32   module output in flat output coords
      slab_ref:  (27*max(Cin,Cout), L) bf16 VMEM im2col slab (reused by both convs)
      xpad2_ref: (Cout, Lp) bf16    VMEM padded-flat input for conv2
    """
    m = m_ref[...]                                   # (1, L)
    gm = gm_ref[...]                                 # (Cout, Cout)

    def gn_relu(y, gamma, beta):
        # Masked two-pass GroupNorm + ReLU on the whole (Cout, L) slab.
        # Group stats are broadcast per channel via the tiny `gm` matmul, so no
        # per-group sublane slicing is needed.  The final mask multiply keeps
        # flat-padding lanes exactly zero (conv2 relies on this as padding).
        ym = y * m
        mean = jnp.sum(jnp.dot(gm, ym, preferred_element_type=jnp.float32),
                       axis=1, keepdims=True)        # (Cout, 1) group mean
        cen = (y - mean) * m
        var = jnp.sum(jnp.dot(gm, cen * cen, preferred_element_type=jnp.float32),
                      axis=1, keepdims=True)         # (Cout, 1) group var
        y = (y - mean) * jax.lax.rsqrt(var + eps) * gamma + beta
        return jnp.maximum(y, 0.0) * m

    # ---- conv1: build fused-im2col slab, ONE MXU matmul ----------------------
    x = x_ref[0]                                     # (Cin, Lp) bf16
    for t, off in enumerate(taps):                   # 27 static lane offsets
        slab_ref[t * cin:(t + 1) * cin, :] = x[:, off:off + l_pad]
    y = jnp.dot(w1_ref[...], slab_ref[0:27 * cin, :],
                preferred_element_type=jnp.float32)  # (Cout, L) f32
    y = gn_relu(y + pp_ref[:, 0:1], pp_ref[:, 1:2], pp_ref[:, 2:3])

    # ---- GN1 output -> conv2's padded-flat bf16 input (lane-aligned store) ---
    xpad2_ref[...] = jnp.zeros_like(xpad2_ref)       # zero halo / tail lanes
    xpad2_ref[:, data_start:data_start + l_pad] = y.astype(xpad2_ref.dtype)

    # ---- conv2 ---------------------------------------------------------------
    x2 = xpad2_ref[...]                              # (Cout, Lp) bf16
    for t, off in enumerate(taps):
        slab_ref[t * cout:(t + 1) * cout, :] = \
            x2[:, lead2 + off:lead2 + off + l_pad]
    y = jnp.dot(w2_ref[...], slab_ref[0:27 * cout, :],
                preferred_element_type=jnp.float32)  # (Cout, L) f32
    y = gn_relu(y + pp_ref[:, 3:4], pp_ref[:, 4:5], pp_ref[:, 5:6])
    o_ref[0] = y.astype(o_ref.dtype)


def double_conv_fused(x_flat, w1, w2, pp, geom, *, num_groups=8, eps=1e-5):
    """x_flat: (N, Cin, Lp) bf16 padded-flat input.  Returns (N, Cout, L) f32."""
    n, cin, lp_pad = x_flat.shape
    cout = w1.shape[0]
    assert cout % num_groups == 0
    l_pad = geom["l_out_pad"]
    gmat = make_group_matrix(cout, num_groups, geom["valid_count"])
    kmax = 27 * max(cin, cout)

    kern = partial(_double_conv_kernel,
                   taps=geom["tap_offsets"], l_pad=l_pad,
                   lead2=geom["lead2"], data_start=geom["data_start"],
                   cin=cin, cout=cout, eps=eps)
    return pl.pallas_call(
        kern,
        out_shape=jax.ShapeDtypeStruct((n, cout, l_pad), jnp.float32),
        grid=(n,),
        in_specs=[
            pl.BlockSpec((1, cin, lp_pad), lambda i: (i, 0, 0)),
            pl.BlockSpec((cout, 27 * cin), lambda i: (0, 0)),
            pl.BlockSpec((cout, 27 * cout), lambda i: (0, 0)),
            pl.BlockSpec((cout, cout), lambda i: (0, 0)),
            pl.BlockSpec((cout, 8), lambda i: (0, 0)),
            pl.BlockSpec((1, l_pad), lambda i: (0, 0)),
        ],
        out_specs=pl.BlockSpec((1, cout, l_pad), lambda i: (i, 0, 0)),
        scratch_shapes=[
            pltpu.VMEM((kmax, l_pad), jnp.bfloat16),          # im2col slab
            pltpu.VMEM((cout, lp_pad), jnp.bfloat16),          # conv2 padded input
        ],
        compiler_params=pltpu.CompilerParams(
            dimension_semantics=("parallel",),
            vmem_limit_bytes=32 * 1024 * 1024),
    )(x_flat, w1, w2, gmat, pp, geom["mask"])


# ----------------------------------------------------------------------------
# Padded-flat geometry & XLA glue
# ----------------------------------------------------------------------------
def conv_geometry(d, h, w):
    dp, hp, wp = d + 2, h + 2, w + 2
    hw = hp * wp
    l_out = d * hw                        # flat output-coordinate extent
    l_out_pad = _round_up(max(l_out, 128), 128)
    shift = hw + wp + 1                   # flat offset of voxel (1,1,1) in padded coords
    lead2 = (-shift) % 128                # extra lead so conv2's data store is lane-aligned
    data_start = shift + lead2            # multiple of 128
    lp_pad = _round_up(lead2 + 2 * shift + l_out_pad, 128)
    taps = tuple(kd * hw + kh * wp + kw
                 for kd in range(3) for kh in range(3) for kw in range(3))
    q = jnp.arange(l_out_pad)
    dd, rr = q // hw, q % hw
    hh, ww = rr // wp, rr % wp
    mask = ((dd < d) & (hh < h) & (ww < w)).astype(jnp.float32)[None, :]
    return dict(d=d, h=h, w=w, dp=dp, hp=hp, wp=wp, hw=hw,
                l_out=l_out, l_out_pad=l_out_pad, shift=shift, lead2=lead2,
                data_start=data_start, lp_pad=lp_pad,
                tap_offsets=taps, mask=mask, valid_count=d * h * w)


def make_group_matrix(c, num_groups, valid_count):
    """Block-diagonal (C, C) matrix: 1/(cpg*D*H*W) within a group, else 0."""
    cpg = c // num_groups
    gid = jnp.arange(c) // cpg
    same = (gid[:, None] == gid[None, :]).astype(jnp.float32)
    return same / float(valid_count * cpg)


def dense_to_padded_flat(x, geom):
    """(N, C, D, H, W) f32 -> (N, C, Lp_pad) bf16 flattened zero-padded volume."""
    n, c = x.shape[:2]
    xp = jnp.pad(x, ((0, 0), (0, 0), (1, 1), (1, 1), (1, 1)))
    flat = xp.reshape(n, c, geom["dp"] * geom["hw"])
    flat = jnp.pad(flat, ((0, 0), (0, 0), (0, geom["lp_pad"] - flat.shape[-1])))
    return flat.astype(jnp.bfloat16)


def outflat_to_dense(y, geom):
    n, c = y.shape[:2]
    d, h, w = geom["d"], geom["h"], geom["w"]
    y = y[:, :, :d * geom["hw"]].reshape(n, c, d, geom["hp"], geom["wp"])
    return y[:, :, :, :h, :w]


def maxpool3d_2(x):
    n, c, d, h, w = x.shape
    return x.reshape(n, c, d // 2, 2, h // 2, 2, w // 2, 2).max(axis=(3, 5, 7))


# ----------------------------------------------------------------------------
# Down forward (MaxPool3d(2,2) -> DoubleConv), NCDHW in / NCDHW out
# ----------------------------------------------------------------------------
def down_forward(params, x, num_groups=8):
    x = maxpool3d_2(x)
    n, cin, d, h, w = x.shape
    geom = conv_geometry(d, h, w)
    xf = dense_to_padded_flat(x, geom)
    y = double_conv_fused(xf, params["w1"], params["w2"], params["pp"], geom,
                          num_groups=num_groups)
    return outflat_to_dense(y, geom)


# ----------------------------------------------------------------------------
# Parameter init (deterministic, synthetic) + weight layout conversion
# ----------------------------------------------------------------------------
def prep_conv_weight(w_oidhw):
    """PyTorch layout (Cout, Cin, kd, kh, kw) f32 -> lane-dense (Cout, 27*Cin)
    bf16; contraction index order (tap, cin) matches the im2col slab rows."""
    cout, cin = w_oidhw.shape[:2]
    w = jnp.transpose(w_oidhw, (0, 2, 3, 4, 1)).reshape(cout, 27 * cin)
    return w.astype(jnp.bfloat16)


def pack_channel_params(b1, g1, be1, b2, g2, be2):
    z = jnp.zeros_like(b1)
    return jnp.stack([b1, g1, be1, b2, g2, be2, z, z], axis=1).astype(jnp.float32)


def init_down_params(key, cin, cout):
    ks = jax.random.split(key, 4)
    w1 = jax.random.normal(ks[0], (cout, cin, 3, 3, 3), jnp.float32) / jnp.sqrt(27.0 * cin)
    w2 = jax.random.normal(ks[1], (cout, cout, 3, 3, 3), jnp.float32) / jnp.sqrt(27.0 * cout)
    b1 = jax.random.normal(ks[2], (cout,), jnp.float32) * 0.01
    b2 = jax.random.normal(ks[3], (cout,), jnp.float32) * 0.01
    g1 = jnp.ones((cout,), jnp.float32)
    be1 = jnp.zeros((cout,), jnp.float32)
    g2 = jnp.ones((cout,), jnp.float32)
    be2 = jnp.zeros((cout,), jnp.float32)
    raw = dict(w1=w1, b1=b1, w2=w2, b2=b2, g1=g1, be1=be1, g2=g2, be2=be2)
    params = dict(w1=prep_conv_weight(w1),
                  w2=prep_conv_weight(w2),
                  pp=pack_channel_params(b1, g1, be1, b2, g2, be2))
    return params, raw


# ----------------------------------------------------------------------------
# Pure-XLA f32 reference (matches the PyTorch Down module semantics)
# ----------------------------------------------------------------------------
def down_reference(raw, x):
    x = maxpool3d_2(x)

    def conv(x, w, b):
        y = jax.lax.conv_general_dilated(
            x, w, window_strides=(1, 1, 1),
            padding=((1, 1), (1, 1), (1, 1)),
            dimension_numbers=("NCDHW", "OIDHW", "NCDHW"))
        return y + b.reshape(1, -1, 1, 1, 1)

    def gn_relu(x, g, b, num_groups=8, eps=1e-5):
        n, c = x.shape[:2]
        xg = x.reshape(n, num_groups, -1)
        mean = xg.mean(axis=-1, keepdims=True)
        var = xg.var(axis=-1, keepdims=True)
        xg = (xg - mean) * jax.lax.rsqrt(var + eps)
        y = xg.reshape(x.shape) * g.reshape(1, c, 1, 1, 1) + b.reshape(1, c, 1, 1, 1)
        return jnp.maximum(y, 0.0)

    x = gn_relu(conv(x, raw["w1"], raw["b1"]), raw["g1"], raw["be1"])
    x = gn_relu(conv(x, raw["w2"], raw["b2"]), raw["g2"], raw["be2"])
    return x


if __name__ == "__main__":
    key = jax.random.PRNGKey(0)
    pkey, xkey = jax.random.split(key)
    in_channels, out_channels = 16, 32
    n, d, h, w = 2, 16, 16, 16

    params, raw = init_down_params(pkey, in_channels, out_channels)
    x = jax.random.normal(xkey, (n, in_channels, d, h, w), jnp.float32)

    fwd = jax.jit(down_forward)
    out = fwd(params, x)
    jax.block_until_ready(out)

    assert out.shape == (n, out_channels, d // 2, h // 2, w // 2), out.shape
    assert out.dtype == jnp.float32

    # Loose-tolerance sanity check against a pure-XLA f32 reference (the
    # Pallas path uses bf16 matmul operands with f32 accumulation).
    ref = jax.jit(down_reference)(raw, x)
    max_err = float(jnp.max(jnp.abs(out - ref)))
    mean_err = float(jnp.mean(jnp.abs(out - ref)))
    assert max_err < 0.35 and mean_err < 0.03, (max_err, mean_err)

    print("KERNEL_OK")
</pallas_src>

<mosaic_0001>
module attributes {stable_mosaic.version = 11 : i64} {
  func.func @_double_conv_kernel(%arg0: i32, %arg1: memref<1x16x1152xbf16, #tpu.memory_space<vmem>>, %arg2: memref<32x432xbf16, #tpu.memory_space<vmem>>, %arg3: memref<32x864xbf16, #tpu.memory_space<vmem>>, %arg4: memref<32x32xf32, #tpu.memory_space<vmem>>, %arg5: memref<32x8xf32, #tpu.memory_space<vmem>>, %arg6: memref<1x896xf32, #tpu.memory_space<vmem>>, %arg7: memref<1x32x896xf32, #tpu.memory_space<vmem>>, %arg8: memref<864x896xbf16, #tpu.memory_space<vmem>>, %arg9: memref<32x1152xbf16, #tpu.memory_space<vmem>>) attributes {dimension_semantics = [#tpu.dimension_semantics<parallel>], iteration_bounds = array<i64: 2>, scalar_prefetch = 0 : i64, scratch_operands = 2 : i64, tpu.core_type = #tpu.core_type<tc>, window_params = [{transform_indices = @transform_0, window_bounds = array<i64: 1, 16, 1152>}, {pipeline_mode = #tpu.pipeline_mode<synchronous>, transform_indices = @transform_1, window_bounds = array<i64: 32, 432>}, {pipeline_mode = #tpu.pipeline_mode<synchronous>, transform_indices = @transform_2, window_bounds = array<i64: 32, 864>}, {pipeline_mode = #tpu.pipeline_mode<synchronous>, transform_indices = @transform_3, window_bounds = array<i64: 32, 32>}, {pipeline_mode = #tpu.pipeline_mode<synchronous>, transform_indices = @transform_4, window_bounds = array<i64: 32, 8>}, {pipeline_mode = #tpu.pipeline_mode<synchronous>, transform_indices = @transform_5, window_bounds = array<i64: 1, 896>}, {transform_indices = @transform_6, window_bounds = array<i64: 1, 32, 896>}]} {
    %c0 = arith.constant 0 : index
    %c0_0 = arith.constant 0 : index
    %0 = vector.load %arg6[%c0, %c0_0] : memref<1x896xf32, #tpu.memory_space<vmem>>, vector<1x896xf32>
    %c0_1 = arith.constant 0 : index
    %c0_2 = arith.constant 0 : index
    %1 = vector.load %arg4[%c0_1, %c0_2] : memref<32x32xf32, #tpu.memory_space<vmem>>, vector<32x32xf32>
    %c0_3 = arith.constant 0 : index
    %c0_4 = arith.constant 0 : index
    %c0_5 = arith.constant 0 : index
    %2 = vector.load %arg1[%c0_3, %c0_4, %c0_5] : memref<1x16x1152xbf16, #tpu.memory_space<vmem>>, vector<1x16x1152xbf16>
    %3 = vector.shape_cast %2 : vector<1x16x1152xbf16> to vector<16x1152xbf16>
    %4 = vector.extract_strided_slice %3 {offsets = [0, 0], sizes = [16, 896], strides = [1, 1]} : vector<16x1152xbf16> to vector<16x896xbf16>
    %c0_6 = arith.constant 0 : index
    %c0_7 = arith.constant 0 : index
    %5 = vector.load %arg8[%c0_6, %c0_7] : memref<864x896xbf16, #tpu.memory_space<vmem>>, vector<16x896xbf16>
    tpu.vector_store %arg8[%c0_6, %c0_7], %4 {strides = array<i32>} : memref<864x896xbf16, #tpu.memory_space<vmem>>, vector<16x896xbf16>,
    %6 = vector.extract_strided_slice %3 {offsets = [0, 1], sizes = [16, 896], strides = [1, 1]} : vector<16x1152xbf16> to vector<16x896xbf16>
    %c16 = arith.constant 16 : index
    %c0_8 = arith.constant 0 : index
    %7 = vector.load %arg8[%c16, %c0_8] : memref<864x896xbf16, #tpu.memory_space<vmem>>, vector<16x896xbf16>
    tpu.vector_store %arg8[%c16, %c0_8], %6 {strides = array<i32>} : memref<864x896xbf16, #tpu.memory_space<vmem>>, vector<16x896xbf16>,
    %8 = vector.extract_strided_slice %3 {offsets = [0, 2], sizes = [16, 896], strides = [1, 1]} : vector<16x1152xbf16> to vector<16x896xbf16>
    %c32 = arith.constant 32 : index
    %c0_9 = arith.constant 0 : index
    %9 = vector.load %arg8[%c32, %c0_9] : memref<864x896xbf16, #tpu.memory_space<vmem>>, vector<16x896xbf16>
    tpu.vector_store %arg8[%c32, %c0_9], %8 {strides = array<i32>} : memref<864x896xbf16, #tpu.memory_space<vmem>>, vector<16x896xbf16>,
    %10 = vector.extract_strided_slice %3 {offsets = [0, 10], sizes = [16, 896], strides = [1, 1]} : vector<16x1152xbf16> to vector<16x896xbf16>
    %c48 = arith.constant 48 : index
    %c0_10 = arith.constant 0 : index
    %11 = vector.load %arg8[%c48, %c0_10] : memref<864x896xbf16, #tpu.memory_space<vmem>>, vector<16x896xbf16>
    tpu.vector_store %arg8[%c48, %c0_10], %10 {strides = array<i32>} : memref<864x896xbf16, #tpu.memory_space<vmem>>, vector<16x896xbf16>,
    %12 = vector.extract_strided_slice %3 {offsets = [0, 11], sizes = [16, 896], strides = [1, 1]} : vector<16x1152xbf16> to vector<16x896xbf16>
    %c64 = arith.constant 64 : index
    %c0_11 = arith.constant 0 : index
    %13 = vector.load %arg8[%c64, %c0_11] : memref<864x896xbf16, #tpu.memory_space<vmem>>, vector<16x896xbf16>
    tpu.vector_store %arg8[%c64, %c0_11], %12 {strides = array<i32>} : memref<864x896xbf16, #tpu.memory_space<vmem>>, vector<16x896xbf16>,
    %14 = vector.extract_strided_slice %3 {offsets = [0, 12], sizes = [16, 896], strides = [1, 1]} : vector<16x1152xbf16> to vector<16x896xbf16>
    %c80 = arith.constant 80 : index
    %c0_12 = arith.constant 0 : index
    %15 = vector.load %arg8[%c80, %c0_12] : memref<864x896xbf16, #tpu.memory_space<vmem>>, vector<16x896xbf16>
    tpu.vector_store %arg8[%c80, %c0_12], %14 {strides = array<i32>} : memref<864x896xbf16, #tpu.memory_space<vmem>>, vector<16x896xbf16>,
    %16 = vector.extract_strided_slice %3 {offsets = [0, 20], sizes = [16, 896], strides = [1, 1]} : vector<16x1152xbf16> to vector<16x896xbf16>
    %c96 = arith.constant 96 : index
    %c0_13 = arith.constant 0 : index
    %17 = vector.load %arg8[%c96, %c0_13] : memref<864x896xbf16, #tpu.memory_space<vmem>>, vector<16x896xbf16>
    tpu.vector_store %arg8[%c96, %c0_13], %16 {strides = array<i32>} : memref<864x896xbf16, #tpu.memory_space<vmem>>, vector<16x896xbf16>,
    %18 = vector.extract_strided_slice %3 {offsets = [0, 21], sizes = [16, 896], strides = [1, 1]} : vector<16x1152xbf16> to vector<16x896xbf16>
    %c112 = arith.constant 112 : index
    %c0_14 = arith.constant 0 : index
    %19 = vector.load %arg8[%c112, %c0_14] : memref<864x896xbf16, #tpu.memory_space<vmem>>, vector<16x896xbf16>
    tpu.vector_store %arg8[%c112, %c0_14], %18 {strides = array<i32>} : memref<864x896xbf16, #tpu.memory_space<vmem>>, vector<16x896xbf16>,
    %20 = vector.extract_strided_slice %3 {offsets = [0, 22], sizes = [16, 896], strides = [1, 1]} : vector<16x1152xbf16> to vector<16x896xbf16>
    %c128 = arith.constant 128 : index
    %c0_15 = arith.constant 0 : index
    %21 = vector.load %arg8[%c128, %c0_15] : memref<864x896xbf16, #tpu.memory_space<vmem>>, vector<16x896xbf16>
    tpu.vector_store %arg8[%c128, %c0_15], %20 {strides = array<i32>} : memref<864x896xbf16, #tpu.memory_space<vmem>>, vector<16x896xbf16>,
    %22 = vector.extract_strided_slice %3 {offsets = [0, 100], sizes = [16, 896], strides = [1, 1]} : vector<16x1152xbf16> to vector<16x896xbf16>
    %c144 = arith.constant 144 : index
    %c0_16 = arith.constant 0 : index
    %23 = vector.load %arg8[%c144, %c0_16] : memref<864x896xbf16, #tpu.memory_space<vmem>>, vector<16x896xbf16>
    tpu.vector_store %arg8[%c144, %c0_16], %22 {strides = array<i32>} : memref<864x896xbf16, #tpu.memory_space<vmem>>, vector<16x896xbf16>,
    %24 = vector.extract_strided_slice %3 {offsets = [0, 101], sizes = [16, 896], strides = [1, 1]} : vector<16x1152xbf16> to vector<16x896xbf16>
    %c160 = arith.constant 160 : index
    %c0_17 = arith.constant 0 : index
    %25 = vector.load %arg8[%c160, %c0_17] : memref<864x896xbf16, #tpu.memory_space<vmem>>, vector<16x896xbf16>
    tpu.vector_store %arg8[%c160, %c0_17], %24 {strides = array<i32>} : memref<864x896xbf16, #tpu.memory_space<vmem>>, vector<16x896xbf16>,
    %26 = vector.extract_strided_slice %3 {offsets = [0, 102], sizes = [16, 896], strides = [1, 1]} : vector<16x1152xbf16> to vector<16x896xbf16>
    %c176 = arith.constant 176 : index
    %c0_18 = arith.constant 0 : index
    %27 = vector.load %arg8[%c176, %c0_18] : memref<864x896xbf16, #tpu.memory_space<vmem>>, vector<16x896xbf16>
    tpu.vector_store %arg8[%c176, %c0_18], %26 {strides = array<i32>} : memref<864x896xbf16, #tpu.memory_space<vmem>>, vector<16x896xbf16>,
    %28 = vector.extract_strided_slice %3 {offsets = [0, 110], sizes = [16, 896], strides = [1, 1]} : vector<16x1152xbf16> to vector<16x896xbf16>
    %c192 = arith.constant 192 : index
    %c0_19 = arith.constant 0 : index
    %29 = vector.load %arg8[%c192, %c0_19] : memref<864x896xbf16, #tpu.memory_space<vmem>>, vector<16x896xbf16>
    tpu.vector_store %arg8[%c192, %c0_19], %28 {strides = array<i32>} : memref<864x896xbf16, #tpu.memory_space<vmem>>, vector<16x896xbf16>,
    %30 = vector.extract_strided_slice %3 {offsets = [0, 111], sizes = [16, 896], strides = [1, 1]} : vector<16x1152xbf16> to vector<16x896xbf16>
    %c208 = arith.constant 208 : index
    %c0_20 = arith.constant 0 : index
    %31 = vector.load %arg8[%c208, %c0_20] : memref<864x896xbf16, #tpu.memory_space<vmem>>, vector<16x896xbf16>
    tpu.vector_store %arg8[%c208, %c0_20], %30 {strides = array<i32>} : memref<864x896xbf16, #tpu.memory_space<vmem>>, vector<16x896xbf16>,
    %32 = vector.extract_strided_slice %3 {offsets = [0, 112], sizes = [16, 896], strides = [1, 1]} : vector<16x1152xbf16> to vector<16x896xbf16>
    %c224 = arith.constant 224 : index
    %c0_21 = arith.constant 0 : index
    %33 = vector.load %arg8[%c224, %c0_21] : memref<864x896xbf16, #tpu.memory_space<vmem>>, vector<16x896xbf16>
    tpu.vector_store %arg8[%c224, %c0_21], %32 {strides = array<i32>} : memref<864x896xbf16, #tpu.memory_space<vmem>>, vector<16x896xbf16>,
    %34 = vector.extract_strided_slice %3 {offsets = [0, 120], sizes = [16, 896], strides = [1, 1]} : vector<16x1152xbf16> to vector<16x896xbf16>
    %c240 = arith.constant 240 : index
    %c0_22 = arith.constant 0 : index
    %35 = vector.load %arg8[%c240, %c0_22] : memref<864x896xbf16, #tpu.memory_space<vmem>>, vector<16x896xbf16>
    tpu.vector_store %arg8[%c240, %c0_22], %34 {strides = array<i32>} : memref<864x896xbf16, #tpu.memory_space<vmem>>, vector<16x896xbf16>,
    %36 = vector.extract_strided_slice %3 {offsets = [0, 121], sizes = [16, 896], strides = [1, 1]} : vector<16x1152xbf16> to vector<16x896xbf16>
    %c256 = arith.constant 256 : index
    %c0_23 = arith.constant 0 : index
    %37 = vector.load %arg8[%c256, %c0_23] : memref<864x896xbf16, #tpu.memory_space<vmem>>, vector<16x896xbf16>
    tpu.vector_store %arg8[%c256, %c0_23], %36 {strides = array<i32>} : memref<864x896xbf16, #tpu.memory_space<vmem>>, vector<16x896xbf16>,
    %38 = vector.extract_strided_slice %3 {offsets = [0, 122], sizes = [16, 896], strides = [1, 1]} : vector<16x1152xbf16> to vector<16x896xbf16>
    %c272 = arith.constant 272 : index
    %c0_24 = arith.constant 0 : index
    %39 = vector.load %arg8[%c272, %c0_24] : memref<864x896xbf16, #tpu.memory_space<vmem>>, vector<16x896xbf16>
    tpu.vector_store %arg8[%c272, %c0_24], %38 {strides = array<i32>} : memref<864x896xbf16, #tpu.memory_space<vmem>>, vector<16x896xbf16>,
    %40 = vector.extract_strided_slice %3 {offsets = [0, 200], sizes = [16, 896], strides = [1, 1]} : vector<16x1152xbf16> to vector<16x896xbf16>
    %c288 = arith.constant 288 : index
    %c0_25 = arith.constant 0 : index
    %41 = vector.load %arg8[%c288, %c0_25] : memref<864x896xbf16, #tpu.memory_space<vmem>>, vector<16x896xbf16>
    tpu.vector_store %arg8[%c288, %c0_25], %40 {strides = array<i32>} : memref<864x896xbf16, #tpu.memory_space<vmem>>, vector<16x896xbf16>,
    %42 = vector.extract_strided_slice %3 {offsets = [0, 201], sizes = [16, 896], strides = [1, 1]} : vector<16x1152xbf16> to vector<16x896xbf16>
    %c304 = arith.constant 304 : index
    %c0_26 = arith.constant 0 : index
    %43 = vector.load %arg8[%c304, %c0_26] : memref<864x896xbf16, #tpu.memory_space<vmem>>, vector<16x896xbf16>
    tpu.vector_store %arg8[%c304, %c0_26], %42 {strides = array<i32>} : memref<864x896xbf16, #tpu.memory_space<vmem>>, vector<16x896xbf16>,
    %44 = vector.extract_strided_slice %3 {offsets = [0, 202], sizes = [16, 896], strides = [1, 1]} : vector<16x1152xbf16> to vector<16x896xbf16>
    %c320 = arith.constant 320 : index
    %c0_27 = arith.constant 0 : index
    %45 = vector.load %arg8[%c320, %c0_27] : memref<864x896xbf16, #tpu.memory_space<vmem>>, vector<16x896xbf16>
    tpu.vector_store %arg8[%c320, %c0_27], %44 {strides = array<i32>} : memref<864x896xbf16, #tpu.memory_space<vmem>>, vector<16x896xbf16>,
    %46 = vector.extract_strided_slice %3 {offsets = [0, 210], sizes = [16, 896], strides = [1, 1]} : vector<16x1152xbf16> to vector<16x896xbf16>
    %c336 = arith.constant 336 : index
    %c0_28 = arith.constant 0 : index
    %47 = vector.load %arg8[%c336, %c0_28] : memref<864x896xbf16, #tpu.memory_space<vmem>>, vector<16x896xbf16>
    tpu.vector_store %arg8[%c336, %c0_28], %46 {strides = array<i32>} : memref<864x896xbf16, #tpu.memory_space<vmem>>, vector<16x896xbf16>,
    %48 = vector.extract_strided_slice %3 {offsets = [0, 211], sizes = [16, 896], strides = [1, 1]} : vector<16x1152xbf16> to vector<16x896xbf16>
    %c352 = arith.constant 352 : index
    %c0_29 = arith.constant 0 : index
    %49 = vector.load %arg8[%c352, %c0_29] : memref<864x896xbf16, #tpu.memory_space<vmem>>, vector<16x896xbf16>
    tpu.vector_store %arg8[%c352, %c0_29], %48 {strides = array<i32>} : memref<864x896xbf16, #tpu.memory_space<vmem>>, vector<16x896xbf16>,
    %50 = vector.extract_strided_slice %3 {offsets = [0, 212], sizes = [16, 896], strides = [1, 1]} : vector<16x1152xbf16> to vector<16x896xbf16>
    %c368 = arith.constant 368 : index
    %c0_30 = arith.constant 0 : index
    %51 = vector.load %arg8[%c368, %c0_30] : memref<864x896xbf16, #tpu.memory_space<vmem>>, vector<16x896xbf16>
    tpu.vector_store %arg8[%c368, %c0_30], %50 {strides = array<i32>} : memref<864x896xbf16, #tpu.memory_space<vmem>>, vector<16x896xbf16>,
    %52 = vector.extract_strided_slice %3 {offsets = [0, 220], sizes = [16, 896], strides = [1, 1]} : vector<16x1152xbf16> to vector<16x896xbf16>
    %c384 = arith.constant 384 : index
    %c0_31 = arith.constant 0 : index
    %53 = vector.load %arg8[%c384, %c0_31] : memref<864x896xbf16, #tpu.memory_space<vmem>>, vector<16x896xbf16>
    tpu.vector_store %arg8[%c384, %c0_31], %52 {strides = array<i32>} : memref<864x896xbf16, #tpu.memory_space<vmem>>, vector<16x896xbf16>,
    %54 = vector.extract_strided_slice %3 {offsets = [0, 221], sizes = [16, 896], strides = [1, 1]} : vector<16x1152xbf16> to vector<16x896xbf16>
    %c400 = arith.constant 400 : index
    %c0_32 = arith.constant 0 : index
    %55 = vector.load %arg8[%c400, %c0_32] : memref<864x896xbf16, #tpu.memory_space<vmem>>, vector<16x896xbf16>
    tpu.vector_store %arg8[%c400, %c0_32], %54 {strides = array<i32>} : memref<864x896xbf16, #tpu.memory_space<vmem>>, vector<16x896xbf16>,
    %56 = vector.extract_strided_slice %3 {offsets = [0, 222], sizes = [16, 896], strides = [1, 1]} : vector<16x1152xbf16> to vector<16x896xbf16>
    %c416 = arith.constant 416 : index
    %c0_33 = arith.constant 0 : index
    %57 = vector.load %arg8[%c416, %c0_33] : memref<864x896xbf16, #tpu.memory_space<vmem>>, vector<16x896xbf16>
    tpu.vector_store %arg8[%c416, %c0_33], %56 {strides = array<i32>} : memref<864x896xbf16, #tpu.memory_space<vmem>>, vector<16x896xbf16>,
    %c0_34 = arith.constant 0 : index
    %c0_35 = arith.constant 0 : index
    %58 = vector.load %arg2[%c0_34, %c0_35] : memref<32x432xbf16, #tpu.memory_space<vmem>>, vector<32x432xbf16>
    %c0_36 = arith.constant 0 : index
    %c0_37 = arith.constant 0 : index
    %59 = vector.load %arg8[%c0_36, %c0_37] : memref<864x896xbf16, #tpu.memory_space<vmem>>, vector<432x896xbf16>
    %cst = arith.constant dense<0.000000e+00> : vector<32x896xf32>
    %60 = tpu.matmul %58, %59, %cst {dimension_numbers = #tpu.dot_dimension_numbers<[1], [0], [0], [1], [0, 0, 1, 1], [], []>} : vector<32x432xbf16>, vector<432x896xbf16>, vector<32x896xf32> -> vector<32x896xf32>
    %c0_38 = arith.constant 0 : index
    %c0_39 = arith.constant 0 : index
    %61 = vector.load %arg5[%c0_38, %c0_39] : memref<32x8xf32, #tpu.memory_space<vmem>>, vector<32x1xf32>
    %62 = vector.broadcast %61 : vector<32x1xf32> to vector<32x896xf32>
    %63 = arith.addf %60, %62 : vector<32x896xf32>
    %c0_40 = arith.constant 0 : index
    %c1 = arith.constant 1 : index
    %64 = vector.load %arg5[%c0_40, %c1] : memref<32x8xf32, #tpu.memory_space<vmem>>, vector<32x1xf32>
    %c0_41 = arith.constant 0 : index
    %c2 = arith.constant 2 : index
    %65 = vector.load %arg5[%c0_41, %c2] : memref<32x8xf32, #tpu.memory_space<vmem>>, vector<32x1xf32>
    %66 = vector.broadcast %0 : vector<1x896xf32> to vector<32x896xf32>
    %67 = arith.mulf %63, %66 : vector<32x896xf32>
    %cst_42 = arith.constant dense<0.000000e+00> : vector<32x896xf32>
    %68 = tpu.matmul %1, %67, %cst_42 {dimension_numbers = #tpu.dot_dimension_numbers<[1], [0], [0], [1], [0, 0, 1, 1], [], []>} : vector<32x32xf32>, vector<32x896xf32>, vector<32x896xf32> -> vector<32x896xf32>
    %cst_43 = arith.constant dense<0.000000e+00> : vector<32xf32>
    %69 = vector.multi_reduction <add>, %68, %cst_43 [1] : vector<32x896xf32> to vector<32xf32>
    %70 = vector.shape_cast %69 : vector<32xf32> to vector<32x1xf32>
    %71 = vector.broadcast %70 : vector<32x1xf32> to vector<32x896xf32>
    %72 = arith.subf %63, %71 : vector<32x896xf32>
    %73 = vector.broadcast %0 : vector<1x896xf32> to vector<32x896xf32>
    %74 = arith.mulf %72, %73 : vector<32x896xf32>
    %75 = arith.mulf %74, %74 : vector<32x896xf32>
    %cst_44 = arith.constant dense<0.000000e+00> : vector<32x896xf32>
    %76 = tpu.matmul %1, %75, %cst_44 {dimension_numbers = #tpu.dot_dimension_numbers<[1], [0], [0], [1], [0, 0, 1, 1], [], []>} : vector<32x32xf32>, vector<32x896xf32>, vector<32x896xf32> -> vector<32x896xf32>
    %cst_45 = arith.constant dense<0.000000e+00> : vector<32xf32>
    %77 = vector.multi_reduction <add>, %76, %cst_45 [1] : vector<32x896xf32> to vector<32xf32>
    %78 = vector.shape_cast %77 : vector<32xf32> to vector<32x1xf32>
    %79 = vector.broadcast %70 : vector<32x1xf32> to vector<32x896xf32>
    %80 = arith.subf %63, %79 : vector<32x896xf32>
    %cst_46 = arith.constant 9.99999974E-6 : f32
    %81 = vector.broadcast %cst_46 : f32 to vector<32x1xf32>
    %82 = arith.addf %78, %81 : vector<32x1xf32>
    %83 = math.rsqrt %82 : vector<32x1xf32>
    %84 = vector.broadcast %83 : vector<32x1xf32> to vector<32x896xf32>
    %85 = arith.mulf %80, %84 : vector<32x896xf32>
    %86 = vector.broadcast %64 : vector<32x1xf32> to vector<32x896xf32>
    %87 = arith.mulf %85, %86 : vector<32x896xf32>
    %88 = vector.broadcast %65 : vector<32x1xf32> to vector<32x896xf32>
    %89 = arith.addf %87, %88 : vector<32x896xf32>
    %cst_47 = arith.constant 0.000000e+00 : f32
    %90 = vector.broadcast %cst_47 : f32 to vector<32x896xf32>
    %91 = arith.maximumf %89, %90 : vector<32x896xf32>
    %92 = vector.broadcast %0 : vector<1x896xf32> to vector<32x896xf32>
    %93 = arith.mulf %91, %92 : vector<32x896xf32>
    %cst_48 = arith.constant 0.000000e+00 : bf16
    %94 = vector.broadcast %cst_48 : bf16 to vector<32x1152xbf16>
    %c0_49 = arith.constant 0 : index
    %c0_50 = arith.constant 0 : index
    %95 = vector.load %arg9[%c0_49, %c0_50] : memref<32x1152xbf16, #tpu.memory_space<vmem>>, vector<32x1152xbf16>
    tpu.vector_store %arg9[%c0_49, %c0_50], %94 {strides = array<i32>} : memref<32x1152xbf16, #tpu.memory_space<vmem>>, vector<32x1152xbf16>,
    %96 = arith.truncf %93 : vector<32x896xf32> to vector<32x896xbf16>
    %c0_51 = arith.constant 0 : index
    %c128_52 = arith.constant 128 : index
    %97 = vector.load %arg9[%c0_51, %c128_52] : memref<32x1152xbf16, #tpu.memory_space<vmem>>, vector<32x896xbf16>
    tpu.vector_store %arg9[%c0_51, %c128_52], %96 {strides = array<i32>} : memref<32x1152xbf16, #tpu.memory_space<vmem>>, vector<32x896xbf16>,
    %c0_53 = arith.constant 0 : index
    %c0_54 = arith.constant 0 : index
    %98 = vector.load %arg9[%c0_53, %c0_54] : memref<32x1152xbf16, #tpu.memory_space<vmem>>, vector<32x1152xbf16>
    %99 = vector.extract_strided_slice %98 {offsets = [0, 17], sizes = [32, 896], strides = [1, 1]} : vector<32x1152xbf16> to vector<32x896xbf16>
    %c0_55 = arith.constant 0 : index
    %c0_56 = arith.constant 0 : index
    %100 = vector.load %arg8[%c0_55, %c0_56] : memref<864x896xbf16, #tpu.memory_space<vmem>>, vector<32x896xbf16>
    tpu.vector_store %arg8[%c0_55, %c0_56], %99 {strides = array<i32>} : memref<864x896xbf16, #tpu.memory_space<vmem>>, vector<32x896xbf16>,
    %101 = vector.extract_strided_slice %98 {offsets = [0, 18], sizes = [32, 896], strides = [1, 1]} : vector<32x1152xbf16> to vector<32x896xbf16>
    %c32_57 = arith.constant 32 : index
    %c0_58 = arith.constant 0 : index
    %102 = vector.load %arg8[%c32_57, %c0_58] : memref<864x896xbf16, #tpu.memory_space<vmem>>, vector<32x896xbf16>
    tpu.vector_store %arg8[%c32_57, %c0_58], %101 {strides = array<i32>} : memref<864x896xbf16, #tpu.memory_space<vmem>>, vector<32x896xbf16>,
    %103 = vector.extract_strided_slice %98 {offsets = [0, 19], sizes = [32, 896], strides = [1, 1]} : vector<32x1152xbf16> to vector<32x896xbf16>
    %c64_59 = arith.constant 64 : index
    %c0_60 = arith.constant 0 : index
    %104 = vector.load %arg8[%c64_59, %c0_60] : memref<864x896xbf16, #tpu.memory_space<vmem>>, vector<32x896xbf16>
    tpu.vector_store %arg8[%c64_59, %c0_60], %103 {strides = array<i32>} : memref<864x896xbf16, #tpu.memory_space<vmem>>, vector<32x896xbf16>,
    %105 = vector.extract_strided_slice %98 {offsets = [0, 27], sizes = [32, 896], strides = [1, 1]} : vector<32x1152xbf16> to vector<32x896xbf16>
    %c96_61 = arith.constant 96 : index
    %c0_62 = arith.constant 0 : index
    %106 = vector.load %arg8[%c96_61, %c0_62] : memref<864x896xbf16, #tpu.memory_space<vmem>>, vector<32x896xbf16>
    tpu.vector_store %arg8[%c96_61, %c0_62], %105 {strides = array<i32>} : memref<864x896xbf16, #tpu.memory_space<vmem>>, vector<32x896xbf16>,
    %107 = vector.extract_strided_slice %98 {offsets = [0, 28], sizes = [32, 896], strides = [1, 1]} : vector<32x1152xbf16> to vector<32x896xbf16>
    %c128_63 = arith.constant 128 : index
    %c0_64 = arith.constant 0 : index
    %108 = vector.load %arg8[%c128_63, %c0_64] : memref<864x896xbf16, #tpu.memory_space<vmem>>, vector<32x896xbf16>
    tpu.vector_store %arg8[%c128_63, %c0_64], %107 {strides = array<i32>} : memref<864x896xbf16, #tpu.memory_space<vmem>>, vector<32x896xbf16>,
    %109 = vector.extract_strided_slice %98 {offsets = [0, 29], sizes = [32, 896], strides = [1, 1]} : vector<32x1152xbf16> to vector<32x896xbf16>
    %c160_65 = arith.constant 160 : index
    %c0_66 = arith.constant 0 : index
    %110 = vector.load %arg8[%c160_65, %c0_66] : memref<864x896xbf16, #tpu.memory_space<vmem>>, vector<32x896xbf16>
    tpu.vector_store %arg8[%c160_65, %c0_66], %109 {strides = array<i32>} : memref<864x896xbf16, #tpu.memory_space<vmem>>, vector<32x896xbf16>,
    %111 = vector.extract_strided_slice %98 {offsets = [0, 37], sizes = [32, 896], strides = [1, 1]} : vector<32x1152xbf16> to vector<32x896xbf16>
    %c192_67 = arith.constant 192 : index
    %c0_68 = arith.constant 0 : index
    %112 = vector.load %arg8[%c192_67, %c0_68] : memref<864x896xbf16, #tpu.memory_space<vmem>>, vector<32x896xbf16>
    tpu.vector_store %arg8[%c192_67, %c0_68], %111 {strides = array<i32>} : memref<864x896xbf16, #tpu.memory_space<vmem>>, vector<32x896xbf16>,
    %113 = vector.extract_strided_slice %98 {offsets = [0, 38], sizes = [32, 896], strides = [1, 1]} : vector<32x1152xbf16> to vector<32x896xbf16>
    %c224_69 = arith.constant 224 : index
    %c0_70 = arith.constant 0 : index
    %114 = vector.load %arg8[%c224_69, %c0_70] : memref<864x896xbf16, #tpu.memory_space<vmem>>, vector<32x896xbf16>
    tpu.vector_store %arg8[%c224_69, %c0_70], %113 {strides = array<i32>} : memref<864x896xbf16, #tpu.memory_space<vmem>>, vector<32x896xbf16>,
    %115 = vector.extract_strided_slice %98 {offsets = [0, 39], sizes = [32, 896], strides = [1, 1]} : vector<32x1152xbf16> to vector<32x896xbf16>
    %c256_71 = arith.constant 256 : index
    %c0_72 = arith.constant 0 : index
    %116 = vector.load %arg8[%c256_71, %c0_72] : memref<864x896xbf16, #tpu.memory_space<vmem>>, vector<32x896xbf16>
    tpu.vector_store %arg8[%c256_71, %c0_72], %115 {strides = array<i32>} : memref<864x896xbf16, #tpu.memory_space<vmem>>, vector<32x896xbf16>,
    %117 = vector.extract_strided_slice %98 {offsets = [0, 117], sizes = [32, 896], strides = [1, 1]} : vector<32x1152xbf16> to vector<32x896xbf16>
    %c288_73 = arith.constant 288 : index
    %c0_74 = arith.constant 0 : index
    %118 = vector.load %arg8[%c288_73, %c0_74] : memref<864x896xbf16, #tpu.memory_space<vmem>>, vector<32x896xbf16>
    tpu.vector_store %arg8[%c288_73, %c0_74], %117 {strides = array<i32>} : memref<864x896xbf16, #tpu.memory_space<vmem>>, vector<32x896xbf16>,
    %119 = vector.extract_strided_slice %98 {offsets = [0, 118], sizes = [32, 896], strides = [1, 1]} : vector<32x1152xbf16> to vector<32x896xbf16>
    %c320_75 = arith.constant 320 : index
    %c0_76 = arith.constant 0 : index
    %120 = vector.load %arg8[%c320_75, %c0_76] : memref<864x896xbf16, #tpu.memory_space<vmem>>, vector<32x896xbf16>
    tpu.vector_store %arg8[%c320_75, %c0_76], %119 {strides = array<i32>} : memref<864x896xbf16, #tpu.memory_space<vmem>>, vector<32x896xbf16>,
    %121 = vector.extract_strided_slice %98 {offsets = [0, 119], sizes = [32, 896], strides = [1, 1]} : vector<32x1152xbf16> to vector<32x896xbf16>
    %c352_77 = arith.constant 352 : index
    %c0_78 = arith.constant 0 : index
    %122 = vector.load %arg8[%c352_77, %c0_78] : memref<864x896xbf16, #tpu.memory_space<vmem>>, vector<32x896xbf16>
    tpu.vector_store %arg8[%c352_77, %c0_78], %121 {strides = array<i32>} : memref<864x896xbf16, #tpu.memory_space<vmem>>, vector<32x896xbf16>,
    %123 = vector.extract_strided_slice %98 {offsets = [0, 127], sizes = [32, 896], strides = [1, 1]} : vector<32x1152xbf16> to vector<32x896xbf16>
    %c384_79 = arith.constant 384 : index
    %c0_80 = arith.constant 0 : index
    %124 = vector.load %arg8[%c384_79, %c0_80] : memref<864x896xbf16, #tpu.memory_space<vmem>>, vector<32x896xbf16>
    tpu.vector_store %arg8[%c384_79, %c0_80], %123 {strides = array<i32>} : memref<864x896xbf16, #tpu.memory_space<vmem>>, vector<32x896xbf16>,
    %125 = vector.extract_strided_slice %98 {offsets = [0, 128], sizes = [32, 896], strides = [1, 1]} : vector<32x1152xbf16> to vector<32x896xbf16>
    %c416_81 = arith.constant 416 : index
    %c0_82 = arith.constant 0 : index
    %126 = vector.load %arg8[%c416_81, %c0_82] : memref<864x896xbf16, #tpu.memory_space<vmem>>, vector<32x896xbf16>
    tpu.vector_store %arg8[%c416_81, %c0_82], %125 {strides = array<i32>} : memref<864x896xbf16, #tpu.memory_space<vmem>>, vector<32x896xbf16>,
    %127 = vector.extract_strided_slice %98 {offsets = [0, 129], sizes = [32, 896], strides = [1, 1]} : vector<32x1152xbf16> to vector<32x896xbf16>
    %c448 = arith.constant 448 : index
    %c0_83 = arith.constant 0 : index
    %128 = vector.load %arg8[%c448, %c0_83] : memref<864x896xbf16, #tpu.memory_space<vmem>>, vector<32x896xbf16>
    tpu.vector_store %arg8[%c448, %c0_83], %127 {strides = array<i32>} : memref<864x896xbf16, #tpu.memory_space<vmem>>, vector<32x896xbf16>,
    %129 = vector.extract_strided_slice %98 {offsets = [0, 137], sizes = [32, 896], strides = [1, 1]} : vector<32x1152xbf16> to vector<32x896xbf16>
    %c480 = arith.constant 480 : index
    %c0_84 = arith.constant 0 : index
    %130 = vector.load %arg8[%c480, %c0_84] : memref<864x896xbf16, #tpu.memory_space<vmem>>, vector<32x896xbf16>
    tpu.vector_store %arg8[%c480, %c0_84], %129 {strides = array<i32>} : memref<864x896xbf16, #tpu.memory_space<vmem>>, vector<32x896xbf16>,
    %131 = vector.extract_strided_slice %98 {offsets = [0, 138], sizes = [32, 896], strides = [1, 1]} : vector<32x1152xbf16> to vector<32x896xbf16>
    %c512 = arith.constant 512 : index
    %c0_85 = arith.constant 0 : index
    %132 = vector.load %arg8[%c512, %c0_85] : memref<864x896xbf16, #tpu.memory_space<vmem>>, vector<32x896xbf16>
    tpu.vector_store %arg8[%c512, %c0_85], %131 {strides = array<i32>} : memref<864x896xbf16, #tpu.memory_space<vmem>>, vector<32x896xbf16>,
    %133 = vector.extract_strided_slice %98 {offsets = [0, 139], sizes = [32, 896], strides = [1, 1]} : vector<32x1152xbf16> to vector<32x896xbf16>
    %c544 = arith.constant 544 : index
    %c0_86 = arith.constant 0 : index
    %134 = vector.load %arg8[%c544, %c0_86] : memref<864x896xbf16, #tpu.memory_space<vmem>>, vector<32x896xbf16>
    tpu.vector_store %arg8[%c544, %c0_86], %133 {strides = array<i32>} : memref<864x896xbf16, #tpu.memory_space<vmem>>, vector<32x896xbf16>,
    %135 = vector.extract_strided_slice %98 {offsets = [0, 217], sizes = [32, 896], strides = [1, 1]} : vector<32x1152xbf16> to vector<32x896xbf16>
    %c576 = arith.constant 576 : index
    %c0_87 = arith.constant 0 : index
    %136 = vector.load %arg8[%c576, %c0_87] : memref<864x896xbf16, #tpu.memory_space<vmem>>, vector<32x896xbf16>
    tpu.vector_store %arg8[%c576, %c0_87], %135 {strides = array<i32>} : memref<864x896xbf16, #tpu.memory_space<vmem>>, vector<32x896xbf16>,
    %137 = vector.extract_strided_slice %98 {offsets = [0, 218], sizes = [32, 896], strides = [1, 1]} : vector<32x1152xbf16> to vector<32x896xbf16>
    %c608 = arith.constant 608 : index
    %c0_88 = arith.constant 0 : index
    %138 = vector.load %arg8[%c608, %c0_88] : memref<864x896xbf16, #tpu.memory_space<vmem>>, vector<32x896xbf16>
    tpu.vector_store %arg8[%c608, %c0_88], %137 {strides = array<i32>} : memref<864x896xbf16, #tpu.memory_space<vmem>>, vector<32x896xbf16>,
    %139 = vector.extract_strided_slice %98 {offsets = [0, 219], sizes = [32, 896], strides = [1, 1]} : vector<32x1152xbf16> to vector<32x896xbf16>
    %c640 = arith.constant 640 : index
    %c0_89 = arith.constant 0 : index
    %140 = vector.load %arg8[%c640, %c0_89] : memref<864x896xbf16, #tpu.memory_space<vmem>>, vector<32x896xbf16>
    tpu.vector_store %arg8[%c640, %c0_89], %139 {strides = array<i32>} : memref<864x896xbf16, #tpu.memory_space<vmem>>, vector<32x896xbf16>,
    %141 = vector.extract_strided_slice %98 {offsets = [0, 227], sizes = [32, 896], strides = [1, 1]} : vector<32x1152xbf16> to vector<32x896xbf16>
    %c672 = arith.constant 672 : index
    %c0_90 = arith.constant 0 : index
    %142 = vector.load %arg8[%c672, %c0_90] : memref<864x896xbf16, #tpu.memory_space<vmem>>, vector<32x896xbf16>
    tpu.vector_store %arg8[%c672, %c0_90], %141 {strides = array<i32>} : memref<864x896xbf16, #tpu.memory_space<vmem>>, vector<32x896xbf16>,
    %143 = vector.extract_strided_slice %98 {offsets = [0, 228], sizes = [32, 896], strides = [1, 1]} : vector<32x1152xbf16> to vector<32x896xbf16>
    %c704 = arith.constant 704 : index
    %c0_91 = arith.constant 0 : index
    %144 = vector.load %arg8[%c704, %c0_91] : memref<864x896xbf16, #tpu.memory_space<vmem>>, vector<32x896xbf16>
    tpu.vector_store %arg8[%c704, %c0_91], %143 {strides = array<i32>} : memref<864x896xbf16, #tpu.memory_space<vmem>>, vector<32x896xbf16>,
    %145 = vector.extract_strided_slice %98 {offsets = [0, 229], sizes = [32, 896], strides = [1, 1]} : vector<32x1152xbf16> to vector<32x896xbf16>
    %c736 = arith.constant 736 : index
    %c0_92 = arith.constant 0 : index
    %146 = vector.load %arg8[%c736, %c0_92] : memref<864x896xbf16, #tpu.memory_space<vmem>>, vector<32x896xbf16>
    tpu.vector_store %arg8[%c736, %c0_92], %145 {strides = array<i32>} : memref<864x896xbf16, #tpu.memory_space<vmem>>, vector<32x896xbf16>,
    %147 = vector.extract_strided_slice %98 {offsets = [0, 237], sizes = [32, 896], strides = [1, 1]} : vector<32x1152xbf16> to vector<32x896xbf16>
    %c768 = arith.constant 768 : index
    %c0_93 = arith.constant 0 : index
    %148 = vector.load %arg8[%c768, %c0_93] : memref<864x896xbf16, #tpu.memory_space<vmem>>, vector<32x896xbf16>
    tpu.vector_store %arg8[%c768, %c0_93], %147 {strides = array<i32>} : memref<864x896xbf16, #tpu.memory_space<vmem>>, vector<32x896xbf16>,
    %149 = vector.extract_strided_slice %98 {offsets = [0, 238], sizes = [32, 896], strides = [1, 1]} : vector<32x1152xbf16> to vector<32x896xbf16>
    %c800 = arith.constant 800 : index
    %c0_94 = arith.constant 0 : index
    %150 = vector.load %arg8[%c800, %c0_94] : memref<864x896xbf16, #tpu.memory_space<vmem>>, vector<32x896xbf16>
    tpu.vector_store %arg8[%c800, %c0_94], %149 {strides = array<i32>} : memref<864x896xbf16, #tpu.memory_space<vmem>>, vector<32x896xbf16>,
    %151 = vector.extract_strided_slice %98 {offsets = [0, 239], sizes = [32, 896], strides = [1, 1]} : vector<32x1152xbf16> to vector<32x896xbf16>
    %c832 = arith.constant 832 : index
    %c0_95 = arith.constant 0 : index
    %152 = vector.load %arg8[%c832, %c0_95] : memref<864x896xbf16, #tpu.memory_space<vmem>>, vector<32x896xbf16>
    tpu.vector_store %arg8[%c832, %c0_95], %151 {strides = array<i32>} : memref<864x896xbf16, #tpu.memory_space<vmem>>, vector<32x896xbf16>,
    %c0_96 = arith.constant 0 : index
    %c0_97 = arith.constant 0 : index
    %153 = vector.load %arg3[%c0_96, %c0_97] : memref<32x864xbf16, #tpu.memory_space<vmem>>, vector<32x864xbf16>
    %c0_98 = arith.constant 0 : index
    %c0_99 = arith.constant 0 : index
    %154 = vector.load %arg8[%c0_98, %c0_99] : memref<864x896xbf16, #tpu.memory_space<vmem>>, vector<864x896xbf16>
    %cst_100 = arith.constant dense<0.000000e+00> : vector<32x896xf32>
    %155 = tpu.matmul %153, %154, %cst_100 {dimension_numbers = #tpu.dot_dimension_numbers<[1], [0], [0], [1], [0, 0, 1, 1], [], []>} : vector<32x864xbf16>, vector<864x896xbf16>, vector<32x896xf32> -> vector<32x896xf32>
    %c0_101 = arith.constant 0 : index
    %c3 = arith.constant 3 : index
    %156 = vector.load %arg5[%c0_101, %c3] : memref<32x8xf32, #tpu.memory_space<vmem>>, vector<32x1xf32>
    %157 = vector.broadcast %156 : vector<32x1xf32> to vector<32x896xf32>
    %158 = arith.addf %155, %157 : vector<32x896xf32>
    %c0_102 = arith.constant 0 : index
    %c4 = arith.constant 4 : index
    %159 = vector.load %arg5[%c0_102, %c4] : memref<32x8xf32, #tpu.memory_space<vmem>>, vector<32x1xf32>
    %c0_103 = arith.constant 0 : index
    %c5 = arith.constant 5 : index
    %160 = vector.load %arg5[%c0_103, %c5] : memref<32x8xf32, #tpu.memory_space<vmem>>, vector<32x1xf32>
    %161 = vector.broadcast %0 : vector<1x896xf32> to vector<32x896xf32>
    %162 = arith.mulf %158, %161 : vector<32x896xf32>
    %cst_104 = arith.constant dense<0.000000e+00> : vector<32x896xf32>
    %163 = tpu.matmul %1, %162, %cst_104 {dimension_numbers = #tpu.dot_dimension_numbers<[1], [0], [0], [1], [0, 0, 1, 1], [], []>} : vector<32x32xf32>, vector<32x896xf32>, vector<32x896xf32> -> vector<32x896xf32>
    %cst_105 = arith.constant dense<0.000000e+00> : vector<32xf32>
    %164 = vector.multi_reduction <add>, %163, %cst_105 [1] : vector<32x896xf32> to vector<32xf32>
    %165 = vector.shape_cast %164 : vector<32xf32> to vector<32x1xf32>
    %166 = vector.broadcast %165 : vector<32x1xf32> to vector<32x896xf32>
    %167 = arith.subf %158, %166 : vector<32x896xf32>
    %168 = vector.broadcast %0 : vector<1x896xf32> to vector<32x896xf32>
    %169 = arith.mulf %167, %168 : vector<32x896xf32>
    %170 = arith.mulf %169, %169 : vector<32x896xf32>
    %cst_106 = arith.constant dense<0.000000e+00> : vector<32x896xf32>
    %171 = tpu.matmul %1, %170, %cst_106 {dimension_numbers = #tpu.dot_dimension_numbers<[1], [0], [0], [1], [0, 0, 1, 1], [], []>} : vector<32x32xf32>, vector<32x896xf32>, vector<32x896xf32> -> vector<32x896xf32>
    %cst_107 = arith.constant dense<0.000000e+00> : vector<32xf32>
    %172 = vector.multi_reduction <add>, %171, %cst_107 [1] : vector<32x896xf32> to vector<32xf32>
    %173 = vector.shape_cast %172 : vector<32xf32> to vector<32x1xf32>
    %174 = vector.broadcast %165 : vector<32x1xf32> to vector<32x896xf32>
    %175 = arith.subf %158, %174 : vector<32x896xf32>
    %cst_108 = arith.constant 9.99999974E-6 : f32
    %176 = vector.broadcast %cst_108 : f32 to vector<32x1xf32>
    %177 = arith.addf %173, %176 : vector<32x1xf32>
    %178 = math.rsqrt %177 : vector<32x1xf32>
    %179 = vector.broadcast %178 : vector<32x1xf32> to vector<32x896xf32>
    %180 = arith.mulf %175, %179 : vector<32x896xf32>
    %181 = vector.broadcast %159 : vector<32x1xf32> to vector<32x896xf32>
    %182 = arith.mulf %180, %181 : vector<32x896xf32>
    %183 = vector.broadcast %160 : vector<32x1xf32> to vector<32x896xf32>
    %184 = arith.addf %182, %183 : vector<32x896xf32>
    %cst_109 = arith.constant 0.000000e+00 : f32
    %185 = vector.broadcast %cst_109 : f32 to vector<32x896xf32>
    %186 = arith.maximumf %184, %185 : vector<32x896xf32>
    %187 = vector.broadcast %0 : vector<1x896xf32> to vector<32x896xf32>
    %188 = arith.mulf %186, %187 : vector<32x896xf32>
    %c0_110 = arith.constant 0 : index
    %c0_111 = arith.constant 0 : index
    %c0_112 = arith.constant 0 : index
    %189 = vector.load %arg7[%c0_110, %c0_111, %c0_112] : memref<1x32x896xf32, #tpu.memory_space<vmem>>, vector<1x32x896xf32>
    %190 = vector.shape_cast %189 : vector<1x32x896xf32> to vector<32x896xf32>
    %191 = vector.shape_cast %188 : vector<32x896xf32> to vector<1x32x896xf32>
    tpu.vector_store %arg7[%c0_110, %c0_111, %c0_112], %191 {strides = array<i32>} : memref<1x32x896xf32, #tpu.memory_space<vmem>>, vector<1x32x896xf32>,
    return
  }
  func.func @transform_0(%arg0: i32) -> (i32, i32, i32) {
    %c0_i32 = arith.constant 0 : i32
    %c0_i32_0 = arith.constant 0 : i32
    %c0_i32_1 = arith.constant 0 : i32
    return %arg0, %c0_i32, %c0_i32_0 : i32, i32, i32
  }
  func.func @transform_1(%arg0: i32) -> (i32, i32) {
    %c0_i32 = arith.constant 0 : i32
    %c0_i32_0 = arith.constant 0 : i32
    %c0_i32_1 = arith.constant 0 : i32
    return %c0_i32, %c0_i32_0 : i32, i32
  }
  func.func @transform_2(%arg0: i32) -> (i32, i32) {
    %c0_i32 = arith.constant 0 : i32
    %c0_i32_0 = arith.constant 0 : i32
    %c0_i32_1 = arith.constant 0 : i32
    return %c0_i32, %c0_i32_0 : i32, i32
  }
  func.func @transform_3(%arg0: i32) -> (i32, i32) {
    %c0_i32 = arith.constant 0 : i32
    %c0_i32_0 = arith.constant 0 : i32
    %c0_i32_1 = arith.constant 0 : i32
    return %c0_i32, %c0_i32_0 : i32, i32
  }
  func.func @transform_4(%arg0: i32) -> (i32, i32) {
    %c0_i32 = arith.constant 0 : i32
    %c0_i32_0 = arith.constant 0 : i32
    %c0_i32_1 = arith.constant 0 : i32
    return %c0_i32, %c0_i32_0 : i32, i32
  }
  func.func @transform_5(%arg0: i32) -> (i32, i32) {
    %c0_i32 = arith.constant 0 : i32
    %c0_i32_0 = arith.constant 0 : i32
    %c0_i32_1 = arith.constant 0 : i32
    return %c0_i32, %c0_i32_0 : i32, i32
  }
  func.func @transform_6(%arg0: i32) -> (i32, i32, i32) {
    %c0_i32 = arith.constant 0 : i32
    %c0_i32_0 = arith.constant 0 : i32
    %c0_i32_1 = arith.constant 0 : i32
    return %arg0, %c0_i32, %c0_i32_0 : i32, i32, i32
  }
}

</mosaic_0001>

<bundles_post_ra>
// kernel: down_forward.1
= control target key start
LH: loop header
LB: loop body
LE: loop exit
PB: predicated region body
PF: predicated region fallthrough
CT: control target
= control target key end

     0   :  { %s8596_s21 = smov 0   ;;  %s13354_s0 = inlined_call_operand.vmem [shape: bf16[2,16,1152], index: 0, kind: input, shape index: {}]   ;;  %s13355_s1 = inlined_call_operand.vmem [shape: bf16[32,432], index: 1, kind: input, shape index: {}]   ;;  %s13356_s2 = inlined_call_operand.vmem [shape: bf16[32,864], index: 2, kind: input, shape index: {}]   ;;  %s13357_s3 = inlined_call_operand.vmem [shape: f32[32,32], index: 3, kind: input, shape index: {}]   ;;  %s13358_s4 = inlined_call_operand.vmem [shape: f32[32,8], index: 4, kind: input, shape index: {}]   ;;  %s13359_s5 = inlined_call_operand.vmem [shape: f32[1,896], index: 5, kind: input, shape index: {}]   ;;  %s13360_s6 = inlined_call_operand.vmem [shape: f32[2,32,896], index: 6, kind: output, shape index: {}]  }
   0x1   :  { %13637 = sst [smem:[#allocation164_spill]] %s13354_s0 }
   0x2   :  { %13638 = sst [smem:[#allocation165_spill]] %s13355_s1 }
   0x3   :  { %13639 = sst [smem:[#allocation166_spill]] %s13357_s3 }
   0x4   :  { %13640 = sst [smem:[#allocation167_spill]] %s13359_s5 }
   0x5   :  { %13641 = sst [smem:[#allocation168_spill]] %s13360_s6 }
   0x6 LB: > { %13642 = sst [smem:[#allocation4_spill]] %s8507_s21  ;;  %s7607_s22 = sadd.s32 4294967295, %s8507_s21   ;;  %s8507_s21 = sphi %s8596_s21, %s16_s21  }
   0x7   : > { %p7611_p0 = scmp.ge.s32.totalorder %s8507_s21, 1  ;;  %p212_p1 = scmp.lt.s32.totalorder %s8507_s21, 3 }
   0x9   : > { %p213_p2 = pnand %p7611_p0, %p212_p1 }
   0xb   : > { %216 = sbr.rel (%p213_p2) target bundleno = 3573 (0xdf5), region = 44 }
  0x12   : > { %p242_p3 = scmp.lt.s32.totalorder %s7607_s22, 1  ;;  %s13644_s0 = sld [smem:[#allocation164_spill]]  ;;  %vm13402_vm0 = vcmask 1039360   ;;  %vm368_vm1 = vcmask 1031168   ;;  %vm406_vm2 = vcmask 965632   ;;  %vm13380_vm3 = vcmask 957440  }
  0x13   : > { %s13391_s27 = smov 127   ;;  %s8510_s28 = smov 126   ;;  %vm13379_vm4 = vcmask 949248   ;;  %vm13381_vm5 = vcmask 883712   ;;  %vm13382_vm6 = vcmask 875520   ;;  %vm13383_vm7 = vcmask 867328  }
  0x14   : > { %s14308_s22 = smov (!%p242_p3, %s7607_s22), 1  ;;  %s13394_s29 = smov 118   ;;  %vm13384_vm8 = vcmask 228352   ;;  %vm13385_vm9 = vcmask 220160   ;;  %vm13386_vm10 = vcmask 211968   ;;  %vm13387_vm11 = vcmask 146432  }
  0x15   : > { %13643 = sst [smem:[#allocation5_spill]] %s14308_s22  ;;  %s8223_s23 = smul.u32 72, %s14308_s22  ;;  %vm13388_vm12 = vcmask 138240   ;;  %vm13393_vm13 = vcmask 130048   ;;  %vm862_vm14 = vcmask 64512   ;;  %vm900_vm15 = vcmask 56320  }
  0x16   : > { %s13419_s30 = smov 117   ;;  %s8513_s7 = smov 116  }
  0x17   : > { %s8514_s8 = smov 108   ;;  %s8515_s9 = smov 107  }
  0x18   : > { %s8610_s26 = scalar_lea.vmem %s13644_s0, %s8223_s23  ;;  %s8516_s10 = smov 106  }
  0x19   : > { %v8613_v0 = vld [vmem:[%s8610_s26 + $0x4] ss:$36 sps:$4 sm:$0xff]   ;;  %v8624_v3 = vld [vmem:[%s8610_s26 + $0xc] ss:$36 sps:$4 sm:$0xff]   ;;  %s13389_s11 = smov 28   ;;  %s13361_s12 = smov 27  }
  0x1a   : > { %v8616_v1 = vld [vmem:[%s8610_s26] ss:$36 sps:$4 sm:$0xff]   ;;  %316 = vrot.lane.b32.xlu0 %v8613_v0, %s13391_s27  ;;  %v8621_v2 = vld [vmem:[%s8610_s26 + $0x8] ss:$36 sps:$4 sm:$0xff]   ;;  %1573 = vmatprep.subr.bf16.mxu0 %v8613_v0  ;;  %s13363_s13 = smov 26   ;;  %s13365_s14 = smov 18  }
  0x1b   : > { %314 = vrot.lane.b32.xlu1 %v8616_v1, %s13391_s27  ;;  %1574 = vmatpush1.bf16.msra.mxu0 %v8616_v1  ;;  %v8695_v4 = vld [vmem:[%s8610_s26 + $0x10] ss:$36 sps:$4 sm:$0xff]   ;;  %s13367_s15 = smov 17   ;;  %s13369_s16 = smov 16  }
  0x1c   : > { %1679 = vmatprep.subr.bf16.mxu1 %v8624_v3  ;;  %s13645_s1 = sld [smem:[#allocation165_spill]]  ;;  %s13371_s19 = smov 8  }
  0x1d   : > { %1680 = vmatpush1.bf16.msra.mxu1 %v8621_v2  ;;  %s13375_s20 = smov 7   ;;  %s8525_s23 = smov 6  }
  0x1e   : > { %318 = vrot.lane.b32.xlu0 %v8621_v2, %s13391_s27  ;;  %s8526_s24 = smov 56   ;;  %s8527_s25 = smov 55  }
  0x1f   : > { %354 = vrot.lane.b32.xlu1 %v8613_v0, %s8510_s28  ;;  %s8528_s17 = smov 54   ;;  %s8529_s18 = smov 46  }
  0x20   : > { %s13701_s5 = sld [smem:[#allocation167_spill]]  ;;  %s13704_s3 = sld [smem:[#allocation166_spill]] }
  0x21   : > { %s13836_s0 = smov 11   ;;  %s13855_s21 = smov 1  }
  0x22   : > { %356 = vrot.lane.b32.xlu0 %v8621_v2, %s8510_s28  ;;  %v8734_v5 = vld [vmem:[%s13645_s1 + $0x4] ss:$16 sps:$4 sm:$0xff]  }
  0x23   : > { %352 = vrot.lane.b32.xlu1 %v8616_v1, %s8510_s28  ;;  %1605 = vmatprep.mubr.bf16.mxu0 %v8734_v5 }
  0x24   : > { %1711 = vmatprep.mubr.bf16.mxu1 %v8734_v5 }
  0x26   : > { %392 = vrot.lane.b32.xlu0 %v8613_v0, %s13394_s29 }
  0x27   : > { %394 = vrot.lane.b32.xlu1 %v8621_v2, %s13394_s29 }
  0x2a   : > { %390 = vrot.lane.b32.xlu0 %v8616_v1, %s13394_s29 }
  0x2b   : > { %430 = vrot.lane.b32.xlu1 %v8613_v0, %s13419_s30 }
  0x2e   : > { %432 = vrot.lane.b32.xlu0 %v8621_v2, %s13419_s30 }
  0x2f   : > { %428 = vrot.lane.b32.xlu1 %v8616_v1, %s13419_s30 }
  0x32   : > { %468 = vrot.lane.b32.xlu0 %v8613_v0, %s8513_s7 }
  0x33   : > { %470 = vrot.lane.b32.xlu1 %v8621_v2, %s8513_s7 }
  0x36   : > { %466 = vrot.lane.b32.xlu0 %v8616_v1, %s8513_s7 }
  0x37   : > { %506 = vrot.lane.b32.xlu1 %v8613_v0, %s8514_s8 }
  0x3a   : > { %508 = vrot.lane.b32.xlu0 %v8621_v2, %s8514_s8 }
  0x3b   : > { %504 = vrot.lane.b32.xlu1 %v8616_v1, %s8514_s8 }
  0x3e   : > { %544 = vrot.lane.b32.xlu0 %v8613_v0, %s8515_s9 }
  0x3f   : > { %546 = vrot.lane.b32.xlu1 %v8621_v2, %s8515_s9 }
  0x42   : > { %542 = vrot.lane.b32.xlu0 %v8616_v1, %s8515_s9 }
  0x43   : > { %582 = vrot.lane.b32.xlu1 %v8613_v0, %s8516_s10 }
  0x46   : > { %584 = vrot.lane.b32.xlu0 %v8621_v2, %s8516_s10 }
  0x47   : > { %580 = vrot.lane.b32.xlu1 %v8616_v1, %s8516_s10 }
  0x4a   : > { %620 = vrot.lane.b32.xlu0 %v8613_v0, %s13389_s11 }
  0x4b   : > { %622 = vrot.lane.b32.xlu1 %v8621_v2, %s13389_s11 }
  0x4e   : > { %618 = vrot.lane.b32.xlu0 %v8616_v1, %s13389_s11 }
  0x4f   : > { %658 = vrot.lane.b32.xlu1 %v8613_v0, %s13361_s12 }
  0x52   : > { %660 = vrot.lane.b32.xlu0 %v8621_v2, %s13361_s12 }
  0x53   : > { %656 = vrot.lane.b32.xlu1 %v8616_v1, %s13361_s12 }
  0x56   : > { %696 = vrot.lane.b32.xlu0 %v8613_v0, %s13363_s13 }
  0x57   : > { %698 = vrot.lane.b32.xlu1 %v8621_v2, %s13363_s13 }
  0x5a   : > { %694 = vrot.lane.b32.xlu0 %v8616_v1, %s13363_s13 }
  0x5b   : > { %320 = vrot.lane.b32.xlu1 %v8624_v3, %s13391_s27 }
  0x5e   : > { %322 = vrot.lane.b32.xlu0 %v8695_v4, %s13391_s27 }
  0x5f   : > { %734 = vrot.lane.b32.xlu1 %v8613_v0, %s13365_s14 }
  0x62   : > { %736 = vrot.lane.b32.xlu0 %v8621_v2, %s13365_s14 }
  0x63   : > { %732 = vrot.lane.b32.xlu1 %v8616_v1, %s13365_s14 }
  0x66   : > { %358 = vrot.lane.b32.xlu0 %v8624_v3, %s8510_s28 }
  0x67   : > { %360 = vrot.lane.b32.xlu1 %v8695_v4, %s8510_s28 }
  0x6a   : > { %772 = vrot.lane.b32.xlu0 %v8613_v0, %s13367_s15 }
  0x6b   : > { %774 = vrot.lane.b32.xlu1 %v8621_v2, %s13367_s15 }
  0x6e   : > { %770 = vrot.lane.b32.xlu0 %v8616_v1, %s13367_s15 }
  0x6f   : > { %396 = vrot.lane.b32.xlu1 %v8624_v3, %s13394_s29 }
  0x72   : > { %398 = vrot.lane.b32.xlu0 %v8695_v4, %s13394_s29 }
  0x73   : > { %810 = vrot.lane.b32.xlu1 %v8613_v0, %s13369_s16 }
  0x76   : > { %812 = vrot.lane.b32.xlu0 %v8621_v2, %s13369_s16 }
  0x77   : > { %808 = vrot.lane.b32.xlu1 %v8616_v1, %s13369_s16 }
  0x7a   : > { %434 = vrot.lane.b32.xlu0 %v8624_v3, %s13419_s30 }
  0x7b   : > { %436 = vrot.lane.b32.xlu1 %v8695_v4, %s13419_s30 }
  0x7e   : > { %848 = vrot.lane.b32.xlu0 %v8613_v0, %s13371_s19 }
  0x7f   : > { %850 = vrot.lane.b32.xlu1 %v8621_v2, %s13371_s19 }
  0x82   : > { %846 = vrot.lane.b32.xlu0 %v8616_v1, %s13371_s19 }
  0x83   : > { %472 = vrot.lane.b32.xlu1 %v8624_v3, %s8513_s7 }
  0x86   : > { %474 = vrot.lane.b32.xlu0 %v8695_v4, %s8513_s7 }
  0x87   : > { %886 = vrot.lane.b32.xlu1 %v8613_v0, %s13375_s20 }
  0x8a   : > { %888 = vrot.lane.b32.xlu0 %v8621_v2, %s13375_s20 }
  0x8b   : > { %884 = vrot.lane.b32.xlu1 %v8616_v1, %s13375_s20 }
  0x8c   : > { %v317_v6 = vpop.permute.xlu0 %316 }
  0x8d   : > { %v315_v7 = vpop.permute.xlu1 %314 }
  0x8e   : > { %510 = vrot.lane.b32.xlu0 %v8624_v3, %s8514_s8  ;;  %v331_v11 = vsel %vm13402_vm0, %v315_v7, %v317_v6 }
  0x8f   : > { %512 = vrot.lane.b32.xlu1 %v8695_v4, %s8514_s8 }
  0x90   : > { %v8758_v8 = vpop.permute.xlu0 %318 }
  0x91   : > { %v355_v9 = vpop.permute.xlu1 %354  ;;  %v332_v10 = vsel %vm13402_vm0, %v317_v6, %v8758_v8 }
  0x92   : > { %924 = vrot.lane.b32.xlu0 %v8613_v0, %s8525_s23  ;;  %1575 = vmatprep.subr.bf16.mxu0 %v332_v10 }
  0x93   : > { %926 = vrot.lane.b32.xlu1 %v8621_v2, %s8525_s23  ;;  %1576 = vmatpush1.bf16.msra.mxu0 %v331_v11 }
  0x94   : > { %v8767_v12 = vpop.permute.xlu0 %356 }
  0x95   : > { %v353_v13 = vpop.permute.xlu1 %352  ;;  %v370_v14 = vsel %vm368_vm1, %v355_v9, %v8767_v12 }
  0x96   : > { %922 = vrot.lane.b32.xlu0 %v8616_v1, %s8525_s23  ;;  %1577 = vmatprep.subr.bf16.mxu0 %v370_v14  ;;  %v369_v15 = vsel %vm368_vm1, %v353_v13, %v355_v9 }
  0x97   : > { %548 = vrot.lane.b32.xlu1 %v8624_v3, %s8515_s9  ;;  %1578 = vmatpush1.bf16.msra.mxu0 %v369_v15 }
  0x98   : > { %v393_v16 = vpop.permute.xlu0 %392 }
  0x99   : > { %v8776_v17 = vpop.permute.xlu1 %394 }
  0x9a   : > { %550 = vrot.lane.b32.xlu0 %v8695_v4, %s8515_s9  ;;  %v408_v18 = vsel %vm406_vm2, %v393_v16, %v8776_v17 }
  0x9b   : > { %967 = vrot.lane.b32.xlu1 %v8621_v2, %s8526_s24  ;;  %1579 = vmatprep.subr.bf16.mxu0 %v408_v18 }
  0x9c   : > { %v391_v19 = vpop.permute.xlu0 %390 }
  0x9d   : > { %v431_v20 = vpop.permute.xlu1 %430  ;;  %v407_v21 = vsel %vm406_vm2, %v391_v19, %v393_v16 }
  0x9e   : > { %969 = vrot.lane.b32.xlu0 %v8624_v3, %s8526_s24  ;;  %1580 = vmatpush1.bf16.msra.mxu0 %v407_v21 }
  0x9f   : > { %965 = vrot.lane.b32.xlu1 %v8613_v0, %s8526_s24 }
  0xa0   : > { %v8789_v22 = vpop.permute.xlu0 %432 }
  0xa1   : > { %v429_v23 = vpop.permute.xlu1 %428  ;;  %v446_v24 = vsel %vm13380_vm3, %v431_v20, %v8789_v22 }
  0xa2   : > { %586 = vrot.lane.b32.xlu0 %v8624_v3, %s8516_s10  ;;  %1581 = vmatprep.subr.bf16.mxu0 %v446_v24  ;;  %v445_v25 = vsel %vm13380_vm3, %v429_v23, %v431_v20 }
  0xa3   : > { %588 = vrot.lane.b32.xlu1 %v8695_v4, %s8516_s10  ;;  %1582 = vmatpush1.bf16.msra.mxu0 %v445_v25 }
  0xa4   : > { %v469_v26 = vpop.permute.xlu0 %468 }
  0xa5   : > { %v8798_v27 = vpop.permute.xlu1 %470 }
  0xa6   : > { %1005 = vrot.lane.b32.xlu0 %v8621_v2, %s8527_s25  ;;  %v484_v28 = vsel %vm13379_vm4, %v469_v26, %v8798_v27 }
  0xa7   : > { %1007 = vrot.lane.b32.xlu1 %v8624_v3, %s8527_s25  ;;  %1583 = vmatprep.subr.bf16.mxu0 %v484_v28 }
  0xa8   : > { %v467_v29 = vpop.permute.xlu0 %466 }
  0xa9   : > { %v507_v30 = vpop.permute.xlu1 %506  ;;  %v483_v31 = vsel %vm13379_vm4, %v467_v29, %v469_v26 }
  0xaa   : > { %1003 = vrot.lane.b32.xlu0 %v8613_v0, %s8527_s25  ;;  %1584 = vmatpush1.bf16.msra.mxu0 %v483_v31 }
  0xab   : > { %624 = vrot.lane.b32.xlu1 %v8624_v3, %s13389_s11 }
  0xac   : > { %v8811_v32 = vpop.permute.xlu0 %508 }
  0xad   : > { %v505_v33 = vpop.permute.xlu1 %504  ;;  %v522_v34 = vsel %vm13381_vm5, %v507_v30, %v8811_v32 }
  0xae   : > { %626 = vrot.lane.b32.xlu0 %v8695_v4, %s13389_s11  ;;  %1585 = vmatprep.subr.bf16.mxu0 %v522_v34  ;;  %v521_v35 = vsel %vm13381_vm5, %v505_v33, %v507_v30 }
  0xaf   : > { %1043 = vrot.lane.b32.xlu1 %v8621_v2, %s8528_s17  ;;  %1586 = vmatpush1.bf16.msra.mxu0 %v521_v35 }
  0xb0   : > { %v545_v36 = vpop.permute.xlu0 %544 }
  0xb1   : > { %v8820_v37 = vpop.permute.xlu1 %546 }
  0xb2   : > { %1045 = vrot.lane.b32.xlu0 %v8624_v3, %s8528_s17  ;;  %v560_v38 = vsel %vm13382_vm6, %v545_v36, %v8820_v37 }
  0xb3   : > { %1041 = vrot.lane.b32.xlu1 %v8613_v0, %s8528_s17  ;;  %1587 = vmatprep.subr.bf16.mxu0 %v560_v38  ;;  %v8955_v38 = vld [vmem:[%s8610_s26 + $0x14] ss:$36 sps:$4 sm:$0xff]  }
  0xb4   : > { %v543_v39 = vpop.permute.xlu0 %542 }
  0xb5   : > { %v583_v40 = vpop.permute.xlu1 %582  ;;  %v559_v41 = vsel %vm13382_vm6, %v543_v39, %v545_v36  ;;  %v8960_v39 = vld [vmem:[%s8610_s26 + $0x18] ss:$36 sps:$4 sm:$0xff]  }
  0xb6   : > { %662 = vrot.lane.b32.xlu0 %v8624_v3, %s13361_s12  ;;  %1588 = vmatpush1.bf16.msra.mxu0 %v559_v41 }
  0xb7   : > { %664 = vrot.lane.b32.xlu1 %v8695_v4, %s13361_s12  ;;  %s8530_s12 = smov 45  }
  0xb8   : > { %v8833_v42 = vpop.permute.xlu0 %584 }
  0xb9   : > { %v581_v43 = vpop.permute.xlu1 %580  ;;  %v598_v44 = vsel %vm13383_vm7, %v583_v40, %v8833_v42 }
  0xba   : > { %1081 = vrot.lane.b32.xlu0 %v8621_v2, %s8529_s18  ;;  %1589 = vmatprep.subr.bf16.mxu0 %v598_v44  ;;  %v597_v45 = vsel %vm13383_vm7, %v581_v43, %v583_v40  ;;  %v8966_v43 = vld [vmem:[%s13645_s1] ss:$16 sps:$4 sm:$0xff]  }
  0xbb   : > { %1083 = vrot.lane.b32.xlu1 %v8624_v3, %s8529_s18  ;;  %1590 = vmatpush1.bf16.msra.mxu0 %v597_v45  ;;  %v8977_v45 = vld [vmem:[%s13645_s1 + $0x24] ss:$16 sps:$4 sm:$0xff]  }
  0xbc   : > { %v621_v46 = vpop.permute.xlu0 %620 }
  0xbd   : > { %v8842_v47 = vpop.permute.xlu1 %622 }
  0xbe   : > { %1079 = vrot.lane.b32.xlu0 %v8613_v0, %s8529_s18  ;;  %v636_v48 = vsel %vm13384_vm8, %v621_v46, %v8842_v47 }
  0xbf   : > { %700 = vrot.lane.b32.xlu1 %v8624_v3, %s13363_s13  ;;  %1591 = vmatprep.subr.bf16.mxu0 %v636_v48 }
  0xc0   : > { %v619_v49 = vpop.permute.xlu0 %618 }
  0xc1   : > { %v659_v50 = vpop.permute.xlu1 %658  ;;  %v635_v51 = vsel %vm13384_vm8, %v619_v49, %v621_v46 }
  0xc2   : > { %702 = vrot.lane.b32.xlu0 %v8695_v4, %s13363_s13  ;;  %1592 = vmatpush1.bf16.msra.mxu0 %v635_v51  ;;  %s8531_s13 = smov 44  }
  0xc3   : > { %1119 = vrot.lane.b32.xlu1 %v8621_v2, %s8530_s12 }
  0xc4   : > { %v8855_v52 = vpop.permute.xlu0 %660 }
  0xc5   : > { %v657_v53 = vpop.permute.xlu1 %656  ;;  %v674_v54 = vsel %vm13385_vm9, %v659_v50, %v8855_v52 }
  0xc6   : > { %1121 = vrot.lane.b32.xlu0 %v8624_v3, %s8530_s12  ;;  %1593 = vmatprep.subr.bf16.mxu0 %v674_v54  ;;  %v673_v55 = vsel %vm13385_vm9, %v657_v53, %v659_v50  ;;  %v9004_v54 = vld [vmem:[%s13645_s1 + $0xc] ss:$16 sps:$4 sm:$0xff]  }
  0xc7   : > { %1117 = vrot.lane.b32.xlu1 %v8613_v0, %s8530_s12  ;;  %1594 = vmatpush1.bf16.msra.mxu0 %v673_v55 }
  0xc8   : > { %v697_v56 = vpop.permute.xlu0 %696 }
  0xc9   : > { %v8864_v57 = vpop.permute.xlu1 %698 }
  0xca   : > { %738 = vrot.lane.b32.xlu0 %v8624_v3, %s13365_s14  ;;  %v712_v58 = vsel %vm13386_vm10, %v697_v56, %v8864_v57 }
  0xcb   : > { %740 = vrot.lane.b32.xlu1 %v8695_v4, %s13365_s14  ;;  %1595 = vmatprep.subr.bf16.mxu0 %v712_v58  ;;  %s13396_s14 = smov 36  }
  0xcc   : > { %v695_v59 = vpop.permute.xlu0 %694 }
  0xcd   : > { %v321_v60 = vpop.permute.xlu1 %320  ;;  %v711_v61 = vsel %vm13386_vm10, %v695_v59, %v697_v56 }
  0xce   : > { %1157 = vrot.lane.b32.xlu0 %v8621_v2, %s8531_s13  ;;  %1596 = vmatpush1.bf16.msra.mxu0 %v711_v61  ;;  %v333_v6 = vsel %vm13402_vm0, %v8758_v8, %v321_v60 }
  0xcf   : > { %1159 = vrot.lane.b32.xlu1 %v8624_v3, %s8531_s13 }
  0xd0   : > { %v8877_v62 = vpop.permute.xlu0 %322 }
  0xd1   : > { %v735_v63 = vpop.permute.xlu1 %734  ;;  %v334_v1 = vsel %vm13402_vm0, %v321_v60, %v8877_v62 }
  0xd2   : > { %1155 = vrot.lane.b32.xlu0 %v8613_v0, %s8531_s13  ;;  %1681 = vmatprep.subr.bf16.mxu1 %v334_v1 }
  0xd3   : > { %776 = vrot.lane.b32.xlu1 %v8624_v3, %s13367_s15  ;;  %1682 = vmatpush1.bf16.msra.mxu1 %v333_v6 }
  0xd4   : > { %v8887_v7 = vpop.permute.xlu0 %736 }
  0xd5   : > { %v733_v9 = vpop.permute.xlu1 %732  ;;  %v750_v10 = vsel %vm13387_vm11, %v735_v63, %v8887_v7 }
  0xd6   : > { %778 = vrot.lane.b32.xlu0 %v8695_v4, %s13367_s15  ;;  %1597 = vmatprep.subr.bf16.mxu0 %v750_v10  ;;  %v749_v11 = vsel %vm13387_vm11, %v733_v9, %v735_v63  ;;  %s13377_s15 = smov 35  }
  0xd7   : > { %1195 = vrot.lane.b32.xlu1 %v8621_v2, %s13396_s14  ;;  %1598 = vmatpush1.bf16.msra.mxu0 %v749_v11 }
  0xd8   : > { %v359_v8 = vpop.permute.xlu0 %358 }
  0xd9   : > { %v8896_v13 = vpop.permute.xlu1 %360  ;;  %v371_v14 = vsel %vm368_vm1, %v8767_v12, %v359_v8 }
  0xda   : > { %1197 = vrot.lane.b32.xlu0 %v8624_v3, %s13396_s14  ;;  %v372_v15 = vsel %vm368_vm1, %v359_v8, %v8896_v13 }
  0xdb   : > { %1193 = vrot.lane.b32.xlu1 %v8613_v0, %s13396_s14  ;;  %1683 = vmatprep.subr.bf16.mxu1 %v372_v15 }
  0xdc   : > { %1684 = vmatpush1.bf16.msra.mxu1 %v371_v14  ;;  %v773_v16 = vpop.permute.xlu0 %772 }
  0xdd   : > { %v8906_v18 = vpop.permute.xlu1 %774 }
  0xde   : > { %814 = vrot.lane.b32.xlu0 %v8624_v3, %s13369_s16  ;;  %v788_v12 = vsel %vm13388_vm12, %v773_v16, %v8906_v18 }
  0xdf   : > { %816 = vrot.lane.b32.xlu1 %v8695_v4, %s13369_s16  ;;  %1599 = vmatprep.subr.bf16.mxu0 %v788_v12  ;;  %s13373_s16 = smov 34  }
  0xe0   : > { %v771_v19 = vpop.permute.xlu0 %770 }
  0xe1   : > { %v397_v20 = vpop.permute.xlu1 %396  ;;  %v787_v21 = vsel %vm13388_vm12, %v771_v19, %v773_v16 }
  0xe2   : > { %1233 = vrot.lane.b32.xlu0 %v8621_v2, %s13377_s15  ;;  %1600 = vmatpush1.bf16.msra.mxu0 %v787_v21  ;;  %v409_v26 = vsel %vm406_vm2, %v8776_v17, %v397_v20 }
  0xe3   : > { %1235 = vrot.lane.b32.xlu1 %v8624_v3, %s13377_s15 }
  0xe4   : > { %v8919_v23 = vpop.permute.xlu0 %398 }
  0xe5   : > { %v811_v24 = vpop.permute.xlu1 %810  ;;  %v410_v25 = vsel %vm406_vm2, %v397_v20, %v8919_v23 }
  0xe6   : > { %1231 = vrot.lane.b32.xlu0 %v8613_v0, %s13377_s15  ;;  %1685 = vmatprep.subr.bf16.mxu1 %v410_v25  ;;  %s13646_s15 = smov 35  }
  0xe7   : > { %852 = vrot.lane.b32.xlu1 %v8624_v3, %s13371_s19  ;;  %1686 = vmatpush1.bf16.msra.mxu1 %v409_v26 }
  0xe8   : > { %v8929_v28 = vpop.permute.xlu0 %812 }
  0xe9   : > { %v809_v29 = vpop.permute.xlu1 %808  ;;  %v826_v30 = vsel %vm13393_vm13, %v811_v24, %v8929_v28 }
  0xea   : > { %854 = vrot.lane.b32.xlu0 %v8695_v4, %s13371_s19  ;;  %1601 = vmatprep.subr.bf16.mxu0 %v826_v30  ;;  %v825_v31 = vsel %vm13393_vm13, %v809_v29, %v811_v24  ;;  %s13648_s19 = smov 34  }
  0xeb   : > { %1271 = vrot.lane.b32.xlu1 %v8621_v2, %s13373_s16  ;;  %1602 = vmatpush1.bf16.msra.mxu0 %v825_v31 }
  0xec   : > { %v435_v17 = vpop.permute.xlu0 %434 }
  0xed   : > { %v8938_v33 = vpop.permute.xlu1 %436  ;;  %v447_v34 = vsel %vm13380_vm3, %v8789_v22, %v435_v17 }
  0xee   : > { %1273 = vrot.lane.b32.xlu0 %v8624_v3, %s13373_s16  ;;  %v448_v35 = vsel %vm13380_vm3, %v435_v17, %v8938_v33  ;;  %vm13399_vm3 = vcmask 48128  }
  0xef   : > { %1269 = vrot.lane.b32.xlu1 %v8613_v0, %s13373_s16  ;;  %1687 = vmatprep.subr.bf16.mxu1 %v448_v35  ;;  %s13647_s16 = smov 27  }
  0xf0   : > { %1688 = vmatpush1.bf16.msra.mxu1 %v447_v34  ;;  %v849_v2 = vpop.permute.xlu0 %848 }
  0xf1   : > { %v8948_v36 = vpop.permute.xlu1 %850 }
  0xf2   : > { %890 = vrot.lane.b32.xlu0 %v8624_v3, %s13375_s20  ;;  %v864_v22 = vsel %vm862_vm14, %v849_v2, %v8948_v36 }
  0xf3   : > { %892 = vrot.lane.b32.xlu1 %v8695_v4, %s13375_s20  ;;  %1603 = vmatprep.subr.bf16.mxu0 %v864_v22  ;;  %s13649_s20 = smov 26  }
  0xf4   : > { %v847_v0 = vpop.permute.xlu0 %846 }
  0xf5   : > { %v473_v40 = vpop.permute.xlu1 %472  ;;  %v863_v41 = vsel %vm862_vm14, %v847_v0, %v849_v2 }
  0xf6   : > { %324 = vrot.lane.b32.xlu0 %v8955_v38, %s13391_s27  ;;  %1604 = vmatpush1.bf16.msra.mxu0 %v863_v41  ;;  %v485_v49 = vsel %vm13379_vm4, %v8798_v27, %v473_v40 }
  0xf7   : > { %326 = vrot.lane.b32.xlu1 %v8960_v39, %s13391_s27 }
  0xf8   : > { %v8972_v44 = vpop.permute.xlu0 %474 }
  0xf9   : > { %v887_v46 = vpop.permute.xlu1 %886  ;;  %v486_v48 = vsel %vm13379_vm4, %v473_v40, %v8972_v44  ;;  %1606 = vmatmul.mubr.bf16.vlgmr.msra.gmra.mrb[0].mxu0 %v8966_v43  ;;  %vm1566_vm4 = vcmask 392192  }
  0xfa   : > { %928 = vrot.lane.b32.xlu0 %v8624_v3, %s8525_s23  ;;  %1689 = vmatprep.subr.bf16.mxu1 %v486_v48  ;;  %v8996_v3 = vld [vmem:[%s13645_s1 + $0x20] ss:$16 sps:$4 sm:$0xff]  }
  0xfb   : > { %930 = vrot.lane.b32.xlu1 %v8695_v4, %s8525_s23  ;;  %1690 = vmatpush1.bf16.msra.mxu1 %v485_v49 }
  0xfc   : > { %v8988_v50 = vpop.permute.xlu0 %888  ;;  %1615 = vmatprep.mubr.bf16.mxu0 %v8977_v45 }
  0xfd   : > { %v885_v51 = vpop.permute.xlu1 %884  ;;  %v902_v53 = vsel %vm900_vm15, %v887_v46, %v8988_v50 }
  0xfe   : > { %v901_v27 = vsel %vm900_vm15, %v885_v51, %v887_v46  ;;  %362 = vrot.lane.b32.xlu0 %v8955_v38, %s8510_s28  ;;  %1626 = vmatprep.subr.bf16.mxu0 %v902_v53 }
  0xff   : > { %364 = vrot.lane.b32.xlu1 %v8960_v39, %s8510_s28  ;;  %1627 = vmatpush1.bf16.msra.mxu0 %v901_v27 }
 0x100   : > { %v511_v55 = vpop.permute.xlu0 %510 }
 0x101   : > { %v9008_v56 = vpop.permute.xlu1 %512  ;;  %v523_v58 = vsel %vm13381_vm5, %v8811_v32, %v511_v55  ;;  %1616 = vmatmul.mubr.bf16.gmra.mrb[4].mxu0 %v8996_v3 }
 0x102   : > { %971 = vrot.lane.b32.xlu0 %v8695_v4, %s8526_s24  ;;  %v524_v59 = vsel %vm13381_vm5, %v511_v55, %v9008_v56  ;;  %7631 = vmatprep.mubr.msk.bf16.mxu0 %vm1566_vm4, %v9004_v54  ;;  %vm13398_vm5 = vcmask 457728  }
 0x103   : > { %973 = vrot.lane.b32.xlu1 %v8955_v38, %s8526_s24  ;;  %1691 = vmatprep.subr.bf16.mxu1 %v524_v59 }
 0x104   : > { %1692 = vmatpush1.bf16.msra.mxu1 %v523_v58  ;;  %v925_v60 = vpop.permute.xlu0 %924 }
 0x105   : > { %v9021_v61 = vpop.permute.xlu1 %926 }
 0x106   : > { %400 = vrot.lane.b32.xlu0 %v8955_v38, %s13394_s29  ;;  %v940_v32 = vsel %vm13399_vm3, %v925_v60, %v9021_v61 }
 0x107   : > { %402 = vrot.lane.b32.xlu1 %v8960_v39, %s13394_s29  ;;  %1628 = vmatprep.subr.bf16.mxu0 %v940_v32 }
 0x108   : > { %v923_v63 = vpop.permute.xlu0 %922 }
 0x109   : > { %v939_v1 = vsel %vm13399_vm3, %v923_v63, %v925_v60  ;;  %v549_v6 = vpop.permute.xlu1 %548 }
 0x10a   : > { %1009 = vrot.lane.b32.xlu0 %v8695_v4, %s8527_s25  ;;  %1629 = vmatpush1.bf16.msra.mxu0 %v939_v1  ;;  %v561_v8 = vsel %vm13382_vm6, %v8820_v37, %v549_v6 }
 0x10b   : > { %1011 = vrot.lane.b32.xlu1 %v8955_v38, %s8527_s25 }
 0x10c   : > { %v9034_v9 = vpop.permute.xlu0 %550 }
 0x10d   : > { %v968_v10 = vpop.permute.xlu1 %967  ;;  %v562_v11 = vsel %vm13382_vm6, %v549_v6, %v9034_v9  ;;  %vm1019_vm6 = vcmask 449536  }
 0x10e   : > { %438 = vrot.lane.b32.xlu0 %v8955_v38, %s13419_s30  ;;  %1693 = vmatprep.subr.bf16.mxu1 %v562_v11 }
 0x10f   : > { %440 = vrot.lane.b32.xlu1 %v8960_v39, %s13419_s30  ;;  %1694 = vmatpush1.bf16.msra.mxu1 %v561_v8 }
 0x110   : > { %v9044_v14 = vpop.permute.xlu0 %969 }
 0x111   : > { %v966_v15 = vpop.permute.xlu1 %965  ;;  %v983_v16 = vsel %vm13398_vm5, %v968_v10, %v9044_v14 }
 0x112   : > { %v982_v12 = vsel %vm13398_vm5, %v966_v15, %v968_v10  ;;  %1047 = vrot.lane.b32.xlu0 %v8695_v4, %s8528_s17  ;;  %1630 = vmatprep.subr.bf16.mxu0 %v983_v16 }
 0x113   : > { %1049 = vrot.lane.b32.xlu1 %v8955_v38, %s8528_s17  ;;  %1631 = vmatpush1.bf16.msra.mxu0 %v982_v12 }
 0x114   : > { %v587_v37 = vpop.permute.xlu0 %586 }
 0x115   : > { %v9053_v19 = vpop.permute.xlu1 %588  ;;  %v599_v20 = vsel %vm13383_vm7, %v8833_v42, %v587_v37 }
 0x116   : > { %476 = vrot.lane.b32.xlu0 %v8955_v38, %s8513_s7  ;;  %v600_v21 = vsel %vm13383_vm7, %v587_v37, %v9053_v19  ;;  %vm1057_vm7 = vcmask 441344   ;;  %v9154_v37 = vld [vmem:[%s8610_s26 + $0x1c] ss:$36 sps:$4 sm:$0xff]  }
 0x117   : > { %478 = vrot.lane.b32.xlu1 %v8960_v39, %s8513_s7  ;;  %1695 = vmatprep.subr.bf16.mxu1 %v600_v21 }
 0x118   : > { %1696 = vmatpush1.bf16.msra.mxu1 %v599_v20  ;;  %v1006_v24 = vpop.permute.xlu0 %1005 }
 0x119   : > { %v9063_v25 = vpop.permute.xlu1 %1007 }
 0x11a   : > { %1085 = vrot.lane.b32.xlu0 %v8695_v4, %s8529_s18  ;;  %v1021_v42 = vsel %vm1019_vm6, %v1006_v24, %v9063_v25 }
 0x11b   : > { %1087 = vrot.lane.b32.xlu1 %v8955_v38, %s8529_s18  ;;  %1632 = vmatprep.subr.bf16.mxu0 %v1021_v42 }
 0x11c   : > { %v1004_v26 = vpop.permute.xlu0 %1003 }
 0x11d   : > { %v1020_v29 = vsel %vm1019_vm6, %v1004_v26, %v1006_v24  ;;  %v625_v30 = vpop.permute.xlu1 %624 }
 0x11e   : > { %514 = vrot.lane.b32.xlu0 %v8955_v38, %s8514_s8  ;;  %1633 = vmatpush1.bf16.msra.mxu0 %v1020_v29  ;;  %v637_v35 = vsel %vm13384_vm8, %v8842_v47, %v625_v30 }
 0x11f   : > { %516 = vrot.lane.b32.xlu1 %v8960_v39, %s8514_s8 }
 0x120   : > { %v9076_v31 = vpop.permute.xlu0 %626 }
 0x121   : > { %v1044_v17 = vpop.permute.xlu1 %1043  ;;  %v638_v34 = vsel %vm13384_vm8, %v625_v30, %v9076_v31  ;;  %vm1095_vm8 = vcmask 375808  }
 0x122   : > { %1123 = vrot.lane.b32.xlu0 %v8695_v4, %s8530_s12  ;;  %1697 = vmatprep.subr.bf16.mxu1 %v638_v34 }
 0x123   : > { %1125 = vrot.lane.b32.xlu1 %v8955_v38, %s8530_s12  ;;  %1698 = vmatpush1.bf16.msra.mxu1 %v637_v35 }
 0x124   : > { %v9086_v2 = vpop.permute.xlu0 %1045 }
 0x125   : > { %v1042_v22 = vpop.permute.xlu1 %1041  ;;  %v1059_v0 = vsel %vm1057_vm7, %v1044_v17, %v9086_v2 }
 0x126   : > { %v1058_v40 = vsel %vm1057_vm7, %v1042_v22, %v1044_v17  ;;  %552 = vrot.lane.b32.xlu0 %v8955_v38, %s8515_s9  ;;  %1634 = vmatprep.subr.bf16.mxu0 %v1059_v0 }
 0x127   : > { %554 = vrot.lane.b32.xlu1 %v8960_v39, %s8515_s9  ;;  %1635 = vmatpush1.bf16.msra.mxu0 %v1058_v40 }
 0x128   : > { %v663_v47 = vpop.permute.xlu0 %662 }
 0x129   : > { %v9095_v41 = vpop.permute.xlu1 %664  ;;  %v675_v46 = vsel %vm13385_vm9, %v8855_v52, %v663_v47 }
 0x12a   : > { %1161 = vrot.lane.b32.xlu0 %v8695_v4, %s8531_s13  ;;  %v676_v48 = vsel %vm13385_vm9, %v663_v47, %v9095_v41  ;;  %vm1133_vm9 = vcmask 367616  }
 0x12b   : > { %1163 = vrot.lane.b32.xlu1 %v8955_v38, %s8531_s13  ;;  %1699 = vmatprep.subr.bf16.mxu1 %v676_v48 }
 0x12c   : > { %1700 = vmatpush1.bf16.msra.mxu1 %v675_v46  ;;  %v1082_v49 = vpop.permute.xlu0 %1081 }
 0x12d   : > { %v9105_v51 = vpop.permute.xlu1 %1083 }
 0x12e   : > { %590 = vrot.lane.b32.xlu0 %v8955_v38, %s8516_s10  ;;  %v1097_v52 = vsel %vm1095_vm8, %v1082_v49, %v9105_v51 }
 0x12f   : > { %592 = vrot.lane.b32.xlu1 %v8960_v39, %s8516_s10  ;;  %1636 = vmatprep.subr.bf16.mxu0 %v1097_v52 }
 0x130   : > { %v1080_v53 = vpop.permute.xlu0 %1079 }
 0x131   : > { %v1096_v27 = vsel %vm1095_vm8, %v1080_v53, %v1082_v49  ;;  %v701_v55 = vpop.permute.xlu1 %700 }
 0x132   : > { %1199 = vrot.lane.b32.xlu0 %v8695_v4, %s13396_s14  ;;  %1637 = vmatpush1.bf16.msra.mxu0 %v1096_v27  ;;  %v713_v32 = vsel %vm13386_vm10, %v8864_v57, %v701_v55 }
 0x133   : > { %1201 = vrot.lane.b32.xlu1 %v8955_v38, %s13396_s14  ;;  %s13589_s14 = smov 91  }
 0x134   : > { %v9118_v58 = vpop.permute.xlu0 %702 }
 0x135   : > { %v1120_v59 = vpop.permute.xlu1 %1119  ;;  %v714_v60 = vsel %vm13386_vm10, %v701_v55, %v9118_v58  ;;  %vm1171_vm10 = vcmask 359424  }
 0x136   : > { %628 = vrot.lane.b32.xlu0 %v8955_v38, %s13389_s11  ;;  %1701 = vmatprep.subr.bf16.mxu1 %v714_v60 }
 0x137   : > { %630 = vrot.lane.b32.xlu1 %v8960_v39, %s13389_s11  ;;  %1702 = vmatpush1.bf16.msra.mxu1 %v713_v32 }
 0x138   : > { %v9128_v63 = vpop.permute.xlu0 %1121 }
 0x139   : > { %v1118_v1 = vpop.permute.xlu1 %1117  ;;  %v1135_v6 = vsel %vm1133_vm9, %v1120_v59, %v9128_v63 }
 0x13a   : > { %v1134_v10 = vsel %vm1133_vm9, %v1118_v1, %v1120_v59  ;;  %1237 = vrot.lane.b32.xlu0 %v8695_v4, %s13646_s15  ;;  %1638 = vmatprep.subr.bf16.mxu0 %v1135_v6 }
 0x13b   : > { %1239 = vrot.lane.b32.xlu1 %v8955_v38, %s13646_s15  ;;  %1639 = vmatpush1.bf16.msra.mxu0 %v1134_v10 }
 0x13c   : > { %v739_v57 = vpop.permute.xlu0 %738 }
 0x13d   : > { %v9137_v11 = vpop.permute.xlu1 %740  ;;  %v751_v8 = vsel %vm13387_vm11, %v8887_v7, %v739_v57 }
 0x13e   : > { %666 = vrot.lane.b32.xlu0 %v8955_v38, %s13647_s16  ;;  %v752_v15 = vsel %vm13387_vm11, %v739_v57, %v9137_v11  ;;  %vm1209_vm11 = vcmask 293888  }
 0x13f   : > { %668 = vrot.lane.b32.xlu1 %v8960_v39, %s13647_s16  ;;  %1703 = vmatprep.subr.bf16.mxu1 %v752_v15 }
 0x140   : > { %1704 = vmatpush1.bf16.msra.mxu1 %v751_v8  ;;  %v1158_v16 = vpop.permute.xlu0 %1157 }
 0x141   : > { %v9147_v12 = vpop.permute.xlu1 %1159 }
 0x142   : > { %1275 = vrot.lane.b32.xlu0 %v8695_v4, %s13648_s19  ;;  %v1173_v7 = vsel %vm1171_vm10, %v1158_v16, %v9147_v12 }
 0x143   : > { %1277 = vrot.lane.b32.xlu1 %v8955_v38, %s13648_s19  ;;  %1640 = vmatprep.subr.bf16.mxu0 %v1173_v7  ;;  %v13405_v7 = vmov 0  }
 0x144   : > { %v1156_v20 = vpop.permute.xlu0 %1155  ;;  %8286 = vset.pattern.permute.xlu1 %v13405_v7  ;;  %8285 = vset.pattern.permute.xlu0 %v13405_v7 }
 0x145   : > { %v1172_v21 = vsel %vm1171_vm10, %v1156_v20, %v1158_v16  ;;  %v777_v24 = vpop.permute.xlu1 %776  ;;  %v9238_v16 = vld [vmem:[%s13645_s1 + $0x2c] ss:$16 sps:$4 sm:$0xff]  }
 0x146   : > { %594 = vrot.lane.b32.xlu0 %v9154_v37, %s8516_s10  ;;  %1641 = vmatpush1.bf16.msra.mxu0 %v1172_v21  ;;  %v789_v30 = vsel %vm13388_vm12, %v8906_v18, %v777_v24  ;;  %s13650_s10 = smov 18  }
 0x147   : > { %704 = vrot.lane.b32.xlu1 %v8955_v38, %s13649_s20 }
 0x148   : > { %v9163_v42 = vpop.permute.xlu0 %778 }
 0x149   : > { %v1196_v26 = vpop.permute.xlu1 %1195  ;;  %v790_v29 = vsel %vm13388_vm12, %v777_v24, %v9163_v42  ;;  %vm13401_vm12 = vcmask 285696  }
 0x14a   : > { %706 = vrot.lane.b32.xlu0 %v8960_v39, %s13649_s20  ;;  %1705 = vmatprep.subr.bf16.mxu1 %v790_v29 }
 0x14b   : > { %632 = vrot.lane.b32.xlu1 %v9154_v37, %s13389_s11  ;;  %1706 = vmatpush1.bf16.msra.mxu1 %v789_v30  ;;  %s13651_s11 = smov 17  }
 0x14c   : > { %v9173_v17 = vpop.permute.xlu0 %1197 }
 0x14d   : > { %v1194_v34 = vpop.permute.xlu1 %1193  ;;  %v1211_v35 = vsel %vm1209_vm11, %v1196_v26, %v9173_v17 }
 0x14e   : > { %v1210_v22 = vsel %vm1209_vm11, %v1194_v34, %v1196_v26  ;;  %742 = vrot.lane.b32.xlu0 %v8955_v38, %s13650_s10  ;;  %1642 = vmatprep.subr.bf16.mxu0 %v1211_v35 }
 0x14f   : > { %744 = vrot.lane.b32.xlu1 %v8960_v39, %s13650_s10  ;;  %1643 = vmatpush1.bf16.msra.mxu0 %v1210_v22 }
 0x150   : > { %v815_v18 = vpop.permute.xlu0 %814 }
 0x151   : > { %v9182_v0 = vpop.permute.xlu1 %816  ;;  %v827_v40 = vsel %vm13393_vm13, %v8929_v28, %v815_v18 }
 0x152   : > { %328 = vrot.lane.b32.xlu0 %v9154_v37, %s13391_s27  ;;  %v828_v47 = vsel %vm13393_vm13, %v815_v18, %v9182_v0  ;;  %s13652_s27 = smov 16   ;;  %vm13400_vm13 = vcmask 277504  }
 0x153   : > { %670 = vrot.lane.b32.xlu1 %v9154_v37, %s13647_s16  ;;  %1707 = vmatprep.subr.bf16.mxu1 %v828_v47 }
 0x154   : > { %1708 = vmatpush1.bf16.msra.mxu1 %v827_v40  ;;  %v1234_v46 = vpop.permute.xlu0 %1233 }
 0x155   : > { %v9192_v48 = vpop.permute.xlu1 %1235 }
 0x156   : > { %780 = vrot.lane.b32.xlu0 %v8955_v38, %s13651_s11  ;;  %v1249_v28 = vsel %vm13401_vm12, %v1234_v46, %v9192_v48 }
 0x157   : > { %782 = vrot.lane.b32.xlu1 %v8960_v39, %s13651_s11  ;;  %1644 = vmatprep.subr.bf16.mxu0 %v1249_v28 }
 0x158   : > { %v1232_v49 = vpop.permute.xlu0 %1231 }
 0x159   : > { %v1248_v52 = vsel %vm13401_vm12, %v1232_v49, %v1234_v46  ;;  %v853_v53 = vpop.permute.xlu1 %852 }
 0x15a   : > { %366 = vrot.lane.b32.xlu0 %v9154_v37, %s8510_s28  ;;  %1645 = vmatpush1.bf16.msra.mxu0 %v1248_v52  ;;  %v865_v60 = vsel %vm862_vm14, %v8948_v36, %v853_v53  ;;  %v9225_v36 = vld [vmem:[%s13645_s1 + $0x8] ss:$16 sps:$4 sm:$0xff]   ;;  %s13653_s28 = smov 8  }
 0x15b   : > { %708 = vrot.lane.b32.xlu1 %v9154_v37, %s13649_s20  ;;  %s13654_s20 = smov 7  }
 0x15c   : > { %v9205_v27 = vpop.permute.xlu0 %854 }
 0x15d   : > { %v1272_v55 = vpop.permute.xlu1 %1271  ;;  %v866_v59 = vsel %vm862_vm14, %v853_v53, %v9205_v27 }
 0x15e   : > { %818 = vrot.lane.b32.xlu0 %v8955_v38, %s13652_s27  ;;  %1709 = vmatprep.subr.bf16.mxu1 %v866_v59 }
 0x15f   : > { %820 = vrot.lane.b32.xlu1 %v8960_v39, %s13652_s27  ;;  %1710 = vmatpush1.bf16.msra.mxu1 %v865_v60 }
 0x160   : > { %v9215_v32 = vpop.permute.xlu0 %1273 }
 0x161   : > { %v1270_v1 = vpop.permute.xlu1 %1269  ;;  %v1287_v6 = vsel %vm13400_vm13, %v1272_v55, %v9215_v32 }
 0x162   : > { %v1286_v10 = vsel %vm13400_vm13, %v1270_v1, %v1272_v55  ;;  %404 = vrot.lane.b32.xlu0 %v9154_v37, %s13394_s29  ;;  %1646 = vmatprep.subr.bf16.mxu0 %v1287_v6  ;;  %s13477_s29 = smov 101  }
 0x163   : > { %746 = vrot.lane.b32.xlu1 %v9154_v37, %s13650_s10  ;;  %1647 = vmatpush1.bf16.msra.mxu0 %v1286_v10 }
 0x164   : > { %v891_v57 = vpop.permute.xlu0 %890  ;;  %1785 = vmatprep.subr.bf16.mxu0 %v8955_v38  ;;  %1712 = vmatmul.mubr.bf16.vlgmr.msra.gmra.mrb[0].mxu1 %v8966_v43 }
 0x165   : > { %v9231_v8 = vpop.permute.xlu1 %892  ;;  %v903_v15 = vsel %vm900_vm15, %v8988_v50, %v891_v57  ;;  %1721 = vmatprep.mubr.bf16.mxu1 %v8977_v45 }
 0x166   : > { %856 = vrot.lane.b32.xlu0 %v8955_v38, %s13653_s28  ;;  %v904_v20 = vsel %vm900_vm15, %v891_v57, %v9231_v8  ;;  %1659 = vmatmul.mubr.bf16.vlgmr.msra.gmra.mrb[0].mxu0 %v9225_v36 }
 0x167   : > { %858 = vrot.lane.b32.xlu1 %v8960_v39, %s13653_s28  ;;  %1732 = vmatprep.subr.bf16.mxu1 %v904_v20 }
 0x168   : > { %1733 = vmatpush1.bf16.msra.mxu1 %v903_v15  ;;  %1786 = vmatpush1.bf16.msra.mxu0 %v8695_v4  ;;  %v325_v50 = vpop.permute.xlu0 %324  ;;  %v9264_v4 = vld [vmem:[%s13645_s1 + $0x28] ss:$16 sps:$4 sm:$0xff]  }
 0x169   : > { %v9250_v21 = vpop.permute.xlu1 %326  ;;  %v335_v24 = vsel %vm13402_vm0, %v8877_v62, %v325_v50  ;;  %7632 = vmatprep.mubr.msk.bf16.mxu0 %vm1566_vm4, %v9238_v16 }
 0x16a   : > { %442 = vrot.lane.b32.xlu0 %v9154_v37, %s13419_s30  ;;  %v336_v26 = vsel %vm13402_vm0, %v325_v50, %v9250_v21 }
 0x16b   : > { %784 = vrot.lane.b32.xlu1 %v9154_v37, %s13651_s11  ;;  %1787 = vmatprep.subr.bf16.mxu0 %v336_v26 }
 0x16c   : > { %1788 = vmatpush1.bf16.msra.mxu0 %v335_v24  ;;  %v929_v62 = vpop.permute.xlu0 %928  ;;  %1722 = vmatmul.mubr.bf16.gmra.mrb[4].mxu1 %v8996_v3 }
 0x16d   : > { %v9269_v29 = vpop.permute.xlu1 %930  ;;  %v941_v30 = vsel %vm13399_vm3, %v9021_v61, %v929_v62  ;;  %7633 = vmatprep.mubr.msk.bf16.mxu1 %vm1566_vm4, %v9004_v54 }
 0x16e   : > { %894 = vrot.lane.b32.xlu0 %v8955_v38, %s13654_s20  ;;  %v942_v34 = vsel %vm13399_vm3, %v929_v62, %v9269_v29  ;;  %1669 = vmatmul.mubr.bf16.gmra.mrb[4].mxu0 %v9264_v4  ;;  %v9364_v62 = vld [vmem:[%s8610_s26 + $0x20] ss:$36 sps:$4 sm:$0xff]   ;;  %s13664_s26 = smov 36  }
 0x16f   : > { %896 = vrot.lane.b32.xlu1 %v8960_v39, %s13654_s20  ;;  %1734 = vmatprep.subr.bf16.mxu1 %v942_v34 }
 0x170   : > { %1735 = vmatpush1.bf16.msra.mxu1 %v941_v30  ;;  %v363_v35 = vpop.permute.xlu0 %362  ;;  %1817 = vmatprep.mubr.bf16.mxu0 %v8734_v5 }
 0x171   : > { %v9283_v61 = vpop.permute.xlu1 %364  ;;  %v373_v22 = vsel %vm368_vm1, %v8896_v13, %v363_v35 }
 0x172   : > { %480 = vrot.lane.b32.xlu0 %v9154_v37, %s8513_s7  ;;  %v374_v18 = vsel %vm368_vm1, %v363_v35, %v9283_v61  ;;  %s13479_s7 = smov 10  }
 0x173   : > { %822 = vrot.lane.b32.xlu1 %v9154_v37, %s13652_s27  ;;  %1789 = vmatprep.subr.bf16.mxu0 %v374_v18  ;;  %s13500_s27 = smov 90  }
 0x174   : > { %1790 = vmatpush1.bf16.msra.mxu0 %v373_v22  ;;  %v972_v40 = vpop.permute.xlu0 %971 }
 0x175   : > { %v9293_v47 = vpop.permute.xlu1 %973  ;;  %v984_v5 = vsel %vm13398_vm5, %v9044_v14, %v972_v40 }
 0x176   : > { %932 = vrot.lane.b32.xlu0 %v8955_v38, %s8525_s23  ;;  %v985_v13 = vsel %vm13398_vm5, %v972_v40, %v9293_v47  ;;  %vm13655_vm5 = vcmask 957440  }
 0x177   : > { %934 = vrot.lane.b32.xlu1 %v8960_v39, %s8525_s23  ;;  %1736 = vmatprep.subr.bf16.mxu1 %v985_v13  ;;  %vm13656_vm3 = vmmov %vm13655_vm5 }
 0x178   : > { %1737 = vmatpush1.bf16.msra.mxu1 %v984_v5  ;;  %v401_v46 = vpop.permute.xlu0 %400 }
 0x179   : > { %v9303_v28 = vpop.permute.xlu1 %402  ;;  %v411_v49 = vsel %vm406_vm2, %v8919_v23, %v401_v46 }
 0x17a   : > { %518 = vrot.lane.b32.xlu0 %v9154_v37, %s8514_s8  ;;  %v412_v38 = vsel %vm406_vm2, %v401_v46, %v9303_v28  ;;  %s13498_s8 = smov 11  }
 0x17b   : > { %860 = vrot.lane.b32.xlu1 %v9154_v37, %s13653_s28  ;;  %1791 = vmatprep.subr.bf16.mxu0 %v412_v38  ;;  %s13449_s28 = smov 100  }
 0x17c   : > { %1792 = vmatpush1.bf16.msra.mxu0 %v411_v49  ;;  %v1010_v14 = vpop.permute.xlu0 %1009 }
 0x17d   : > { %v9313_v52 = vpop.permute.xlu1 %1011  ;;  %v1022_v53 = vsel %vm1019_vm6, %v9063_v25, %v1010_v14 }
 0x17e   : > { %975 = vrot.lane.b32.xlu0 %v8960_v39, %s8526_s24  ;;  %v1023_v23 = vsel %vm1019_vm6, %v1010_v14, %v9313_v52 }
 0x17f   : > { %977 = vrot.lane.b32.xlu1 %v9154_v37, %s8526_s24  ;;  %1738 = vmatprep.subr.bf16.mxu1 %v1023_v23 }
 0x180   : > { %1739 = vmatpush1.bf16.msra.mxu1 %v1022_v53  ;;  %v439_v55 = vpop.permute.xlu0 %438 }
 0x181   : > { %v9323_v59 = vpop.permute.xlu1 %440  ;;  %v449_v60 = vsel %vm13655_vm5, %v8938_v33, %v439_v55 }
 0x182   : > { %556 = vrot.lane.b32.xlu0 %v9154_v37, %s8515_s9  ;;  %v450_v25 = vsel %vm13656_vm3, %v439_v55, %v9323_v59  ;;  %vm13657_vm3 = vcmask 949248   ;;  %s13528_s9 = smov 1  }
 0x183   : > { %1013 = vrot.lane.b32.xlu1 %v8960_v39, %s8527_s25  ;;  %1793 = vmatprep.subr.bf16.mxu0 %v450_v25  ;;  %vm13658_vm5 = vmmov %vm13657_vm3 }
 0x184   : > { %1794 = vmatpush1.bf16.msra.mxu0 %v449_v60  ;;  %v1048_v1 = vpop.permute.xlu0 %1047 }
 0x185   : > { %v9333_v6 = vpop.permute.xlu1 %1049  ;;  %v1060_v10 = vsel %vm1057_vm7, %v9086_v2, %v1048_v1 }
 0x186   : > { %1015 = vrot.lane.b32.xlu0 %v9154_v37, %s8527_s25  ;;  %v1061_v33 = vsel %vm1057_vm7, %v1048_v1, %v9333_v6 }
 0x187   : > { %898 = vrot.lane.b32.xlu1 %v9154_v37, %s13654_s20  ;;  %1740 = vmatprep.subr.bf16.mxu1 %v1061_v33  ;;  %s13454_s20 = smov 99  }
 0x188   : > { %1741 = vmatpush1.bf16.msra.mxu1 %v1060_v10  ;;  %v477_v57 = vpop.permute.xlu0 %476 }
 0x189   : > { %v9343_v15 = vpop.permute.xlu1 %478  ;;  %v487_v20 = vsel %vm13657_vm3, %v8972_v44, %v477_v57  ;;  %vm13659_vm3 = vcmask 883712  }
 0x18a   : > { %1051 = vrot.lane.b32.xlu0 %v8960_v39, %s8528_s17  ;;  %v488_v2 = vsel %vm13658_vm5, %v477_v57, %v9343_v15  ;;  %vm13660_vm5 = vmmov %vm13659_vm3 }
 0x18b   : > { %1053 = vrot.lane.b32.xlu1 %v9154_v37, %s8528_s17  ;;  %1795 = vmatprep.subr.bf16.mxu0 %v488_v2 }
 0x18c   : > { %1796 = vmatpush1.bf16.msra.mxu0 %v487_v20  ;;  %v1086_v50 = vpop.permute.xlu0 %1085 }
 0x18d   : > { %v9353_v24 = vpop.permute.xlu1 %1087  ;;  %v1098_v26 = vsel %vm1095_vm8, %v9105_v51, %v1086_v50 }
 0x18e   : > { %936 = vrot.lane.b32.xlu0 %v9154_v37, %s8525_s23  ;;  %v1099_v44 = vsel %vm1095_vm8, %v1086_v50, %v9353_v24  ;;  %s13417_s23 = smov 119  }
 0x18f   : > { %1089 = vrot.lane.b32.xlu1 %v8960_v39, %s8529_s18  ;;  %1742 = vmatprep.subr.bf16.mxu1 %v1099_v44 }
 0x190   : > { %1743 = vmatpush1.bf16.msra.mxu1 %v1098_v26  ;;  %v515_v30 = vpop.permute.xlu0 %514 }
 0x191   : > { %v9366_v34 = vpop.permute.xlu1 %516  ;;  %v525_v35 = vsel %vm13659_vm3, %v9008_v56, %v515_v30  ;;  %vm13661_vm3 = vcmask 875520  }
 0x192   : > { %1091 = vrot.lane.b32.xlu0 %v9154_v37, %s8529_s18  ;;  %v526_v51 = vsel %vm13660_vm5, %v515_v30, %v9366_v34  ;;  %vm13662_vm5 = vmmov %vm13661_vm3 }
 0x193   : > { %979 = vrot.lane.b32.xlu1 %v9364_v62, %s8526_s24  ;;  %1797 = vmatprep.subr.bf16.mxu0 %v526_v51  ;;  %s13735_s24 = smov 118  }
 0x194   : > { %1798 = vmatpush1.bf16.msra.mxu0 %v525_v35  ;;  %v1124_v22 = vpop.permute.xlu0 %1123 }
 0x195   : > { %v9376_v18 = vpop.permute.xlu1 %1125  ;;  %v1136_v40 = vsel %vm1133_vm9, %v9128_v63, %v1124_v22 }
 0x196   : > { %1127 = vrot.lane.b32.xlu0 %v8960_v39, %s8530_s12  ;;  %v1137_v56 = vsel %vm1133_vm9, %v1124_v22, %v9376_v18  ;;  %v9460_v22 = vld [vmem:[%s13358_s4] sm:$0xff] }
 0x197   : > { %1129 = vrot.lane.b32.xlu1 %v9154_v37, %s8530_s12  ;;  %1744 = vmatprep.subr.bf16.mxu1 %v1137_v56 }
 0x198   : > { %1745 = vmatpush1.bf16.msra.mxu1 %v1136_v40  ;;  %v553_v5 = vpop.permute.xlu0 %552 }
 0x199   : > { %v9386_v13 = vpop.permute.xlu1 %554  ;;  %v563_v46 = vsel %vm13661_vm3, %v9034_v9, %v553_v5  ;;  %vm13663_vm3 = vcmask 867328  }
 0x19a   : > { %1017 = vrot.lane.b32.xlu0 %v9364_v62, %s8527_s25  ;;  %v564_v63 = vsel %vm13662_vm5, %v553_v5, %v9386_v13  ;;  %vm13665_vm5 = vmmov %vm13663_vm3  ;;  %s13421_s25 = smov 39  }
 0x19b   : > { %1165 = vrot.lane.b32.xlu1 %v8960_v39, %s8531_s13  ;;  %1799 = vmatprep.subr.bf16.mxu0 %v564_v63 }
 0x19c   : > { %1800 = vmatpush1.bf16.msra.mxu0 %v563_v46  ;;  %v1162_v49 = vpop.permute.xlu0 %1161 }
 0x19d   : > { %v9396_v38 = vpop.permute.xlu1 %1163  ;;  %v1174_v14 = vsel %vm1171_vm10, %v9147_v12, %v1162_v49 }
 0x19e   : > { %1167 = vrot.lane.b32.xlu0 %v9154_v37, %s8531_s13  ;;  %v1175_v9 = vsel %vm1171_vm10, %v1162_v49, %v9396_v38 }
 0x19f   : > { %1055 = vrot.lane.b32.xlu1 %v9364_v62, %s8528_s17  ;;  %1746 = vmatprep.subr.bf16.mxu1 %v1175_v9  ;;  %s13423_s17 = smov 38  }
 0x1a0   : > { %1747 = vmatpush1.bf16.msra.mxu1 %v1174_v14  ;;  %v591_v53 = vpop.permute.xlu0 %590  ;;  %v9483_v14 = vld [vmem:[%s13358_s4 + $0x10] sm:$0xff] }
 0x1a1   : > { %v593_v23 = vpop.permute.xlu1 %592  ;;  %v601_v55 = vsel %vm13663_vm3, %v9053_v19, %v591_v53  ;;  %vm13666_vm3 = vcmask 228352  }
 0x1a2   : > { %1203 = vrot.lane.b32.xlu0 %v8960_v39, %s13664_s26  ;;  %v602_v12 = vsel %vm13665_vm5, %v591_v53, %v593_v23  ;;  %vm13667_vm5 = vmmov %vm13666_vm3 }
 0x1a3   : > { %1205 = vrot.lane.b32.xlu1 %v9154_v37, %s13664_s26  ;;  %1801 = vmatprep.subr.bf16.mxu0 %v602_v12 }
 0x1a4   : > { %1802 = vmatpush1.bf16.msra.mxu0 %v601_v55  ;;  %v1200_v60 = vpop.permute.xlu0 %1199 }
 0x1a5   : > { %v9413_v25 = vpop.permute.xlu1 %1201  ;;  %v1212_v1 = vsel %vm1209_vm11, %v9173_v17, %v1200_v60 }
 0x1a6   : > { %1093 = vrot.lane.b32.xlu0 %v9364_v62, %s8529_s18  ;;  %v1213_v19 = vsel %vm1209_vm11, %v1200_v60, %v9413_v25  ;;  %s13524_s18 = smov 111  }
 0x1a7   : > { %1241 = vrot.lane.b32.xlu1 %v8960_v39, %s13646_s15  ;;  %1748 = vmatprep.subr.bf16.mxu1 %v1213_v19 }
 0x1a8   : > { %1749 = vmatpush1.bf16.msra.mxu1 %v1212_v1  ;;  %v629_v10 = vpop.permute.xlu0 %628 }
 0x1a9   : > { %v631_v33 = vpop.permute.xlu1 %630  ;;  %v639_v57 = vsel %vm13666_vm3, %v9076_v31, %v629_v10  ;;  %vm13668_vm3 = vcmask 220160  }
 0x1aa   : > { %1243 = vrot.lane.b32.xlu0 %v9154_v37, %s13646_s15  ;;  %v640_v17 = vsel %vm13667_vm5, %v629_v10, %v631_v33  ;;  %vm13669_vm5 = vmmov %vm13668_vm3 }
 0x1ab   : > { %1131 = vrot.lane.b32.xlu1 %v9364_v62, %s8530_s12  ;;  %1803 = vmatprep.subr.bf16.mxu0 %v640_v17  ;;  %s13506_s12 = smov 9  }
 0x1ac   : > { %1804 = vmatpush1.bf16.msra.mxu0 %v639_v57  ;;  %v1238_v20 = vpop.permute.xlu0 %1237 }
 0x1ad   : > { %v9430_v2 = vpop.permute.xlu1 %1239  ;;  %v1250_v50 = vsel %vm13401_vm12, %v9192_v48, %v1238_v20 }
 0x1ae   : > { %1279 = vrot.lane.b32.xlu0 %v8960_v39, %s13648_s19  ;;  %v1251_v31 = vsel %vm13401_vm12, %v1238_v20, %v9430_v2 }
 0x1af   : > { %1281 = vrot.lane.b32.xlu1 %v9154_v37, %s13648_s19  ;;  %1750 = vmatprep.subr.bf16.mxu1 %v1251_v31 }
 0x1b0   : > { %1751 = vmatpush1.bf16.msra.mxu1 %v1250_v50  ;;  %v667_v26 = vpop.permute.xlu0 %666 }
 0x1b1   : > { %v669_v44 = vpop.permute.xlu1 %668  ;;  %v677_v30 = vsel %vm13668_vm3, %v9095_v41, %v667_v26  ;;  %vm13670_vm3 = vcmask 867328  }
 0x1b2   : > { %1169 = vrot.lane.b32.xlu0 %v9364_v62, %s8531_s13  ;;  %v678_v48 = vsel %vm13669_vm5, %v667_v26, %v669_v44  ;;  %vm13671_vm5 = vcmask 211968   ;;  %s13734_s13 = smov 127  }
 0x1b3   : > { %1207 = vrot.lane.b32.xlu1 %v9364_v62, %s13664_s26  ;;  %1805 = vmatprep.subr.bf16.mxu0 %v678_v48  ;;  %s13540_s26 = smov 89  }
 0x1b4   : > { %1806 = vmatpush1.bf16.msra.mxu0 %v677_v30  ;;  %v1276_v35 = vpop.permute.xlu0 %1275 }
 0x1b5   : > { %v9447_v51 = vpop.permute.xlu1 %1277  ;;  %v1288_v37 = vsel %vm13400_vm13, %v9215_v32, %v1276_v35  ;;  %v9465_v32 = vld [vmem:[%s13358_s4 + $0x8] sm:$0xff] }
 0x1b6   : > { %1245 = vrot.lane.b32.xlu0 %v9364_v62, %s13646_s15  ;;  %v1289_v41 = vsel %vm13400_vm13, %v1276_v35, %v9447_v51  ;;  %vm13673_vm13 = vmmov %vm13671_vm5  ;;  %s13472_s15 = smov 109  }
 0x1b7   : > { %1283 = vrot.lane.b32.xlu1 %v9364_v62, %s13648_s19  ;;  %1752 = vmatprep.subr.bf16.mxu1 %v1289_v41  ;;  %v9474_v62 = vld [vmem:[%s13358_s4 + $0x18] sm:$0xff]  ;;  %s13463_s19 = smov 110  }
 0x1b8   : > { %1753 = vmatpush1.bf16.msra.mxu1 %v1288_v37  ;;  %v595_v40 = vpop.permute.xlu0 %594 }
 0x1b9   : > { %v705_v56 = vpop.permute.xlu1 %704  ;;  %v603_v5 = vsel %vm13670_vm3, %v593_v23, %v595_v40  ;;  %vm13672_vm3 = vcmask 228352  }
 0x1ba   : > { %7727 = vmatprep.subr.bf16.mxu1 %v603_v5  ;;  %1510 = vperm.xlu0 %8285, %v9460_v22   ;;  %v715_v53 = vsel %vm13673_vm13, %v9118_v58, %v705_v56  ;;  %v8474_v58 = vld [vmem:[%s13645_s1 + $0x4] ss:$16 sps:$4 sm:$0xff]   ;;  %vm13676_vm13 = vcmask 220160  }
 0x1bb   : > { %1765 = vmatmul.mubr.bf16.vlgmr.msra.gmra.mrb[0].mxu1 %v9225_v36  ;;  %1515 = vperm.xlu1 %8286, %v9465_v32  }
 0x1bc   : > { %v707_v46 = vpop.permute.xlu0 %706  ;;  %7728 = vmatpush3.bf16.msra.mxu1 %v8960_v39  ;;  %7634 = vmatprep.mubr.msk.bf16.mxu1 %vm1566_vm4, %v9238_v16 }
 0x1bd   : > { %v633_v63 = vpop.permute.xlu1 %632  ;;  %v716_v49 = vsel %vm13671_vm5, %v705_v56, %v707_v46  ;;  %vm13674_vm5 = vcmask 146432  }
 0x1be   : > { %1807 = vmatprep.subr.bf16.mxu0 %v716_v49  ;;  %v641_v9 = vsel %vm13672_vm3, %v631_v33, %v633_v63  ;;  %1525 = vperm.xlu0 %8285, %v9474_v62   ;;  %vm13675_vm12 = vmmov %vm13674_vm5 }
 0x1bf   : > { %7729 = vmatprep.subr.bf16.mxu1 %v641_v9  ;;  %1808 = vmatpush1.bf16.msra.mxu0 %v715_v53 }
 0x1c0   : > { %v743_v39 = vpop.permute.xlu0 %742  ;;  %1520 = vperm.xlu1 %8286, %v9483_v14  }
 0x1c1   : > { %v745_v23 = vpop.permute.xlu1 %744  ;;  %v753_v55 = vsel %vm13674_vm5, %v9137_v11, %v743_v39  ;;  %vm13679_vm5 = vcmask 211968  }
 0x1c2   : > { %v754_v12 = vsel %vm13675_vm12, %v743_v39, %v745_v23  ;;  %vm13677_vm12 = vcmask 138240  }
 0x1c3   : > { %1809 = vmatprep.subr.bf16.mxu0 %v754_v12  ;;  %1775 = vmatmul.mubr.bf16.gmra.mrb[4].mxu1 %v9264_v4  ;;  %vm13678_vm3 = vmmov %vm13677_vm12 }
 0x1c4   : > { %1810 = vmatpush1.bf16.msra.mxu0 %v753_v55  ;;  %v329_v60 = vpop.permute.xlu0 %328  ;;  %1923 = vmatprep.mubr.bf16.mxu1 %v8474_v58 }
 0x1c5   : > { %v337_v1 = vsel %vm13402_vm0, %v9250_v21, %v329_v60  ;;  %v671_v19 = vpop.permute.xlu1 %670 }
 0x1c6   : > { %7730 = vmatpush3.bf16.msra.mxu1 %v337_v1  ;;  %v679_v10 = vsel %vm13676_vm13, %v669_v44, %v671_v19  ;;  %vm13680_vm13 = vcmask 130048  }
 0x1c7   : > { %7731 = vmatprep.subr.bf16.mxu1 %v679_v10  ;;  %vm13681_vm0 = vmmov %vm13680_vm13 }
 0x1c8   : > { %v781_v11 = vpop.permute.xlu0 %780 }
 0x1c9   : > { %v783_v33 = vpop.permute.xlu1 %782  ;;  %v791_v57 = vsel %vm13677_vm12, %v9163_v42, %v781_v11  ;;  %vm13684_vm12 = vmmov %vm13678_vm3 }
 0x1ca   : > { %v792_v17 = vsel %vm13678_vm3, %v781_v11, %v783_v33  ;;  %vm13685_vm3 = vcmask 949248  }
 0x1cb   : > { %1811 = vmatprep.subr.bf16.mxu0 %v792_v17 }
 0x1cc   : > { %1812 = vmatpush1.bf16.msra.mxu0 %v791_v57  ;;  %v367_v20 = vpop.permute.xlu0 %366 }
 0x1cd   : > { %v375_v50 = vsel %vm368_vm1, %v9283_v61, %v367_v20  ;;  %v709_v31 = vpop.permute.xlu1 %708  ;;  %vm13682_vm1 = vcmask 146432  }
 0x1ce   : > { %7732 = vmatpush3.bf16.msra.mxu1 %v375_v50  ;;  %v717_v21 = vsel %vm13679_vm5, %v707_v46, %v709_v31  ;;  %vm13686_vm5 = vmmov %vm13680_vm13 }
 0x1cf   : > { %7733 = vmatprep.subr.bf16.mxu1 %v717_v21 }
 0x1d0   : > { %v819_v26 = vpop.permute.xlu0 %818 }
 0x1d1   : > { %v821_v44 = vpop.permute.xlu1 %820  ;;  %v829_v30 = vsel %vm13680_vm13, %v9182_v0, %v819_v26  ;;  %vm13687_vm13 = vcmask 48128  }
 0x1d2   : > { %v830_v42 = vsel %vm13681_vm0, %v819_v26, %v821_v44  ;;  %vm13683_vm0 = vcmask 957440  }
 0x1d3   : > { %1813 = vmatprep.subr.bf16.mxu0 %v830_v42 }
 0x1d4   : > { %1814 = vmatpush1.bf16.msra.mxu0 %v829_v30  ;;  %v405_v48 = vpop.permute.xlu0 %404 }
 0x1d5   : > { %v413_v35 = vsel %vm406_vm2, %v9303_v28, %v405_v48  ;;  %v747_v37 = vpop.permute.xlu1 %746  ;;  %v8477_v48 = vld [vmem:[%s13645_s1 + $0x20] ss:$16 sps:$4 sm:$0xff]  }
 0x1d6   : > { %7734 = vmatpush3.bf16.msra.mxu1 %v413_v35  ;;  %v755_v61 = vsel %vm13682_vm1, %v745_v23, %v747_v37  ;;  %vm13688_vm1 = vmmov %vm13687_vm13  ;;  %v8478_v35 = vld [vmem:[%s13645_s1 + $0xc] ss:$16 sps:$4 sm:$0xff]  }
 0x1d7   : > { %7735 = vmatprep.subr.bf16.mxu1 %v755_v61 }
 0x1d8   : > { %v857_v41 = vpop.permute.xlu0 %856 }
 0x1d9   : > { %v859_v40 = vpop.permute.xlu1 %858  ;;  %v867_v56 = vsel %vm862_vm14, %v9205_v27, %v857_v41 }
 0x1da   : > { %v868_v0 = vsel %vm862_vm14, %v857_v41, %v859_v40 }
 0x1db   : > { %1815 = vmatprep.subr.bf16.mxu0 %v868_v0 }
 0x1dc   : > { %1816 = vmatpush1.bf16.msra.mxu0 %v867_v56  ;;  %v443_v5 = vpop.permute.xlu0 %442 }
 0x1dd   : > { %v451_v46 = vsel %vm13683_vm0, %v9323_v59, %v443_v5  ;;  %v785_v63 = vpop.permute.xlu1 %784  ;;  %vm13689_vm0 = vcmask 883712  }
 0x1de   : > { %7736 = vmatpush3.bf16.msra.mxu1 %v451_v46  ;;  %v793_v28 = vsel %vm13684_vm12, %v783_v33, %v785_v63  ;;  %vm13690_vm12 = vcmask 457728  }
 0x1df   : > { %7737 = vmatprep.subr.bf16.mxu1 %v793_v28  ;;  %1818 = vmatmul.mubr.bf16.vlgmr.msra.gmra.mrb[8].mxu0 %v8966_v43 }
 0x1e0   : > { %v895_v49 = vpop.permute.xlu0 %894  ;;  %1827 = vmatprep.mubr.bf16.mxu0 %v8977_v45 }
 0x1e1   : > { %v897_v9 = vpop.permute.xlu1 %896  ;;  %v905_v27 = vsel %vm900_vm15, %v9231_v8, %v895_v49 }
 0x1e2   : > { %v906_v53 = vsel %vm900_vm15, %v895_v49, %v897_v9 }
 0x1e3   : > { %1838 = vmatprep.subr.bf16.mxu0 %v906_v53 }
 0x1e4   : > { %1839 = vmatpush1.bf16.msra.mxu0 %v905_v27  ;;  %v481_v39 = vpop.permute.xlu0 %480 }
 0x1e5   : > { %v489_v59 = vsel %vm13685_vm3, %v9343_v15, %v481_v39  ;;  %v823_v23 = vpop.permute.xlu1 %822  ;;  %vm13691_vm3 = vmmov %vm13690_vm12 }
 0x1e6   : > { %7738 = vmatpush3.bf16.msra.mxu1 %v489_v59  ;;  %v831_v55 = vsel %vm13686_vm5, %v821_v44, %v823_v23  ;;  %vm13692_vm5 = vcmask 875520  }
 0x1e7   : > { %7739 = vmatprep.subr.bf16.mxu1 %v831_v55  ;;  %1828 = vmatmul.mubr.bf16.gmra.mrb[12].mxu0 %v8996_v3 }
 0x1e8   : > { %v933_v43 = vpop.permute.xlu0 %932  ;;  %7635 = vmatprep.mubr.msk.bf16.mxu0 %vm1566_vm4, %v9004_v54 }
 0x1e9   : > { %v935_v45 = vpop.permute.xlu1 %934  ;;  %v943_v8 = vsel %vm13687_vm13, %v9269_v29, %v933_v43 }
 0x1ea   : > { %v944_v12 = vsel %vm13688_vm1, %v933_v43, %v935_v45 }
 0x1eb   : > { %1840 = vmatprep.subr.bf16.mxu0 %v944_v12 }
 0x1ec   : > { %1841 = vmatpush1.bf16.msra.mxu0 %v943_v8  ;;  %v519_v15 = vpop.permute.xlu0 %518 }
 0x1ed   : > { %v527_v60 = vsel %vm13689_vm0, %v9366_v34, %v519_v15  ;;  %v861_v58 = vpop.permute.xlu1 %860  ;;  %vm3360_vm0 = vcmask 891904  }
 0x1ee   : > { %7740 = vmatpush3.bf16.msra.mxu1 %v527_v60  ;;  %v869_v3 = vsel %vm862_vm14, %v859_v40, %v861_v58  ;;  %vm13693_vm14 = vmmov %vm13688_vm1  ;;  %vm3285_vm1 = vcmask 900096  }
 0x1ef   : > { %7741 = vmatprep.subr.bf16.mxu1 %v869_v3 }
 0x1f0   : > { %v976_v1 = vpop.permute.xlu0 %975 }
 0x1f1   : > { %v978_v19 = vpop.permute.xlu1 %977  ;;  %v986_v54 = vsel %vm13690_vm12, %v9293_v47, %v976_v1  ;;  %v8475_v47 = vld [vmem:[%s13645_s1] ss:$16 sps:$4 sm:$0xff]   ;;  %vm3435_vm12 = vcmask 826368  }
 0x1f2   : > { %v987_v29 = vsel %vm13691_vm3, %v976_v1, %v978_v19 }
 0x1f3   : > { %1842 = vmatprep.subr.bf16.mxu0 %v987_v29 }
 0x1f4   : > { %1843 = vmatpush1.bf16.msra.mxu0 %v986_v54  ;;  %v557_v10 = vpop.permute.xlu0 %556 }
 0x1f5   : > { %v565_v11 = vsel %vm13692_vm5, %v9386_v13, %v557_v10  ;;  %v1014_v33 = vpop.permute.xlu1 %1013  ;;  %v8476_v13 = vld [vmem:[%s13645_s1 + $0x24] ss:$16 sps:$4 sm:$0xff]   ;;  %s13862_s1 = smov 89   ;;  %vm3585_vm5 = vcmask 809984  }
 0x1f6   : > { %7742 = vmatpush3.bf16.msra.mxu1 %v565_v11  ;;  %v1024_v50 = vsel %vm1019_vm6, %v9313_v52, %v1014_v33 }
 0x1f7   : > { %1940 = vmatprep.subr.bf16.mxu1 %v13405_v7 }
 0x1f8   : > { %v1016_v34 = vpop.permute.xlu0 %1015 }
 0x1f9   : > { %v899_v57 = vpop.permute.xlu1 %898  ;;  %v1025_v17 = vsel %vm1019_vm6, %v1014_v33, %v1016_v34  ;;  %1924 = vmatmul.mubr.bf16.vlgmr.msra.gmra.mrb[8].mxu1 %v8475_v47 }
 0x1fa   : > { %v907_v20 = vsel %vm900_vm15, %v897_v9, %v899_v57  ;;  %1844 = vmatprep.subr.bf16.mxu0 %v1025_v17  ;;  %1931 = vmatprep.mubr.bf16.mxu1 %v8476_v13  ;;  %vm13694_vm15 = vmmov %vm13691_vm3  ;;  %v13403_v17 = vmov 0.0   ;;  %vm3510_vm3 = vcmask 818176  }
 0x1fb   : > { %1941 = vmatpush1.bf16.msra.mxu1 %v907_v20  ;;  %1845 = vmatpush1.bf16.msra.mxu0 %v1024_v50  ;;  %v9611_v50 = vld [vmem:[%s13701_s5] sm:$0xff]  ;;  %s13863_s5 = smov 111  }
 0x1fc   : > { %v1052_v31 = vpop.permute.xlu0 %1051  ;;  %1942 = vmatprep.subr.bf16.mxu1 %v13405_v7 }
 0x1fd   : > { %v1054_v21 = vpop.permute.xlu1 %1053  ;;  %v1062_v26 = vsel %vm1057_vm7, %v9333_v6, %v1052_v31 }
 0x1fe   : > { %v1063_v44 = vsel %vm1057_vm7, %v1052_v31, %v1054_v21 }
 0x1ff   : > { %1846 = vmatprep.subr.bf16.mxu0 %v1063_v44 }
 0x200   : > { %1847 = vmatpush1.bf16.msra.mxu0 %v1062_v26  ;;  %v937_v30 = vpop.permute.xlu0 %936 }
 0x201   : > { %v945_v52 = vsel %vm13693_vm14, %v935_v45, %v937_v30  ;;  %v1090_v42 = vpop.permute.xlu1 %1089  ;;  %1932 = vmatmul.mubr.bf16.gmra.mrb[12].mxu1 %v8477_v48  ;;  %vm3660_vm14 = vcmask 744448  }
 0x202   : > { %1943 = vmatpush1.bf16.msra.mxu1 %v945_v52  ;;  %7637 = vmatprep.mubr.msk.bf16.mxu1 %vm1566_vm4, %v8478_v35  ;;  %v1100_v40 = vsel %vm1095_vm8, %v9353_v24, %v1090_v42 }
 0x203   : > { %1944 = vmatprep.subr.bf16.mxu1 %v13405_v7 }
 0x204   : > { %v1092_v6 = vpop.permute.xlu0 %1091 }
 0x205   : > { %v980_v37 = vpop.permute.xlu1 %979  ;;  %v1101_v61 = vsel %vm1095_vm8, %v1090_v42, %v1092_v6 }
 0x206   : > { %v988_v41 = vsel %vm13694_vm15, %v978_v19, %v980_v37  ;;  %1848 = vmatprep.subr.bf16.mxu0 %v1101_v61  ;;  %vm3735_vm15 = vcmask 736256  }
 0x207   : > { %1945 = vmatpush1.bf16.msra.mxu1 %v988_v41  ;;  %1849 = vmatpush1.bf16.msra.mxu0 %v1100_v40 }
 0x208   : > { %v1128_v56 = vpop.permute.xlu0 %1127  ;;  %1946 = vmatprep.subr.bf16.mxu1 %v13405_v7 }
 0x209   : > { %v1130_v0 = vpop.permute.xlu1 %1129  ;;  %v1138_v5 = vsel %vm1133_vm9, %v9376_v18, %v1128_v56 }
 0x20a   : > { %v1139_v46 = vsel %vm1133_vm9, %v1128_v56, %v1130_v0 }
 0x20b   : > { %1850 = vmatprep.subr.bf16.mxu0 %v1139_v46 }
 0x20c   : > { %1851 = vmatpush1.bf16.msra.mxu0 %v1138_v5  ;;  %v1018_v63 = vpop.permute.xlu0 %1017 }
 0x20d   : > { %v1026_v28 = vsel %vm1019_vm6, %v1016_v34, %v1018_v63  ;;  %v1166_v49 = vpop.permute.xlu1 %1165  ;;  %vm13695_vm6 = vcmask 285696  }
 0x20e   : > { %1947 = vmatpush1.bf16.msra.mxu1 %v1026_v28  ;;  %v1176_v18 = vsel %vm1171_vm10, %v9396_v38, %v1166_v49 }
 0x20f   : > { %1948 = vmatprep.subr.bf16.mxu1 %v13405_v7 }
 0x210   : > { %v1168_v24 = vpop.permute.xlu0 %1167 }
 0x211   : > { %v1056_v9 = vpop.permute.xlu1 %1055  ;;  %v1177_v27 = vsel %vm1171_vm10, %v1166_v49, %v1168_v24 }
 0x212   : > { %v1064_v53 = vsel %vm1057_vm7, %v1054_v21, %v1056_v9  ;;  %1852 = vmatprep.subr.bf16.mxu0 %v1177_v27  ;;  %vm13696_vm7 = vmmov %vm13695_vm6 }
 0x213   : > { %1949 = vmatpush1.bf16.msra.mxu1 %v1064_v53  ;;  %1853 = vmatpush1.bf16.msra.mxu0 %v1176_v18 }
 0x214   : > { %v1204_v39 = vpop.permute.xlu0 %1203  ;;  %1950 = vmatprep.subr.bf16.mxu1 %v13405_v7 }
 0x215   : > { %v1206_v59 = vpop.permute.xlu1 %1205  ;;  %v1214_v23 = vsel %vm1209_vm11, %v9413_v25, %v1204_v39 }
 0x216   : > { %v1215_v55 = vsel %vm1209_vm11, %v1204_v39, %v1206_v59 }
 0x217   : > { %1854 = vmatprep.subr.bf16.mxu0 %v1215_v55 }
 0x218   : > { %1855 = vmatpush1.bf16.msra.mxu0 %v1214_v23  ;;  %v1094_v43 = vpop.permute.xlu0 %1093 }
 0x219   : > { %v1102_v45 = vsel %vm1095_vm8, %v1092_v6, %v1094_v43  ;;  %v1242_v8 = vpop.permute.xlu1 %1241  ;;  %vm13697_vm8 = vcmask 277504  }
 0x21a   : > { %1951 = vmatpush1.bf16.msra.mxu1 %v1102_v45  ;;  %v1252_v25 = vsel %vm13696_vm7, %v9430_v2, %v1242_v8  ;;  %vm13698_vm13 = vmmov %vm13697_vm8  ;;  %v9675_v45 = vld [vmem:[%s13704_s3] sm:$0xff]  ;;  %vm3885_vm7 = vcmask 89088  }
 0x21b   : > { %1952 = vmatprep.subr.bf16.mxu1 %v13405_v7 }
 0x21c   : > { %v1244_v38 = vpop.permute.xlu0 %1243 }
 0x21d   : > { %v1132_v12 = vpop.permute.xlu1 %1131  ;;  %v1253_v15 = vsel %vm13695_vm6, %v1242_v8, %v1244_v38  ;;  %v9683_v8 = vld [vmem:[%s13704_s3 + $0x8] sm:$0xff] }
 0x21e   : > { %v1140_v60 = vsel %vm1133_vm9, %v1130_v0, %v1132_v12  ;;  %1856 = vmatprep.subr.bf16.mxu0 %v1253_v15  ;;  %vm13699_vm9 = vmmov %vm13695_vm6  ;;  %v9699_v12 = vld [vmem:[%s13704_s3 + $0x18] sm:$0xff]  ;;  %vm13622_vm6 = vcmask 728064  }
 0x21f   : > { %1953 = vmatpush1.bf16.msra.mxu1 %v1140_v60  ;;  %1857 = vmatpush1.bf16.msra.mxu0 %v1252_v25 }
 0x220   : > { %v1280_v58 = vpop.permute.xlu0 %1279  ;;  %1954 = vmatprep.subr.bf16.mxu1 %v13405_v7 }
 0x221   : > { %v1282_v3 = vpop.permute.xlu1 %1281  ;;  %v1290_v1 = vsel %vm13697_vm8, %v9447_v51, %v1280_v58  ;;  %v1990_v51 = vlaneseq }
 0x222   : > { %v1291_v19 = vsel %vm13698_vm13, %v1280_v58, %v1282_v3  ;;  %vm13603_vm13 = vcmask 72704  }
 0x223   : > { %1858 = vmatprep.subr.bf16.mxu0 %v1291_v19  ;;  %v9602_v57 = vshrl.u32 %v1990_v51, 7 }
 0x224   : > { %1859 = vmatpush1.bf16.msra.mxu0 %v1290_v1  ;;  %v1170_v54 = vpop.permute.xlu0 %1169 }
 0x225   : > { %v1178_v29 = vsel %vm1171_vm10, %v1168_v24, %v1170_v54  ;;  %v1208_v10 = vpop.permute.xlu1 %1207  ;;  %vm13700_vm10 = vmmov %vm13697_vm8  ;;  %v1992_v20 = vsub.s32 0, %v9602_v57  ;;  %v1996_v13 = vsub.s32 1, %v9602_v57  ;;  %v2000_v15 = vsub.s32 2, %v9602_v57 }
 0x226   : > { %1955 = vmatpush1.bf16.msra.mxu1 %v1178_v29  ;;  %v1216_v2 = vsel %vm1209_vm11, %v1206_v59, %v1208_v10  ;;  %v2004_v60 = vsub.s32 3, %v9602_v57  ;;  %vm3210_vm11 = vcmask 908288   ;;  %vm13624_vm8 = vcmask 80896  }
 0x227   : > { %1871 = vmatmul.mubr.bf16.vlgmr.msra.gmra.mrb[8].mxu0 %v9225_v36  ;;  %1956 = vmatprep.subr.bf16.mxu1 %v13405_v7  ;;  %v9617_v31 = vrot.slane %v9611_v50, %v1992_v20  ;;  %v9622_v44 = vrot.slane %v9611_v50, %v1996_v13  ;;  %v9707_v25 = vrot.slane %v9611_v50, %v2000_v15 }
 0x228   : > { %7636 = vmatprep.mubr.msk.bf16.mxu0 %vm1566_vm4, %v9238_v16  ;;  %v1246_v11 = vpop.permute.xlu0 %1245 }
 0x229   : > { %v1254_v33 = vsel %vm13699_vm9, %v1244_v38, %v1246_v11  ;;  %v1284_v34 = vpop.permute.xlu1 %1283  ;;  %13702 = vst [vmem:[#allocation6_spill] sm:$0xff] %v9617_v31  ;;  %13703 = vst [vmem:[#allocation7_spill] sm:$0xff] %v9622_v44  ;;  %v9691_v38 = vld [vmem:[%s13704_s3 + $0x10] sm:$0xff]  ;;  %vm13602_vm9 = vcmask 7168   ;;  %s13942_s3 = smov 91  }
 0x22a   : > { %1957 = vmatpush1.bf16.msra.mxu1 %v1216_v2  ;;  %v1292_v47 = vsel %vm13700_vm10, %v1282_v3, %v1284_v34  ;;  %13705 = vst [vmem:[#allocation8_spill] sm:$0xff] %v9707_v25  ;;  %v9710_v3 = vrot.slane %v9611_v50, %v2004_v60  ;;  %vm13908_vm10 = vcmask 1039360  }
 0x22b   : > { %1958 = vmatprep.subr.bf16.mxu1 %v13405_v7 }
 0x22c   : > { %13706 = vst [vmem:[#allocation9_spill] sm:$0xff] %v9710_v3 }
 0x22e   : > { %1959 = vmatpush1.bf16.msra.mxu1 %v1254_v33 }
 0x22f   : > { %1881 = vmatmul.mubr.bf16.gmra.mrb[12].mxu0 %v9264_v4  ;;  %1960 = vmatprep.subr.bf16.mxu1 %v13405_v7 }
 0x230   : > { %2308 = vmatprep.mubr.f32.mxu0 %v13403_v17 }
 0x232   : > { %1961 = vmatpush1.bf16.msra.mxu1 %v1292_v47 }
 0x235   : > { %1973 = vmatmul.mubr.bf16.vlgmr.msra.gmra.mrb[16].mxu1 %v9225_v36 }
 0x236   : > { %7638 = vmatprep.mubr.msk.bf16.mxu1 %vm1566_vm4, %v9238_v16  ;;  %vm13600_vm4 = vcmask 261120  }
 0x239   : > { %v1660_v21 = vpop.f32.mrb[0].mxu0  ;;  %v9619_v26 = vpop.permute.xlu0 %1510 }
 0x23a   : > { %v1662_v36 = vpop.f32.mrb[1].mxu0  ;;  %v9624_v30 = vpop.permute.xlu1 %1515  ;;  %v9627_v52 = vadd.f32 %v1660_v21, %v9619_v26 }
 0x23b   : > { %v1664_v42 = vpop.f32.mrb[2].mxu0  ;;  %v9630_v48 = vadd.f32 %v1662_v36, %v9619_v26 }
 0x23c   : > { %v1666_v16 = vpop.f32.mrb[3].mxu0  ;;  %v9633_v35 = vadd.f32 %v1664_v42, %v9624_v30  ;;  %v2025_v6 = vmul.f32 %v9627_v52, %v9617_v31 }
 0x23d   : > { %1981 = vmatmul.mubr.bf16.gmra.mrb[20].mxu1 %v9264_v4  ;;  %v9639_v37 = vadd.f32 %v1666_v16, %v9624_v30  ;;  %v2026_v61 = vmul.f32 %v9630_v48, %v9622_v44  ;;  %v9650_v4 = vpop.permute.xlu0 %1525 }
 0x23e   : > { %v2032_v41 = vmul.f32 %v9633_v35, %v9617_v31  ;;  %2130 = vmatprep.mubr.f32.mxu1 %v13403_v17 }
 0x23f   : > { %v2033_v40 = vmul.f32 %v9639_v37, %v9622_v44  ;;  %v9648_v56 = vpop.permute.xlu1 %1520 }
 0x240   : > { %v7953_v0 = vpack.c.bf16 %v2032_v41, %v2025_v6 }
 0x241   : > { %v7951_v5 = vpack.c.bf16 %v2033_v40, %v2026_v61  ;;  %v1670_v46 = vpop.f32.mrb[4].mxu0 }
 0x242   : > { %v1672_v63 = vpop.f32.mrb[5].mxu0  ;;  %v9653_v28 = vadd.f32 %v1670_v46, %v9648_v56 }
 0x243   : > { %7952 = vmatprep.subr.bf16.mxu1 %v7951_v5  ;;  %v1674_v49 = vpop.f32.mrb[6].mxu0  ;;  %v9656_v24 = vadd.f32 %v1672_v63, %v9648_v56 }
 0x244   : > { %7954 = vmatpush1.bf16.msra.mxu1 %v7953_v0  ;;  %v1676_v9 = vpop.f32.mrb[7].mxu0  ;;  %v9659_v27 = vadd.f32 %v1674_v49, %v9650_v4  ;;  %v2039_v53 = vmul.f32 %v9653_v28, %v9617_v31 }
 0x245   : > { %v9664_v18 = vadd.f32 %v1676_v9, %v9650_v4  ;;  %v2040_v39 = vmul.f32 %v9656_v24, %v9622_v44 }
 0x246   : > { %v2046_v59 = vmul.f32 %v9659_v27, %v9617_v31 }
 0x247   : > { %v2047_v23 = vmul.f32 %v9664_v18, %v9622_v44 }
 0x248   : > { %v7957_v55 = vpack.c.bf16 %v2046_v59, %v2039_v53  ;;  %v8537_v53 = vmov 1  }
 0x249   : > { %v7955_v43 = vpack.c.bf16 %v2047_v23, %v2040_v39  ;;  %8288 = vset.pattern.permute.xlu1 %v8537_v53  ;;  %8287 = vset.pattern.permute.xlu0 %v8537_v53  ;;  %v8538_v39 = vmov 2  }
 0x24a   : > { %2959 = vperm.xlu1 %8288, %v9465_v32   ;;  %2955 = vperm.xlu0 %8287, %v9460_v22  }
 0x24b   : > { %7956 = vmatprep.subr.bf16.mxu1 %v7955_v43 }
 0x24c   : > { %7958 = vmatpush1.bf16.msra.mxu1 %v7957_v55 }
 0x24e   : > { %8289 = vset.pattern.permute.xlu1 %v8538_v39  ;;  %8298 = vrot.lane.b32.xlu0 %v13405_v7, %s13463_s19 }
 0x24f   : > { %7639 = vmatmul.mubr.msk.f32.vlgmr.msra.gmra.mrb[24].mxu1 %vm13600_vm4, %v9675_v45  ;;  %2999 = vperm.xlu1 %8289, %v9460_v22  }
 0x250   : > { %2136 = vmatprep.mubr.f32.mxu1 %v13403_v17 }
 0x253   : > { %7640 = vmatmul.mubr.msk.f32.gmra.mrb[26].mxu1 %vm13600_vm4, %v9683_v8  ;;  %3003 = vperm.xlu1 %8289, %v9465_v32  }
 0x254   : > { %2142 = vmatprep.mubr.f32.mxu1 %v13403_v17 }
 0x257   : > { %7641 = vmatmul.mubr.msk.f32.gmra.mrb[28].mxu1 %vm13600_vm4, %v9691_v38  ;;  %8290 = vset.pattern.permute.xlu1 %v8537_v53 }
 0x258   : > { %2148 = vmatprep.mubr.f32.mxu1 %v13403_v17  ;;  %2963 = vperm.xlu1 %8290, %v9483_v14  }
 0x25b   : > { %7642 = vmatmul.mubr.msk.f32.gmra.mrb[30].mxu1 %vm13600_vm4, %v9699_v12 }
 0x25c   : > { %2219 = vmatprep.mubr.f32.mxu1 %v13403_v17  ;;  %2967 = vperm.xlu1 %8290, %v9474_v62  }
 0x260   : > { %8291 = vset.pattern.permute.xlu1 %v8538_v39 }
 0x261   : > { %3007 = vperm.xlu1 %8291, %v9483_v14  }
 0x265   : > { %3011 = vperm.xlu1 %8291, %v9474_v62  }
 0x269   : > { %8293 = vrot.lane.b32.xlu1 %v13405_v7, %s13524_s18 }
 0x26d   : > { %8303 = vrot.lane.b32.xlu1 %v13405_v7, %s13472_s15 }
 0x28e   : > { %v1766_v58 = vpop.f32.mrb[0].mxu1 }
 0x28f   : > { %v9713_v1 = vadd.f32 %v1766_v58, %v9619_v26  ;;  %v1768_v19 = vpop.f32.mrb[1].mxu1 }
 0x290   : > { %v9716_v54 = vadd.f32 %v1768_v19, %v9619_v26  ;;  %v1770_v29 = vpop.f32.mrb[2].mxu1 }
 0x291   : > { %v2027_v10 = vmul.f32 %v9713_v1, %v9707_v25  ;;  %v9721_v2 = vadd.f32 %v1770_v29, %v9624_v30  ;;  %v1772_v11 = vpop.f32.mrb[3].mxu1  ;;  %v2012_v29 = vsub.s32 5, %v9602_v57 }
 0x292   : > { %v2028_v51 = vmul.f32 %v9716_v54, %v9710_v3  ;;  %v9726_v33 = vadd.f32 %v1772_v11, %v9624_v30 }
 0x293   : > { %v2034_v34 = vmul.f32 %v9721_v2, %v9707_v25 }
 0x294   : > { %v2035_v47 = vmul.f32 %v9726_v33, %v9710_v3 }
 0x295   : > { %v7961_v20 = vpack.c.bf16 %v2034_v34, %v2027_v10  ;;  %v2008_v10 = vsub.s32 4, %v9602_v57 }
 0x296   : > { %v7959_v13 = vpack.c.bf16 %v2035_v47, %v2028_v51  ;;  %v1776_v21 = vpop.f32.mrb[4].mxu1  ;;  %v9785_v47 = vrot.slane %v9611_v50, %v2012_v29 }
 0x297   : > { %v9733_v36 = vadd.f32 %v1776_v21, %v9648_v56  ;;  %v1778_v42 = vpop.f32.mrb[5].mxu1  ;;  %v9791_v21 = vrot.slane %v9611_v50, %v2008_v10 }
 0x298   : > { %7960 = vmatprep.subr.bf16.mxu1 %v7959_v13  ;;  %v9736_v16 = vadd.f32 %v1778_v42, %v9648_v56  ;;  %v1780_v6 = vpop.f32.mrb[6].mxu1  ;;  %13707 = vst [vmem:[#allocation10_spill] sm:$0xff] %v9785_v47 }
 0x299   : > { %7962 = vmatpush1.bf16.msra.mxu1 %v7961_v20  ;;  %v2041_v61 = vmul.f32 %v9733_v36, %v9707_v25  ;;  %v9741_v41 = vadd.f32 %v1780_v6, %v9650_v4  ;;  %v1782_v40 = vpop.f32.mrb[7].mxu1  ;;  %13708 = vst [vmem:[#allocation11_spill] sm:$0xff] %v9791_v21 }
 0x29a   : > { %v2042_v0 = vmul.f32 %v9736_v16, %v9710_v3  ;;  %v9746_v5 = vadd.f32 %v1782_v40, %v9650_v4 }
 0x29b   : > { %v2048_v46 = vmul.f32 %v9741_v41, %v9707_v25 }
 0x29c   : > { %v2049_v63 = vmul.f32 %v9746_v5, %v9710_v3 }
 0x29d   : > { %v7965_v49 = vpack.c.bf16 %v2048_v46, %v2041_v61 }
 0x29e   : > { %v7963_v9 = vpack.c.bf16 %v2049_v63, %v2042_v0 }
 0x2a0   : > { %7964 = vmatprep.subr.bf16.mxu1 %v7963_v9 }
 0x2a1   : > { %7966 = vmatpush1.bf16.msra.mxu1 %v7965_v49 }
 0x2a4   : > { %7643 = vmatmul.mubr.msk.f32.vlgmr.msra.gmra.mrb[32].mxu1 %vm13600_vm4, %v9675_v45 }
 0x2a5   : > { %2225 = vmatprep.mubr.f32.mxu1 %v13403_v17 }
 0x2a8   : > { %7644 = vmatmul.mubr.msk.f32.gmra.mrb[34].mxu1 %vm13600_vm4, %v9683_v8 }
 0x2a9   : > { %2231 = vmatprep.mubr.f32.mxu1 %v13403_v17 }
 0x2ac   : > { %7645 = vmatmul.mubr.msk.f32.gmra.mrb[36].mxu1 %vm13600_vm4, %v9691_v38 }
 0x2ad   : > { %2237 = vmatprep.mubr.f32.mxu1 %v13403_v17 }
 0x2b0   : > { %7646 = vmatmul.mubr.msk.f32.gmra.mrb[38].mxu1 %vm13600_vm4, %v9699_v12 }
 0x2b1   : > { %7887 = vmatprep.mubr.msk.f32.mxu1 %vm13600_vm4, %v9675_v45 }
 0x2cc   : > { %v7743_v22 = vpop.f32.mrb[8].mxu1 }
 0x2cd   : > { %v7744_v32 = vpop.f32.mrb[9].mxu1 }
 0x2ce   : > { %v7745_v59 = vadd.f32 %v7744_v32, %v7743_v22  ;;  %v7746_v23 = vpop.f32.mrb[10].mxu1 }
 0x2cf   : > { %v7747_v55 = vpop.f32.mrb[11].mxu1 }
 0x2d0   : > { %v7748_v43 = vadd.f32 %v7747_v55, %v7746_v23  ;;  %v1926_v29 = vadd.f32 %v7745_v59, %v9619_v26 }
 0x2d4   : > { %v7749_v15 = vpop.f32.mrb[12].mxu1 }
 0x2d5   : > { %v7750_v60 = vpop.f32.mrb[13].mxu1 }
 0x2d6   : > { %v7751_v58 = vadd.f32 %v7750_v60, %v7749_v15  ;;  %v7752_v14 = vpop.f32.mrb[14].mxu1  ;;  %v2016_v60 = vsub.s32 6, %v9602_v57 }
 0x2d7   : > { %v7753_v19 = vpop.f32.mrb[15].mxu1 }
 0x2d8   : > { %v7754_v62 = vadd.f32 %v7753_v19, %v7752_v14  ;;  %v9832_v57 = vrot.slane %v9611_v50, %v2016_v60  ;;  %v1934_v50 = vadd.f32 %v7751_v58, %v9648_v56 }
 0x2da   : > { %13709 = vst [vmem:[#allocation12_spill] sm:$0xff] %v9832_v57 }
 0x2fa   : > { %v1872_v11 = vpop.f32.mrb[8].mxu0 }
 0x2fb   : > { %v1874_v51 = vpop.f32.mrb[9].mxu0  ;;  %v9788_v13 = vadd.f32 %v1872_v11, %v9619_v26 }
 0x2fc   : > { %v9782_v34 = vadd.f32 %v1874_v51, %v9619_v26  ;;  %v1876_v20 = vpop.f32.mrb[10].mxu0 }
 0x2fd   : > { %v9794_v42 = vadd.f32 %v1876_v20, %v9624_v30  ;;  %v1878_v6 = vpop.f32.mrb[11].mxu0  ;;  %v2029_v63 = vmul.f32 %v9788_v13, %v9791_v21 }
 0x2fe   : > { %v9797_v61 = vadd.f32 %v1878_v6, %v9624_v30  ;;  %v2030_v0 = vmul.f32 %v9782_v34, %v9785_v47 }
 0x2ff   : > { %v2036_v40 = vmul.f32 %v9794_v42, %v9791_v21 }
 0x300   : > { %v2037_v46 = vmul.f32 %v9797_v61, %v9785_v47 }
 0x301   : > { %v7969_v53 = vpack.c.bf16 %v2036_v40, %v2029_v63 }
 0x302   : > { %v1882_v49 = vpop.f32.mrb[12].mxu0  ;;  %v7967_v9 = vpack.c.bf16 %v2037_v46, %v2030_v0  ;;  %v1929_v0 = vadd.f32 %v7748_v43, %v9624_v30 }
 0x303   : > { %v1884_v39 = vpop.f32.mrb[13].mxu0  ;;  %v9811_v23 = vadd.f32 %v1882_v49, %v9648_v56 }
 0x304   : > { %v9808_v22 = vadd.f32 %v1884_v39, %v9648_v56  ;;  %v1886_v32 = vpop.f32.mrb[14].mxu0  ;;  %7968 = vmatprep.subr.bf16.mxu0 %v7967_v9 }
 0x305   : > { %v9814_v55 = vadd.f32 %v1886_v32, %v9650_v4  ;;  %v1888_v15 = vpop.f32.mrb[15].mxu0  ;;  %7970 = vmatpush1.bf16.msra.mxu0 %v7969_v53  ;;  %v2043_v20 = vmul.f32 %v9811_v23, %v9791_v21 }
 0x306   : > { %v9818_v14 = vadd.f32 %v1888_v15, %v9650_v4  ;;  %v2044_v10 = vmul.f32 %v9808_v22, %v9785_v47  ;;  %v1937_v15 = vadd.f32 %v7754_v62, %v9650_v4 }
 0x307   : > { %v2050_v19 = vmul.f32 %v9814_v55, %v9791_v21 }
 0x308   : > { %v2051_v11 = vmul.f32 %v9818_v14, %v9785_v47  ;;  %v1974_v51 = vpop.f32.mrb[16].mxu1 }
 0x309   : > { %v9829_v6 = vadd.f32 %v1974_v51, %v1926_v29  ;;  %v1976_v40 = vpop.f32.mrb[17].mxu1  ;;  %v7973_v59 = vpack.c.bf16 %v2050_v19, %v2043_v20 }
 0x30a   : > { %v1977_v46 = vpop.f32.mrb[18].mxu1  ;;  %v7971_v26 = vpack.c.bf16 %v2051_v11, %v2044_v10 }
 0x30b   : > { %v9835_v63 = vadd.f32 %v1977_v46, %v1929_v0  ;;  %v1979_v49 = vpop.f32.mrb[19].mxu1  ;;  %v2031_v9 = vmul.f32 %v9832_v57, %v9829_v6 }
 0x30c   : > { %7972 = vmatprep.subr.bf16.mxu0 %v7971_v26 }
 0x30d   : > { %v2038_v53 = vmul.f32 %v9832_v57, %v9835_v63  ;;  %7974 = vmatpush1.bf16.msra.mxu0 %v7973_v59 }
 0x30f   : > { %v7975_v39 = vpack.c.bf16 %v2038_v53, %v2031_v9 }
 0x310   : > { %7647 = vmatmul.mubr.msk.f32.vlgmr.msra.gmra.mrb[16].mxu0 %vm13600_vm4, %v9675_v45  ;;  %v1982_v30 = vpop.f32.mrb[20].mxu1 }
 0x311   : > { %v9844_v43 = vadd.f32 %v1982_v30, %v1934_v50  ;;  %v1984_v32 = vpop.f32.mrb[21].mxu1  ;;  %7976 = vmatprep.subr.bf16.mxu1 %v7975_v39  ;;  %2314 = vmatprep.mubr.f32.mxu0 %v13403_v17 }
 0x312   : > { %v1985_v60 = vpop.f32.mrb[22].mxu1  ;;  %7978 = vmatpush3.bf16.msra.mxu1 %v7975_v39 }
 0x313   : > { %v9848_v19 = vadd.f32 %v1985_v60, %v1937_v15  ;;  %v1987_v29 = vpop.f32.mrb[23].mxu1  ;;  %v2045_v56 = vmul.f32 %v9832_v57, %v9844_v43 }
 0x314   : > { %7648 = vmatmul.mubr.msk.f32.gmra.mrb[18].mxu0 %vm13600_vm4, %v9683_v8 }
 0x315   : > { %v2052_v58 = vmul.f32 %v9832_v57, %v9848_v19  ;;  %2320 = vmatprep.mubr.f32.mxu0 %v13403_v17 }
 0x317   : > { %v7979_v10 = vpack.c.bf16 %v2052_v58, %v2045_v56 }
 0x318   : > { %7649 = vmatmul.mubr.msk.f32.gmra.mrb[20].mxu0 %vm13600_vm4, %v9691_v38 }
 0x319   : > { %7980 = vmatprep.subr.bf16.mxu1 %v7979_v10  ;;  %2326 = vmatprep.mubr.f32.mxu0 %v13403_v17 }
 0x31a   : > { %7982 = vmatpush3.bf16.msra.mxu1 %v7979_v10 }
 0x31c   : > { %7650 = vmatmul.mubr.msk.f32.gmra.mrb[22].mxu0 %vm13600_vm4, %v9699_v12 }
 0x31d   : > { %7888 = vmatmul.mubr.msk.f32.vlgmr.msra.gmra.mrb[40].mxu1 %vm13600_vm4, %v9683_v8  ;;  %2687 = vmatprep.mubr.f32.mxu0 %v13403_v17 }
 0x31e   : > { %7890 = vmatprep.mubr.msk.f32.mxu1 %vm13600_vm4, %v9691_v38 }
 0x321   : > { %7891 = vmatmul.mubr.msk.f32.gmra.mrb[42].mxu1 %vm13600_vm4, %v9699_v12 }
 0x322   : > { %v2132_v4 = vpop.f32.mrb[24].mxu1  ;;  %2598 = vmatprep.mubr.f32.mxu1 %v13403_v17 }
 0x323   : > { %v2134_v62 = vpop.f32.mrb[25].mxu1 }
 0x324   : > { %v2418_v11 = vadd.f32 %v2134_v62, %v2132_v4 }
 0x326   : > { %v2138_v51 = vpop.f32.mrb[26].mxu1 }
 0x327   : > { %v2140_v20 = vpop.f32.mrb[27].mxu1 }
 0x328   : > { %v2426_v40 = vadd.f32 %v2140_v20, %v2138_v51 }
 0x32a   : > { %v2144_v0 = vpop.f32.mrb[28].mxu1 }
 0x32b   : > { %v2146_v46 = vpop.f32.mrb[29].mxu1 }
 0x32c   : > { %v2434_v26 = vadd.f32 %v2146_v46, %v2144_v0 }
 0x32e   : > { %v2150_v59 = vpop.f32.mrb[30].mxu1 }
 0x32f   : > { %v2152_v49 = vpop.f32.mrb[31].mxu1 }
 0x330   : > { %v2442_v9 = vadd.f32 %v2152_v49, %v2150_v59 }
 0x377   : > { %v2221_v53 = vpop.f32.mrb[32].mxu1 }
 0x378   : > { %v2419_v50 = vadd.f32 %v2418_v11, %v2221_v53  ;;  %v2223_v39 = vpop.f32.mrb[33].mxu1 }
 0x37a   : > { %v2420_v30 = vadd.f32 %v2419_v50, %v2223_v39 }
 0x37b   : > { %v2227_v32 = vpop.f32.mrb[34].mxu1 }
 0x37c   : > { %v2427_v15 = vadd.f32 %v2426_v40, %v2227_v32  ;;  %v2229_v60 = vpop.f32.mrb[35].mxu1 }
 0x37e   : > { %v2428_v29 = vadd.f32 %v2427_v15, %v2229_v60 }
 0x37f   : > { %v2233_v56 = vpop.f32.mrb[36].mxu1 }
 0x380   : > { %v2435_v58 = vadd.f32 %v2434_v26, %v2233_v56  ;;  %v2235_v10 = vpop.f32.mrb[37].mxu1 }
 0x382   : > { %v2436_v4 = vadd.f32 %v2435_v58, %v2235_v10 }
 0x383   : > { %v2239_v62 = vpop.f32.mrb[38].mxu1 }
 0x384   : > { %v2443_v51 = vadd.f32 %v2442_v9, %v2239_v62  ;;  %v2241_v20 = vpop.f32.mrb[39].mxu1 }
 0x386   : > { %v2444_v17 = vadd.f32 %v2443_v51, %v2241_v20 }
 0x3e3   : > { %v2310_v0 = vpop.f32.mrb[16].mxu0 }
 0x3e4   : > { %v2421_v46 = vadd.f32 %v2420_v30, %v2310_v0  ;;  %v2312_v7 = vpop.f32.mrb[17].mxu0 }
 0x3e6   : > { %v2422_v59 = vadd.f32 %v2421_v46, %v2312_v7 }
 0x3e7   : > { %v2316_v49 = vpop.f32.mrb[18].mxu0 }
 0x3e8   : > { %v2429_v11 = vadd.f32 %v2428_v29, %v2316_v49  ;;  %v2318_v53 = vpop.f32.mrb[19].mxu0 }
 0x3ea   : > { %v2430_v50 = vadd.f32 %v2429_v11, %v2318_v53 }
 0x3eb   : > { %v2322_v39 = vpop.f32.mrb[20].mxu0 }
 0x3ec   : > { %v2437_v40 = vadd.f32 %v2436_v4, %v2322_v39  ;;  %v2324_v32 = vpop.f32.mrb[21].mxu0  ;;  %v13710_v4 = vmov 0  }
 0x3ee   : > { %v2438_v15 = vadd.f32 %v2437_v40, %v2324_v32 }
 0x3ef   : > { %v2328_v60 = vpop.f32.mrb[22].mxu0 }
 0x3f0   : > { %v2445_v26 = vadd.f32 %v2444_v17, %v2328_v60  ;;  %v2330_v56 = vpop.f32.mrb[23].mxu0  ;;  %v7889_v58 = vpop.f32.mrb[40].mxu1 }
 0x3f1   : > { %v2431_v10 = vadd.f32 %v7889_v58, %v2430_v50  ;;  %v2399_v9 = vpop.f32.mrb[41].mxu1  ;;  %v9890_v17 = vpop.permute.xlu1 %2959 }
 0x3f2   : > { %v2446_v62 = vadd.f32 %v2445_v26, %v2330_v56  ;;  %v2423_v51 = vadd.f32 %v2422_v59, %v2399_v9  ;;  %v9904_v50 = vpop.permute.xlu0 %2955 }
 0x3f3   : > { %2432 = vadd.xlane.f32.xlu0 %v2431_v10 }
 0x3f4   : > { %2424 = vadd.xlane.f32.xlu1 %v2423_v51  ;;  %v7892_v30 = vpop.f32.mrb[42].mxu1 }
 0x3f5   : > { %v2447_v7 = vadd.f32 %v7892_v30, %v2446_v62  ;;  %v2409_v20 = vpop.f32.mrb[43].mxu1  ;;  %v9892_v0 = vpop.permute.xlu1 %2999 }
 0x3f6   : > { %v2439_v29 = vadd.f32 %v2438_v15, %v2409_v20  ;;  %v9908_v40 = vpop.permute.xlu0 %8298 }
 0x3f7   : > { %13716 = vst [vmem:[#allocation18_spill] sm:$0xff] %v9908_v40 }
 0x3f8   : > { %2448 = vadd.xlane.f32.xlu1 %v2447_v7  ;;  %2440 = vadd.xlane.f32.xlu0 %v2439_v29 }
 0x3f9   : > { %v9894_v46 = vpop.permute.xlu1 %3003 }
 0x3fd   : > { %v9896_v59 = vpop.permute.xlu1 %2963 }
 0x3fe   : > { %13711 = vst [vmem:[#allocation13_spill] sm:$0xff] %v9896_v59 }
 0x401   : > { %v9898_v49 = vpop.permute.xlu1 %2967 }
 0x402   : > { %13712 = vst [vmem:[#allocation14_spill] sm:$0xff] %v9898_v49 }
 0x405   : > { %v9900_v11 = vpop.permute.xlu1 %3007 }
 0x406   : > { %13713 = vst [vmem:[#allocation15_spill] sm:$0xff] %v9900_v11 }
 0x409   : > { %8313 = vrot.lane.b32.xlu1 %v13710_v4, %s13449_s28  ;;  %v9902_v53 = vpop.permute.xlu1 %3011 }
 0x40a   : > { %13714 = vst [vmem:[#allocation16_spill] sm:$0xff] %v9902_v53 }
 0x40d   : > { %8323 = vrot.lane.b32.xlu1 %v13710_v4, %s13589_s14  ;;  %v9906_v39 = vpop.permute.xlu1 %8293 }
 0x40e   : > { %8308 = vrot.lane.b32.xlu0 %v13710_v4, %s13477_s29  ;;  %13715 = vst [vmem:[#allocation17_spill] sm:$0xff] %v9906_v39 }
 0x411   : > { %8333 = vrot.lane.b32.xlu1 %v13710_v4, %s13540_s26  ;;  %v9910_v32 = vpop.permute.xlu1 %8303 }
 0x412   : > { %8318 = vrot.lane.b32.xlu0 %v13710_v4, %s13454_s20  ;;  %13717 = vst [vmem:[#allocation19_spill] sm:$0xff] %v9910_v32 }
 0x415   : > { %8343 = vrot.lane.b32.xlu1 %v13710_v4, %s13479_s7 }
 0x416   : > { %8328 = vrot.lane.b32.xlu0 %v13710_v4, %s13500_s27 }
 0x419   : > { %8353 = vrot.lane.b32.xlu1 %v13710_v4, %s13528_s9 }
 0x41a   : > { %8338 = vrot.lane.b32.xlu0 %v13710_v4, %s13498_s8 }
 0x41e   : > { %8348 = vrot.lane.b32.xlu0 %v13710_v4, %s13506_s12 }
 0x480   : > { %v9912_v15 = vpop.xlane.xlu0 %2432 }
 0x481   : > { %v9914_v60 = vpop.xlane.xlu1 %2424  ;;  %v9918_v26 = vsub.f32 %v9639_v37, %v9912_v15  ;;  %v9922_v56 = vsub.f32 %v9726_v33, %v9912_v15  ;;  %v9926_v58 = vsub.f32 %v9633_v35, %v9912_v15  ;;  %v9930_v10 = vsub.f32 %v9721_v2, %v9912_v15 }
 0x482   : > { %v9934_v9 = vsub.f32 %v9630_v48, %v9914_v60  ;;  %v9938_v37 = vsub.f32 %v9716_v54, %v9914_v60  ;;  %v9942_v33 = vsub.f32 %v9627_v52, %v9914_v60  ;;  %v9946_v35 = vsub.f32 %v9713_v1, %v9914_v60 }
 0x483   : > { %13718 = vst [vmem:[#allocation20_spill] sm:$0xff] %v9930_v10  ;;  %v2486_v2 = vmul.f32 %v9918_v26, %v9622_v44  ;;  %v2488_v62 = vmul.f32 %v9922_v56, %v9710_v3  ;;  %v2485_v48 = vmul.f32 %v9926_v58, %v9617_v31  ;;  %v2487_v54 = vmul.f32 %v9930_v10, %v9707_v25 }
 0x484   : > { %13719 = vst [vmem:[#allocation21_spill] sm:$0xff] %v9946_v35  ;;  %v2479_v52 = vmul.f32 %v9934_v9, %v9622_v44  ;;  %v2481_v51 = vmul.f32 %v9938_v37, %v9710_v3  ;;  %v2478_v1 = vmul.f32 %v9942_v33, %v9617_v31  ;;  %v2480_v30 = vmul.f32 %v9946_v35, %v9707_v25 }
 0x485   : > { %v9964_v7 = vpop.xlane.xlu1 %2448  ;;  %v9966_v20 = vpop.xlane.xlu0 %2440  ;;  %v2514_v29 = vmul.f32 %v2486_v2, %v2486_v2  ;;  %v2516_v32 = vmul.f32 %v2488_v62, %v2488_v62  ;;  %v2513_v40 = vmul.f32 %v2485_v48, %v2485_v48  ;;  %v2515_v4 = vmul.f32 %v2487_v54, %v2487_v54 }
 0x486   : > { %v2507_v39 = vmul.f32 %v2479_v52, %v2479_v52  ;;  %v2509_v10 = vmul.f32 %v2481_v51, %v2481_v51  ;;  %v2506_v53 = vmul.f32 %v2478_v1, %v2478_v1  ;;  %v2508_v49 = vmul.f32 %v2480_v30, %v2480_v30 }
 0x487   : > { %v9970_v11 = vsub.f32 %v9656_v24, %v9966_v20  ;;  %v9974_v59 = vsub.f32 %v9664_v18, %v9964_v7  ;;  %v9978_v35 = vsub.f32 %v9736_v16, %v9966_v20  ;;  %v9982_v2 = vsub.f32 %v9746_v5, %v9964_v7 }
 0x488   : > { %v7983_v62 = vpack.c.bf16 %v2514_v29, %v2507_v39  ;;  %v7991_v48 = vpack.c.bf16 %v2516_v32, %v2509_v10  ;;  %v7985_v54 = vpack.c.bf16 %v2513_v40, %v2506_v53  ;;  %v7993_v52 = vpack.c.bf16 %v2515_v4, %v2508_v49 }
 0x489   : > { %v2493_v24 = vmul.f32 %v9970_v11, %v9622_v44  ;;  %v2500_v51 = vmul.f32 %v9974_v59, %v9622_v44  ;;  %v2495_v18 = vmul.f32 %v9978_v35, %v9710_v3  ;;  %v2502_v16 = vmul.f32 %v9982_v2, %v9710_v3 }
 0x48a   : > { %7984 = vmatprep.subr.bf16.mxu1 %v7983_v62  ;;  %7992 = vmatprep.subr.bf16.mxu0 %v7991_v48  ;;  %v9994_v5 = vsub.f32 %v9653_v28, %v9966_v20  ;;  %v9998_v4 = vsub.f32 %v9659_v27, %v9964_v7  ;;  %v10002_v49 = vsub.f32 %v9733_v36, %v9966_v20 }
 0x48b   : > { %7986 = vmatpush1.bf16.msra.mxu1 %v7985_v54  ;;  %7994 = vmatpush1.bf16.msra.mxu0 %v7993_v52  ;;  %v2521_v53 = vmul.f32 %v2493_v24, %v2493_v24  ;;  %v2528_v39 = vmul.f32 %v2500_v51, %v2500_v51  ;;  %v2523_v40 = vmul.f32 %v2495_v18, %v2495_v18 }
 0x48c   : > { %v2530_v32 = vmul.f32 %v2502_v16, %v2502_v16  ;;  %v2492_v10 = vmul.f32 %v9994_v5, %v9617_v31  ;;  %v2499_v28 = vmul.f32 %v9998_v4, %v9617_v31  ;;  %v10010_v27 = vsub.f32 %v9741_v41, %v9964_v7 }
 0x48d   : > { %v7987_v1 = vpack.c.bf16 %v2528_v39, %v2521_v53  ;;  %v2494_v36 = vmul.f32 %v10002_v49, %v9707_v25  ;;  %v10016_v30 = vsub.f32 %v9782_v34, %v9914_v60  ;;  %v10020_v29 = vsub.f32 %v9797_v61, %v9912_v15 }
 0x48e   : > { %v7995_v62 = vpack.c.bf16 %v2530_v32, %v2523_v40  ;;  %v2520_v48 = vmul.f32 %v2492_v10, %v2492_v10  ;;  %v2527_v54 = vmul.f32 %v2499_v28, %v2499_v28  ;;  %v2501_v52 = vmul.f32 %v10010_v27, %v9707_v25 }
 0x48f   : > { %7988 = vmatprep.subr.bf16.mxu1 %v7987_v1  ;;  %v2522_v41 = vmul.f32 %v2494_v36, %v2494_v36  ;;  %v2483_v24 = vmul.f32 %v10016_v30, %v9785_v47  ;;  %v2490_v51 = vmul.f32 %v10020_v29, %v9785_v47  ;;  %v10030_v34 = vsub.f32 %v9829_v6, %v9914_v60 }
 0x490   : > { %7996 = vmatprep.subr.bf16.mxu0 %v7995_v62  ;;  %v7989_v61 = vpack.c.bf16 %v2527_v54, %v2520_v48  ;;  %v2529_v18 = vmul.f32 %v2501_v52, %v2501_v52  ;;  %v10034_v16 = vsub.f32 %v9835_v63, %v9912_v15  ;;  %v10038_v53 = vsub.f32 %v9788_v13, %v9914_v60 }
 0x491   : > { %v2511_v39 = vmul.f32 %v2483_v24, %v2483_v24  ;;  %v2518_v40 = vmul.f32 %v2490_v51, %v2490_v51  ;;  %v2484_v32 = vmul.f32 %v10030_v34, %v9832_v57  ;;  %v10044_v6 = vsub.f32 %v9794_v42, %v9912_v15 }
 0x492   : > { %7990 = vmatpush1.bf16.msra.mxu1 %v7989_v61  ;;  %v7997_v10 = vpack.c.bf16 %v2529_v18, %v2522_v41  ;;  %v2491_v28 = vmul.f32 %v10034_v16, %v9832_v57  ;;  %v2482_v63 = vmul.f32 %v10038_v53, %v9791_v21  ;;  %v10052_v13 = vsub.f32 %v9808_v22, %v9966_v20 }
 0x493   : > { %v7999_v60 = vpack.c.bf16 %v2518_v40, %v2511_v39  ;;  %v2512_v1 = vmul.f32 %v2484_v32, %v2484_v32  ;;  %v2489_v36 = vmul.f32 %v10044_v6, %v9791_v21  ;;  %v10058_v42 = vsub.f32 %v9818_v14, %v9964_v7 }
 0x494   : > { %7998 = vmatpush1.bf16.msra.mxu0 %v7997_v10  ;;  %v2519_v15 = vmul.f32 %v2491_v28, %v2491_v28  ;;  %v2510_v62 = vmul.f32 %v2482_v63, %v2482_v63  ;;  %v2497_v48 = vmul.f32 %v10052_v13, %v9785_v47  ;;  %v10064_v54 = vsub.f32 %v9844_v43, %v9966_v20 }
 0x495   : > { %8000 = vmatprep.subr.bf16.mxu1 %v7999_v60  ;;  %7655 = vmatmul.mubr.msk.f32.vlgmr.msra.gmra.mrb[44].mxu1 %vm13600_vm4, %v9675_v45  ;;  %v2517_v22 = vmul.f32 %v2489_v36, %v2489_v36  ;;  %v2504_v52 = vmul.f32 %v10058_v42, %v9785_v47  ;;  %v10072_v14 = vsub.f32 %v9848_v19, %v9964_v7  ;;  %v13720_v61 = vmov 0.0  }
 0x496   : > { %v8007_v41 = vpack.c.bf16 %v2519_v15, %v2512_v1  ;;  %v2525_v24 = vmul.f32 %v2497_v48, %v2497_v48  ;;  %v2498_v51 = vmul.f32 %v10064_v54, %v9832_v57  ;;  %2604 = vmatprep.mubr.f32.mxu1 %v13720_v61  ;;  %v10079_v43 = vsub.f32 %v9811_v23, %v9966_v20 }
 0x497   : > { %7659 = vmatmul.mubr.msk.f32.vlgmr.msra.gmra.mrb[24].mxu0 %vm13600_vm4, %v9675_v45  ;;  %v8001_v18 = vpack.c.bf16 %v2517_v22, %v2510_v62  ;;  %v2532_v39 = vmul.f32 %v2504_v52, %v2504_v52  ;;  %v2505_v19 = vmul.f32 %v10072_v14, %v9832_v57  ;;  %v10087_v40 = vsub.f32 %v9814_v55, %v9964_v7 }
 0x498   : > { %8008 = vmatprep.subr.bf16.mxu0 %v8007_v41  ;;  %v2526_v32 = vmul.f32 %v2498_v51, %v2498_v51  ;;  %v2496_v10 = vmul.f32 %v10079_v43, %v9791_v21  ;;  %2693 = vmatprep.mubr.f32.mxu0 %v13720_v61 }
 0x499   : > { %8002 = vmatpush1.bf16.msra.mxu1 %v8001_v18  ;;  %8010 = vmatpush3.bf16.msra.mxu0 %v8007_v41  ;;  %v8003_v23 = vpack.c.bf16 %v2532_v39, %v2525_v24  ;;  %v2533_v20 = vmul.f32 %v2505_v19, %v2505_v19  ;;  %v2503_v28 = vmul.f32 %v10087_v40, %v9791_v21 }
 0x49a   : > { %7656 = vmatmul.mubr.msk.f32.gmra.mrb[46].mxu1 %vm13600_vm4, %v9683_v8  ;;  %v2524_v63 = vmul.f32 %v2496_v10, %v2496_v10 }
 0x49b   : > { %8004 = vmatprep.subr.bf16.mxu1 %v8003_v23  ;;  %v8011_v55 = vpack.c.bf16 %v2533_v20, %v2526_v32  ;;  %v2531_v7 = vmul.f32 %v2503_v28, %v2503_v28  ;;  %2610 = vmatprep.mubr.f32.mxu1 %v13720_v61 }
 0x49c   : > { %7660 = vmatmul.mubr.msk.f32.gmra.mrb[26].mxu0 %vm13600_vm4, %v9683_v8 }
 0x49d   : > { %8012 = vmatprep.subr.bf16.mxu0 %v8011_v55  ;;  %v8005_v60 = vpack.c.bf16 %v2531_v7, %v2524_v63  ;;  %2699 = vmatprep.mubr.f32.mxu0 %v13720_v61 }
 0x49e   : > { %8014 = vmatpush3.bf16.msra.mxu0 %v8011_v55  ;;  %7657 = vmatmul.mubr.msk.f32.gmra.mrb[48].mxu1 %vm13600_vm4, %v9691_v38 }
 0x49f   : > { %8006 = vmatpush1.bf16.msra.mxu1 %v8005_v60  ;;  %2616 = vmatprep.mubr.f32.mxu1 %v13720_v61 }
 0x4a0   : > { %7661 = vmatmul.mubr.msk.f32.gmra.mrb[28].mxu0 %vm13600_vm4, %v9691_v38 }
 0x4a1   : > { %2705 = vmatprep.mubr.f32.mxu0 %v13720_v61 }
 0x4a2   : > { %7658 = vmatmul.mubr.msk.f32.gmra.mrb[50].mxu1 %vm13600_vm4, %v9699_v12 }
 0x4a3   : > { %2776 = vmatprep.mubr.f32.mxu1 %v13720_v61 }
 0x4a4   : > { %7662 = vmatmul.mubr.msk.f32.gmra.mrb[30].mxu0 %vm13600_vm4, %v9699_v12 }
 0x4a5   : > { %7901 = vmatprep.mubr.msk.f32.mxu0 %vm13600_vm4, %v9675_v45 }
 0x4a6   : > { %7663 = vmatmul.mubr.msk.f32.vlgmr.msra.gmra.mrb[52].mxu1 %vm13600_vm4, %v9675_v45 }
 0x4a7   : > { %2782 = vmatprep.mubr.f32.mxu1 %v13720_v61 }
 0x4a8   : > { %7902 = vmatmul.mubr.msk.f32.vlgmr.msra.gmra.mrb[32].mxu0 %vm13600_vm4, %v9683_v8 }
 0x4a9   : > { %7904 = vmatprep.mubr.msk.f32.mxu0 %vm13600_vm4, %v9691_v38 }
 0x4aa   : > { %7664 = vmatmul.mubr.msk.f32.gmra.mrb[54].mxu1 %vm13600_vm4, %v9683_v8 }
 0x4ab   : > { %2788 = vmatprep.mubr.f32.mxu1 %v13720_v61 }
 0x4ac   : > { %7905 = vmatmul.mubr.msk.f32.gmra.mrb[34].mxu0 %vm13600_vm4, %v9699_v12 }
 0x4ae   : > { %7665 = vmatmul.mubr.msk.f32.gmra.mrb[56].mxu1 %vm13600_vm4, %v9691_v38 }
 0x4af   : > { %2794 = vmatprep.mubr.f32.mxu1 %v13720_v61 }
 0x4b2   : > { %7666 = vmatmul.mubr.msk.f32.gmra.mrb[58].mxu1 %vm13600_vm4, %v9699_v12  ;;  %vm13911_vm4 = vmmov %vm13908_vm10 }
 0x568   : > { %v2600_v45 = vpop.f32.mrb[44].mxu1 }
 0x569   : > { %v2602_v1 = vpop.f32.mrb[45].mxu1 }
 0x56a   : > { %v2886_v36 = vadd.f32 %v2602_v1, %v2600_v45  ;;  %v2689_v15 = vpop.f32.mrb[24].mxu0 }
 0x56b   : > { %v2691_v62 = vpop.f32.mrb[25].mxu0 }
 0x56c   : > { %v2887_v48 = vadd.f32 %v2886_v36, %v2689_v15 }
 0x56d   : > { %v2606_v8 = vpop.f32.mrb[46].mxu1 }
 0x56e   : > { %v2608_v22 = vpop.f32.mrb[47].mxu1  ;;  %v2888_v52 = vadd.f32 %v2887_v48, %v2691_v62 }
 0x56f   : > { %v2894_v41 = vadd.f32 %v2608_v22, %v2606_v8  ;;  %v2695_v24 = vpop.f32.mrb[26].mxu0 }
 0x570   : > { %v2697_v51 = vpop.f32.mrb[27].mxu0 }
 0x571   : > { %v2895_v18 = vadd.f32 %v2894_v41, %v2695_v24  ;;  %v2612_v39 = vpop.f32.mrb[48].mxu1 }
 0x572   : > { %v2614_v38 = vpop.f32.mrb[49].mxu1 }
 0x573   : > { %v2902_v19 = vadd.f32 %v2614_v38, %v2612_v39  ;;  %v2896_v32 = vadd.f32 %v2895_v18, %v2697_v51  ;;  %v2701_v10 = vpop.f32.mrb[28].mxu0 }
 0x574   : > { %v2703_v23 = vpop.f32.mrb[29].mxu0 }
 0x575   : > { %v2903_v12 = vadd.f32 %v2902_v19, %v2701_v10  ;;  %v2618_v20 = vpop.f32.mrb[50].mxu1 }
 0x576   : > { %v2620_v28 = vpop.f32.mrb[51].mxu1 }
 0x577   : > { %v2910_v63 = vadd.f32 %v2620_v28, %v2618_v20  ;;  %v2904_v55 = vadd.f32 %v2903_v12, %v2703_v23  ;;  %v2707_v7 = vpop.f32.mrb[30].mxu0 }
 0x578   : > { %v2709_v60 = vpop.f32.mrb[31].mxu0 }
 0x579   : > { %v2911_v45 = vadd.f32 %v2910_v63, %v2707_v7  ;;  %v2778_v1 = vpop.f32.mrb[52].mxu1 }
 0x57a   : > { %v2889_v36 = vadd.f32 %v2888_v52, %v2778_v1  ;;  %v2780_v15 = vpop.f32.mrb[53].mxu1 }
 0x57b   : > { %v2912_v62 = vadd.f32 %v2911_v45, %v2709_v60  ;;  %v7903_v48 = vpop.f32.mrb[32].mxu0 }
 0x57c   : > { %v2890_v8 = vadd.f32 %v2889_v36, %v2780_v15  ;;  %v2867_v22 = vpop.f32.mrb[33].mxu0  ;;  %v10132_v36 = vpop.permute.xlu1 %8313 }
 0x57d   : > { %v2784_v41 = vpop.f32.mrb[54].mxu1 }
 0x57e   : > { %v2897_v24 = vadd.f32 %v2896_v32, %v2784_v41  ;;  %v2891_v51 = vadd.f32 %v2890_v8, %v2867_v22  ;;  %v2786_v18 = vpop.f32.mrb[55].mxu1  ;;  %v10130_v32 = vpop.permute.xlu0 %8308 }
 0x57f   : > { %v7906_v39 = vpop.f32.mrb[34].mxu0 }
 0x580   : > { %v2898_v38 = vadd.f32 %v2897_v24, %v2786_v18  ;;  %2892 = vadd.xlane.f32.xlu0 %v2891_v51  ;;  %v2877_v19 = vpop.f32.mrb[35].mxu0  ;;  %v10136_v8 = vpop.permute.xlu1 %8323 }
 0x581   : > { %v2790_v10 = vpop.f32.mrb[56].mxu1 }
 0x582   : > { %v2899_v23 = vadd.f32 %v7903_v48, %v2898_v38  ;;  %v2905_v12 = vadd.f32 %v2904_v55, %v2790_v10  ;;  %v2792_v20 = vpop.f32.mrb[57].mxu1  ;;  %v10134_v15 = vpop.permute.xlu0 %8318 }
 0x584   : > { %v2906_v28 = vadd.f32 %v2905_v12, %v2792_v20  ;;  %2900 = vadd.xlane.f32.xlu1 %v2899_v23  ;;  %v10140_v48 = vpop.permute.xlu1 %8333 }
 0x585   : > { %v2796_v52 = vpop.f32.mrb[58].mxu1 }
 0x586   : > { %v2913_v63 = vadd.f32 %v2912_v62, %v2796_v52  ;;  %v2907_v7 = vadd.f32 %v2906_v28, %v2877_v19  ;;  %v2798_v60 = vpop.f32.mrb[59].mxu1  ;;  %v10138_v55 = vpop.permute.xlu0 %8328 }
 0x588   : > { %v2914_v45 = vadd.f32 %v2913_v63, %v2798_v60  ;;  %2908 = vadd.xlane.f32.xlu0 %v2907_v7  ;;  %v10144_v62 = vpop.permute.xlu1 %8343 }
 0x58a   : > { %v2915_v1 = vadd.f32 %v7906_v39, %v2914_v45  ;;  %v10142_v22 = vpop.permute.xlu0 %8338 }
 0x58c   : > { %2916 = vadd.xlane.f32.xlu1 %v2915_v1  ;;  %v10148_v24 = vpop.permute.xlu1 %8353 }
 0x58e   : > { %v10146_v41 = vpop.permute.xlu0 %8348 }
 0x60d   : > { %v2893_v51 = vpop.xlane.xlu0 %2892 }
 0x60e   : > { %v2918_v18 = vadd.f32 1e-05, %v2893_v51 }
 0x610   : > { %8458 = vrsqrt.f32 %v2918_v18 }
 0x611   : > { %v2901_v39 = vpop.xlane.xlu1 %2900 }
 0x612   : > { %v2919_v38 = vadd.f32 1e-05, %v2901_v39 }
 0x614   : > { %8460 = vrsqrt.f32 %v2919_v38 }
 0x615   : > { %v2909_v19 = vpop.xlane.xlu0 %2908 }
 0x616   : > { %v2920_v28 = vadd.f32 1e-05, %v2909_v19 }
 0x618   : > { %8462 = vrsqrt.f32 %v2920_v28 }
 0x619   : > { %v2917_v60 = vpop.xlane.xlu1 %2916 }
 0x61a   : > { %v10150_v10 = vpop.eup %8458  ;;  %v2921_v18 = vadd.f32 1e-05, %v2917_v60 }
 0x61b   : > { %v2926_v23 = vmul.f32 %v10150_v10, %v9942_v33  ;;  %v2927_v12 = vmul.f32 %v10150_v10, %v9934_v9  ;;  %v2929_v20 = vmul.f32 %v10150_v10, %v9938_v37  ;;  %v2930_v52 = vmul.f32 %v10150_v10, %v10038_v53 }
 0x61c   : > { %v2931_v63 = vmul.f32 %v10150_v10, %v10016_v30  ;;  %v2932_v7 = vmul.f32 %v10150_v10, %v10030_v34  ;;  %8464 = vrsqrt.f32 %v2921_v18 }
 0x61d   : > { %v2970_v45 = vmul.f32 %v9904_v50, %v2926_v23  ;;  %v2971_v33 = vmul.f32 %v9904_v50, %v2927_v12  ;;  %v2973_v9 = vmul.f32 %v9904_v50, %v2929_v20  ;;  %v2974_v1 = vmul.f32 %v9904_v50, %v2930_v52 }
 0x61e   : > { %v2975_v37 = vmul.f32 %v9904_v50, %v2931_v63  ;;  %v2976_v51 = vmul.f32 %v9904_v50, %v2932_v7  ;;  %v10170_v53 = vpop.eup %8460 }
 0x61f   : > { %v3014_v30 = vadd.f32 %v9892_v0, %v2970_v45  ;;  %v3015_v34 = vadd.f32 %v9892_v0, %v2971_v33  ;;  %v3017_v39 = vadd.f32 %v9892_v0, %v2973_v9  ;;  %v3018_v38 = vadd.f32 %v9892_v0, %v2974_v1 }
 0x620   : > { %v3019_v19 = vadd.f32 %v9892_v0, %v2975_v37  ;;  %v3020_v23 = vadd.f32 %v9892_v0, %v2976_v51  ;;  %v2933_v20 = vmul.f32 %v10170_v53, %v9926_v58  ;;  %v2934_v52 = vmul.f32 %v10170_v53, %v9918_v26 }
 0x621   : > { %v3042_v12 = vmax.f32 %v3014_v30, 0.0  ;;  %v3043_v28 = vmax.f32 %v3015_v34, 0.0  ;;  %v3045_v63 = vmax.f32 %v3017_v39, 0.0  ;;  %v3046_v7 = vmax.f32 %v3018_v38, 0.0 }
 0x622   : > { %v3047_v60 = vmax.f32 %v3019_v19, 0.0  ;;  %v2936_v45 = vmul.f32 %v10170_v53, %v9922_v56  ;;  %v2937_v33 = vmul.f32 %v10170_v53, %v10044_v6  ;;  %v2938_v9 = vmul.f32 %v10170_v53, %v10020_v29  ;;  %v10201_v38 = vpop.eup %8462 }
 0x623   : > { %v2939_v58 = vmul.f32 %v10170_v53, %v10034_v16  ;;  %v3048_v1 = vmax.f32 %v3020_v23, 0.0  ;;  %v3070_v26 = vmul.f32 %v3042_v12, %v9617_v31  ;;  %v2977_v37 = vmul.f32 %v9890_v17, %v2933_v20 }
 0x624   : > { %v2978_v51 = vmul.f32 %v9890_v17, %v2934_v52  ;;  %v2980_v30 = vmul.f32 %v9890_v17, %v2936_v45  ;;  %v2981_v56 = vmul.f32 %v9890_v17, %v2937_v33  ;;  %v2982_v18 = vmul.f32 %v9890_v17, %v2938_v9 }
 0x625   : > { %v2983_v6 = vmul.f32 %v9890_v17, %v2939_v58  ;;  %v3071_v29 = vmul.f32 %v3043_v28, %v9622_v44  ;;  %v3073_v34 = vmul.f32 %v3045_v63, %v9710_v3  ;;  %v3021_v16 = vadd.f32 %v9894_v46, %v2977_v37 }
 0x626   : > { %v3022_v39 = vadd.f32 %v9894_v46, %v2978_v51  ;;  %v3024_v19 = vadd.f32 %v9894_v46, %v2980_v30  ;;  %v3025_v23 = vadd.f32 %v9894_v46, %v2981_v56  ;;  %v3026_v12 = vadd.f32 %v9894_v46, %v2982_v18 }
 0x627   : > { %v3027_v20 = vadd.f32 %v9894_v46, %v2983_v6  ;;  %v3074_v52 = vmul.f32 %v3046_v7, %v9791_v21  ;;  %v3075_v28 = vmul.f32 %v3047_v60, %v9785_v47  ;;  %v3049_v45 = vmax.f32 %v3021_v16, 0.0  ;;  %v10214_v6 = vpop.eup %8464 }
 0x628   : > { %v3050_v63 = vmax.f32 %v3022_v39, 0.0  ;;  %v3052_v33 = vmax.f32 %v3024_v19, 0.0  ;;  %v3053_v9 = vmax.f32 %v3025_v23, 0.0  ;;  %v3054_v58 = vmax.f32 %v3026_v12, 0.0 }
 0x629   : > { %v3055_v37 = vmax.f32 %v3027_v20, 0.0  ;;  %v3076_v51 = vmul.f32 %v3048_v1, %v9832_v57  ;;  %v3077_v30 = vmul.f32 %v3049_v45, %v9617_v31  ;;  %v2942_v18 = vmul.f32 %v10201_v38, %v10002_v49 }
 0x62a   : > { %v3078_v56 = vmul.f32 %v3050_v63, %v9622_v44  ;;  %v3080_v7 = vmul.f32 %v3052_v33, %v9710_v3  ;;  %v3081_v60 = vmul.f32 %v3053_v9, %v9791_v21  ;;  %v3082_v16 = vmul.f32 %v3054_v58, %v9785_v47 }
 0x62b   : > { %v3083_v39 = vmul.f32 %v3055_v37, %v9832_v57  ;;  %v10220_v19 = vpack.c.bf16 %v3077_v30, %v3070_v26  ;;  %v2943_v23 = vmul.f32 %v10201_v38, %v9978_v35  ;;  %v2944_v49 = vmul.f32 %v10201_v38, %v10079_v43  ;;  %v13725_v43 = vld [vmem:[#allocation13_spill] sm:$0xff] }
 0x62c   : > { %v10222_v1 = vpack.c.bf16 %v3078_v56, %v3071_v29  ;;  %v10228_v12 = vpack.c.bf16 %v3080_v7, %v3073_v34  ;;  %v10230_v20 = vpack.c.bf16 %v3081_v60, %v3074_v52  ;;  %v10232_v45 = vpack.c.bf16 %v3082_v16, %v3075_v28  ;;  %v13727_v60 = vld [vmem:[#allocation14_spill] sm:$0xff] }
 0x62d   : > { %v10234_v63 = vpack.c.bf16 %v3083_v39, %v3076_v51  ;;  %v2945_v26 = vmul.f32 %v10201_v38, %v10052_v13  ;;  %v2946_v35 = vmul.f32 %v10201_v38, %v10064_v54  ;;  %3180 = vrot.lane.b32.xlu1 %v10220_v19, %s13524_s18  ;;  %v2986_v29 = vmul.f32 %v13725_v43, %v2942_v18  ;;  %v13726_v54 = vld [vmem:[#allocation15_spill] sm:$0xff] }
 0x62e   : > { %13721 = vst [vmem:[#allocation22_spill] sm:$0xff] %v10228_v12  ;;  %13722 = vst [vmem:[#allocation23_spill] sm:$0xff] %v10230_v20  ;;  %3182 = vrot.lane.b32.xlu0 %v10222_v1, %s13524_s18  ;;  %v2987_v34 = vmul.f32 %v13725_v43, %v2943_v23  ;;  %v2988_v52 = vmul.f32 %v13725_v43, %v2944_v49  ;;  %v2949_v33 = vmul.f32 %v10214_v6, %v10010_v27 }
 0x62f   : > { %13723 = vst [vmem:[#allocation24_spill] sm:$0xff] %v10232_v45  ;;  %13724 = vst [vmem:[#allocation25_spill] sm:$0xff] %v10234_v63  ;;  %v2989_v28 = vmul.f32 %v13725_v43, %v2945_v26  ;;  %v2990_v13 = vmul.f32 %v13725_v43, %v2946_v35  ;;  %v3030_v9 = vadd.f32 %v13726_v54, %v2986_v29  ;;  %v13728_v35 = vld [vmem:[#allocation16_spill] sm:$0xff] }
 0x630   : > { %v3031_v58 = vadd.f32 %v13726_v54, %v2987_v34  ;;  %v3032_v37 = vadd.f32 %v13726_v54, %v2988_v52  ;;  %v2950_v51 = vmul.f32 %v10214_v6, %v9982_v2  ;;  %v2951_v56 = vmul.f32 %v10214_v6, %v10087_v40 }
 0x631   : > { %3257 = vrot.lane.b32.xlu1 %v10222_v1, %s13463_s19  ;;  %v3033_v30 = vadd.f32 %v13726_v54, %v2989_v28  ;;  %v2952_v27 = vmul.f32 %v10214_v6, %v10058_v42  ;;  %v3034_v18 = vadd.f32 %v13726_v54, %v2990_v13  ;;  %v2953_v7 = vmul.f32 %v10214_v6, %v10072_v14 }
 0x632   : > { %3255 = vrot.lane.b32.xlu0 %v10220_v19, %s13463_s19  ;;  %v2993_v16 = vmul.f32 %v13727_v60, %v2949_v33  ;;  %v3058_v2 = vmax.f32 %v3030_v9, 0.0  ;;  %v2994_v39 = vmul.f32 %v13727_v60, %v2950_v51  ;;  %v2995_v40 = vmul.f32 %v13727_v60, %v2951_v56 }
 0x633   : > { %v2996_v42 = vmul.f32 %v13727_v60, %v2952_v27  ;;  %v3059_v23 = vmax.f32 %v3031_v58, 0.0  ;;  %v3060_v49 = vmax.f32 %v3032_v37, 0.0  ;;  %v2997_v26 = vmul.f32 %v13727_v60, %v2953_v7 }
 0x634   : > { %v3037_v29 = vadd.f32 %v13728_v35, %v2993_v16  ;;  %v3061_v34 = vmax.f32 %v3033_v30, 0.0  ;;  %v3038_v14 = vadd.f32 %v13728_v35, %v2994_v39  ;;  %v3039_v52 = vadd.f32 %v13728_v35, %v2995_v40 }
 0x635   : > { %3330 = vrot.lane.b32.xlu1 %v10220_v19, %s13472_s15  ;;  %v3040_v28 = vadd.f32 %v13728_v35, %v2996_v42  ;;  %v3062_v13 = vmax.f32 %v3034_v18, 0.0  ;;  %v3041_v33 = vadd.f32 %v13728_v35, %v2997_v26  ;;  %v3086_v58 = vmul.f32 %v3058_v2, %v9707_v25 }
 0x636   : > { %3332 = vrot.lane.b32.xlu0 %v10222_v1, %s13472_s15  ;;  %v3065_v9 = vmax.f32 %v3037_v29, 0.0  ;;  %v3066_v37 = vmax.f32 %v3038_v14, 0.0  ;;  %v3067_v51 = vmax.f32 %v3039_v52, 0.0  ;;  %v3087_v56 = vmul.f32 %v3059_v23, %v9710_v3  ;;  %v13731_v52 = vld [vmem:[#allocation20_spill] sm:$0xff] }
 0x637   : > { %v3068_v30 = vmax.f32 %v3040_v28, 0.0  ;;  %v3088_v27 = vmul.f32 %v3060_v49, %v9791_v21  ;;  %v3069_v7 = vmax.f32 %v3041_v33, 0.0  ;;  %v3089_v18 = vmul.f32 %v3061_v34, %v9785_v47 }
 0x638   : > { %v3093_v16 = vmul.f32 %v3065_v9, %v9707_v25  ;;  %v3094_v39 = vmul.f32 %v3066_v37, %v9710_v3  ;;  %v3095_v40 = vmul.f32 %v3067_v51, %v9791_v21  ;;  %v3090_v2 = vmul.f32 %v3062_v13, %v9832_v57  ;;  %v13732_v13 = vld [vmem:[#allocation21_spill] sm:$0xff] }
 0x639   : > { %3407 = vrot.lane.b32.xlu1 %v10222_v1, %s13477_s29  ;;  %v3096_v42 = vmul.f32 %v3068_v30, %v9785_v47  ;;  %v3097_v23 = vmul.f32 %v3069_v7, %v9832_v57  ;;  %v2935_v28 = vmul.f32 %v10170_v53, %v13731_v52  ;;  %v2928_v33 = vmul.f32 %v10150_v10, %v13732_v13  ;;  %v13736_v51 = vld [vmem:[#allocation17_spill] sm:$0xff] }
 0x63a   : > { %3405 = vrot.lane.b32.xlu0 %v10220_v19, %s13477_s29  ;;  %v10298_v26 = vpack.c.bf16 %v3093_v16, %v3086_v58  ;;  %v10302_v49 = vpack.c.bf16 %v3094_v39, %v3087_v56  ;;  %v10304_v29 = vpack.c.bf16 %v3095_v40, %v3088_v27  ;;  %v8295_v30 = vunpack.i.l.bf16 %v13736_v51 }
 0x63b   : > { %v10306_v34 = vpack.c.bf16 %v3096_v42, %v3089_v18  ;;  %v10308_v14 = vpack.c.bf16 %v3097_v23, %v3090_v2  ;;  %v2979_v9 = vmul.f32 %v9890_v17, %v2935_v28  ;;  %v2972_v58 = vmul.f32 %v9904_v50, %v2928_v33 }
 0x63c   : > { %13729 = vst [vmem:[#allocation13_spill] sm:$0xff] %v10304_v29 }
 0x63d   : > { %3480 = vrot.lane.b32.xlu1 %v10220_v19, %s13449_s28  ;;  %13730 = vst [vmem:[#allocation15_spill] sm:$0xff] %v10308_v14  ;;  %v3023_v53 = vadd.f32 %v9894_v46, %v2979_v9  ;;  %v3016_v10 = vadd.f32 %v9892_v0, %v2972_v58 }
 0x63e   : > { %3482 = vrot.lane.b32.xlu0 %v10222_v1, %s13449_s28 }
 0x63f   : > { %v3051_v37 = vmax.f32 %v3023_v53, 0.0  ;;  %v3044_v17 = vmax.f32 %v3016_v10, 0.0 }
 0x641   : > { %3557 = vrot.lane.b32.xlu1 %v10222_v1, %s13454_s20  ;;  %v3079_v50 = vmul.f32 %v3051_v37, %v9707_v25  ;;  %v3072_v46 = vmul.f32 %v3044_v17, %v9707_v25 }
 0x642   : > { %3555 = vrot.lane.b32.xlu0 %v10220_v19, %s13454_s20 }
 0x643   : > { %v10352_v0 = vpack.c.bf16 %v3079_v50, %v3072_v46 }
 0x645   : > { %3630 = vrot.lane.b32.xlu1 %v10220_v19, %s13589_s14  ;;  %13733 = vst [vmem:[#allocation14_spill] sm:$0xff] %v10352_v0 }
 0x646   : > { %3632 = vrot.lane.b32.xlu0 %v10222_v1, %s13589_s14 }
 0x649   : > { %3707 = vrot.lane.b32.xlu1 %v10222_v1, %s13500_s27 }
 0x64a   : > { %3705 = vrot.lane.b32.xlu0 %v10220_v19, %s13500_s27 }
 0x64d   : > { %3780 = vrot.lane.b32.xlu1 %v10220_v19, %s13540_s26 }
 0x64e   : > { %3782 = vrot.lane.b32.xlu0 %v10222_v1, %s13540_s26 }
 0x651   : > { %3857 = vrot.lane.b32.xlu1 %v10222_v1, %s13498_s8 }
 0x652   : > { %3855 = vrot.lane.b32.xlu0 %v10220_v19, %s13498_s8 }
 0x655   : > { %3930 = vrot.lane.b32.xlu1 %v10220_v19, %s13479_s7 }
 0x656   : > { %3932 = vrot.lane.b32.xlu0 %v10222_v1, %s13479_s7 }
 0x659   : > { %4007 = vrot.lane.b32.xlu1 %v10222_v1, %s13506_s12 }
 0x65a   : > { %4005 = vrot.lane.b32.xlu0 %v10220_v19, %s13506_s12 }
 0x65d   : > { %4080 = vrot.lane.b32.xlu1 %v10220_v19, %s13528_s9 }
 0x65e   : > { %4082 = vrot.lane.b32.xlu0 %v10222_v1, %s13528_s9 }
 0x661   : > { %4173 = vrot.lane.b32.xlu1 %v10352_v0, %s13734_s13 }
 0x662   : > { %4171 = vrot.lane.b32.xlu0 %v10222_v1, %s13734_s13 }
 0x665   : > { %3184 = vrot.lane.b32.xlu1 %v10352_v0, %s13524_s18 }
 0x666   : > { %4169 = vrot.lane.b32.xlu0 %v10220_v19, %s13734_s13 }
 0x669   : > { %4247 = vrot.lane.b32.xlu1 %v10352_v0, %s13417_s23 }
 0x66a   : > { %3186 = vrot.lane.b32.xlu0 %v10228_v12, %s13524_s18 }
 0x66d   : > { %3259 = vrot.lane.b32.xlu1 %v10352_v0, %s13463_s19 }
 0x66e   : > { %4245 = vrot.lane.b32.xlu0 %v10222_v1, %s13417_s23 }
 0x671   : > { %4322 = vrot.lane.b32.xlu1 %v10352_v0, %s13735_s24 }
 0x672   : > { %4243 = vrot.lane.b32.xlu0 %v10220_v19, %s13417_s23  ;;  %s13495_s23 = smov 37  }
 0x675   : > { %3334 = vrot.lane.b32.xlu1 %v10352_v0, %s13472_s15 }
 0x676   : > { %3261 = vrot.lane.b32.xlu0 %v10228_v12, %s13463_s19 }
 0x679   : > { %4396 = vrot.lane.b32.xlu1 %v10352_v0, %s13419_s30 }
 0x67a   : > { %4320 = vrot.lane.b32.xlu0 %v10222_v1, %s13735_s24 }
 0x67d   : > { %3409 = vrot.lane.b32.xlu1 %v10352_v0, %s13477_s29 }
 0x67e   : > { %4318 = vrot.lane.b32.xlu0 %v10220_v19, %s13735_s24 }
 0x681   : > { %4470 = vrot.lane.b32.xlu1 %v10352_v0, %s13421_s25 }
 0x682   : > { %3336 = vrot.lane.b32.xlu0 %v10228_v12, %s13472_s15 }
 0x685   : > { %3484 = vrot.lane.b32.xlu1 %v10352_v0, %s13449_s28 }
 0x686   : > { %4394 = vrot.lane.b32.xlu0 %v10222_v1, %s13419_s30 }
 0x689   : > { %4545 = vrot.lane.b32.xlu1 %v10352_v0, %s13423_s17 }
 0x68a   : > { %4392 = vrot.lane.b32.xlu0 %v10220_v19, %s13419_s30  ;;  %s13436_s30 = smov 29  }
 0x68d   : > { %3559 = vrot.lane.b32.xlu1 %v10352_v0, %s13454_s20 }
 0x68e   : > { %3411 = vrot.lane.b32.xlu0 %v10228_v12, %s13477_s29 }
 0x691   : > { %4620 = vrot.lane.b32.xlu1 %v10352_v0, %s13495_s23 }
 0x692   : > { %4468 = vrot.lane.b32.xlu0 %v10222_v1, %s13421_s25 }
 0x695   : > { %3634 = vrot.lane.b32.xlu1 %v10352_v0, %s13589_s14 }
 0x696   : > { %4466 = vrot.lane.b32.xlu0 %v10220_v19, %s13421_s25  ;;  %s13737_s25 = smov 28  }
 0x699   : > { %4695 = vrot.lane.b32.xlu1 %v10352_v0, %s13436_s30 }
 0x69a   : > { %3486 = vrot.lane.b32.xlu0 %v10228_v12, %s13449_s28 }
 0x69d   : > { %3709 = vrot.lane.b32.xlu1 %v10352_v0, %s13500_s27 }
 0x69e   : > { %4543 = vrot.lane.b32.xlu0 %v10222_v1, %s13423_s17 }
 0x69f   : > { %v3181_v27 = vpop.permute.xlu1 %3180 }
 0x6a0   : > { %v10419_v56 = vpop.permute.xlu0 %3182  ;;  %v3211_v16 = vsel %vm3210_vm11, %v8295_v30, %v3181_v27 }
 0x6a1   : > { %v3212_v7 = vsel %vm3210_vm11, %v3181_v27, %v10419_v56  ;;  %4770 = vrot.lane.b32.xlu1 %v10352_v0, %s13737_s25 }
 0x6a2   : > { %4541 = vrot.lane.b32.xlu0 %v10220_v19, %s13423_s17  ;;  %5632 = vmatprep.subr.bf16.mxu1 %v3212_v7  ;;  %s13444_s17 = smov 19  }
 0x6a3   : > { %5633 = vmatpush1.bf16.msra.mxu1 %v3211_v16  ;;  %v10430_v39 = vpop.permute.xlu1 %3257 }
 0x6a4   : > { %v10428_v18 = vpop.permute.xlu0 %3255 }
 0x6a5   : > { %3784 = vrot.lane.b32.xlu1 %v10352_v0, %s13540_s26 }
 0x6a6   : > { %3561 = vrot.lane.b32.xlu0 %v10228_v12, %s13454_s20 }
 0x6a7   : > { %v10438_v42 = vpop.permute.xlu1 %3330 }
 0x6a8   : > { %v10436_v40 = vpop.permute.xlu0 %3332 }
 0x6a9   : > { %4844 = vrot.lane.b32.xlu1 %v10352_v0, %s13647_s16 }
 0x6aa   : > { %4618 = vrot.lane.b32.xlu0 %v10222_v1, %s13495_s23 }
 0x6ab   : > { %v10446_v23 = vpop.permute.xlu1 %3407 }
 0x6ac   : > { %v10444_v2 = vpop.permute.xlu0 %3405 }
 0x6ad   : > { %3859 = vrot.lane.b32.xlu1 %v10352_v0, %s13498_s8 }
 0x6ae   : > { %4616 = vrot.lane.b32.xlu0 %v10220_v19, %s13495_s23 }
 0x6af   : > { %v10454_v28 = vpop.permute.xlu1 %3480 }
 0x6b0   : > { %v10452_v52 = vpop.permute.xlu0 %3482 }
 0x6b1   : > { %4918 = vrot.lane.b32.xlu1 %v10352_v0, %s13444_s17 }
 0x6b2   : > { %3636 = vrot.lane.b32.xlu0 %v10228_v12, %s13589_s14 }
 0x6b3   : > { %v10462_v33 = vpop.permute.xlu1 %3557 }
 0x6b4   : > { %v10460_v13 = vpop.permute.xlu0 %3555 }
 0x6b5   : > { %3934 = vrot.lane.b32.xlu1 %v10352_v0, %s13479_s7 }
 0x6b6   : > { %4693 = vrot.lane.b32.xlu0 %v10222_v1, %s13436_s30 }
 0x6b7   : > { %v10470_v58 = vpop.permute.xlu1 %3630 }
 0x6b8   : > { %v10468_v9 = vpop.permute.xlu0 %3632 }
 0x6b9   : > { %4993 = vrot.lane.b32.xlu1 %v10352_v0, %s13650_s10 }
 0x6ba   : > { %4691 = vrot.lane.b32.xlu0 %v10220_v19, %s13436_s30  ;;  %s13741_s30 = smov 119  }
 0x6bb   : > { %v10478_v10 = vpop.permute.xlu1 %3707 }
 0x6bc   : > { %v10476_v53 = vpop.permute.xlu0 %3705 }
 0x6bd   : > { %4009 = vrot.lane.b32.xlu1 %v10352_v0, %s13506_s12 }
 0x6be   : > { %3711 = vrot.lane.b32.xlu0 %v10228_v12, %s13500_s27 }
 0x6bf   : > { %v10486_v17 = vpop.permute.xlu1 %3780 }
 0x6c0   : > { %v10484_v37 = vpop.permute.xlu0 %3782 }
 0x6c1   : > { %5067 = vrot.lane.b32.xlu1 %v10352_v0, %s13651_s11 }
 0x6c2   : > { %4768 = vrot.lane.b32.xlu0 %v10222_v1, %s13737_s25 }
 0x6c3   : > { %v10494_v46 = vpop.permute.xlu1 %3857 }
 0x6c4   : > { %v10492_v50 = vpop.permute.xlu0 %3855 }
 0x6c5   : > { %4084 = vrot.lane.b32.xlu1 %v10352_v0, %s13528_s9 }
 0x6c6   : > { %4766 = vrot.lane.b32.xlu0 %v10220_v19, %s13737_s25 }
 0x6c7   : > { %v10502_v27 = vpop.permute.xlu1 %3930 }
 0x6c8   : > { %v10500_v30 = vpop.permute.xlu0 %3932 }
 0x6c9   : > { %3190 = vrot.lane.b32.xlu1 %v10232_v45, %s13524_s18 }
 0x6ca   : > { %3786 = vrot.lane.b32.xlu0 %v10228_v12, %s13540_s26 }
 0x6cb   : > { %v10510_v16 = vpop.permute.xlu1 %4007 }
 0x6cc   : > { %v10508_v7 = vpop.permute.xlu0 %4005 }
 0x6cd   : > { %3265 = vrot.lane.b32.xlu1 %v10232_v45, %s13463_s19 }
 0x6ce   : > { %4842 = vrot.lane.b32.xlu0 %v10222_v1, %s13647_s16 }
 0x6cf   : > { %v10518_v47 = vpop.permute.xlu1 %4080 }
 0x6d0   : > { %v10516_v57 = vpop.permute.xlu0 %4082 }
 0x6d1   : > { %4177 = vrot.lane.b32.xlu1 %v10230_v20, %s13734_s13 }
 0x6d2   : > { %4840 = vrot.lane.b32.xlu0 %v10220_v19, %s13647_s16 }
 0x6d3   : > { %v10526_v3 = vpop.permute.xlu1 %4173 }
 0x6d4   : > { %v10524_v21 = vpop.permute.xlu0 %4171  ;;  %13739 = vst [vmem:[#allocation20_spill] sm:$0xff] %v10526_v3 }
 0x6d5   : > { %13738 = vst [vmem:[#allocation16_spill] sm:$0xff] %v10524_v21  ;;  %3340 = vrot.lane.b32.xlu1 %v10232_v45, %s13472_s15 }
 0x6d6   : > { %3861 = vrot.lane.b32.xlu0 %v10228_v12, %s13498_s8 }
 0x6d7   : > { %v3185_v61 = vpop.permute.xlu1 %3184 }
 0x6d8   : > { %v10532_v25 = vpop.permute.xlu0 %4169 }
 0x6d9   : > { %13740 = vst [vmem:[#allocation21_spill] sm:$0xff] %v10532_v25  ;;  %4251 = vrot.lane.b32.xlu1 %v10230_v20, %s13741_s30  ;;  %v3213_v25 = vsel %vm3210_vm11, %v10419_v56, %v3185_v61 }
 0x6da   : > { %4916 = vrot.lane.b32.xlu0 %v10222_v1, %s13444_s17 }
 0x6db   : > { %v10540_v14 = vpop.permute.xlu1 %4247 }
 0x6dc   : > { %v10538_v0 = vpop.permute.xlu0 %3186 }
 0x6dd   : > { %13742 = vst [vmem:[#allocation17_spill] sm:$0xff] %v10538_v0  ;;  %v3214_v21 = vsel %vm3210_vm11, %v3185_v61, %v10538_v0  ;;  %3415 = vrot.lane.b32.xlu1 %v10232_v45, %s13477_s29 }
 0x6de   : > { %4914 = vrot.lane.b32.xlu0 %v10220_v19, %s13444_s17  ;;  %5844 = vmatprep.subr.bf16.mxu0 %v3214_v21  ;;  %s13749_s17 = smov 117  }
 0x6df   : > { %5845 = vmatpush1.bf16.msra.mxu0 %v3213_v25  ;;  %v10552_v29 = vpop.permute.xlu1 %3259 }
 0x6e0   : > { %v10550_v3 = vpop.permute.xlu0 %4245  ;;  %13744 = vst [vmem:[#allocation27_spill] sm:$0xff] %v10552_v29 }
 0x6e1   : > { %13743 = vst [vmem:[#allocation26_spill] sm:$0xff] %v10550_v3  ;;  %4326 = vrot.lane.b32.xlu1 %v10230_v20, %s13735_s24 }
 0x6e2   : > { %3936 = vrot.lane.b32.xlu0 %v10228_v12, %s13479_s7 }
 0x6e3   : > { %v10560_v21 = vpop.permute.xlu1 %4322 }
 0x6e4   : > { %v10558_v0 = vpop.permute.xlu0 %4243  ;;  %13746 = vst [vmem:[#allocation29_spill] sm:$0xff] %v10560_v21 }
 0x6e5   : > { %13745 = vst [vmem:[#allocation28_spill] sm:$0xff] %v10558_v0  ;;  %3490 = vrot.lane.b32.xlu1 %v10232_v45, %s13449_s28  ;;  %s13754_s28 = smov 39   ;;  %v2947_v0 = vmul.f32 %v10214_v6, %v9998_v4 }
 0x6e6   : > { %4991 = vrot.lane.b32.xlu0 %v10222_v1, %s13650_s10 }
 0x6e7   : > { %v10568_v61 = vpop.permute.xlu1 %3334 }
 0x6e8   : > { %v10566_v25 = vpop.permute.xlu0 %3261  ;;  %13748 = vst [vmem:[#allocation31_spill] sm:$0xff] %v10568_v61 }
 0x6e9   : > { %13747 = vst [vmem:[#allocation30_spill] sm:$0xff] %v10566_v25  ;;  %4400 = vrot.lane.b32.xlu1 %v10230_v20, %s13749_s17 }
 0x6ea   : > { %4989 = vrot.lane.b32.xlu0 %v10220_v19, %s13650_s10 }
 0x6eb   : > { %v10576_v29 = vpop.permute.xlu1 %4396 }
 0x6ec   : > { %v10574_v56 = vpop.permute.xlu0 %4320  ;;  %13751 = vst [vmem:[#allocation33_spill] sm:$0xff] %v10576_v29 }
 0x6ed   : > { %13750 = vst [vmem:[#allocation32_spill] sm:$0xff] %v10574_v56  ;;  %3565 = vrot.lane.b32.xlu1 %v10232_v45, %s13454_s20  ;;  %s13759_s20 = smov 38  }
 0x6ee   : > { %4011 = vrot.lane.b32.xlu0 %v10228_v12, %s13506_s12 }
 0x6ef   : > { %v10584_v25 = vpop.permute.xlu1 %3409 }
 0x6f0   : > { %v10582_v21 = vpop.permute.xlu0 %4318  ;;  %13753 = vst [vmem:[#allocation35_spill] sm:$0xff] %v10584_v25 }
 0x6f1   : > { %13752 = vst [vmem:[#allocation34_spill] sm:$0xff] %v10582_v21  ;;  %4474 = vrot.lane.b32.xlu1 %v10230_v20, %s13754_s28 }
 0x6f2   : > { %5065 = vrot.lane.b32.xlu0 %v10222_v1, %s13651_s11 }
 0x6f3   : > { %v10592_v56 = vpop.permute.xlu1 %4470 }
 0x6f4   : > { %v10590_v61 = vpop.permute.xlu0 %3336  ;;  %13756 = vst [vmem:[#allocation37_spill] sm:$0xff] %v10592_v56 }
 0x6f5   : > { %13755 = vst [vmem:[#allocation36_spill] sm:$0xff] %v10590_v61  ;;  %3640 = vrot.lane.b32.xlu1 %v10232_v45, %s13589_s14 }
 0x6f6   : > { %5063 = vrot.lane.b32.xlu0 %v10220_v19, %s13651_s11 }
 0x6f7   : > { %v10600_v21 = vpop.permute.xlu1 %3484 }
 0x6f8   : > { %v10598_v29 = vpop.permute.xlu0 %4394  ;;  %13758 = vst [vmem:[#allocation39_spill] sm:$0xff] %v10600_v21 }
 0x6f9   : > { %13757 = vst [vmem:[#allocation38_spill] sm:$0xff] %v10598_v29  ;;  %4549 = vrot.lane.b32.xlu1 %v10230_v20, %s13759_s20 }
 0x6fa   : > { %4086 = vrot.lane.b32.xlu0 %v10228_v12, %s13528_s9 }
 0x6fb   : > { %v10608_v61 = vpop.permute.xlu1 %4545 }
 0x6fc   : > { %v10606_v25 = vpop.permute.xlu0 %4392  ;;  %13761 = vst [vmem:[#allocation41_spill] sm:$0xff] %v10608_v61 }
 0x6fd   : > { %13760 = vst [vmem:[#allocation40_spill] sm:$0xff] %v10606_v25  ;;  %3715 = vrot.lane.b32.xlu1 %v10232_v45, %s13500_s27 }
 0x6fe   : > { %3188 = vrot.lane.b32.xlu0 %v10230_v20, %s13524_s18 }
 0x6ff   : > { %v10616_v29 = vpop.permute.xlu1 %3559 }
 0x700   : > { %v10614_v56 = vpop.permute.xlu0 %3411  ;;  %13763 = vst [vmem:[#allocation43_spill] sm:$0xff] %v10616_v29 }
 0x701   : > { %13762 = vst [vmem:[#allocation42_spill] sm:$0xff] %v10614_v56  ;;  %4624 = vrot.lane.b32.xlu1 %v10230_v20, %s13495_s23 }
 0x702   : > { %3263 = vrot.lane.b32.xlu0 %v10230_v20, %s13463_s19  ;;  %s13768_s19 = smov 29  }
 0x703   : > { %v10624_v25 = vpop.permute.xlu1 %4620 }
 0x704   : > { %v10622_v21 = vpop.permute.xlu0 %4468  ;;  %13765 = vst [vmem:[#allocation45_spill] sm:$0xff] %v10624_v25 }
 0x705   : > { %13764 = vst [vmem:[#allocation44_spill] sm:$0xff] %v10622_v21  ;;  %3790 = vrot.lane.b32.xlu1 %v10232_v45, %s13540_s26 }
 0x706   : > { %4175 = vrot.lane.b32.xlu0 %v10228_v12, %s13734_s13 }
 0x707   : > { %v10632_v56 = vpop.permute.xlu1 %3634 }
 0x708   : > { %v10630_v61 = vpop.permute.xlu0 %4466  ;;  %13767 = vst [vmem:[#allocation47_spill] sm:$0xff] %v10632_v56 }
 0x709   : > { %13766 = vst [vmem:[#allocation46_spill] sm:$0xff] %v10630_v61  ;;  %4699 = vrot.lane.b32.xlu1 %v10230_v20, %s13768_s19 }
 0x70a   : > { %3338 = vrot.lane.b32.xlu0 %v10230_v20, %s13472_s15  ;;  %s13777_s15 = smov 100  }
 0x70b   : > { %v10640_v21 = vpop.permute.xlu1 %4695 }
 0x70c   : > { %v10638_v29 = vpop.permute.xlu0 %3486  ;;  %13770 = vst [vmem:[#allocation49_spill] sm:$0xff] %v10640_v21 }
 0x70d   : > { %13769 = vst [vmem:[#allocation48_spill] sm:$0xff] %v10638_v29  ;;  %3865 = vrot.lane.b32.xlu1 %v10232_v45, %s13498_s8 }
 0x70e   : > { %4249 = vrot.lane.b32.xlu0 %v10228_v12, %s13741_s30 }
 0x70f   : > { %v10648_v61 = vpop.permute.xlu1 %3709 }
 0x710   : > { %v10646_v25 = vpop.permute.xlu0 %4543  ;;  %13772 = vst [vmem:[#allocation51_spill] sm:$0xff] %v10648_v61 }
 0x711   : > { %13771 = vst [vmem:[#allocation50_spill] sm:$0xff] %v10646_v25  ;;  %4774 = vrot.lane.b32.xlu1 %v10230_v20, %s13737_s25 }
 0x712   : > { %3413 = vrot.lane.b32.xlu0 %v10230_v20, %s13477_s29  ;;  %s13782_s29 = smov 99  }
 0x713   : > { %v10656_v29 = vpop.permute.xlu1 %4770 }
 0x714   : > { %v10654_v56 = vpop.permute.xlu0 %4541  ;;  %13774 = vst [vmem:[#allocation53_spill] sm:$0xff] %v10656_v29 }
 0x715   : > { %13773 = vst [vmem:[#allocation52_spill] sm:$0xff] %v10654_v56  ;;  %3940 = vrot.lane.b32.xlu1 %v10232_v45, %s13479_s7  ;;  %s13783_s7 = smov 19  }
 0x716   : > { %4324 = vrot.lane.b32.xlu0 %v10228_v12, %s13735_s24 }
 0x717   : > { %v10664_v25 = vpop.permute.xlu1 %3784 }
 0x718   : > { %v10662_v21 = vpop.permute.xlu0 %3561  ;;  %13776 = vst [vmem:[#allocation55_spill] sm:$0xff] %v10664_v25 }
 0x719   : > { %13775 = vst [vmem:[#allocation54_spill] sm:$0xff] %v10662_v21  ;;  %4848 = vrot.lane.b32.xlu1 %v10230_v20, %s13647_s16 }
 0x71a   : > { %3488 = vrot.lane.b32.xlu0 %v10230_v20, %s13777_s15 }
 0x71b   : > { %v10672_v56 = vpop.permute.xlu1 %4844 }
 0x71c   : > { %v10670_v61 = vpop.permute.xlu0 %4618  ;;  %13779 = vst [vmem:[#allocation57_spill] sm:$0xff] %v10672_v56 }
 0x71d   : > { %13778 = vst [vmem:[#allocation56_spill] sm:$0xff] %v10670_v61  ;;  %4015 = vrot.lane.b32.xlu1 %v10232_v45, %s13506_s12 }
 0x71e   : > { %4398 = vrot.lane.b32.xlu0 %v10228_v12, %s13749_s17 }
 0x71f   : > { %v10680_v21 = vpop.permute.xlu1 %3859 }
 0x720   : > { %v10678_v29 = vpop.permute.xlu0 %4616  ;;  %13781 = vst [vmem:[#allocation59_spill] sm:$0xff] %v10680_v21 }
 0x721   : > { %13780 = vst [vmem:[#allocation58_spill] sm:$0xff] %v10678_v29  ;;  %4922 = vrot.lane.b32.xlu1 %v10230_v20, %s13783_s7 }
 0x722   : > { %3563 = vrot.lane.b32.xlu0 %v10230_v20, %s13782_s29 }
 0x723   : > { %v10688_v61 = vpop.permute.xlu1 %4918 }
 0x724   : > { %v10686_v25 = vpop.permute.xlu0 %3636  ;;  %13785 = vst [vmem:[#allocation61_spill] sm:$0xff] %v10688_v61 }
 0x725   : > { %13784 = vst [vmem:[#allocation60_spill] sm:$0xff] %v10686_v25  ;;  %4090 = vrot.lane.b32.xlu1 %v10232_v45, %s13528_s9 }
 0x726   : > { %4472 = vrot.lane.b32.xlu0 %v10228_v12, %s13754_s28 }
 0x727   : > { %v10696_v29 = vpop.permute.xlu1 %3934 }
 0x728   : > { %v10694_v56 = vpop.permute.xlu0 %4693  ;;  %13787 = vst [vmem:[#allocation63_spill] sm:$0xff] %v10696_v29  ;;  %v2948_v29 = vmul.f32 %v10214_v6, %v9974_v59  ;;  %v2940_v59 = vmul.f32 %v10201_v38, %v9994_v5 }
 0x729   : > { %13786 = vst [vmem:[#allocation62_spill] sm:$0xff] %v10694_v56  ;;  %4997 = vrot.lane.b32.xlu1 %v10230_v20, %s13650_s10 }
 0x72a   : > { %3638 = vrot.lane.b32.xlu0 %v10230_v20, %s13589_s14 }
 0x72b   : > { %v10704_v25 = vpop.permute.xlu1 %4993 }
 0x72c   : > { %v10702_v21 = vpop.permute.xlu0 %4691  ;;  %13789 = vst [vmem:[#allocation65_spill] sm:$0xff] %v10704_v25 }
 0x72d   : > { %13788 = vst [vmem:[#allocation64_spill] sm:$0xff] %v10702_v21  ;;  %5071 = vrot.lane.b32.xlu1 %v10230_v20, %s13651_s11  ;;  %v2941_v21 = vmul.f32 %v10201_v38, %v9970_v11 }
 0x72e   : > { %4547 = vrot.lane.b32.xlu0 %v10228_v12, %s13759_s20 }
 0x72f   : > { %v10714_v56 = vpop.permute.xlu1 %4009  ;;  %v2985_v11 = vmul.f32 %v13725_v43, %v2941_v21 }
 0x730   : > { %v10710_v61 = vpop.permute.xlu0 %3711  ;;  %13791 = vst [vmem:[#allocation67_spill] sm:$0xff] %v10714_v56 }
 0x731   : > { %13790 = vst [vmem:[#allocation66_spill] sm:$0xff] %v10710_v61  ;;  %4181 = vrot.lane.b32.xlu1 %v10234_v63, %s13734_s13  ;;  %v2992_v61 = vmul.f32 %v13727_v60, %v2948_v29  ;;  %v2984_v29 = vmul.f32 %v13725_v43, %v2940_v59  ;;  %v3029_v5 = vadd.f32 %v13726_v54, %v2985_v11 }
 0x732   : > { %3713 = vrot.lane.b32.xlu0 %v10230_v20, %s13500_s27  ;;  %s13804_s27 = smov 109  }
 0x733   : > { %v10727_v3 = vpop.permute.xlu1 %5067  ;;  %v3036_v4 = vadd.f32 %v13728_v35, %v2992_v61  ;;  %v3057_v61 = vmax.f32 %v3029_v5, 0.0 }
 0x734   : > { %v10722_v25 = vpop.permute.xlu0 %4768  ;;  %13793 = vst [vmem:[#allocation69_spill] sm:$0xff] %v10727_v3 }
 0x735   : > { %13792 = vst [vmem:[#allocation68_spill] sm:$0xff] %v10722_v25  ;;  %3192 = vrot.lane.b32.xlu1 %v10234_v63, %s13524_s18  ;;  %v2991_v25 = vmul.f32 %v13727_v60, %v2947_v0  ;;  %v3064_v3 = vmax.f32 %v3036_v4, 0.0  ;;  %v3028_v0 = vadd.f32 %v13726_v54, %v2984_v29 }
 0x736   : > { %4622 = vrot.lane.b32.xlu0 %v10228_v12, %s13495_s23  ;;  %s13796_s23 = smov 110  }
 0x737   : > { %v10740_v6 = vpop.permute.xlu1 %4084  ;;  %v3035_v21 = vadd.f32 %v13728_v35, %v2991_v25  ;;  %v3092_v11 = vmul.f32 %v3064_v3, %v9622_v44  ;;  %v3056_v35 = vmax.f32 %v3028_v0, 0.0  ;;  %v3085_v25 = vmul.f32 %v3057_v61, %v9622_v44 }
 0x738   : > { %v10736_v56 = vpop.permute.xlu0 %4766  ;;  %13794 = vst [vmem:[#allocation70_spill] sm:$0xff] %v10740_v6 }
 0x739   : > { %4253 = vrot.lane.b32.xlu1 %v10232_v45, %s13741_s30  ;;  %v3063_v59 = vmax.f32 %v3035_v21, 0.0  ;;  %v10771_v29 = vpack.c.bf16 %v3092_v11, %v3085_v25  ;;  %v3084_v3 = vmul.f32 %v3056_v35, %v9617_v31 }
 0x73a   : > { %3788 = vrot.lane.b32.xlu0 %v10230_v20, %s13540_s26 }
 0x73b   : > { %v10751_v60 = vpop.permute.xlu1 %3190  ;;  %v3091_v4 = vmul.f32 %v3063_v59, %v9617_v31 }
 0x73c   : > { %v10748_v38 = vpop.permute.xlu0 %3786  ;;  %13795 = vst [vmem:[#allocation71_spill] sm:$0xff] %v10751_v60 }
 0x73d   : > { %3267 = vrot.lane.b32.xlu1 %v10234_v63, %s13796_s23  ;;  %v10782_v0 = vpack.c.bf16 %v3091_v4, %v3084_v3 }
 0x73e   : > { %4697 = vrot.lane.b32.xlu0 %v10228_v12, %s13768_s19 }
 0x73f   : > { %v10761_v6 = vpop.permute.xlu1 %3265 }
 0x740   : > { %v10758_v43 = vpop.permute.xlu0 %4842  ;;  %13797 = vst [vmem:[#allocation72_spill] sm:$0xff] %v10761_v6 }
 0x741   : > { %4328 = vrot.lane.b32.xlu1 %v10232_v45, %s13735_s24 }
 0x742   : > { %3863 = vrot.lane.b32.xlu0 %v10230_v20, %s13498_s8  ;;  %s13801_s8 = smov 10  }
 0x743   : > { %v10773_v5 = vpop.permute.xlu1 %4177 }
 0x744   : > { %v10768_v54 = vpop.permute.xlu0 %4840  ;;  %13798 = vst [vmem:[#allocation73_spill] sm:$0xff] %v10773_v5 }
 0x745   : > { %3198 = vrot.lane.b32.xlu1 %v10771_v29, %s13524_s18 }
 0x746   : > { %4772 = vrot.lane.b32.xlu0 %v10228_v12, %s13737_s25 }
 0x747   : > { %v10784_v61 = vpop.permute.xlu1 %3340 }
 0x748   : > { %v10780_v21 = vpop.permute.xlu0 %3861  ;;  %13800 = vst [vmem:[#allocation75_spill] sm:$0xff] %v10784_v61 }
 0x749   : > { %13799 = vst [vmem:[#allocation74_spill] sm:$0xff] %v10780_v21  ;;  %3271 = vrot.lane.b32.xlu1 %v10782_v0, %s13796_s23 }
 0x74a   : > { %3938 = vrot.lane.b32.xlu0 %v10230_v20, %s13801_s8 }
 0x74b   : > { %v10792_v11 = vpop.permute.xlu1 %4251 }
 0x74c   : > { %v10790_v59 = vpop.permute.xlu0 %4916  ;;  %13803 = vst [vmem:[#allocation77_spill] sm:$0xff] %v10792_v11 }
 0x74d   : > { %13802 = vst [vmem:[#allocation76_spill] sm:$0xff] %v10790_v59  ;;  %3342 = vrot.lane.b32.xlu1 %v10234_v63, %s13804_s27 }
 0x74e   : > { %4846 = vrot.lane.b32.xlu0 %v10228_v12, %s13647_s16 }
 0x74f   : > { %v10800_v25 = vpop.permute.xlu1 %3415 }
 0x750   : > { %v10798_v35 = vpop.permute.xlu0 %4914  ;;  %13806 = vst [vmem:[#allocation79_spill] sm:$0xff] %v10800_v25 }
 0x751   : > { %13805 = vst [vmem:[#allocation78_spill] sm:$0xff] %v10798_v35  ;;  %4402 = vrot.lane.b32.xlu1 %v10232_v45, %s13749_s17 }
 0x752   : > { %4013 = vrot.lane.b32.xlu0 %v10230_v20, %s13506_s12  ;;  %s13811_s12 = smov 101  }
 0x753   : > { %v10808_v3 = vpop.permute.xlu1 %4326 }
 0x754   : > { %v10806_v4 = vpop.permute.xlu0 %3936  ;;  %13808 = vst [vmem:[#allocation81_spill] sm:$0xff] %v10808_v3 }
 0x755   : > { %13807 = vst [vmem:[#allocation80_spill] sm:$0xff] %v10806_v4  ;;  %3348 = vrot.lane.b32.xlu1 %v10771_v29, %s13804_s27 }
 0x756   : > { %4920 = vrot.lane.b32.xlu0 %v10228_v12, %s13783_s7 }
 0x757   : > { %v10816_v44 = vpop.permute.xlu1 %3490 }
 0x758   : > { %v10814_v31 = vpop.permute.xlu0 %4991  ;;  %13810 = vst [vmem:[#allocation83_spill] sm:$0xff] %v10816_v44 }
 0x759   : > { %13809 = vst [vmem:[#allocation82_spill] sm:$0xff] %v10814_v31  ;;  %3421 = vrot.lane.b32.xlu1 %v10782_v0, %s13811_s12  ;;  %v8296_v31 = vunpack.i.h.bf16 %v13736_v51  ;;  %v3287_v51 = vsel %vm3285_vm1, %v10428_v18, %v10430_v39 }
 0x75a   : > { %4088 = vrot.lane.b32.xlu0 %v10230_v20, %s13528_s9  ;;  %s13831_s9 = smov 37  }
 0x75b   : > { %v10824_v11 = vpop.permute.xlu1 %4400 }
 0x75c   : > { %v10822_v25 = vpop.permute.xlu0 %4989  ;;  %13813 = vst [vmem:[#allocation85_spill] sm:$0xff] %v10824_v11 }
 0x75d   : > { %13812 = vst [vmem:[#allocation84_spill] sm:$0xff] %v10822_v25  ;;  %3417 = vrot.lane.b32.xlu1 %v10234_v63, %s13811_s12 }
 0x75e   : > { %4995 = vrot.lane.b32.xlu0 %v10228_v12, %s13650_s10 }
 0x75f   : > { %v10832_v61 = vpop.permute.xlu1 %3565 }
 0x760   : > { %v10830_v3 = vpop.permute.xlu0 %4011  ;;  %13815 = vst [vmem:[#allocation87_spill] sm:$0xff] %v10832_v61 }
 0x761   : > { %13814 = vst [vmem:[#allocation86_spill] sm:$0xff] %v10830_v3  ;;  %4476 = vrot.lane.b32.xlu1 %v10232_v45, %s13754_s28 }
 0x762   : > { %5069 = vrot.lane.b32.xlu0 %v10228_v12, %s13651_s11 }
 0x763   : > { %v10840_v44 = vpop.permute.xlu1 %4474 }
 0x764   : > { %v10838_v20 = vpop.permute.xlu0 %5065  ;;  %13817 = vst [vmem:[#allocation89_spill] sm:$0xff] %v10840_v44 }
 0x765   : > { %13816 = vst [vmem:[#allocation88_spill] sm:$0xff] %v10838_v20  ;;  %3498 = vrot.lane.b32.xlu1 %v10771_v29, %s13777_s15 }
 0x766   : > { %4179 = vrot.lane.b32.xlu0 %v10232_v45, %s13734_s13 }
 0x767   : > { %v10848_v5 = vpop.permute.xlu1 %3640 }
 0x768   : > { %v10846_v11 = vpop.permute.xlu0 %5063  ;;  %13819 = vst [vmem:[#allocation91_spill] sm:$0xff] %v10848_v5 }
 0x769   : > { %13818 = vst [vmem:[#allocation90_spill] sm:$0xff] %v10846_v11  ;;  %3571 = vrot.lane.b32.xlu1 %v10782_v0, %s13782_s29 }
 0x76a   : > { %3492 = vrot.lane.b32.xlu0 %v10234_v63, %s13777_s15 }
 0x76b   : > { %v10856_v6 = vpop.permute.xlu1 %4549 }
 0x76c   : > { %v10854_v61 = vpop.permute.xlu0 %4086  ;;  %13821 = vst [vmem:[#allocation93_spill] sm:$0xff] %v10856_v6 }
 0x76d   : > { %13820 = vst [vmem:[#allocation92_spill] sm:$0xff] %v10854_v61  ;;  %3792 = vrot.lane.b32.xlu1 %v10234_v63, %s13540_s26 }
 0x76e   : > { %4255 = vrot.lane.b32.xlu0 %v10234_v63, %s13741_s30 }
 0x76f   : > { %v10864_v12 = vpop.permute.xlu1 %3715 }
 0x770   : > { %v10862_v44 = vpop.permute.xlu0 %3188  ;;  %13823 = vst [vmem:[#allocation95_spill] sm:$0xff] %v10864_v12 }
 0x771   : > { %13822 = vst [vmem:[#allocation94_spill] sm:$0xff] %v10862_v44  ;;  %4551 = vrot.lane.b32.xlu1 %v10232_v45, %s13759_s20 }
 0x772   : > { %3196 = vrot.lane.b32.xlu0 %v10782_v0, %s13524_s18  ;;  %s13828_s18 = smov 90  }
 0x773   : > { %v10872_v60 = vpop.permute.xlu1 %4624 }
 0x774   : > { %v10870_v5 = vpop.permute.xlu0 %3263  ;;  %13825 = vst [vmem:[#allocation97_spill] sm:$0xff] %v10872_v60 }
 0x775   : > { %13824 = vst [vmem:[#allocation96_spill] sm:$0xff] %v10870_v5  ;;  %3648 = vrot.lane.b32.xlu1 %v10771_v29, %s13589_s14 }
 0x776   : > { %3567 = vrot.lane.b32.xlu0 %v10234_v63, %s13782_s29 }
 0x777   : > { %v10880_v44 = vpop.permute.xlu1 %3790 }
 0x778   : > { %v10878_v6 = vpop.permute.xlu0 %4175  ;;  %13827 = vst [vmem:[#allocation99_spill] sm:$0xff] %v10880_v44 }
 0x779   : > { %13826 = vst [vmem:[#allocation98_spill] sm:$0xff] %v10878_v6  ;;  %3721 = vrot.lane.b32.xlu1 %v10782_v0, %s13828_s18 }
 0x77a   : > { %3273 = vrot.lane.b32.xlu0 %v10771_v29, %s13796_s23 }
 0x77b   : > { %v10888_v5 = vpop.permute.xlu1 %4699 }
 0x77c   : > { %v10886_v12 = vpop.permute.xlu0 %3338  ;;  %13830 = vst [vmem:[#allocation101_spill] sm:$0xff] %v10888_v5 }
 0x77d   : > { %13829 = vst [vmem:[#allocation100_spill] sm:$0xff] %v10886_v12  ;;  %4626 = vrot.lane.b32.xlu1 %v10232_v45, %s13831_s9 }
 0x77e   : > { %4330 = vrot.lane.b32.xlu0 %v10234_v63, %s13735_s24 }
 0x77f   : > { %v10896_v6 = vpop.permute.xlu1 %3865 }
 0x780   : > { %v10894_v60 = vpop.permute.xlu0 %4249  ;;  %13833 = vst [vmem:[#allocation103_spill] sm:$0xff] %v10896_v6 }
 0x781   : > { %13832 = vst [vmem:[#allocation102_spill] sm:$0xff] %v10894_v60  ;;  %3798 = vrot.lane.b32.xlu1 %v10771_v29, %s13540_s26  ;;  %s13843_s26 = smov 9  }
 0x782   : > { %3346 = vrot.lane.b32.xlu0 %v10782_v0, %s13804_s27 }
 0x783   : > { %v10904_v12 = vpop.permute.xlu1 %4774 }
 0x784   : > { %v10902_v44 = vpop.permute.xlu0 %3413  ;;  %13835 = vst [vmem:[#allocation105_spill] sm:$0xff] %v10904_v12 }
 0x785   : > { %13834 = vst [vmem:[#allocation104_spill] sm:$0xff] %v10902_v44  ;;  %3871 = vrot.lane.b32.xlu1 %v10782_v0, %s13836_s0 }
 0x786   : > { %3642 = vrot.lane.b32.xlu0 %v10234_v63, %s13589_s14 }
 0x787   : > { %v10912_v60 = vpop.permute.xlu1 %3940 }
 0x788   : > { %v10910_v5 = vpop.permute.xlu0 %4324  ;;  %13838 = vst [vmem:[#allocation107_spill] sm:$0xff] %v10912_v60 }
 0x789   : > { %13837 = vst [vmem:[#allocation106_spill] sm:$0xff] %v10910_v5  ;;  %3942 = vrot.lane.b32.xlu1 %v10234_v63, %s13801_s8 }
 0x78a   : > { %3423 = vrot.lane.b32.xlu0 %v10771_v29, %s13811_s12 }
 0x78b   : > { %v10920_v44 = vpop.permute.xlu1 %4848 }
 0x78c   : > { %v10918_v6 = vpop.permute.xlu0 %3488  ;;  %13840 = vst [vmem:[#allocation109_spill] sm:$0xff] %v10920_v44 }
 0x78d   : > { %13839 = vst [vmem:[#allocation108_spill] sm:$0xff] %v10918_v6  ;;  %3948 = vrot.lane.b32.xlu1 %v10771_v29, %s13801_s8 }
 0x78e   : > { %4404 = vrot.lane.b32.xlu0 %v10234_v63, %s13749_s17 }
 0x78f   : > { %v10928_v5 = vpop.permute.xlu1 %4015 }
 0x790   : > { %v10926_v12 = vpop.permute.xlu0 %4398  ;;  %13842 = vst [vmem:[#allocation111_spill] sm:$0xff] %v10928_v5  ;;  %v13848_v5 = vmov 0  }
 0x791   : > { %13841 = vst [vmem:[#allocation110_spill] sm:$0xff] %v10926_v12  ;;  %4021 = vrot.lane.b32.xlu1 %v10782_v0, %s13843_s26 }
 0x792   : > { %3496 = vrot.lane.b32.xlu0 %v10782_v0, %s13777_s15 }
 0x793   : > { %v10936_v6 = vpop.permute.xlu1 %4922 }
 0x794   : > { %v10934_v60 = vpop.permute.xlu0 %3563  ;;  %13845 = vst [vmem:[#allocation113_spill] sm:$0xff] %v10936_v6 }
 0x795   : > { %13844 = vst [vmem:[#allocation112_spill] sm:$0xff] %v10934_v60  ;;  %4703 = vrot.lane.b32.xlu1 %v10234_v63, %s13768_s19 }
 0x796   : > { %3717 = vrot.lane.b32.xlu0 %v10234_v63, %s13828_s18 }
 0x797   : > { %v10944_v12 = vpop.permute.xlu1 %4090 }
 0x798   : > { %v10942_v44 = vpop.permute.xlu0 %4472  ;;  %13847 = vst [vmem:[#allocation115_spill] sm:$0xff] %v10944_v12  ;;  %v8440_v12 = vld [vmem:[%s13356_s2 + $0x4] ss:$28 sps:$4 sm:$0xff]  }
 0x799   : > { %13846 = vst [vmem:[#allocation114_spill] sm:$0xff] %v10942_v44  ;;  %8363 = vrot.lane.b32.xlu1 %v13848_v5, %s13741_s30  ;;  %5664 = vmatprep.mubr.bf16.mxu1 %v8440_v12 }
 0x79a   : > { %3573 = vrot.lane.b32.xlu0 %v10771_v29, %s13782_s29  ;;  %5876 = vmatprep.mubr.bf16.mxu0 %v8440_v12 }
 0x79b   : > { %v10952_v60 = vpop.permute.xlu1 %4997 }
 0x79c   : > { %v10950_v61 = vpop.permute.xlu0 %3638  ;;  %13850 = vst [vmem:[#allocation117_spill] sm:$0xff] %v10952_v60 }
 0x79d   : > { %13849 = vst [vmem:[#allocation116_spill] sm:$0xff] %v10950_v61  ;;  %4776 = vrot.lane.b32.xlu1 %v10232_v45, %s13737_s25 }
 0x79e   : > { %4478 = vrot.lane.b32.xlu0 %v10234_v63, %s13754_s28 }
 0x79f   : > { %v10960_v44 = vpop.permute.xlu1 %5071 }
 0x7a0   : > { %v10958_v6 = vpop.permute.xlu0 %4547  ;;  %13852 = vst [vmem:[#allocation119_spill] sm:$0xff] %v10960_v44 }
 0x7a1   : > { %13851 = vst [vmem:[#allocation118_spill] sm:$0xff] %v10958_v6  ;;  %8373 = vrot.lane.b32.xlu1 %v13848_v5, %s13735_s24 }
 0x7a2   : > { %3646 = vrot.lane.b32.xlu0 %v10782_v0, %s13589_s14 }
 0x7a3   : > { %v10971_v61 = vpop.permute.xlu1 %4181 }
 0x7a4   : > { %v10969_v60 = vpop.permute.xlu0 %3713  ;;  %13854 = vst [vmem:[#allocation121_spill] sm:$0xff] %v10971_v61 }
 0x7a5   : > { %13853 = vst [vmem:[#allocation120_spill] sm:$0xff] %v10969_v60  ;;  %4098 = vrot.lane.b32.xlu1 %v10771_v29, %s13855_s21 }
 0x7a6   : > { %4092 = vrot.lane.b32.xlu0 %v10234_v63, %s13855_s21 }
 0x7a7   : > { %v10979_v6 = vpop.permute.xlu1 %3192 }
 0x7a8   : > { %v10977_v44 = vpop.permute.xlu0 %4622  ;;  %13857 = vst [vmem:[#allocation123_spill] sm:$0xff] %v10979_v6 }
 0x7a9   : > { %13856 = vst [vmem:[#allocation122_spill] sm:$0xff] %v10977_v44  ;;  %4187 = vrot.lane.b32.xlu1 %v10771_v29, %s13734_s13 }
 0x7aa   : > { %3723 = vrot.lane.b32.xlu0 %v10771_v29, %s13828_s18 }
 0x7ab   : > { %v10987_v12 = vpop.permute.xlu1 %4253 }
 0x7ac   : > { %v10985_v60 = vpop.permute.xlu0 %3788  ;;  %13859 = vst [vmem:[#allocation125_spill] sm:$0xff] %v10987_v12 }
 0x7ad   : > { %13858 = vst [vmem:[#allocation124_spill] sm:$0xff] %v10985_v60  ;;  %4185 = vrot.lane.b32.xlu1 %v10782_v0, %s13734_s13 }
 0x7ae   : > { %4553 = vrot.lane.b32.xlu0 %v10234_v63, %s13759_s20 }
 0x7af   : > { %v10995_v44 = vpop.permute.xlu1 %3267 }
 0x7b0   : > { %v10993_v61 = vpop.permute.xlu0 %4697  ;;  %13861 = vst [vmem:[#allocation127_spill] sm:$0xff] %v10995_v44 }
 0x7b1   : > { %13860 = vst [vmem:[#allocation126_spill] sm:$0xff] %v10993_v61  ;;  %3202 = vrot.lane.b32.xlu1 %v10302_v49, %s13863_s5 }
 0x7b2   : > { %3796 = vrot.lane.b32.xlu0 %v10782_v0, %s13862_s1 }
 0x7b3   : > { %v11003_v60 = vpop.permute.xlu1 %4328 }
 0x7b4   : > { %v11001_v6 = vpop.permute.xlu0 %3863  ;;  %13865 = vst [vmem:[#allocation129_spill] sm:$0xff] %v11003_v60 }
 0x7b5   : > { %13864 = vst [vmem:[#allocation128_spill] sm:$0xff] %v11001_v6  ;;  %4261 = vrot.lane.b32.xlu1 %v10771_v29, %s13741_s30 }
 0x7b6   : > { %3867 = vrot.lane.b32.xlu0 %v10234_v63, %s13836_s0 }
 0x7b7   : > { %v11011_v61 = vpop.permute.xlu1 %3198 }
 0x7b8   : > { %v11009_v12 = vpop.permute.xlu0 %4772 }
 0x7b9   : > { %13866 = vst [vmem:[#allocation130_spill] sm:$0xff] %v11009_v12  ;;  %4259 = vrot.lane.b32.xlu1 %v10782_v0, %s13741_s30 }
 0x7ba   : > { %3873 = vrot.lane.b32.xlu0 %v10771_v29, %s13836_s0 }
 0x7bb   : > { %v11019_v6 = vpop.permute.xlu1 %3271 }
 0x7bc   : > { %v11017_v44 = vpop.permute.xlu0 %3938 }
 0x7bd   : > { %13867 = vst [vmem:[#allocation131_spill] sm:$0xff] %v11017_v44  ;;  %3277 = vrot.lane.b32.xlu1 %v10302_v49, %s13796_s23 }
 0x7be   : > { %4628 = vrot.lane.b32.xlu0 %v10234_v63, %s13831_s9 }
 0x7bf   : > { %v11027_v12 = vpop.permute.xlu1 %3342 }
 0x7c0   : > { %v11025_v60 = vpop.permute.xlu0 %4846  ;;  %13869 = vst [vmem:[#allocation133_spill] sm:$0xff] %v11027_v12 }
 0x7c1   : > { %13868 = vst [vmem:[#allocation132_spill] sm:$0xff] %v11025_v60  ;;  %4336 = vrot.lane.b32.xlu1 %v10771_v29, %s13735_s24 }
 0x7c2   : > { %3946 = vrot.lane.b32.xlu0 %v10782_v0, %s13801_s8 }
 0x7c3   : > { %v11035_v44 = vpop.permute.xlu1 %4402 }
 0x7c4   : > { %v11033_v11 = vpop.permute.xlu0 %4013  ;;  %13871 = vst [vmem:[#allocation135_spill] sm:$0xff] %v11035_v44 }
 0x7c5   : > { %13870 = vst [vmem:[#allocation134_spill] sm:$0xff] %v11033_v11  ;;  %4334 = vrot.lane.b32.xlu1 %v10782_v0, %s13735_s24 }
 0x7c6   : > { %8358 = vrot.lane.b32.xlu0 %v13848_v5, %s13734_s13 }
 0x7c7   : > { %v11043_v60 = vpop.permute.xlu1 %3348 }
 0x7c8   : > { %v11041_v20 = vpop.permute.xlu0 %4920 }
 0x7c9   : > { %13872 = vst [vmem:[#allocation136_spill] sm:$0xff] %v11041_v20  ;;  %3352 = vrot.lane.b32.xlu1 %v10302_v49, %s13804_s27 }
 0x7ca   : > { %4023 = vrot.lane.b32.xlu0 %v10771_v29, %s13843_s26 }
 0x7cb   : > { %v11051_v11 = vpop.permute.xlu1 %3421 }
 0x7cc   : > { %v11049_v12 = vpop.permute.xlu0 %4088 }
 0x7cd   : > { %13873 = vst [vmem:[#allocation137_spill] sm:$0xff] %v11049_v12  ;;  %4410 = vrot.lane.b32.xlu1 %v10771_v29, %s13749_s17 }
 0x7ce   : > { %4701 = vrot.lane.b32.xlu0 %v10232_v45, %s13768_s19 }
 0x7cf   : > { %v11059_v20 = vpop.permute.xlu1 %3417 }
 0x7d0   : > { %v11057_v44 = vpop.permute.xlu0 %4995  ;;  %13875 = vst [vmem:[#allocation139_spill] sm:$0xff] %v11059_v20 }
 0x7d1   : > { %13874 = vst [vmem:[#allocation138_spill] sm:$0xff] %v11057_v44  ;;  %4408 = vrot.lane.b32.xlu1 %v10782_v0, %s13749_s17 }
 0x7d2   : > { %4096 = vrot.lane.b32.xlu0 %v10782_v0, %s13855_s21 }
 0x7d3   : > { %v11067_v12 = vpop.permute.xlu1 %4476 }
 0x7d4   : > { %v11065_v3 = vpop.permute.xlu0 %5069  ;;  %13877 = vst [vmem:[#allocation141_spill] sm:$0xff] %v11067_v12 }
 0x7d5   : > { %13876 = vst [vmem:[#allocation140_spill] sm:$0xff] %v11065_v3  ;;  %3427 = vrot.lane.b32.xlu1 %v10302_v49, %s13811_s12 }
 0x7d6   : > { %4017 = vrot.lane.b32.xlu0 %v10234_v63, %s13843_s26 }
 0x7d7   : > { %v11075_v44 = vpop.permute.xlu1 %3498 }
 0x7d8   : > { %v11073_v25 = vpop.permute.xlu0 %4179 }
 0x7d9   : > { %13878 = vst [vmem:[#allocation142_spill] sm:$0xff] %v11073_v25  ;;  %4484 = vrot.lane.b32.xlu1 %v10771_v29, %s13754_s28 }
 0x7da   : > { %4778 = vrot.lane.b32.xlu0 %v10234_v63, %s13737_s25 }
 0x7db   : > { %v11083_v3 = vpop.permute.xlu1 %3571 }
 0x7dc   : > { %v11081_v20 = vpop.permute.xlu0 %3492 }
 0x7dd   : > { %13879 = vst [vmem:[#allocation143_spill] sm:$0xff] %v11081_v20  ;;  %4482 = vrot.lane.b32.xlu1 %v10782_v0, %s13754_s28 }
 0x7de   : > { %8368 = vrot.lane.b32.xlu0 %v13848_v5, %s13831_s9 }
 0x7df   : > { %v11091_v25 = vpop.permute.xlu1 %3792 }
 0x7e0   : > { %v11089_v12 = vpop.permute.xlu0 %4255  ;;  %13881 = vst [vmem:[#allocation145_spill] sm:$0xff] %v11091_v25  ;;  %v13883_v25 = vld [vmem:[#allocation18_spill] sm:$0xff] }
 0x7e1   : > { %13880 = vst [vmem:[#allocation144_spill] sm:$0xff] %v11089_v12  ;;  %3502 = vrot.lane.b32.xlu1 %v10302_v49, %s13777_s15  ;;  %v8300_v12 = vunpack.i.l.bf16 %v13883_v25 }
 0x7e2   : > { %4189 = vrot.lane.b32.xlu0 %v10298_v26, %s13734_s13 }
 0x7e3   : > { %v11098_v4 = vpop.permute.xlu1 %4551 }
 0x7e4   : > { %v3197_v20 = vpop.permute.xlu0 %3196  ;;  %13882 = vst [vmem:[#allocation146_spill] sm:$0xff] %v11098_v4 }
 0x7e5   : > { %v3219_v5 = vsel %vm3210_vm11, %v3197_v20, %v11011_v61  ;;  %v3218_v35 = vsel %vm3210_vm11, %v8296_v31, %v3197_v20  ;;  %4559 = vrot.lane.b32.xlu1 %v10771_v29, %s13759_s20  ;;  %v3286_v31 = vsel %vm3285_vm1, %v8300_v12, %v10428_v18  ;;  %v8301_v20 = vunpack.i.h.bf16 %v13883_v25  ;;  %v13885_v12 = vld [vmem:[#allocation19_spill] sm:$0xff] }
 0x7e6   : > { %3200 = vrot.lane.b32.xlu0 %v10298_v26, %s13863_s5  ;;  %5634 = vmatprep.subr.bf16.mxu1 %v3219_v5  ;;  %v3362_v25 = vsel %vm3360_vm0, %v10438_v42, %v10436_v40 }
 0x7e7   : > { %5635 = vmatpush1.bf16.msra.mxu1 %v3218_v35  ;;  %v11113_v59 = vpop.permute.xlu1 %3648  ;;  %v3293_v18 = vsel %vm3285_vm1, %v8301_v20, %v11019_v6  ;;  %v8306_v20 = vunpack.i.h.bf16 %v13885_v12 }
 0x7e8   : > { %5636 = vmatprep.subr.bf16.mxu1 %v3287_v51  ;;  %v11111_v4 = vpop.permute.xlu0 %3567 }
 0x7e9   : > { %13884 = vst [vmem:[#allocation18_spill] sm:$0xff] %v11111_v4  ;;  %4557 = vrot.lane.b32.xlu1 %v10782_v0, %s13759_s20 }
 0x7ea   : > { %4263 = vrot.lane.b32.xlu0 %v10298_v26, %s13741_s30 }
 0x7eb   : > { %5637 = vmatpush1.bf16.msra.mxu1 %v3286_v31  ;;  %v11124_v35 = vpop.permute.xlu1 %3721  ;;  %v8305_v31 = vunpack.i.l.bf16 %v13885_v12  ;;  %v8310_v12 = vunpack.i.l.bf16 %v10130_v32 }
 0x7ec   : > { %v11122_v5 = vpop.permute.xlu0 %3273 }
 0x7ed   : > { %v3294_v51 = vsel %vm3285_vm1, %v11019_v6, %v11122_v5  ;;  %3577 = vrot.lane.b32.xlu1 %v10302_v49, %s13782_s29  ;;  %v3361_v6 = vsel %vm3360_vm0, %v8305_v31, %v10438_v42  ;;  %v3437_v42 = vsel %vm3435_vm12, %v10444_v2, %v10446_v23 }
 0x7ee   : > { %3275 = vrot.lane.b32.xlu0 %v10298_v26, %s13796_s23  ;;  %5638 = vmatprep.subr.bf16.mxu1 %v3294_v51 }
 0x7ef   : > { %5639 = vmatpush1.bf16.msra.mxu1 %v3293_v18  ;;  %v11141_v21 = vpop.permute.xlu1 %4626 }
 0x7f0   : > { %5640 = vmatprep.subr.bf16.mxu1 %v3362_v25  ;;  %v11139_v4 = vpop.permute.xlu0 %4330  ;;  %13887 = vst [vmem:[#allocation147_spill] sm:$0xff] %v11141_v21 }
 0x7f1   : > { %13886 = vst [vmem:[#allocation19_spill] sm:$0xff] %v11139_v4  ;;  %4634 = vrot.lane.b32.xlu1 %v10771_v29, %s13831_s9 }
 0x7f2   : > { %4338 = vrot.lane.b32.xlu0 %v10298_v26, %s13735_s24 }
 0x7f3   : > { %5641 = vmatpush1.bf16.msra.mxu1 %v3361_v6  ;;  %v11150_v18 = vpop.permute.xlu1 %3798 }
 0x7f4   : > { %v3347_v51 = vpop.permute.xlu0 %3346 }
 0x7f5   : > { %v3369_v25 = vsel %vm3360_vm0, %v3347_v51, %v11043_v60  ;;  %v3368_v21 = vsel %vm3360_vm0, %v8306_v20, %v3347_v51  ;;  %4632 = vrot.lane.b32.xlu1 %v10782_v0, %s13831_s9  ;;  %v3436_v20 = vsel %vm3435_vm12, %v8310_v12, %v10444_v2  ;;  %v8315_v12 = vunpack.i.l.bf16 %v10132_v36 }
 0x7f6   : > { %3350 = vrot.lane.b32.xlu0 %v10298_v26, %s13804_s27  ;;  %5642 = vmatprep.subr.bf16.mxu1 %v3369_v25 }
 0x7f7   : > { %5643 = vmatpush1.bf16.msra.mxu1 %v3368_v21  ;;  %v11165_v6 = vpop.permute.xlu1 %3871  ;;  %v8311_v21 = vunpack.i.h.bf16 %v10130_v32  ;;  %v3512_v32 = vsel %vm3510_vm3, %v10454_v28, %v10452_v52 }
 0x7f8   : > { %5644 = vmatprep.subr.bf16.mxu1 %v3437_v42  ;;  %v11163_v31 = vpop.permute.xlu0 %3642 }
 0x7f9   : > { %13888 = vst [vmem:[#allocation148_spill] sm:$0xff] %v11163_v31  ;;  %3652 = vrot.lane.b32.xlu1 %v10302_v49, %s13589_s14  ;;  %v3443_v2 = vsel %vm3435_vm12, %v8311_v21, %v11051_v11  ;;  %v8316_v21 = vunpack.i.h.bf16 %v10132_v36  ;;  %v3587_v36 = vsel %vm3585_vm5, %v10460_v13, %v10462_v33 }
 0x7fa   : > { %4412 = vrot.lane.b32.xlu0 %v10298_v26, %s13749_s17 }
 0x7fb   : > { %5645 = vmatpush1.bf16.msra.mxu1 %v3436_v20  ;;  %v11176_v25 = vpop.permute.xlu1 %3942 }
 0x7fc   : > { %v11174_v51 = vpop.permute.xlu0 %3423  ;;  %13889 = vst [vmem:[#allocation149_spill] sm:$0xff] %v11176_v25 }
 0x7fd   : > { %v3444_v42 = vsel %vm3435_vm12, %v11051_v11, %v11174_v51  ;;  %4709 = vrot.lane.b32.xlu1 %v10771_v29, %s13768_s19  ;;  %v3511_v11 = vsel %vm3510_vm3, %v8315_v12, %v10454_v28  ;;  %v8320_v28 = vunpack.i.l.bf16 %v10134_v15 }
 0x7fe   : > { %3425 = vrot.lane.b32.xlu0 %v10298_v26, %s13811_s12  ;;  %5646 = vmatprep.subr.bf16.mxu1 %v3444_v42 }
 0x7ff   : > { %5647 = vmatpush1.bf16.msra.mxu1 %v3443_v2  ;;  %v11193_v25 = vpop.permute.xlu1 %3948 }
 0x800   : > { %v11191_v20 = vpop.permute.xlu0 %4404  ;;  %5648 = vmatprep.subr.bf16.mxu1 %v3512_v32 }
 0x801   : > { %13890 = vst [vmem:[#allocation150_spill] sm:$0xff] %v11191_v20  ;;  %4707 = vrot.lane.b32.xlu1 %v10782_v0, %s13768_s19 }
 0x802   : > { %4486 = vrot.lane.b32.xlu0 %v10298_v26, %s13754_s28 }
 0x803   : > { %5649 = vmatpush1.bf16.msra.mxu1 %v3511_v11  ;;  %v11202_v2 = vpop.permute.xlu1 %4021 }
 0x804   : > { %v3497_v42 = vpop.permute.xlu0 %3496 }
 0x805   : > { %v3519_v32 = vsel %vm3510_vm3, %v3497_v42, %v11075_v44  ;;  %v3518_v20 = vsel %vm3510_vm3, %v8316_v21, %v3497_v42  ;;  %3727 = vrot.lane.b32.xlu1 %v10302_v49, %s13828_s18  ;;  %v3586_v21 = vsel %vm3585_vm5, %v8320_v28, %v10460_v13  ;;  %v8325_v28 = vunpack.i.l.bf16 %v10136_v8 }
 0x806   : > { %3500 = vrot.lane.b32.xlu0 %v10298_v26, %s13777_s15  ;;  %5650 = vmatprep.subr.bf16.mxu1 %v3519_v32 }
 0x807   : > { %5651 = vmatpush1.bf16.msra.mxu1 %v3518_v20  ;;  %v11217_v11 = vpop.permute.xlu1 %4703  ;;  %v8321_v20 = vunpack.i.h.bf16 %v10134_v15  ;;  %v3662_v15 = vsel %vm3660_vm14, %v10470_v58, %v10468_v9 }
 0x808   : > { %v11215_v12 = vpop.permute.xlu0 %3717  ;;  %5652 = vmatprep.subr.bf16.mxu1 %v3587_v36  ;;  %13892 = vst [vmem:[#allocation152_spill] sm:$0xff] %v11217_v11 }
 0x809   : > { %13891 = vst [vmem:[#allocation151_spill] sm:$0xff] %v11215_v12  ;;  %4784 = vrot.lane.b32.xlu1 %v10771_v29, %s13737_s25  ;;  %v3593_v13 = vsel %vm3585_vm5, %v8321_v20, %v11083_v3  ;;  %v8326_v20 = vunpack.i.h.bf16 %v10136_v8  ;;  %v3737_v8 = vsel %vm3735_vm15, %v10476_v53, %v10478_v10 }
 0x80a   : > { %4561 = vrot.lane.b32.xlu0 %v10298_v26, %s13759_s20 }
 0x80b   : > { %5653 = vmatpush1.bf16.msra.mxu1 %v3586_v21  ;;  %v11228_v32 = vpop.permute.xlu1 %8363 }
 0x80c   : > { %v11226_v42 = vpop.permute.xlu0 %3573  ;;  %13893 = vst [vmem:[#allocation153_spill] sm:$0xff] %v11228_v32 }
 0x80d   : > { %v3594_v36 = vsel %vm3585_vm5, %v11083_v3, %v11226_v42  ;;  %4782 = vrot.lane.b32.xlu1 %v10782_v0, %s13737_s25  ;;  %v3661_v3 = vsel %vm3660_vm14, %v8325_v28, %v10470_v58  ;;  %v8330_v58 = vunpack.i.l.bf16 %v10138_v55 }
 0x80e   : > { %3575 = vrot.lane.b32.xlu0 %v10298_v26, %s13782_s29  ;;  %5654 = vmatprep.subr.bf16.mxu1 %v3594_v36 }
 0x80f   : > { %5655 = vmatpush1.bf16.msra.mxu1 %v3593_v13  ;;  %v11245_v11 = vpop.permute.xlu1 %4776 }
 0x810   : > { %v11243_v21 = vpop.permute.xlu0 %4478  ;;  %5656 = vmatprep.subr.bf16.mxu1 %v3662_v15  ;;  %13895 = vst [vmem:[#allocation155_spill] sm:$0xff] %v11245_v11 }
 0x811   : > { %13894 = vst [vmem:[#allocation154_spill] sm:$0xff] %v11243_v21  ;;  %3802 = vrot.lane.b32.xlu1 %v10302_v49, %s13862_s1 }
 0x812   : > { %4636 = vrot.lane.b32.xlu0 %v10298_v26, %s13831_s9 }
 0x813   : > { %5657 = vmatpush1.bf16.msra.mxu1 %v3661_v3  ;;  %v11254_v13 = vpop.permute.xlu1 %8373 }
 0x814   : > { %v3647_v36 = vpop.permute.xlu0 %3646  ;;  %13896 = vst [vmem:[#allocation156_spill] sm:$0xff] %v11254_v13 }
 0x815   : > { %v3669_v15 = vsel %vm3660_vm14, %v3647_v36, %v11113_v59  ;;  %v3668_v11 = vsel %vm3660_vm14, %v8326_v20, %v3647_v36  ;;  %4858 = vrot.lane.b32.xlu1 %v10771_v29, %s13647_s16  ;;  %v3736_v20 = vsel %vm3735_vm15, %v8330_v58, %v10476_v53  ;;  %v3812_v58 = vsel %vm13622_vm6, %v10486_v17, %v10484_v37 }
 0x816   : > { %3650 = vrot.lane.b32.xlu0 %v10298_v26, %s13589_s14  ;;  %5658 = vmatprep.subr.bf16.mxu1 %v3669_v15  ;;  %s14304_s14 = sld [smem:[#allocation5_spill]] }
 0x817   : > { %5659 = vmatpush1.bf16.msra.mxu1 %v3668_v11  ;;  %v11269_v3 = vpop.permute.xlu1 %4098  ;;  %v8331_v11 = vunpack.i.h.bf16 %v10138_v55  ;;  %v11292_v55 = vld [vmem:[%s13356_s2] ss:$28 sps:$4 sm:$0xff]  }
 0x818   : > { %v11267_v28 = vpop.permute.xlu0 %4092  ;;  %5660 = vmatprep.subr.bf16.mxu1 %v3737_v8 }
 0x819   : > { %13897 = vst [vmem:[#allocation157_spill] sm:$0xff] %v11267_v28  ;;  %4856 = vrot.lane.b32.xlu1 %v10782_v0, %s13647_s16  ;;  %v3743_v53 = vsel %vm3735_vm15, %v8331_v11, %v11124_v35 }
 0x81a   : > { %4711 = vrot.lane.b32.xlu0 %v10298_v26, %s13768_s19 }
 0x81b   : > { %5661 = vmatpush1.bf16.msra.mxu1 %v3736_v20  ;;  %v11280_v15 = vpop.permute.xlu1 %4187  ;;  %v8335_v20 = vunpack.i.l.bf16 %v10140_v48 }
 0x81c   : > { %v11278_v36 = vpop.permute.xlu0 %3723  ;;  %s8224_s6 = smul.u32 224, %s14304_s14 }
 0x81d   : > { %v3744_v8 = vsel %vm3735_vm15, %v11124_v35, %v11278_v36  ;;  %3877 = vrot.lane.b32.xlu1 %v10302_v49, %s13836_s0  ;;  %v11305_v35 = vld [vmem:[%s13356_s2 + $0x3c] ss:$28 sps:$4 sm:$0xff]  }
 0x81e   : > { %3725 = vrot.lane.b32.xlu0 %v10298_v26, %s13828_s18  ;;  %5662 = vmatprep.subr.bf16.mxu1 %v3744_v8  ;;  %v3811_v8 = vsel %vm13622_vm6, %v8335_v20, %v10486_v17  ;;  %v3887_v17 = vsel %vm3885_vm7, %v10492_v50, %v10494_v46  ;;  %v8340_v20 = vunpack.i.l.bf16 %v10142_v22 }
 0x81f   : > { %5663 = vmatpush1.bf16.msra.mxu1 %v3743_v53  ;;  %v11307_v11 = vpop.permute.xlu1 %4185  ;;  %v8336_v53 = vunpack.i.h.bf16 %v10140_v48  ;;  %v11328_v48 = vld [vmem:[%s13356_s2 + $0x38] ss:$28 sps:$4 sm:$0xff]  }
 0x820   : > { %v11300_v13 = vpop.permute.xlu0 %4553  ;;  %5685 = vmatprep.subr.bf16.mxu1 %v3812_v58 }
 0x821   : > { %13898 = vst [vmem:[#allocation158_spill] sm:$0xff] %v11300_v13  ;;  %4932 = vrot.lane.b32.xlu1 %v10771_v29, %s13783_s7 }
 0x822   : > { %4786 = vrot.lane.b32.xlu0 %v10298_v26, %s13737_s25  ;;  %5665 = vmatmul.mubr.bf16.vlgmr.msra.gmra.mrb[60].mxu1 %v11292_v55 }
 0x823   : > { %5686 = vmatpush1.bf16.msra.mxu1 %v3811_v8  ;;  %5674 = vmatprep.mubr.bf16.mxu1 %v11305_v35  ;;  %v11318_v32 = vpop.permute.xlu1 %3202 }
 0x824   : > { %v3797_v58 = vpop.permute.xlu0 %3796 }
 0x825   : > { %v3819_v13 = vsel %vm13622_vm6, %v3797_v58, %v11150_v18  ;;  %v3818_v28 = vsel %vm13622_vm6, %v8336_v53, %v3797_v58  ;;  %4930 = vrot.lane.b32.xlu1 %v10782_v0, %s13783_s7  ;;  %v8341_v58 = vunpack.i.h.bf16 %v10142_v22  ;;  %v3962_v22 = vsel %vm13624_vm8, %v10502_v27, %v10500_v30 }
 0x826   : > { %3800 = vrot.lane.b32.xlu0 %v10298_v26, %s13862_s1  ;;  %5687 = vmatprep.subr.bf16.mxu1 %v3819_v13  ;;  %v11341_v13 = vld [vmem:[%s13356_s2 + $0xc] ss:$28 sps:$4 sm:$0xff]  }
 0x827   : > { %5688 = vmatpush1.bf16.msra.mxu1 %v3818_v28  ;;  %v11343_v53 = vpop.permute.xlu1 %4261  ;;  %v3886_v28 = vsel %vm3885_vm7, %v8340_v20, %v10492_v50  ;;  %v3893_v50 = vsel %vm3885_vm7, %v8341_v58, %v11165_v6  ;;  %v8345_v20 = vunpack.i.l.bf16 %v10144_v62 }
 0x828   : > { %v11336_v8 = vpop.permute.xlu0 %3867  ;;  %5689 = vmatprep.subr.bf16.mxu1 %v3887_v17 }
 0x829   : > { %13899 = vst [vmem:[#allocation159_spill] sm:$0xff] %v11336_v8  ;;  %3952 = vrot.lane.b32.xlu1 %v10302_v49, %s13801_s8 }
 0x82a   : > { %4860 = vrot.lane.b32.xlu0 %v10298_v26, %s13647_s16  ;;  %5675 = vmatmul.mubr.bf16.gmra.mrb[64].mxu1 %v11328_v48 }
 0x82b   : > { %5690 = vmatpush1.bf16.msra.mxu1 %v3886_v28  ;;  %5717 = vmatprep.mubr.bf16.mxu1 %v11341_v13  ;;  %v11356_v8 = vpop.permute.xlu1 %4259 }
 0x82c   : > { %v11353_v17 = vpop.permute.xlu0 %3873 }
 0x82d   : > { %v3894_v21 = vsel %vm3885_vm7, %v11165_v6, %v11353_v17  ;;  %5007 = vrot.lane.b32.xlu1 %v10771_v29, %s13650_s10  ;;  %v3961_v6 = vsel %vm13624_vm8, %v8345_v20, %v10502_v27  ;;  %v8350_v27 = vunpack.i.l.bf16 %v10146_v41 }
 0x82e   : > { %3875 = vrot.lane.b32.xlu0 %v10298_v26, %s13836_s0  ;;  %5691 = vmatprep.subr.bf16.mxu1 %v3894_v21  ;;  %v8346_v21 = vunpack.i.h.bf16 %v10144_v62  ;;  %v4037_v62 = vsel %vm13603_vm13, %v10508_v7, %v10510_v16 }
 0x82f   : > { %5692 = vmatpush1.bf16.msra.mxu1 %v3893_v50  ;;  %v11373_v12 = vpop.permute.xlu1 %3277 }
 0x830   : > { %v11371_v28 = vpop.permute.xlu0 %4628  ;;  %5693 = vmatprep.subr.bf16.mxu1 %v3962_v22 }
 0x831   : > { %13900 = vst [vmem:[#allocation160_spill] sm:$0xff] %v11371_v28  ;;  %5005 = vrot.lane.b32.xlu1 %v10782_v0, %s13650_s10 }
 0x832   : > { %4934 = vrot.lane.b32.xlu0 %v10298_v26, %s13783_s7 }
 0x833   : > { %5694 = vmatpush1.bf16.msra.mxu1 %v3961_v6  ;;  %v11382_v50 = vpop.permute.xlu1 %4336 }
 0x834   : > { %v3947_v58 = vpop.permute.xlu0 %3946 }
 0x835   : > { %v3969_v22 = vsel %vm13624_vm8, %v3947_v58, %v11193_v25  ;;  %v3968_v28 = vsel %vm13624_vm8, %v8346_v21, %v3947_v58  ;;  %4027 = vrot.lane.b32.xlu1 %v10302_v49, %s13843_s26  ;;  %v4036_v21 = vsel %vm13603_vm13, %v8350_v27, %v10508_v7  ;;  %v8355_v27 = vunpack.i.l.bf16 %v10148_v24 }
 0x836   : > { %3950 = vrot.lane.b32.xlu0 %v10298_v26, %s13801_s8  ;;  %5695 = vmatprep.subr.bf16.mxu1 %v3969_v22 }
 0x837   : > { %5696 = vmatpush1.bf16.msra.mxu1 %v3968_v28  ;;  %v11397_v6 = vpop.permute.xlu1 %4334  ;;  %v8351_v28 = vunpack.i.h.bf16 %v10146_v41  ;;  %v4112_v41 = vsel %vm13602_vm9, %v10518_v47, %v10516_v57 }
 0x838   : > { %v11395_v20 = vpop.permute.xlu0 %8358  ;;  %5697 = vmatprep.subr.bf16.mxu1 %v4037_v62 }
 0x839   : > { %13901 = vst [vmem:[#allocation161_spill] sm:$0xff] %v11395_v20  ;;  %5081 = vrot.lane.b32.xlu1 %v10771_v29, %s13651_s11  ;;  %v4043_v7 = vsel %vm13603_vm13, %v8351_v28, %v11202_v2  ;;  %v8356_v28 = vunpack.i.h.bf16 %v10148_v24 }
 0x83a   : > { %5009 = vrot.lane.b32.xlu0 %v10298_v26, %s13650_s10 }
 0x83b   : > { %5698 = vmatpush1.bf16.msra.mxu1 %v4036_v21  ;;  %v11408_v22 = vpop.permute.xlu1 %3352 }
 0x83c   : > { %v11406_v58 = vpop.permute.xlu0 %4023 }
 0x83d   : > { %v4044_v62 = vsel %vm13603_vm13, %v11202_v2, %v11406_v58  ;;  %5079 = vrot.lane.b32.xlu1 %v10782_v0, %s13651_s11  ;;  %v4111_v2 = vsel %vm13602_vm9, %v8355_v27, %v10518_v47  ;;  %v13904_v27 = vld [vmem:[#allocation13_spill] sm:$0xff]  ;;  %vm13913_vm13 = vmmov %vm13911_vm4 }
 0x83e   : > { %4025 = vrot.lane.b32.xlu0 %v10298_v26, %s13843_s26  ;;  %5699 = vmatprep.subr.bf16.mxu1 %v4044_v62 }
 0x83f   : > { %5700 = vmatpush1.bf16.msra.mxu1 %v4043_v7  ;;  %v11425_v20 = vpop.permute.xlu1 %4410 }
 0x840   : > { %v11423_v21 = vpop.permute.xlu0 %4701  ;;  %5701 = vmatprep.subr.bf16.mxu1 %v4112_v41 }
 0x841   : > { %13902 = vst [vmem:[#allocation162_spill] sm:$0xff] %v11423_v21  ;;  %4102 = vrot.lane.b32.xlu1 %v10302_v49, %s13855_s21 }
 0x842   : > { %5083 = vrot.lane.b32.xlu0 %v10298_v26, %s13651_s11 }
 0x843   : > { %5702 = vmatpush1.bf16.msra.mxu1 %v4111_v2  ;;  %v11434_v7 = vpop.permute.xlu1 %4408 }
 0x844   : > { %v4097_v62 = vpop.permute.xlu0 %4096 }
 0x845   : > { %v4119_v41 = vsel %vm13602_vm9, %v4097_v62, %v11269_v3  ;;  %v4118_v21 = vsel %vm13602_vm9, %v8356_v28, %v4097_v62  ;;  %3206 = vrot.lane.b32.xlu1 %v10306_v34, %s13863_s5  ;;  %vm4275_vm9 = vcmask 973824  }
 0x846   : > { %4100 = vrot.lane.b32.xlu0 %v10298_v26, %s13855_s21  ;;  %5703 = vmatprep.subr.bf16.mxu1 %v4119_v41 }
 0x847   : > { %5704 = vmatpush1.bf16.msra.mxu1 %v4118_v21  ;;  %v11446_v24 = vpop.permute.xlu1 %3427  ;;  %v13907_v21 = vld [vmem:[#allocation16_spill] sm:$0xff] }
 0x848   : > { %v11443_v47 = vpop.permute.xlu0 %4017  ;;  %5705 = vmatprep.subr.bf16.mxu1 %v10222_v1  ;;  %v13906_v1 = vld [vmem:[#allocation20_spill] sm:$0xff] }
 0x849   : > { %13903 = vst [vmem:[#allocation163_spill] sm:$0xff] %v11443_v47  ;;  %4852 = vrot.lane.b32.xlu1 %v10234_v63, %s13647_s16  ;;  %v4202_v62 = vsel %vm13908_vm10, %v13907_v21, %v13906_v1  ;;  %vm13912_vm10 = vmmov %vm13911_vm4 }
 0x84a   : > { %3204 = vrot.lane.b32.xlu0 %v13904_v27, %s13863_s5 }
 0x84b   : > { %5706 = vmatpush1.bf16.msra.mxu1 %v10220_v19  ;;  %v11456_v28 = vpop.permute.xlu1 %4484 }
 0x84c   : > { %v11453_v2 = vpop.permute.xlu0 %4778  ;;  %5707 = vmatprep.subr.bf16.mxu1 %v10771_v29  ;;  %v13910_v29 = vld [vmem:[#allocation21_spill] sm:$0xff] }
 0x84d   : > { %13905 = vst [vmem:[#allocation13_spill] sm:$0xff] %v11453_v2  ;;  %3281 = vrot.lane.b32.xlu1 %v10306_v34, %s13796_s23  ;;  %v4201_v2 = vsel %vm13911_vm4, %v13910_v29, %v13907_v21  ;;  %v4208_v21 = vsel %vm13913_vm13, %v11307_v11, %v11280_v15  ;;  %v13915_v11 = vld [vmem:[#allocation28_spill] sm:$0xff]  ;;  %vm13928_vm4 = vcmask 957440  }
 0x84e   : > { %4850 = vrot.lane.b32.xlu0 %v10232_v45, %s13647_s16  ;;  %vm13931_vm13 = vmmov %vm13928_vm4 }
 0x84f   : > { %5708 = vmatpush1.bf16.msra.mxu1 %v10782_v0  ;;  %v11468_v19 = vpop.permute.xlu1 %4482 }
 0x850   : > { %v11466_v41 = vpop.permute.xlu0 %8368  ;;  %5709 = vmatprep.subr.bf16.mxu1 %v4202_v62 }
 0x851   : > { %13909 = vst [vmem:[#allocation20_spill] sm:$0xff] %v11466_v41  ;;  %4193 = vrot.lane.b32.xlu1 %v13904_v27, %s13734_s13 }
 0x852   : > { %3279 = vrot.lane.b32.xlu0 %v13904_v27, %s13796_s23 }
 0x853   : > { %5710 = vmatpush1.bf16.msra.mxu1 %v4201_v2  ;;  %v11479_v47 = vpop.permute.xlu1 %3502  ;;  %v13914_v2 = vld [vmem:[#allocation26_spill] sm:$0xff] }
 0x854   : > { %v11477_v0 = vpop.permute.xlu0 %4189  ;;  %v4277_v29 = vsel %vm4275_vm9, %v13914_v2, %v10540_v14 }
 0x855   : > { %v4209_v62 = vsel %vm13912_vm10, %v11280_v15, %v11477_v0  ;;  %3356 = vrot.lane.b32.xlu1 %v10306_v34, %s13804_s27  ;;  %vm13632_vm10 = vcmask 318464  }
 0x856   : > { %4191 = vrot.lane.b32.xlu0 %v10302_v49, %s13734_s13  ;;  %5711 = vmatprep.subr.bf16.mxu1 %v4209_v62  ;;  %v4276_v62 = vsel %vm4275_vm9, %v13915_v11, %v13914_v2  ;;  %v13919_v2 = vld [vmem:[#allocation29_spill] sm:$0xff] }
 0x857   : > { %5712 = vmatpush1.bf16.msra.mxu1 %v4208_v21  ;;  %v11494_v31 = vpop.permute.xlu1 %4559  ;;  %v13916_v21 = vld [vmem:[#allocation30_spill] sm:$0xff] }
 0x858   : > { %v3201_v41 = vpop.permute.xlu0 %3200  ;;  %5713 = vmatprep.subr.bf16.mxu1 %v4277_v29  ;;  %v13917_v29 = vld [vmem:[#allocation27_spill] sm:$0xff] }
 0x859   : > { %v3221_v4 = vsel %vm3210_vm11, %v3201_v41, %v11318_v32  ;;  %v3220_v15 = vsel %vm3210_vm11, %v11011_v61, %v3201_v41  ;;  %4267 = vrot.lane.b32.xlu1 %v13904_v27, %s13741_s30  ;;  %v3289_v63 = vsel %vm3285_vm1, %v13917_v29, %v13916_v21 }
 0x85a   : > { %3354 = vrot.lane.b32.xlu0 %v13904_v27, %s13804_s27  ;;  %5846 = vmatprep.subr.bf16.mxu0 %v3221_v4  ;;  %v4283_v4 = vsel %vm4275_vm9, %v11356_v8, %v11343_v53  ;;  %v11533_v8 = vld [vmem:[%s13356_s2 + $0x8] ss:$28 sps:$4 sm:$0xff]  }
 0x85b   : > { %5714 = vmatpush1.bf16.msra.mxu1 %v4276_v62  ;;  %5847 = vmatpush1.bf16.msra.mxu0 %v3220_v15  ;;  %v11512_v61 = vpop.permute.xlu1 %4557  ;;  %v13920_v15 = vld [vmem:[#allocation32_spill] sm:$0xff] }
 0x85c   : > { %v11510_v45 = vpop.permute.xlu0 %4263  ;;  %5848 = vmatprep.subr.bf16.mxu0 %v3289_v63  ;;  %v3288_v63 = vsel %vm3285_vm1, %v10430_v39, %v13917_v29  ;;  %v4351_v11 = vsel %vm406_vm2, %v13920_v15, %v13919_v2  ;;  %v11544_v29 = vld [vmem:[%s13356_s2 + $0x44] ss:$28 sps:$4 sm:$0xff]  }
 0x85d   : > { %13918 = vst [vmem:[#allocation16_spill] sm:$0xff] %v11510_v45  ;;  %v4284_v41 = vsel %vm4275_vm9, %v11343_v53, %v11510_v45  ;;  %3431 = vrot.lane.b32.xlu1 %v10306_v34, %s13811_s12  ;;  %13921 = vst [vmem:[#allocation21_spill] sm:$0xff] %v11544_v29 }
 0x85e   : > { %4265 = vrot.lane.b32.xlu0 %v10302_v49, %s13741_s30  ;;  %5715 = vmatprep.subr.bf16.mxu1 %v4284_v41 }
 0x85f   : > { %5716 = vmatpush1.bf16.msra.mxu1 %v4283_v4  ;;  %5849 = vmatpush1.bf16.msra.mxu0 %v3288_v63  ;;  %v11535_v62 = vpop.permute.xlu1 %3577  ;;  %v13922_v4 = vld [vmem:[#allocation34_spill] sm:$0xff] }
 0x860   : > { %v3276_v53 = vpop.permute.xlu0 %3275  ;;  %5738 = vmatprep.subr.bf16.mxu1 %v4351_v11  ;;  %v4350_v63 = vsel %vm406_vm2, %v13922_v4, %v13920_v15  ;;  %v13924_v11 = vld [vmem:[#allocation31_spill] sm:$0xff]  ;;  %v11578_v4 = vld [vmem:[%s13356_s2 + $0x40] ss:$28 sps:$4 sm:$0xff]  }
 0x861   : > { %v3296_v41 = vsel %vm3285_vm1, %v3276_v53, %v11373_v12  ;;  %v3295_v39 = vsel %vm3285_vm1, %v11122_v5, %v3276_v53  ;;  %4342 = vrot.lane.b32.xlu1 %v13904_v27, %s13735_s24  ;;  %v13923_v5 = vld [vmem:[#allocation36_spill] sm:$0xff] }
 0x862   : > { %3429 = vrot.lane.b32.xlu0 %v13904_v27, %s13811_s12  ;;  %5850 = vmatprep.subr.bf16.mxu0 %v3296_v41  ;;  %v3364_v53 = vsel %vm3360_vm0, %v13924_v11, %v13923_v5  ;;  %v4357_v41 = vsel %vm406_vm2, %v11397_v6, %v11382_v50 }
 0x863   : > { %5718 = vmatmul.mubr.bf16.vlgmr.msra.gmra.mrb[60].mxu1 %v11533_v8  ;;  %5851 = vmatpush1.bf16.msra.mxu0 %v3295_v39  ;;  %v11559_v45 = vpop.permute.xlu1 %4634  ;;  %v3363_v39 = vsel %vm3360_vm0, %v10436_v40, %v13924_v11  ;;  %v11592_v11 = vld [vmem:[%s13356_s2 + $0x14] ss:$28 sps:$4 sm:$0xff]  }
 0x864   : > { %5739 = vmatpush1.bf16.msra.mxu1 %v4350_v63  ;;  %v11557_v2 = vpop.permute.xlu0 %4338  ;;  %5852 = vmatprep.subr.bf16.mxu0 %v3364_v53  ;;  %v13926_v53 = vld [vmem:[#allocation33_spill] sm:$0xff]  ;;  %13929 = vst [vmem:[#allocation28_spill] sm:$0xff] %v11592_v11 }
 0x865   : > { %13925 = vst [vmem:[#allocation26_spill] sm:$0xff] %v11557_v2  ;;  %v4358_v15 = vsel %vm406_vm2, %v11382_v50, %v11557_v2  ;;  %5727 = vmatprep.mubr.bf16.mxu1 %v11544_v29  ;;  %3506 = vrot.lane.b32.xlu1 %v10306_v34, %s13777_s15 }
 0x866   : > { %4340 = vrot.lane.b32.xlu0 %v10302_v49, %s13735_s24  ;;  %5740 = vmatprep.subr.bf16.mxu1 %v4358_v15  ;;  %v13927_v15 = vld [vmem:[#allocation38_spill] sm:$0xff] }
 0x867   : > { %5853 = vmatpush1.bf16.msra.mxu0 %v3363_v39  ;;  %v4425_v29 = vsel %vm13928_vm4, %v13927_v15, %v13926_v53  ;;  %v11583_v50 = vpop.permute.xlu1 %4632 }
 0x868   : > { %5741 = vmatpush1.bf16.msra.mxu1 %v4357_v41  ;;  %v3351_v63 = vpop.permute.xlu0 %3350  ;;  %v13930_v41 = vld [vmem:[#allocation40_spill] sm:$0xff] }
 0x869   : > { %5742 = vmatprep.subr.bf16.mxu1 %v4425_v29  ;;  %v3371_v6 = vsel %vm3360_vm0, %v3351_v63, %v11408_v22  ;;  %v3370_v40 = vsel %vm3360_vm0, %v11043_v60, %v3351_v63  ;;  %v4424_v39 = vsel %vm13931_vm13, %v13930_v41, %v13927_v15  ;;  %4416 = vrot.lane.b32.xlu1 %v13904_v27, %s13749_s17  ;;  %v13932_v60 = vld [vmem:[#allocation42_spill] sm:$0xff]  ;;  %v13933_v29 = vld [vmem:[#allocation35_spill] sm:$0xff]  ;;  %vm13935_vm13 = vmmov %vm13928_vm4 }
 0x86a   : > { %3504 = vrot.lane.b32.xlu0 %v13904_v27, %s13777_s15  ;;  %5854 = vmatprep.subr.bf16.mxu0 %v3371_v6  ;;  %v3439_v63 = vsel %vm3435_vm12, %v13933_v29, %v13932_v60  ;;  %v4431_v6 = vsel %vm13935_vm13, %v11434_v7, %v11425_v20  ;;  %vm13619_vm13 = vcmask 302080  }
 0x86b   : > { %5728 = vmatmul.mubr.bf16.gmra.mrb[64].mxu1 %v11578_v4  ;;  %5855 = vmatpush1.bf16.msra.mxu0 %v3370_v40  ;;  %v11607_v2 = vpop.permute.xlu1 %3652  ;;  %v3438_v40 = vsel %vm3435_vm12, %v10446_v23, %v13933_v29  ;;  %v13938_v23 = vld [vmem:[#allocation46_spill] sm:$0xff] }
 0x86c   : > { %5743 = vmatpush1.bf16.msra.mxu1 %v4424_v39  ;;  %v11605_v53 = vpop.permute.xlu0 %4412  ;;  %5856 = vmatprep.subr.bf16.mxu0 %v3439_v63  ;;  %v13936_v39 = vld [vmem:[#allocation37_spill] sm:$0xff]  ;;  %v13937_v63 = vld [vmem:[#allocation44_spill] sm:$0xff] }
 0x86d   : > { %13934 = vst [vmem:[#allocation30_spill] sm:$0xff] %v11605_v53  ;;  %v4432_v15 = vsel %vm13928_vm4, %v11425_v20, %v11605_v53  ;;  %5770 = vmatprep.mubr.bf16.mxu1 %v11592_v11  ;;  %3581 = vrot.lane.b32.xlu1 %v10306_v34, %s13782_s29  ;;  %v4500_v11 = vsel %vm13632_vm10, %v13937_v63, %v13936_v39  ;;  %vm13617_vm4 = vcmask 310272  }
 0x86e   : > { %4414 = vrot.lane.b32.xlu0 %v10302_v49, %s13749_s17  ;;  %5744 = vmatprep.subr.bf16.mxu1 %v4432_v15  ;;  %v4499_v29 = vsel %vm13632_vm10, %v13938_v23, %v13937_v63  ;;  %v13940_v15 = vld [vmem:[#allocation39_spill] sm:$0xff]  ;;  %v4506_v63 = vsel %vm13632_vm10, %v11468_v19, %v11456_v28  ;;  %v13943_v23 = vld [vmem:[#allocation41_spill] sm:$0xff] }
 0x86f   : > { %5857 = vmatpush1.bf16.msra.mxu0 %v3438_v40  ;;  %v11626_v53 = vpop.permute.xlu1 %4709 }
 0x870   : > { %5745 = vmatpush1.bf16.msra.mxu1 %v4431_v6  ;;  %v3426_v41 = vpop.permute.xlu0 %3425 }
 0x871   : > { %5746 = vmatprep.subr.bf16.mxu1 %v4500_v11  ;;  %v3446_v20 = vsel %vm3435_vm12, %v3426_v41, %v11446_v24  ;;  %v3445_v7 = vsel %vm3435_vm12, %v11174_v51, %v3426_v41  ;;  %4490 = vrot.lane.b32.xlu1 %v13904_v27, %s13754_s28  ;;  %v13939_v11 = vld [vmem:[#allocation48_spill] sm:$0xff] }
 0x872   : > { %3579 = vrot.lane.b32.xlu0 %v13904_v27, %s13782_s29  ;;  %5858 = vmatprep.subr.bf16.mxu0 %v3446_v20  ;;  %v3514_v6 = vsel %vm3510_vm3, %v13940_v15, %v13939_v11  ;;  %v3513_v20 = vsel %vm3510_vm3, %v10452_v52, %v13940_v15  ;;  %v13945_v52 = vld [vmem:[#allocation52_spill] sm:$0xff] }
 0x873   : > { %5859 = vmatpush1.bf16.msra.mxu0 %v3445_v7  ;;  %v11644_v51 = vpop.permute.xlu1 %4707 }
 0x874   : > { %5747 = vmatpush1.bf16.msra.mxu1 %v4499_v29  ;;  %v11642_v40 = vpop.permute.xlu0 %4486  ;;  %5860 = vmatprep.subr.bf16.mxu0 %v3514_v6  ;;  %v13944_v29 = vld [vmem:[#allocation50_spill] sm:$0xff] }
 0x875   : > { %13941 = vst [vmem:[#allocation27_spill] sm:$0xff] %v11642_v40  ;;  %v4507_v41 = vsel %vm13632_vm10, %v11456_v28, %v11642_v40  ;;  %3656 = vrot.lane.b32.xlu1 %v10306_v34, %s13942_s3  ;;  %v4575_v6 = vsel %vm13617_vm4, %v13944_v29, %v13943_v23  ;;  %v4574_v15 = vsel %vm13617_vm4, %v13945_v52, %v13944_v29  ;;  %v13949_v52 = vld [vmem:[#allocation45_spill] sm:$0xff] }
 0x876   : > { %4488 = vrot.lane.b32.xlu0 %v10302_v49, %s13754_s28  ;;  %5748 = vmatprep.subr.bf16.mxu1 %v4507_v41  ;;  %v13946_v41 = vld [vmem:[#allocation54_spill] sm:$0xff]  ;;  %v4581_v29 = vsel %vm13617_vm4, %v11512_v61, %v11494_v31 }
 0x877   : > { %5861 = vmatpush1.bf16.msra.mxu0 %v3513_v20  ;;  %v11662_v40 = vpop.permute.xlu1 %3727 }
 0x878   : > { %5749 = vmatpush1.bf16.msra.mxu1 %v4506_v63  ;;  %v3501_v7 = vpop.permute.xlu0 %3500  ;;  %v13947_v63 = vld [vmem:[#allocation43_spill] sm:$0xff] }
 0x879   : > { %5750 = vmatprep.subr.bf16.mxu1 %v4575_v6  ;;  %v3521_v28 = vsel %vm3510_vm3, %v3501_v7, %v11479_v47  ;;  %v3520_v19 = vsel %vm3510_vm3, %v11075_v44, %v3501_v7  ;;  %4565 = vrot.lane.b32.xlu1 %v13904_v27, %s13759_s20  ;;  %v3589_v20 = vsel %vm3585_vm5, %v13947_v63, %v13946_v41 }
 0x87a   : > { %3654 = vrot.lane.b32.xlu0 %v13904_v27, %s13942_s3  ;;  %5862 = vmatprep.subr.bf16.mxu0 %v3521_v28  ;;  %v3588_v28 = vsel %vm3585_vm5, %v10462_v33, %v13947_v63  ;;  %v13951_v33 = vld [vmem:[#allocation58_spill] sm:$0xff] }
 0x87b   : > { %5863 = vmatpush1.bf16.msra.mxu0 %v3520_v19  ;;  %v11680_v44 = vpop.permute.xlu1 %4784 }
 0x87c   : > { %5751 = vmatpush1.bf16.msra.mxu1 %v4574_v15  ;;  %v11678_v6 = vpop.permute.xlu0 %4561  ;;  %5864 = vmatprep.subr.bf16.mxu0 %v3589_v20  ;;  %v13950_v15 = vld [vmem:[#allocation56_spill] sm:$0xff] }
 0x87d   : > { %13948 = vst [vmem:[#allocation32_spill] sm:$0xff] %v11678_v6  ;;  %v4582_v7 = vsel %vm13617_vm4, %v11494_v31, %v11678_v6  ;;  %3731 = vrot.lane.b32.xlu1 %v10306_v34, %s13828_s18  ;;  %v4650_v20 = vsel %vm13619_vm13, %v13950_v15, %v13949_v52  ;;  %v4649_v63 = vsel %vm13619_vm13, %v13951_v33, %v13950_v15  ;;  %vm13621_vm4 = vcmask 236544   ;;  %v13955_v33 = vld [vmem:[#allocation49_spill] sm:$0xff] }
 0x87e   : > { %4563 = vrot.lane.b32.xlu0 %v10302_v49, %s13759_s20  ;;  %5752 = vmatprep.subr.bf16.mxu1 %v4582_v7  ;;  %v13952_v7 = vld [vmem:[#allocation60_spill] sm:$0xff]  ;;  %v4656_v15 = vsel %vm13619_vm13, %v11583_v50, %v11559_v45 }
 0x87f   : > { %5865 = vmatpush1.bf16.msra.mxu0 %v3588_v28  ;;  %v11698_v6 = vpop.permute.xlu1 %4782 }
 0x880   : > { %5753 = vmatpush1.bf16.msra.mxu1 %v4581_v29  ;;  %v3576_v19 = vpop.permute.xlu0 %3575  ;;  %v13953_v29 = vld [vmem:[#allocation47_spill] sm:$0xff] }
 0x881   : > { %5754 = vmatprep.subr.bf16.mxu1 %v4650_v20  ;;  %v3596_v31 = vsel %vm3585_vm5, %v3576_v19, %v11535_v62  ;;  %v3595_v61 = vsel %vm3585_vm5, %v11226_v42, %v3576_v19  ;;  %4640 = vrot.lane.b32.xlu1 %v13904_v27, %s13831_s9  ;;  %v3664_v28 = vsel %vm3660_vm14, %v13953_v29, %v13952_v7 }
 0x882   : > { %3729 = vrot.lane.b32.xlu0 %v13904_v27, %s13828_s18  ;;  %5866 = vmatprep.subr.bf16.mxu0 %v3596_v31  ;;  %v3663_v31 = vsel %vm3660_vm14, %v10468_v9, %v13953_v29  ;;  %v13957_v9 = vld [vmem:[#allocation64_spill] sm:$0xff] }
 0x883   : > { %5867 = vmatpush1.bf16.msra.mxu0 %v3595_v61  ;;  %v11716_v42 = vpop.permute.xlu1 %3802 }
 0x884   : > { %5755 = vmatpush1.bf16.msra.mxu1 %v4649_v63  ;;  %v11714_v20 = vpop.permute.xlu0 %4636  ;;  %5868 = vmatprep.subr.bf16.mxu0 %v3664_v28  ;;  %v13956_v63 = vld [vmem:[#allocation62_spill] sm:$0xff] }
 0x885   : > { %13954 = vst [vmem:[#allocation34_spill] sm:$0xff] %v11714_v20  ;;  %v4657_v19 = vsel %vm13619_vm13, %v11559_v45, %v11714_v20  ;;  %3806 = vrot.lane.b32.xlu1 %v10306_v34, %s13862_s1  ;;  %v4725_v28 = vsel %vm13621_vm4, %v13956_v63, %v13955_v33  ;;  %v4724_v29 = vsel %vm13621_vm4, %v13957_v9, %v13956_v63  ;;  %v13961_v9 = vld [vmem:[#allocation53_spill] sm:$0xff]  ;;  %vm13963_vm13 = vcmask 228352  }
 0x886   : > { %4638 = vrot.lane.b32.xlu0 %v10302_v49, %s13831_s9  ;;  %5756 = vmatprep.subr.bf16.mxu1 %v4657_v19  ;;  %v13958_v19 = vld [vmem:[#allocation66_spill] sm:$0xff]  ;;  %v4731_v63 = vsel %vm13621_vm4, %v11644_v51, %v11626_v53 }
 0x887   : > { %5869 = vmatpush1.bf16.msra.mxu0 %v3663_v31  ;;  %v11734_v20 = vpop.permute.xlu1 %4858 }
 0x888   : > { %5757 = vmatpush1.bf16.msra.mxu1 %v4656_v15  ;;  %v3651_v61 = vpop.permute.xlu0 %3650  ;;  %v13959_v15 = vld [vmem:[#allocation51_spill] sm:$0xff] }
 0x889   : > { %5758 = vmatprep.subr.bf16.mxu1 %v4725_v28  ;;  %v3671_v45 = vsel %vm3660_vm14, %v3651_v61, %v11607_v2  ;;  %v3670_v50 = vsel %vm3660_vm14, %v11113_v59, %v3651_v61  ;;  %4715 = vrot.lane.b32.xlu1 %v13904_v27, %s13768_s19  ;;  %v3739_v31 = vsel %vm3735_vm15, %v13959_v15, %v13958_v19 }
 0x88a   : > { %3804 = vrot.lane.b32.xlu0 %v13904_v27, %s13862_s1  ;;  %5870 = vmatprep.subr.bf16.mxu0 %v3671_v45  ;;  %v3738_v45 = vsel %vm3735_vm15, %v10478_v10, %v13959_v15  ;;  %v13965_v15 = vld [vmem:[#allocation55_spill] sm:$0xff] }
 0x88b   : > { %5871 = vmatpush1.bf16.msra.mxu0 %v3670_v50  ;;  %v4857_v59 = vpop.permute.xlu1 %4856 }
 0x88c   : > { %5759 = vmatpush1.bf16.msra.mxu1 %v4724_v29  ;;  %v11750_v28 = vpop.permute.xlu0 %4711  ;;  %5872 = vmatprep.subr.bf16.mxu0 %v3739_v31  ;;  %v13962_v29 = vld [vmem:[#allocation68_spill] sm:$0xff] }
 0x88d   : > { %13960 = vst [vmem:[#allocation36_spill] sm:$0xff] %v11750_v28  ;;  %v4732_v61 = vsel %vm13621_vm4, %v11626_v53, %v11750_v28  ;;  %3881 = vrot.lane.b32.xlu1 %v10306_v34, %s13836_s0  ;;  %v4799_v31 = vsel %vm13963_vm13, %v13962_v29, %v13961_v9  ;;  %vm13964_vm4 = vmmov %vm13963_vm13 }
 0x88e   : > { %4713 = vrot.lane.b32.xlu0 %v10302_v49, %s13768_s19  ;;  %5760 = vmatprep.subr.bf16.mxu1 %v4732_v61  ;;  %v4798_v10 = vsel %vm13964_vm4, %v10736_v56, %v13962_v29  ;;  %v3814_v61 = vsel %vm13622_vm6, %v13965_v15, %v10748_v38  ;;  %vm13966_vm13 = vmmov %vm13964_vm4  ;;  %v4805_v56 = vsel %vm13964_vm4, %v11698_v6, %v11680_v44 }
 0x88f   : > { %5873 = vmatpush1.bf16.msra.mxu0 %v3738_v45  ;;  %v11768_v28 = vpop.permute.xlu1 %3877 }
 0x890   : > { %5761 = vmatpush1.bf16.msra.mxu1 %v4731_v63  ;;  %v3726_v50 = vpop.permute.xlu0 %3725 }
 0x891   : > { %5762 = vmatprep.subr.bf16.mxu1 %v4799_v31  ;;  %v3746_v53 = vsel %vm3735_vm15, %v3726_v50, %v11662_v40  ;;  %v3745_v51 = vsel %vm3735_vm15, %v11278_v36, %v3726_v50  ;;  %4790 = vrot.lane.b32.xlu1 %v13904_v27, %s13737_s25  ;;  %v3813_v50 = vsel %vm13622_vm6, %v10484_v37, %v13965_v15  ;;  %v13967_v31 = vld [vmem:[#allocation57_spill] sm:$0xff] }
 0x892   : > { %3879 = vrot.lane.b32.xlu0 %v13904_v27, %s13836_s0  ;;  %5874 = vmatprep.subr.bf16.mxu0 %v3746_v53 }
 0x893   : > { %5875 = vmatpush1.bf16.msra.mxu0 %v3745_v51  ;;  %v11786_v36 = vpop.permute.xlu1 %4932 }
 0x894   : > { %5763 = vmatpush1.bf16.msra.mxu1 %v4798_v10  ;;  %v11784_v63 = vpop.permute.xlu0 %4786  ;;  %5897 = vmatprep.subr.bf16.mxu0 %v3814_v61  ;;  %v13971_v10 = vld [vmem:[#allocation59_spill] sm:$0xff] }
 0x895   : > { %v4806_v45 = vsel %vm13966_vm13, %v11680_v44, %v11784_v63  ;;  %3956 = vrot.lane.b32.xlu1 %v10306_v34, %s13801_s8  ;;  %vm13968_vm13 = vcmask 220160  }
 0x896   : > { %4788 = vrot.lane.b32.xlu0 %v10302_v49, %s13737_s25  ;;  %5764 = vmatprep.subr.bf16.mxu1 %v4806_v45  ;;  %v4873_v53 = vsel %vm13968_vm13, %v10758_v43, %v13967_v31  ;;  %vm13969_vm4 = vmmov %vm13968_vm13  ;;  %vm13623_vm13 = vcmask 154624   ;;  %v11839_v45 = vld [vmem:[%s13356_s2 + $0x10] ss:$28 sps:$4 sm:$0xff]  }
 0x897   : > { %5877 = vmatmul.mubr.bf16.vlgmr.msra.gmra.mrb[36].mxu0 %v11292_v55  ;;  %v4931_v51 = vpop.permute.xlu1 %4930  ;;  %v4872_v37 = vsel %vm13969_vm4, %v10768_v54, %v10758_v43  ;;  %v13970_v55 = vld [vmem:[#allocation74_spill] sm:$0xff]  ;;  %v4879_v43 = vsel %vm13969_vm4, %v4857_v59, %v11734_v20  ;;  %v3888_v54 = vsel %vm3885_vm7, %v10494_v46, %v13971_v10 }
 0x898   : > { %5765 = vmatpush1.bf16.msra.mxu1 %v4805_v56  ;;  %5898 = vmatpush1.bf16.msra.mxu0 %v3813_v50  ;;  %v3801_v29 = vpop.permute.xlu0 %3800  ;;  %v3889_v15 = vsel %vm3885_vm7, %v13971_v10, %v13970_v55  ;;  %v13973_v50 = vld [vmem:[#allocation61_spill] sm:$0xff] }
 0x899   : > { %5766 = vmatprep.subr.bf16.mxu1 %v4873_v53  ;;  %v3821_v6 = vsel %vm13622_vm6, %v3801_v29, %v11716_v42  ;;  %v3820_v44 = vsel %vm13622_vm6, %v11150_v18, %v3801_v29  ;;  %5886 = vmatprep.mubr.bf16.mxu0 %v11305_v35  ;;  %vm13972_vm6 = vmmov %vm13969_vm4  ;;  %v13974_v29 = vld [vmem:[#allocation76_spill] sm:$0xff] }
 0x89a   : > { %3954 = vrot.lane.b32.xlu0 %v13904_v27, %s13801_s8  ;;  %5899 = vmatprep.subr.bf16.mxu0 %v3821_v6  ;;  %v11852_v6 = vld [vmem:[%s13356_s2 + $0x4c] ss:$28 sps:$4 sm:$0xff]  }
 0x89b   : > { %4864 = vrot.lane.b32.xlu1 %v13904_v27, %s13647_s16  ;;  %v11822_v35 = vpop.permute.xlu1 %3952 }
 0x89c   : > { %5767 = vmatpush1.bf16.msra.mxu1 %v4872_v37  ;;  %5900 = vmatpush1.bf16.msra.mxu0 %v3820_v44  ;;  %v11820_v18 = vpop.permute.xlu0 %4860  ;;  %v13977_v37 = vld [vmem:[#allocation63_spill] sm:$0xff] }
 0x89d   : > { %5901 = vmatprep.subr.bf16.mxu0 %v3889_v15  ;;  %v4880_v61 = vsel %vm13972_vm6, %v11734_v20, %v11820_v18  ;;  %v4948_v20 = vsel %vm13623_vm13, %v13974_v29, %v13973_v50  ;;  %vm13980_vm6 = vcmask 146432  }
 0x89e   : > { %4862 = vrot.lane.b32.xlu0 %v10302_v49, %s13647_s16  ;;  %5768 = vmatprep.subr.bf16.mxu1 %v4880_v61  ;;  %vm13982_vm4 = vmmov %vm13980_vm6 }
 0x89f   : > { %4031 = vrot.lane.b32.xlu1 %v10306_v34, %s13843_s26  ;;  %5887 = vmatmul.mubr.bf16.gmra.mrb[40].mxu0 %v11328_v48  ;;  %v5008_v59 = vpop.permute.xlu1 %5007  ;;  %v13975_v48 = vld [vmem:[#allocation78_spill] sm:$0xff] }
 0x8a0   : > { %5769 = vmatpush1.bf16.msra.mxu1 %v4879_v43  ;;  %5902 = vmatpush1.bf16.msra.mxu0 %v3888_v54  ;;  %v3876_v56 = vpop.permute.xlu0 %3875  ;;  %v4947_v44 = vsel %vm13623_vm13, %v13975_v48, %v13974_v29  ;;  %v4954_v43 = vsel %vm13623_vm13, %v4931_v51, %v11786_v36  ;;  %v3963_v54 = vsel %vm13624_vm8, %v10500_v30, %v13977_v37  ;;  %v8558_v29 = vmov 3  }
 0x8a1   : > { %5791 = vmatprep.subr.bf16.mxu1 %v4948_v20  ;;  %v3896_v53 = vsel %vm3885_vm7, %v3876_v56, %v11768_v28  ;;  %v3895_v46 = vsel %vm3885_vm7, %v11353_v17, %v3876_v56  ;;  %5929 = vmatprep.mubr.bf16.mxu0 %v11341_v13  ;;  %v13976_v17 = vld [vmem:[#allocation80_spill] sm:$0xff]  ;;  %v11884_v56 = vld [vmem:[%s13356_s2 + $0x48] ss:$28 sps:$4 sm:$0xff]  }
 0x8a2   : > { %4029 = vrot.lane.b32.xlu0 %v13904_v27, %s13843_s26  ;;  %5903 = vmatprep.subr.bf16.mxu0 %v3896_v53  ;;  %v3964_v10 = vsel %vm13624_vm8, %v13977_v37, %v13976_v17  ;;  %v13978_v53 = vld [vmem:[#allocation65_spill] sm:$0xff] }
 0x8a3   : > { %4938 = vrot.lane.b32.xlu1 %v13904_v27, %s13783_s7  ;;  %5771 = vmatmul.mubr.bf16.vlgmr.msra.gmra.mrb[60].mxu1 %v11839_v45  ;;  %v5006_v15 = vpop.permute.xlu1 %5005 }
 0x8a4   : > { %5792 = vmatpush1.bf16.msra.mxu1 %v4947_v44  ;;  %5904 = vmatpush1.bf16.msra.mxu0 %v3895_v46  ;;  %v11866_v13 = vpop.permute.xlu0 %4934  ;;  %v13979_v46 = vld [vmem:[#allocation82_spill] sm:$0xff]  ;;  %v13981_v44 = vld [vmem:[#allocation84_spill] sm:$0xff] }
 0x8a5   : > { %5905 = vmatprep.subr.bf16.mxu0 %v3964_v10  ;;  %v4955_v61 = vsel %vm13623_vm13, %v11786_v36, %v11866_v13  ;;  %5780 = vmatprep.mubr.bf16.mxu1 %v11852_v6  ;;  %v5022_v36 = vsel %vm13980_vm6, %v13979_v46, %v13978_v53  ;;  %v5021_v37 = vsel %vm13982_vm4, %v13981_v44, %v13979_v46  ;;  %v13983_v10 = vld [vmem:[#allocation86_spill] sm:$0xff]  ;;  %vm13985_vm6 = vcmask 72704   ;;  %vm13986_vm13 = vmmov %vm13982_vm4  ;;  %v13989_v44 = vld [vmem:[#allocation88_spill] sm:$0xff] }
 0x8a6   : > { %4936 = vrot.lane.b32.xlu0 %v10302_v49, %s13783_s7  ;;  %5793 = vmatprep.subr.bf16.mxu1 %v4955_v61  ;;  %v13984_v61 = vld [vmem:[#allocation67_spill] sm:$0xff]  ;;  %v5028_v46 = vsel %vm13982_vm4, %v5006_v15, %v5008_v59  ;;  %vm13992_vm4 = vmmov %vm13985_vm6 }
 0x8a7   : > { %4106 = vrot.lane.b32.xlu1 %v10306_v34, %s13855_s21  ;;  %8407 = vset.pattern.permute.xlu0 %v8558_v29  ;;  %v11889_v51 = vpop.permute.xlu1 %4027 }
 0x8a8   : > { %5794 = vmatpush1.bf16.msra.mxu1 %v4954_v43  ;;  %5906 = vmatpush1.bf16.msra.mxu0 %v3963_v54  ;;  %v3951_v20 = vpop.permute.xlu0 %3950 }
 0x8a9   : > { %5795 = vmatprep.subr.bf16.mxu1 %v5022_v36  ;;  %v3971_v30 = vsel %vm13624_vm8, %v3951_v20, %v11822_v35  ;;  %v3970_v48 = vsel %vm13624_vm8, %v11193_v25, %v3951_v20  ;;  %8408 = vset.pattern.permute.xlu1 %v8558_v29  ;;  %v4039_v25 = vsel %vm13985_vm6, %v13984_v61, %v13983_v10  ;;  %v13987_v20 = vmov 0   ;;  %vm13991_vm8 = vmmov %vm13985_vm6 }
 0x8aa   : > { %4104 = vrot.lane.b32.xlu0 %v13904_v27, %s13855_s21  ;;  %5907 = vmatprep.subr.bf16.mxu0 %v3971_v30  ;;  %v4038_v36 = vsel %vm13985_vm6, %v10510_v16, %v13984_v61  ;;  %v13993_v16 = vld [vmem:[#allocation90_spill] sm:$0xff]  ;;  %v13995_v61 = vld [vmem:[#allocation92_spill] sm:$0xff] }
 0x8ab   : > { %5013 = vrot.lane.b32.xlu1 %v13904_v27, %s13650_s10  ;;  %5781 = vmatmul.mubr.bf16.gmra.mrb[64].mxu1 %v11884_v56  ;;  %v5082_v54 = vpop.permute.xlu1 %5081 }
 0x8ac   : > { %5796 = vmatpush1.bf16.msra.mxu1 %v5021_v37  ;;  %5908 = vmatpush1.bf16.msra.mxu0 %v3970_v48  ;;  %v11906_v43 = vpop.permute.xlu0 %5009  ;;  %v13988_v48 = vld [vmem:[#allocation69_spill] sm:$0xff] }
 0x8ad   : > { %5909 = vmatprep.subr.bf16.mxu0 %v4039_v25  ;;  %v5029_v29 = vsel %vm13986_vm13, %v5008_v59, %v11906_v43  ;;  %5823 = vmatprep.mubr.bf16.mxu1 %v13987_v20  ;;  %vm13990_vm13 = vcmask 138240  }
 0x8ae   : > { %5011 = vrot.lane.b32.xlu0 %v10302_v49, %s13650_s10  ;;  %5797 = vmatprep.subr.bf16.mxu1 %v5029_v29  ;;  %v5096_v37 = vsel %vm13990_vm13, %v13989_v44, %v13988_v48  ;;  %vm13994_vm6 = vmmov %vm13990_vm13  ;;  %vm13997_vm13 = vcmask 7168  }
 0x8af   : > { %8383 = vrot.lane.b32.xlu1 %v13987_v20, %s13749_s17  ;;  %v5080_v25 = vpop.permute.xlu1 %5079  ;;  %v5095_v15 = vsel %vm13994_vm6, %v13993_v16, %v13989_v44 }
 0x8b0   : > { %5798 = vmatpush1.bf16.msra.mxu1 %v5028_v46  ;;  %5910 = vmatpush1.bf16.msra.mxu0 %v4038_v36  ;;  %v4026_v30 = vpop.permute.xlu0 %4025  ;;  %v13996_v46 = vld [vmem:[#allocation70_spill] sm:$0xff] }
 0x8b1   : > { %5799 = vmatprep.subr.bf16.mxu1 %v5096_v37  ;;  %v4046_v29 = vsel %vm13991_vm8, %v4026_v30, %v11889_v51  ;;  %v4045_v59 = vsel %vm13992_vm4, %v11406_v58, %v4026_v30  ;;  %v4114_v36 = vsel %vm13997_vm13, %v13996_v46, %v13995_v61  ;;  %vm13998_vm8 = vmmov %vm13994_vm6 }
 0x8b2   : > { %8378 = vrot.lane.b32.xlu0 %v13987_v20, %s13768_s19  ;;  %5911 = vmatprep.subr.bf16.mxu0 %v4046_v29  ;;  %vm13999_vm4 = vmmov %vm13994_vm6 }
 0x8b3   : > { %5087 = vrot.lane.b32.xlu1 %v13904_v27, %s13651_s11  ;;  %v11938_v58 = vpop.permute.xlu1 %4102  ;;  %v5102_v44 = vsel %vm13999_vm4, %v5080_v25, %v5082_v54  ;;  %vm14000_vm6 = vmmov %vm13997_vm13  ;;  %vm5625_vm13 = vcmask 785408  }
 0x8b4   : > { %5800 = vmatpush1.bf16.msra.mxu1 %v5095_v15  ;;  %5912 = vmatpush1.bf16.msra.mxu0 %v4045_v59  ;;  %v11936_v37 = vpop.permute.xlu0 %5083  ;;  %v4113_v29 = vsel %vm14000_vm6, %v10516_v57, %v13996_v46  ;;  %v11953_v59 = vld [vmem:[%s13356_s2 + $0x18] ss:$28 sps:$4 sm:$0xff]   ;;  %v14001_v15 = vld [vmem:[#allocation71_spill] sm:$0xff]  ;;  %vm14004_vm4 = vmmov %vm14000_vm6 }
 0x8b5   : > { %5913 = vmatprep.subr.bf16.mxu0 %v4114_v36  ;;  %v5103_v30 = vsel %vm13998_vm8, %v5082_v54, %v11936_v37  ;;  %v14002_v36 = vld [vmem:[#allocation94_spill] sm:$0xff]  ;;  %vm14003_vm8 = vmmov %vm14000_vm6  ;;  %v14005_v46 = vld [vmem:[#allocation15_spill] sm:$0xff]  ;;  %vm14017_vm6 = vcmask 1039360  }
 0x8b6   : > { %5085 = vrot.lane.b32.xlu0 %v10302_v49, %s13651_s11  ;;  %5801 = vmatprep.subr.bf16.mxu1 %v5103_v30  ;;  %v3216_v30 = vsel %vm3210_vm11, %v14002_v36, %v14001_v15 }
 0x8b7   : > { %4195 = vrot.lane.b32.xlu1 %v10306_v34, %s13734_s13  ;;  %v11958_v54 = vpop.permute.xlu1 %3206 }
 0x8b8   : > { %5802 = vmatpush1.bf16.msra.mxu1 %v5102_v44  ;;  %5914 = vmatpush1.bf16.msra.mxu0 %v4113_v29  ;;  %v4101_v16 = vpop.permute.xlu0 %4100  ;;  %v14006_v44 = vld [vmem:[#allocation17_spill] sm:$0xff] }
 0x8b9   : > { %6056 = vmatprep.subr.bf16.mxu1 %v3216_v30  ;;  %v4121_v25 = vsel %vm14003_vm8, %v4101_v16, %v11938_v58  ;;  %v4120_v57 = vsel %vm14004_vm4, %v11269_v3, %v4101_v16  ;;  %v3215_v29 = vsel %vm3210_vm11, %v14006_v44, %v14002_v36  ;;  %v14008_v3 = vld [vmem:[#allocation22_spill] sm:$0xff]  ;;  %v11988_v36 = vld [vmem:[%s13356_s2 + $0x50] ss:$28 sps:$4 sm:$0xff]   ;;  %vm14018_vm8 = vmmov %vm14017_vm6 }
 0x8ba   : > { %4197 = vrot.lane.b32.xlu0 %v14005_v46, %s13734_s13  ;;  %5915 = vmatprep.subr.bf16.mxu0 %v4121_v25  ;;  %14009 = vst [vmem:[#allocation38_spill] sm:$0xff] %v11988_v36  ;;  %vm14022_vm4 = vmmov %vm14017_vm6 }
 0x8bb   : > { %3208 = vrot.lane.b32.xlu1 %v14005_v46, %s13863_s5  ;;  %7685 = vmatmul.mubr.msk.bf16.vlgmr.msra.gmra.mrb[60].mxu1 %vm5625_vm13, %v11953_v59  ;;  %v11973_v15 = vpop.permute.xlu1 %4852  ;;  %s14305_s5 = sld [smem:[#allocation168_spill]] }
 0x8bc   : > { %5916 = vmatpush1.bf16.msra.mxu0 %v4120_v57  ;;  %6057 = vmatpush1.bf16.msra.mxu1 %v3215_v29  ;;  %v3205_v30 = vpop.permute.xlu0 %3204  ;;  %14007 = vst [vmem:[#allocation31_spill] sm:$0xff] %v11973_v15  ;;  %v14010_v57 = vld [vmem:[#allocation14_spill] sm:$0xff]  ;;  %v14013_v29 = vld [vmem:[#allocation96_spill] sm:$0xff] }
 0x8bd   : > { %5917 = vmatprep.subr.bf16.mxu0 %v14008_v3  ;;  %v3223_v16 = vsel %vm3210_vm11, %v3205_v30, %v11958_v54  ;;  %v3222_v25 = vsel %vm3210_vm11, %v11318_v32, %v3205_v30  ;;  %5833 = vmatprep.mubr.bf16.mxu1 %v13987_v20  ;;  %v14012_v32 = vld [vmem:[#allocation72_spill] sm:$0xff] }
 0x8be   : > { %3508 = vrot.lane.b32.xlu0 %v14005_v46, %s13777_s15  ;;  %6058 = vmatprep.subr.bf16.mxu1 %v3223_v16  ;;  %v3291_v30 = vsel %vm3285_vm1, %v14013_v29, %v14012_v32  ;;  %v3290_v16 = vsel %vm3285_vm1, %v13916_v21, %v14013_v29  ;;  %v12021_v21 = vld [vmem:[%s13356_s2 + $0x4] ss:$28 sps:$4 sm:$0xff]   ;;  %v14019_v29 = vld [vmem:[#allocation75_spill] sm:$0xff] }
 0x8bf   : > { %4269 = vrot.lane.b32.xlu1 %v10306_v34, %s13741_s30  ;;  %v11996_v3 = vpop.permute.xlu1 %3281 }
 0x8c0   : > { %5918 = vmatpush1.bf16.msra.mxu0 %v14010_v57  ;;  %6059 = vmatpush1.bf16.msra.mxu1 %v3222_v25  ;;  %v11991_v44 = vpop.permute.xlu0 %4850  ;;  %14014 = vst [vmem:[#allocation42_spill] sm:$0xff] %v11996_v3  ;;  %v14015_v25 = vld [vmem:[#allocation73_spill] sm:$0xff]  ;;  %v14016_v57 = vld [vmem:[#allocation98_spill] sm:$0xff] }
 0x8c1   : > { %14011 = vst [vmem:[#allocation40_spill] sm:$0xff] %v11991_v44  ;;  %5919 = vmatprep.subr.bf16.mxu0 %v10302_v49  ;;  %6060 = vmatprep.subr.bf16.mxu1 %v3291_v30  ;;  %v4204_v49 = vsel %vm14017_vm6, %v14016_v57, %v14015_v25  ;;  %vm14023_vm6 = vmmov %vm14022_vm4 }
 0x8c2   : > { %4271 = vrot.lane.b32.xlu0 %v14005_v46, %s13741_s30  ;;  %s13278_s30 = scalar_lea.vmem %s14305_s5, %s8224_s6 }
 0x8c3   : > { %3283 = vrot.lane.b32.xlu1 %v14005_v46, %s13796_s23  ;;  %7686 = vmatmul.mubr.msk.bf16.gmra.mrb[64].mxu1 %vm5625_vm13, %v11988_v36  ;;  %v12012_v44 = vpop.permute.xlu1 %4193 }
 0x8c4   : > { %5920 = vmatpush1.bf16.msra.mxu0 %v10298_v26  ;;  %6061 = vmatpush1.bf16.msra.mxu1 %v3290_v16  ;;  %v3280_v30 = vpop.permute.xlu0 %3279  ;;  %v4203_v26 = vsel %vm14018_vm8, %v13906_v1, %v14016_v57  ;;  %v14020_v16 = vld [vmem:[#allocation100_spill] sm:$0xff]  ;;  %v14025_v57 = vld [vmem:[#allocation102_spill] sm:$0xff]  ;;  %vm14039_vm8 = vcmask 957440  }
 0x8c5   : > { %5921 = vmatprep.subr.bf16.mxu0 %v4204_v49  ;;  %v3298_v15 = vsel %vm3285_vm1, %v3280_v30, %v11996_v3  ;;  %v3297_v36 = vsel %vm3285_vm1, %v11373_v12, %v3280_v30  ;;  %6088 = vmatprep.mubr.bf16.mxu1 %v12021_v21  ;;  %v3366_v49 = vsel %vm3360_vm0, %v14020_v16, %v14019_v29 }
 0x8c6   : > { %3583 = vrot.lane.b32.xlu0 %v14005_v46, %s13782_s29  ;;  %6062 = vmatprep.subr.bf16.mxu1 %v3298_v15  ;;  %v3365_v1 = vsel %vm3360_vm0, %v13923_v5, %v14020_v16  ;;  %v4278_v5 = vsel %vm4275_vm9, %v10540_v14, %v14025_v57  ;;  %v14026_v16 = vld [vmem:[#allocation79_spill] sm:$0xff] }
 0x8c7   : > { %4344 = vrot.lane.b32.xlu1 %v10306_v34, %s13735_s24  ;;  %v12034_v30 = vpop.permute.xlu1 %3356 }
 0x8c8   : > { %5922 = vmatpush1.bf16.msra.mxu0 %v4203_v26  ;;  %6063 = vmatpush1.bf16.msra.mxu1 %v3297_v36  ;;  %v4192_v12 = vpop.permute.xlu0 %4191  ;;  %14021 = vst [vmem:[#allocation35_spill] sm:$0xff] %v12034_v30  ;;  %v14024_v36 = vld [vmem:[#allocation77_spill] sm:$0xff] }
 0x8c9   : > { %6064 = vmatprep.subr.bf16.mxu1 %v3366_v49  ;;  %v4211_v15 = vsel %vm14022_vm4, %v4192_v12, %v12012_v44  ;;  %v4210_v3 = vsel %vm14023_vm6, %v11477_v0, %v4192_v12  ;;  %v4279_v26 = vsel %vm4275_vm9, %v14025_v57, %v14024_v36  ;;  %v14030_v57 = vld [vmem:[#allocation81_spill] sm:$0xff]  ;;  %vm14041_vm4 = vmmov %vm14039_vm8 }
 0x8ca   : > { %4346 = vrot.lane.b32.xlu0 %v14005_v46, %s13735_s24  ;;  %5923 = vmatprep.subr.bf16.mxu0 %v4211_v15  ;;  %v14027_v15 = vld [vmem:[#allocation104_spill] sm:$0xff]  ;;  %vm14044_vm6 = vmmov %vm14041_vm4 }
 0x8cb   : > { %3358 = vrot.lane.b32.xlu1 %v14005_v46, %s13804_s27  ;;  %v12050_v29 = vpop.permute.xlu1 %4267  ;;  %v3440_v14 = vsel %vm3435_vm12, %v13932_v60, %v14027_v15  ;;  %v14032_v60 = vld [vmem:[#allocation29_spill] sm:$0xff]  ;;  %s14261_s27 = sld [smem:[#allocation166_spill]] }
 0x8cc   : > { %5924 = vmatpush1.bf16.msra.mxu0 %v4210_v3  ;;  %6065 = vmatpush1.bf16.msra.mxu1 %v3365_v1  ;;  %v3355_v49 = vpop.permute.xlu0 %3354  ;;  %v3441_v1 = vsel %vm3435_vm12, %v14027_v15, %v14026_v16 }
 0x8cd   : > { %5925 = vmatprep.subr.bf16.mxu0 %v4279_v26  ;;  %v3373_v0 = vsel %vm3360_vm0, %v3355_v49, %v12034_v30  ;;  %v3372_v12 = vsel %vm3360_vm0, %v11408_v22, %v3355_v49  ;;  %v14029_v49 = vld [vmem:[#allocation16_spill] sm:$0xff] }
 0x8ce   : > { %3658 = vrot.lane.b32.xlu0 %v14005_v46, %s13942_s3  ;;  %6066 = vmatprep.subr.bf16.mxu1 %v3373_v0  ;;  %v14047_v30 = vld [vmem:[#allocation28_spill] sm:$0xff] }
 0x8cf   : > { %4418 = vrot.lane.b32.xlu1 %v10306_v34, %s13749_s17  ;;  %v12066_v26 = vpop.permute.xlu1 %3431 }
 0x8d0   : > { %5926 = vmatpush1.bf16.msra.mxu0 %v4278_v5  ;;  %6067 = vmatpush1.bf16.msra.mxu1 %v3372_v12  ;;  %v4266_v3 = vpop.permute.xlu0 %4265  ;;  %14028 = vst [vmem:[#allocation37_spill] sm:$0xff] %v12066_v26  ;;  %v14031_v12 = vld [vmem:[#allocation106_spill] sm:$0xff] }
 0x8d1   : > { %6068 = vmatprep.subr.bf16.mxu1 %v3441_v1  ;;  %v4286_v22 = vsel %vm4275_vm9, %v4266_v3, %v12050_v29  ;;  %v4285_v0 = vsel %vm4275_vm9, %v14029_v49, %v4266_v3  ;;  %v4353_v5 = vsel %vm406_vm2, %v14031_v12, %v14030_v57  ;;  %v4352_v15 = vsel %vm406_vm2, %v14032_v60, %v14031_v12  ;;  %v14038_v60 = vld [vmem:[#allocation110_spill] sm:$0xff] }
 0x8d2   : > { %4420 = vrot.lane.b32.xlu0 %v14005_v46, %s13749_s17  ;;  %5927 = vmatprep.subr.bf16.mxu0 %v4286_v22 }
 0x8d3   : > { %3433 = vrot.lane.b32.xlu1 %v14005_v46, %s13811_s12  ;;  %v12082_v16 = vpop.permute.xlu1 %4342 }
 0x8d4   : > { %5928 = vmatpush1.bf16.msra.mxu0 %v4285_v0  ;;  %6069 = vmatpush1.bf16.msra.mxu1 %v3440_v14  ;;  %v3430_v1 = vpop.permute.xlu0 %3429  ;;  %v14033_v0 = vld [vmem:[#allocation83_spill] sm:$0xff]  ;;  %v14034_v14 = vld [vmem:[#allocation108_spill] sm:$0xff] }
 0x8d5   : > { %5950 = vmatprep.subr.bf16.mxu0 %v4353_v5  ;;  %v3448_v3 = vsel %vm3435_vm12, %v3430_v1, %v12066_v26  ;;  %v3447_v22 = vsel %vm3435_vm12, %v11446_v24, %v3430_v1  ;;  %v3516_v24 = vsel %vm3510_vm3, %v14034_v14, %v14033_v0  ;;  %v14036_v26 = vld [vmem:[#allocation21_spill] sm:$0xff]  ;;  %v3515_v12 = vsel %vm3510_vm3, %v13939_v11, %v14034_v14 }
 0x8d6   : > { %3733 = vrot.lane.b32.xlu0 %v14005_v46, %s13828_s18  ;;  %6070 = vmatprep.subr.bf16.mxu1 %v3448_v3  ;;  %v14035_v3 = vld [vmem:[#allocation26_spill] sm:$0xff]  ;;  %v14040_v11 = vld [vmem:[#allocation33_spill] sm:$0xff] }
 0x8d7   : > { %4492 = vrot.lane.b32.xlu1 %v10306_v34, %s13754_s28  ;;  %5930 = vmatmul.mubr.bf16.vlgmr.msra.gmra.mrb[36].mxu0 %v11533_v8  ;;  %v12099_v5 = vpop.permute.xlu1 %3506  ;;  %v4426_v14 = vsel %vm14041_vm4, %v14040_v11, %v14038_v60 }
 0x8d8   : > { %5951 = vmatpush1.bf16.msra.mxu0 %v4352_v15  ;;  %6071 = vmatpush1.bf16.msra.mxu1 %v3447_v22  ;;  %v4341_v49 = vpop.permute.xlu0 %4340  ;;  %v14037_v22 = vld [vmem:[#allocation85_spill] sm:$0xff] }
 0x8d9   : > { %6072 = vmatprep.subr.bf16.mxu1 %v3516_v24  ;;  %v4360_v1 = vsel %vm406_vm2, %v4341_v49, %v12082_v16  ;;  %v4359_v8 = vsel %vm406_vm2, %v14035_v3, %v4341_v49  ;;  %5939 = vmatprep.mubr.bf16.mxu0 %v14036_v26  ;;  %v4427_v15 = vsel %vm14039_vm8, %v14038_v60, %v14037_v22  ;;  %vm14046_vm8 = vmmov %vm14041_vm4  ;;  %v14048_v60 = vld [vmem:[#allocation89_spill] sm:$0xff]  ;;  %vm14058_vm4 = vcmask 310272  }
 0x8da   : > { %4494 = vrot.lane.b32.xlu0 %v14005_v46, %s13754_s28  ;;  %5952 = vmatprep.subr.bf16.mxu0 %v4360_v1 }
 0x8db   : > { %3808 = vrot.lane.b32.xlu1 %v14005_v46, %s13862_s1  ;;  %v12116_v24 = vpop.permute.xlu1 %4416 }
 0x8dc   : > { %5953 = vmatpush1.bf16.msra.mxu0 %v4359_v8  ;;  %6073 = vmatpush1.bf16.msra.mxu1 %v3515_v12  ;;  %v3505_v49 = vpop.permute.xlu0 %3504  ;;  %v14042_v8 = vld [vmem:[#allocation87_spill] sm:$0xff]  ;;  %v14043_v12 = vld [vmem:[#allocation112_spill] sm:$0xff] }
 0x8dd   : > { %5954 = vmatprep.subr.bf16.mxu0 %v4427_v15  ;;  %v3523_v26 = vsel %vm3510_vm3, %v3505_v49, %v12099_v5  ;;  %v3522_v1 = vsel %vm3510_vm3, %v11479_v47, %v3505_v49  ;;  %v3591_v47 = vsel %vm3585_vm5, %v14043_v12, %v14042_v8 }
 0x8de   : > { %4108 = vrot.lane.b32.xlu0 %v14005_v46, %s13855_s21  ;;  %6074 = vmatprep.subr.bf16.mxu1 %v3523_v26  ;;  %v14045_v26 = vld [vmem:[#allocation30_spill] sm:$0xff] }
 0x8df   : > { %4569 = vrot.lane.b32.xlu1 %v14005_v46, %s13759_s20  ;;  %5940 = vmatmul.mubr.bf16.gmra.mrb[40].mxu0 %v11578_v4  ;;  %v12133_v15 = vpop.permute.xlu1 %3581  ;;  %v3590_v4 = vsel %vm3585_vm5, %v13946_v41, %v14043_v12  ;;  %v14052_v12 = vld [vmem:[#allocation91_spill] sm:$0xff] }
 0x8e0   : > { %5955 = vmatpush1.bf16.msra.mxu0 %v4426_v14  ;;  %6075 = vmatpush1.bf16.msra.mxu1 %v3522_v1  ;;  %v4415_v3 = vpop.permute.xlu0 %4414  ;;  %v14049_v1 = vld [vmem:[#allocation114_spill] sm:$0xff] }
 0x8e1   : > { %6076 = vmatprep.subr.bf16.mxu1 %v3591_v47  ;;  %v4434_v49 = vsel %vm14044_vm6, %v4415_v3, %v12116_v24  ;;  %v4433_v22 = vsel %vm14046_vm8, %v14045_v26, %v4415_v3  ;;  %5982 = vmatprep.mubr.bf16.mxu0 %v14047_v30  ;;  %v4502_v11 = vsel %vm13632_vm10, %v14049_v1, %v14048_v60  ;;  %v14053_v26 = vld [vmem:[#allocation116_spill] sm:$0xff]  ;;  %vm14060_vm6 = vmmov %vm14058_vm4 }
 0x8e2   : > { %4567 = vrot.lane.b32.xlu0 %v10306_v34, %s13759_s20  ;;  %5956 = vmatprep.subr.bf16.mxu0 %v4434_v49  ;;  %v14051_v49 = vld [vmem:[#allocation24_spill] sm:$0xff]  ;;  %v4501_v41 = vsel %vm13632_vm10, %v13936_v39, %v14049_v1  ;;  %v14055_v39 = vld [vmem:[#allocation25_spill] sm:$0xff]  ;;  %v3665_v1 = vsel %vm3660_vm14, %v13952_v7, %v14053_v26  ;;  %vm14064_vm8 = vmmov %vm14058_vm4 }
 0x8e3   : > { %3883 = vrot.lane.b32.xlu1 %v14005_v46, %s13836_s0  ;;  %v12150_v3 = vpop.permute.xlu1 %4490 }
 0x8e4   : > { %5957 = vmatpush1.bf16.msra.mxu0 %v4433_v22  ;;  %6077 = vmatpush1.bf16.msra.mxu1 %v3590_v4  ;;  %v3580_v14 = vpop.permute.xlu0 %3579  ;;  %14050 = vst [vmem:[#allocation44_spill] sm:$0xff] %v12150_v3  ;;  %v3666_v4 = vsel %vm3660_vm14, %v14053_v26, %v14052_v12 }
 0x8e5   : > { %5958 = vmatprep.subr.bf16.mxu0 %v4502_v11  ;;  %v3598_v30 = vsel %vm3585_vm5, %v3580_v14, %v12133_v15  ;;  %v3597_v47 = vsel %vm3585_vm5, %v11535_v62, %v3580_v14  ;;  %v14054_v14 = vld [vmem:[#allocation27_spill] sm:$0xff] }
 0x8e6   : > { %4924 = vrot.lane.b32.xlu0 %v14051_v49, %s13783_s7  ;;  %6078 = vmatprep.subr.bf16.mxu1 %v3598_v30 }
 0x8e7   : > { %4642 = vrot.lane.b32.xlu1 %v10306_v34, %s13831_s9  ;;  %v12166_v11 = vpop.permute.xlu1 %3656 }
 0x8e8   : > { %5959 = vmatpush1.bf16.msra.mxu0 %v4501_v41  ;;  %6079 = vmatpush1.bf16.msra.mxu1 %v3597_v47  ;;  %v4489_v22 = vpop.permute.xlu0 %4488  ;;  %v14056_v47 = vld [vmem:[#allocation93_spill] sm:$0xff]  ;;  %v14057_v41 = vld [vmem:[#allocation118_spill] sm:$0xff] }
 0x8e9   : > { %6080 = vmatprep.subr.bf16.mxu1 %v3666_v4  ;;  %v4509_v62 = vsel %vm13632_vm10, %v4489_v22, %v12150_v3  ;;  %v4508_v30 = vsel %vm13632_vm10, %v14054_v14, %v4489_v22  ;;  %v4577_v4 = vsel %vm14058_vm4, %v14057_v41, %v14056_v47  ;;  %v4576_v7 = vsel %vm14060_vm6, %v13943_v23, %v14057_v41  ;;  %v14061_v14 = vld [vmem:[#allocation95_spill] sm:$0xff]  ;;  %v14065_v41 = vld [vmem:[#allocation97_spill] sm:$0xff] }
 0x8ea   : > { %4644 = vrot.lane.b32.xlu0 %v14005_v46, %s13831_s9  ;;  %5960 = vmatprep.subr.bf16.mxu0 %v4509_v62  ;;  %vm14067_vm6 = vcmask 302080  }
 0x8eb   : > { %4926 = vrot.lane.b32.xlu1 %v14055_v39, %s13783_s7  ;;  %v12182_v60 = vpop.permute.xlu1 %4565  ;;  %vm14074_vm10 = vmmov %vm14067_vm6 }
 0x8ec   : > { %5961 = vmatpush1.bf16.msra.mxu0 %v4508_v30  ;;  %6081 = vmatpush1.bf16.msra.mxu1 %v3665_v1  ;;  %v3655_v3 = vpop.permute.xlu0 %3654  ;;  %14059 = vst [vmem:[#allocation46_spill] sm:$0xff] %v12182_v60  ;;  %v14062_v30 = vld [vmem:[#allocation120_spill] sm:$0xff] }
 0x8ed   : > { %5962 = vmatprep.subr.bf16.mxu0 %v4577_v4  ;;  %v3673_v22 = vsel %vm3660_vm14, %v3655_v3, %v12166_v11  ;;  %v3672_v62 = vsel %vm3660_vm14, %v11607_v2, %v3655_v3  ;;  %v3741_v1 = vsel %vm3735_vm15, %v14062_v30, %v14061_v14  ;;  %v14063_v2 = vld [vmem:[#allocation32_spill] sm:$0xff]  ;;  %v3740_v23 = vsel %vm3735_vm15, %v13958_v19, %v14062_v30 }
 0x8ee   : > { %3958 = vrot.lane.b32.xlu0 %v14005_v46, %s13801_s8  ;;  %6082 = vmatprep.subr.bf16.mxu1 %v3673_v22 }
 0x8ef   : > { %4719 = vrot.lane.b32.xlu1 %v14005_v46, %s13768_s19  ;;  %v12198_v4 = vpop.permute.xlu1 %3731 }
 0x8f0   : > { %5963 = vmatpush1.bf16.msra.mxu0 %v4576_v7  ;;  %6083 = vmatpush1.bf16.msra.mxu1 %v3672_v62  ;;  %v4564_v26 = vpop.permute.xlu0 %4563  ;;  %v14066_v62 = vld [vmem:[#allocation122_spill] sm:$0xff] }
 0x8f1   : > { %v4583_v3 = vsel %vm14064_vm8, %v14063_v2, %v4564_v26  ;;  %6084 = vmatprep.subr.bf16.mxu1 %v3741_v1  ;;  %v4584_v22 = vsel %vm14058_vm4, %v4564_v26, %v12182_v60  ;;  %v4652_v7 = vsel %vm14067_vm6, %v14066_v62, %v14065_v41  ;;  %vm14069_vm8 = vmmov %vm14067_vm6  ;;  %vm14072_vm4 = vcmask 728064  }
 0x8f2   : > { %4717 = vrot.lane.b32.xlu0 %v10306_v34, %s13768_s19  ;;  %5964 = vmatprep.subr.bf16.mxu0 %v4584_v22  ;;  %v4651_v19 = vsel %vm14069_vm8, %v13949_v52, %v14066_v62  ;;  %v12243_v52 = vld [vmem:[%s13356_s2] ss:$28 sps:$4 sm:$0xff]   ;;  %vm14075_vm8 = vmmov %vm14072_vm4 }
 0x8f3   : > { %4033 = vrot.lane.b32.xlu1 %v14005_v46, %s13843_s26  ;;  %v12214_v2 = vpop.permute.xlu1 %4640 }
 0x8f4   : > { %5965 = vmatpush1.bf16.msra.mxu0 %v4583_v3  ;;  %6085 = vmatpush1.bf16.msra.mxu1 %v3740_v23  ;;  %v3730_v1 = vpop.permute.xlu0 %3729  ;;  %14068 = vst [vmem:[#allocation48_spill] sm:$0xff] %v12214_v2  ;;  %v14070_v3 = vld [vmem:[#allocation99_spill] sm:$0xff]  ;;  %v14071_v23 = vld [vmem:[#allocation124_spill] sm:$0xff] }
 0x8f5   : > { %5966 = vmatprep.subr.bf16.mxu0 %v4652_v7  ;;  %v3747_v26 = vsel %vm3735_vm15, %v11662_v40, %v3730_v1  ;;  %v3748_v22 = vsel %vm3735_vm15, %v3730_v1, %v12198_v4  ;;  %v3816_v40 = vsel %vm14072_vm4, %v14071_v23, %v14070_v3  ;;  %v14073_v1 = vld [vmem:[#allocation34_spill] sm:$0xff]  ;;  %v3815_v62 = vsel %vm14075_vm8, %v10748_v38, %v14071_v23  ;;  %v12261_v38 = vld [vmem:[%s13356_s2 + $0x3c] ss:$28 sps:$4 sm:$0xff]   ;;  %v14082_v23 = vld [vmem:[#allocation103_spill] sm:$0xff] }
 0x8f6   : > { %8388 = vrot.lane.b32.xlu0 %v13987_v20, %s13737_s25  ;;  %6086 = vmatprep.subr.bf16.mxu1 %v3748_v22 }
 0x8f7   : > { %4792 = vrot.lane.b32.xlu1 %v10306_v34, %s13737_s25  ;;  %v12230_v7 = vpop.permute.xlu1 %3806 }
 0x8f8   : > { %5967 = vmatpush1.bf16.msra.mxu0 %v4651_v19  ;;  %6087 = vmatpush1.bf16.msra.mxu1 %v3747_v26  ;;  %v4639_v30 = vpop.permute.xlu0 %4638  ;;  %v14076_v26 = vld [vmem:[#allocation101_spill] sm:$0xff]  ;;  %v14077_v19 = vld [vmem:[#allocation126_spill] sm:$0xff] }
 0x8f9   : > { %v4658_v41 = vsel %vm14067_vm6, %v14073_v1, %v4639_v30  ;;  %6109 = vmatprep.subr.bf16.mxu1 %v3816_v40  ;;  %v4659_v22 = vsel %vm14074_vm10, %v4639_v30, %v12214_v2  ;;  %vm14078_vm10 = vcmask 236544   ;;  %vm14080_vm6 = vmmov %vm14072_vm4 }
 0x8fa   : > { %4794 = vrot.lane.b32.xlu0 %v14005_v46, %s13737_s25  ;;  %5968 = vmatprep.subr.bf16.mxu0 %v4659_v22  ;;  %v4727_v30 = vsel %vm14078_vm10, %v14077_v19, %v14076_v26  ;;  %vm14081_vm8 = vmmov %vm14078_vm10  ;;  %v14084_v26 = vld [vmem:[#allocation36_spill] sm:$0xff] }
 0x8fb   : > { %8393 = vrot.lane.b32.xlu1 %v13987_v20, %s13754_s28  ;;  %6089 = vmatmul.mubr.bf16.vlgmr.msra.gmra.mrb[68].mxu1 %v12243_v52  ;;  %v12252_v1 = vpop.permute.xlu1 %4715  ;;  %vm14085_vm10 = vmmov %vm14081_vm8 }
 0x8fc   : > { %5969 = vmatpush1.bf16.msra.mxu0 %v4658_v41  ;;  %6110 = vmatpush1.bf16.msra.mxu1 %v3815_v62  ;;  %v3805_v40 = vpop.permute.xlu0 %3804  ;;  %14079 = vst [vmem:[#allocation39_spill] sm:$0xff] %v12252_v1  ;;  %v14083_v62 = vld [vmem:[#allocation128_spill] sm:$0xff] }
 0x8fd   : > { %5970 = vmatprep.subr.bf16.mxu0 %v4727_v30  ;;  %v3822_v22 = vsel %vm14072_vm4, %v11716_v42, %v3805_v40  ;;  %v3823_v2 = vsel %vm14080_vm6, %v3805_v40, %v12230_v7  ;;  %6098 = vmatprep.mubr.bf16.mxu1 %v12261_v38  ;;  %v4726_v42 = vsel %vm14081_vm8, %v13955_v33, %v14077_v19  ;;  %vm14086_vm4 = vmmov %vm14081_vm8  ;;  %v12290_v19 = vld [vmem:[%s13356_s2 + $0x38] ss:$28 sps:$4 sm:$0xff]   ;;  %vm14089_vm6 = vcmask 228352  }
 0x8fe   : > { %4999 = vrot.lane.b32.xlu0 %v14051_v49, %s13650_s10  ;;  %6111 = vmatprep.subr.bf16.mxu1 %v3823_v2  ;;  %v3891_v30 = vsel %vm3885_vm7, %v14083_v62, %v14082_v23  ;;  %v3890_v33 = vsel %vm3885_vm7, %v13970_v55, %v14083_v62  ;;  %vm14090_vm8 = vmmov %vm14089_vm6 }
 0x8ff   : > { %4866 = vrot.lane.b32.xlu1 %v10306_v34, %s13647_s16  ;;  %v12274_v40 = vpop.permute.xlu1 %3881 }
 0x900   : > { %5971 = vmatpush1.bf16.msra.mxu0 %v4726_v42  ;;  %6112 = vmatpush1.bf16.msra.mxu1 %v3822_v22  ;;  %v4714_v41 = vpop.permute.xlu0 %4713  ;;  %v14088_v22 = vld [vmem:[#allocation130_spill] sm:$0xff] }
 0x901   : > { %v4733_v60 = vsel %vm14085_vm10, %v14084_v26, %v4714_v41  ;;  %6113 = vmatprep.subr.bf16.mxu1 %v3891_v30  ;;  %v4734_v2 = vsel %vm14086_vm4, %v4714_v41, %v12252_v1  ;;  %v14087_v26 = vld [vmem:[#allocation105_spill] sm:$0xff]  ;;  %vm14093_vm10 = vcmask 80896   ;;  %vm14094_vm4 = vmmov %vm14089_vm6 }
 0x902   : > { %4868 = vrot.lane.b32.xlu0 %v14005_v46, %s13647_s16  ;;  %5972 = vmatprep.subr.bf16.mxu0 %v4734_v2  ;;  %v4801_v42 = vsel %vm14089_vm6, %v14088_v22, %v14087_v26  ;;  %v12305_v2 = vld [vmem:[%s13356_s2 + $0xc] ss:$28 sps:$4 sm:$0xff]   ;;  %vm14095_vm6 = vmmov %vm14094_vm4 }
 0x903   : > { %5001 = vrot.lane.b32.xlu1 %v14055_v39, %s13650_s10  ;;  %6099 = vmatmul.mubr.bf16.gmra.mrb[72].mxu1 %v12290_v19  ;;  %v12296_v30 = vpop.permute.xlu1 %4790 }
 0x904   : > { %5973 = vmatpush1.bf16.msra.mxu0 %v4733_v60  ;;  %6114 = vmatpush1.bf16.msra.mxu1 %v3890_v33  ;;  %v3880_v41 = vpop.permute.xlu0 %3879  ;;  %v14091_v33 = vld [vmem:[#allocation107_spill] sm:$0xff] }
 0x905   : > { %5974 = vmatprep.subr.bf16.mxu0 %v4801_v42  ;;  %v3897_v55 = vsel %vm3885_vm7, %v11768_v28, %v3880_v41  ;;  %v3898_v62 = vsel %vm3885_vm7, %v3880_v41, %v12274_v40  ;;  %6141 = vmatprep.mubr.bf16.mxu1 %v12305_v2  ;;  %v4800_v28 = vsel %vm14090_vm8, %v13961_v9, %v14088_v22  ;;  %v14092_v42 = vld [vmem:[#allocation131_spill] sm:$0xff]  ;;  %vm14096_vm8 = vmmov %vm14093_vm10  ;;  %v14097_v22 = vld [vmem:[#allocation109_spill] sm:$0xff] }
 0x906   : > { %8398 = vrot.lane.b32.xlu0 %v13987_v20, %s13647_s16  ;;  %6115 = vmatprep.subr.bf16.mxu1 %v3898_v62  ;;  %v3966_v41 = vsel %vm14093_vm10, %v14092_v42, %v14091_v33  ;;  %v3965_v9 = vsel %vm14096_vm8, %v13976_v17, %v14092_v42  ;;  %vm14099_vm10 = vcmask 220160   ;;  %v14103_v42 = vld [vmem:[#allocation111_spill] sm:$0xff] }
 0x907   : > { %4940 = vrot.lane.b32.xlu1 %v10306_v34, %s13783_s7  ;;  %v12318_v26 = vpop.permute.xlu1 %3956 }
 0x908   : > { %5975 = vmatpush1.bf16.msra.mxu0 %v4800_v28  ;;  %6116 = vmatpush1.bf16.msra.mxu1 %v3897_v55  ;;  %v4789_v60 = vpop.permute.xlu0 %4788  ;;  %v14098_v55 = vld [vmem:[#allocation132_spill] sm:$0xff] }
 0x909   : > { %v4807_v1 = vsel %vm14094_vm4, %v11784_v63, %v4789_v60  ;;  %6117 = vmatprep.subr.bf16.mxu1 %v3966_v41  ;;  %v4808_v62 = vsel %vm14095_vm6, %v4789_v60, %v12296_v30  ;;  %v4875_v63 = vsel %vm14099_vm10, %v14098_v55, %v14097_v22  ;;  %vm14100_vm4 = vmmov %vm14096_vm8 }
 0x90a   : > { %4942 = vrot.lane.b32.xlu0 %v14005_v46, %s13783_s7  ;;  %5976 = vmatprep.subr.bf16.mxu0 %v4808_v62  ;;  %vm14101_vm6 = vmmov %vm14100_vm4 }
 0x90b   : > { %8403 = vrot.lane.b32.xlu1 %v13987_v20, %s13759_s20  ;;  %vm14102_vm8 = vmmov %vm14099_vm10  ;;  %vm14105_vm10 = vcmask 72704  }
 0x90c   : > { %5977 = vmatpush1.bf16.msra.mxu0 %v4807_v1  ;;  %6118 = vmatpush1.bf16.msra.mxu1 %v3965_v9  ;;  %v3955_v28 = vpop.permute.xlu0 %3954  ;;  %v4874_v17 = vsel %vm14102_vm8, %v13967_v31, %v14098_v55  ;;  %v14104_v9 = vld [vmem:[#allocation134_spill] sm:$0xff]  ;;  %v14109_v55 = vld [vmem:[#allocation113_spill] sm:$0xff] }
 0x90d   : > { %v12334_v41 = vpop.permute.xlu1 %4864  ;;  %5978 = vmatprep.subr.bf16.mxu0 %v4875_v63  ;;  %v3972_v60 = vsel %vm14100_vm4, %v11822_v35, %v3955_v28  ;;  %v3973_v62 = vsel %vm14101_vm6, %v3955_v28, %v12318_v26  ;;  %v4041_v35 = vsel %vm14105_vm10, %v14104_v9, %v14103_v42  ;;  %vm14106_vm4 = vmmov %vm14102_vm8 }
 0x90e   : > { %5073 = vrot.lane.b32.xlu0 %v14051_v49, %s13651_s11  ;;  %6119 = vmatprep.subr.bf16.mxu1 %v3973_v62  ;;  %vm14107_vm6 = vmmov %vm14106_vm4 }
 0x90f   : > { %5015 = vrot.lane.b32.xlu1 %v10306_v34, %s13650_s10  ;;  %vm14108_vm8 = vmmov %vm14105_vm10  ;;  %vm14111_vm10 = vcmask 154624  }
 0x910   : > { %5979 = vmatpush1.bf16.msra.mxu0 %v4874_v17  ;;  %6120 = vmatpush1.bf16.msra.mxu1 %v3972_v60  ;;  %v4863_v1 = vpop.permute.xlu0 %4862  ;;  %v4040_v31 = vsel %vm14108_vm8, %v13983_v10, %v14104_v9  ;;  %v14110_v60 = vld [vmem:[#allocation136_spill] sm:$0xff] }
 0x911   : > { %v12350_v63 = vpop.permute.xlu1 %4031  ;;  %v4881_v28 = vsel %vm14106_vm4, %v11820_v18, %v4863_v1  ;;  %6121 = vmatprep.subr.bf16.mxu1 %v4041_v35  ;;  %v4882_v62 = vsel %vm14107_vm6, %v4863_v1, %v12334_v41  ;;  %v4950_v18 = vsel %vm14111_vm10, %v14110_v60, %v14109_v55  ;;  %vm14112_vm4 = vmmov %vm14108_vm8 }
 0x912   : > { %5017 = vrot.lane.b32.xlu0 %v14005_v46, %s13650_s10  ;;  %5980 = vmatprep.subr.bf16.mxu0 %v4882_v62  ;;  %vm14113_vm6 = vmmov %vm14112_vm4 }
 0x913   : > { %5075 = vrot.lane.b32.xlu1 %v14055_v39, %s13651_s11  ;;  %vm14114_vm8 = vmmov %vm14111_vm10  ;;  %vm14117_vm10 = vcmask 7168  }
 0x914   : > { %5981 = vmatpush1.bf16.msra.mxu0 %v4881_v28  ;;  %6122 = vmatpush1.bf16.msra.mxu1 %v4040_v31  ;;  %v4030_v17 = vpop.permute.xlu0 %4029  ;;  %v4949_v10 = vsel %vm14114_vm8, %v13973_v50, %v14110_v60  ;;  %v14116_v28 = vld [vmem:[#allocation137_spill] sm:$0xff]  ;;  %v14122_v60 = vld [vmem:[#allocation138_spill] sm:$0xff] }
 0x915   : > { %v12366_v35 = vpop.permute.xlu1 %4938  ;;  %6003 = vmatprep.subr.bf16.mxu0 %v4950_v18  ;;  %v4047_v1 = vsel %vm14112_vm4, %v11889_v51, %v4030_v17  ;;  %v4048_v62 = vsel %vm14113_vm6, %v4030_v17, %v12350_v63  ;;  %v14115_v51 = vld [vmem:[#allocation115_spill] sm:$0xff]  ;;  %vm14118_vm4 = vmmov %vm14114_vm8 }
 0x916   : > { %4928 = vrot.lane.b32.xlu0 %v13987_v20, %s13783_s7  ;;  %6123 = vmatprep.subr.bf16.mxu1 %v4048_v62  ;;  %v4116_v31 = vsel %vm14117_vm10, %v14116_v28, %v14115_v51  ;;  %vm14119_vm6 = vmmov %vm14118_vm4 }
 0x917   : > { %5089 = vrot.lane.b32.xlu1 %v10306_v34, %s13651_s11  ;;  %5983 = vmatmul.mubr.bf16.vlgmr.msra.gmra.mrb[36].mxu0 %v11839_v45  ;;  %vm14120_vm8 = vmmov %vm14117_vm10  ;;  %vm14123_vm10 = vcmask 146432  }
 0x918   : > { %6004 = vmatpush1.bf16.msra.mxu0 %v4949_v10  ;;  %6124 = vmatpush1.bf16.msra.mxu1 %v4047_v1  ;;  %v4937_v9 = vpop.permute.xlu0 %4936  ;;  %v4115_v50 = vsel %vm14120_vm8, %v13995_v61, %v14116_v28 }
 0x919   : > { %v12383_v18 = vpop.permute.xlu1 %4106  ;;  %v4956_v17 = vsel %vm14118_vm4, %v11866_v13, %v4937_v9  ;;  %6125 = vmatprep.subr.bf16.mxu1 %v4116_v31  ;;  %v4957_v45 = vsel %vm14119_vm6, %v4937_v9, %v12366_v35  ;;  %5992 = vmatprep.mubr.bf16.mxu0 %v11852_v6  ;;  %v14121_v13 = vld [vmem:[#allocation117_spill] sm:$0xff]  ;;  %vm14124_vm4 = vmmov %vm14120_vm8 }
 0x91a   : > { %5091 = vrot.lane.b32.xlu0 %v14005_v46, %s13651_s11  ;;  %6005 = vmatprep.subr.bf16.mxu0 %v4957_v45  ;;  %v5024_v1 = vsel %vm14123_vm10, %v14122_v60, %v14121_v13  ;;  %vm14125_vm6 = vmmov %vm14124_vm4 }
 0x91b   : > { %4944 = vrot.lane.b32.xlu1 %v13987_v20, %s13783_s7  ;;  %vm14126_vm8 = vmmov %vm14123_vm10 }
 0x91c   : > { %6006 = vmatpush1.bf16.msra.mxu0 %v4956_v17  ;;  %6126 = vmatpush1.bf16.msra.mxu1 %v4115_v50  ;;  %v4105_v62 = vpop.permute.xlu0 %4104  ;;  %v5023_v61 = vsel %vm14126_vm8, %v13978_v53, %v14122_v60  ;;  %vm14127_vm10 = vmmov %vm14126_vm8  ;;  %v14129_v53 = vld [vmem:[#allocation23_spill] sm:$0xff] }
 0x91d   : > { %v12400_v10 = vpop.permute.xlu1 %5013  ;;  %6007 = vmatprep.subr.bf16.mxu0 %v5024_v1  ;;  %v4122_v6 = vsel %vm14124_vm4, %v11938_v58, %v4105_v62  ;;  %v4123_v9 = vsel %vm14125_vm6, %v4105_v62, %v12383_v18  ;;  %vm14128_vm4 = vmmov %vm14126_vm8  ;;  %vm14132_vm6 = vcmask 138240   ;;  %v5532_v60 = vld [vmem:[%s13358_s4 + $0x8] sm:$0xff] }
 0x91e   : > { %5003 = vrot.lane.b32.xlu0 %v13987_v20, %s13650_s10  ;;  %6127 = vmatprep.subr.bf16.mxu1 %v4123_v9  ;;  %vm14133_vm8 = vmmov %vm14132_vm6 }
 0x91f   : > { %5019 = vrot.lane.b32.xlu1 %v13987_v20, %s13650_s10  ;;  %5993 = vmatmul.mubr.bf16.gmra.mrb[40].mxu0 %v11884_v56  ;;  %v5531_v56 = vld [vmem:[%s13358_s4] sm:$0xff] }
 0x920   : > { %6008 = vmatpush1.bf16.msra.mxu0 %v5023_v61  ;;  %6128 = vmatpush1.bf16.msra.mxu1 %v4122_v6  ;;  %v5012_v28 = vpop.permute.xlu0 %5011  ;;  %v5534_v6 = vld [vmem:[%s13358_s4 + $0x18] sm:$0xff] }
 0x921   : > { %v12414_v58 = vpop.permute.xlu1 %8383  ;;  %v5030_v31 = vsel %vm14127_vm10, %v11906_v43, %v5012_v28  ;;  %6129 = vmatprep.subr.bf16.mxu1 %v14051_v49  ;;  %v5031_v17 = vsel %vm14128_vm4, %v5012_v28, %v12400_v10  ;;  %6035 = vmatprep.mubr.bf16.mxu0 %v13987_v20  ;;  %v14130_v43 = vld [vmem:[#allocation119_spill] sm:$0xff]  ;;  %v14131_v49 = vld [vmem:[#allocation140_spill] sm:$0xff]  ;;  %v14134_v61 = vld [vmem:[#allocation121_spill] sm:$0xff]  ;;  %vm14136_vm10 = vcmask 1039360  }
 0x922   : > { %5077 = vrot.lane.b32.xlu0 %v13987_v20, %s13651_s11  ;;  %6009 = vmatprep.subr.bf16.mxu0 %v5031_v17  ;;  %v5098_v45 = vsel %vm14132_vm6, %v14131_v49, %v14130_v43  ;;  %v5097_v62 = vsel %vm14133_vm8, %v13988_v48, %v14131_v49  ;;  %v14135_v28 = vld [vmem:[#allocation142_spill] sm:$0xff]  ;;  %vm14137_vm4 = vmmov %vm14132_vm6 }
 0x923   : > { %5093 = vrot.lane.b32.xlu1 %v13987_v20, %s13651_s11  ;;  %vm14138_vm6 = vmmov %vm14137_vm4 }
 0x924   : > { %6010 = vmatpush1.bf16.msra.mxu0 %v5030_v31  ;;  %6130 = vmatpush1.bf16.msra.mxu1 %v14129_v53  ;;  %v12433_v50 = vpop.permute.xlu0 %8378  ;;  %v4206_v31 = vsel %vm14136_vm10, %v14135_v28, %v14134_v61  ;;  %vm14139_vm8 = vmmov %vm14136_vm10  ;;  %v14140_v53 = vld [vmem:[#allocation143_spill] sm:$0xff] }
 0x925   : > { %v12438_v1 = vpop.permute.xlu1 %5087  ;;  %6011 = vmatprep.subr.bf16.mxu0 %v5098_v45  ;;  %6131 = vmatprep.subr.bf16.mxu1 %v10306_v34  ;;  %v5533_v34 = vld [vmem:[%s13358_s4 + $0x10] sm:$0xff]  ;;  %v3517_v49 = vsel %vm3510_vm3, %v14033_v0, %v14140_v53  ;;  %vm14141_vm10 = vmmov %vm14139_vm8 }
 0x926   : > { %5537 = vperm.xlu0 %8407, %v5531_v56  }
 0x927   : > { %5542 = vperm.xlu1 %8408, %v5532_v60  }
 0x928   : > { %6012 = vmatpush1.bf16.msra.mxu0 %v5097_v62  ;;  %6132 = vmatpush1.bf16.msra.mxu1 %v13904_v27  ;;  %v5086_v9 = vpop.permute.xlu0 %5085  ;;  %v4205_v27 = vsel %vm14139_vm8, %v14015_v25, %v14135_v28  ;;  %v14142_v62 = vld [vmem:[#allocation123_spill] sm:$0xff]  ;;  %v14145_v28 = vld [vmem:[#allocation144_spill] sm:$0xff] }
 0x929   : > { %v4196_v17 = vpop.permute.xlu1 %4195  ;;  %v5104_v48 = vsel %vm14137_vm4, %v11936_v37, %v5086_v9  ;;  %6133 = vmatprep.subr.bf16.mxu1 %v4206_v31  ;;  %v5105_v56 = vsel %vm14138_vm6, %v5086_v9, %v12438_v1  ;;  %vm14144_vm4 = vmmov %vm14139_vm8  ;;  %v14146_v31 = vld [vmem:[#allocation125_spill] sm:$0xff]  ;;  %vm14174_vm6 = vcmask 7168  }
 0x92a   : > { %5552 = vperm.xlu0 %8407, %v5534_v6   ;;  %6013 = vmatprep.subr.bf16.mxu0 %v5105_v56  ;;  %v14143_v6 = vld [vmem:[#allocation71_spill] sm:$0xff]  ;;  %v4212_v25 = vsel %vm14144_vm4, %v12012_v44, %v4196_v17  ;;  %vm14183_vm4 = vmmov %vm14174_vm6 }
 0x92b   : > { %5547 = vperm.xlu1 %8408, %v5533_v34   ;;  %v3217_v9 = vsel %vm3210_vm11, %v14143_v6, %v14142_v62  ;;  %v4281_v34 = vsel %vm4275_vm9, %v14146_v31, %v14145_v28  ;;  %v14150_v62 = vld [vmem:[#allocation19_spill] sm:$0xff]  ;;  %v14151_v6 = vld [vmem:[#allocation129_spill] sm:$0xff] }
 0x92c   : > { %6014 = vmatpush1.bf16.msra.mxu0 %v5104_v48  ;;  %6134 = vmatpush1.bf16.msra.mxu1 %v4205_v27  ;;  %v12464_v45 = vpop.permute.xlu0 %4197 }
 0x92d   : > { %v3209_v37 = vpop.permute.xlu1 %3208  ;;  %7771 = vmatprep.subr.bf16.mxu0 %v3517_v49  ;;  %v4213_v60 = vsel %vm14141_vm10, %v4196_v17, %v12464_v45  ;;  %v14147_v17 = vld [vmem:[#allocation18_spill] sm:$0xff]  ;;  %vm14182_vm10 = vcmask 310272  }
 0x92e   : > { %6135 = vmatprep.subr.bf16.mxu1 %v4213_v60  ;;  %v3224_v44 = vsel %vm3210_vm11, %v11958_v54, %v3209_v37  ;;  %v3592_v27 = vsel %vm3585_vm5, %v14042_v8, %v14147_v17  ;;  %v14148_v60 = vld [vmem:[#allocation127_spill] sm:$0xff]  ;;  %v14149_v37 = vld [vmem:[#allocation38_spill] sm:$0xff]  ;;  %vm14158_vm11 = vcmask 957440  }
 0x92f   : > { %7687 = vmatmul.mubr.msk.bf16.vlgmr.msra.gmra.mrb[36].mxu0 %vm5625_vm13, %v11953_v59  ;;  %v4280_v59 = vsel %vm4275_vm9, %v14024_v36, %v14146_v31  ;;  %v3292_v54 = vsel %vm3285_vm1, %v14012_v32, %v14148_v60  ;;  %v14152_v32 = vld [vmem:[#allocation42_spill] sm:$0xff]  ;;  %v14155_v17 = vld [vmem:[#allocation75_spill] sm:$0xff] }
 0x930   : > { %6136 = vmatpush1.bf16.msra.mxu1 %v4212_v25  ;;  %7772 = vmatpush3.bf16.msra.mxu0 %v3217_v9  ;;  %v3509_v0 = vpop.permute.xlu0 %3508  ;;  %v4355_v9 = vsel %vm406_vm2, %v14151_v6, %v14150_v62  ;;  %v12511_v31 = vld [vmem:[%s13356_s2 + $0x8] ss:$28 sps:$4 sm:$0xff]  }
 0x931   : > { %v4270_v48 = vpop.permute.xlu1 %4269  ;;  %6137 = vmatprep.subr.bf16.mxu1 %v4281_v34  ;;  %v3524_v56 = vsel %vm3510_vm3, %v12099_v5, %v3509_v0  ;;  %6045 = vmatprep.mubr.bf16.mxu0 %v13987_v20  ;;  %v4354_v34 = vsel %vm406_vm2, %v14030_v57, %v14151_v6  ;;  %v14154_v57 = vld [vmem:[#allocation133_spill] sm:$0xff]  ;;  %v14157_v60 = vld [vmem:[#allocation135_spill] sm:$0xff] }
 0x932   : > { %7773 = vmatprep.subr.bf16.mxu0 %v3524_v56  ;;  %v4287_v36 = vsel %vm4275_vm9, %v12050_v29, %v4270_v48 }
 0x934   : > { %6138 = vmatpush1.bf16.msra.mxu1 %v4280_v59  ;;  %7774 = vmatpush3.bf16.msra.mxu0 %v3224_v44  ;;  %v12489_v53 = vpop.permute.xlu0 %4271  ;;  %v12527_v59 = vld [vmem:[%s13356_s2 + $0x44] ss:$28 sps:$4 sm:$0xff]  }
 0x935   : > { %v3284_v49 = vpop.permute.xlu1 %3283  ;;  %7775 = vmatprep.subr.bf16.mxu0 %v3592_v27  ;;  %v4288_v5 = vsel %vm4275_vm9, %v4270_v48, %v12489_v53  ;;  %v3367_v27 = vsel %vm3360_vm0, %v14155_v17, %v14154_v57  ;;  %v14167_v17 = vld [vmem:[#allocation154_spill] sm:$0xff] }
 0x936   : > { %6139 = vmatprep.subr.bf16.mxu1 %v4288_v5  ;;  %v3299_v29 = vsel %vm3285_vm1, %v14152_v32, %v3284_v49  ;;  %v14156_v5 = vld [vmem:[#allocation150_spill] sm:$0xff]  ;;  %vm14161_vm1 = vmmov %vm14158_vm11 }
 0x937   : > { %7688 = vmatmul.mubr.msk.bf16.gmra.mrb[40].mxu0 %vm5625_vm13, %v14149_v37 }
 0x938   : > { %6140 = vmatpush1.bf16.msra.mxu1 %v4287_v36  ;;  %7776 = vmatpush3.bf16.msra.mxu0 %v3292_v54  ;;  %v3584_v8 = vpop.permute.xlu0 %3583  ;;  %v4429_v54 = vsel %vm14158_vm11, %v14157_v60, %v14156_v5 }
 0x939   : > { %v4345_v25 = vpop.permute.xlu1 %4344  ;;  %6162 = vmatprep.subr.bf16.mxu1 %v4355_v9  ;;  %v3599_v0 = vsel %vm3585_vm5, %v12133_v15, %v3584_v8  ;;  %6300 = vmatprep.mubr.bf16.mxu0 %v12021_v21  ;;  %v14153_v15 = vld [vmem:[#allocation148_spill] sm:$0xff]  ;;  %v14159_v8 = vld [vmem:[#allocation35_spill] sm:$0xff]  ;;  %v14160_v9 = vld [vmem:[#allocation85_spill] sm:$0xff]  ;;  %vm14169_vm5 = vcmask 318464  }
 0x93a   : > { %7777 = vmatprep.subr.bf16.mxu0 %v3599_v0  ;;  %v3667_v21 = vsel %vm3660_vm14, %v14052_v12, %v14153_v15  ;;  %v4361_v12 = vsel %vm406_vm2, %v12082_v16, %v4345_v25  ;;  %v4428_v16 = vsel %vm14161_vm1, %v14160_v9, %v14157_v60  ;;  %v14162_v0 = vld [vmem:[#allocation151_spill] sm:$0xff]  ;;  %v12561_v15 = vld [vmem:[%s13356_s2 + $0x14] ss:$28 sps:$4 sm:$0xff]   ;;  %vm14179_vm8 = vmmov %vm14169_vm5 }
 0x93b   : > { %6142 = vmatmul.mubr.bf16.vlgmr.msra.gmra.mrb[68].mxu1 %v12511_v31 }
 0x93c   : > { %6163 = vmatpush1.bf16.msra.mxu1 %v4354_v34  ;;  %7778 = vmatpush3.bf16.msra.mxu0 %v3299_v29  ;;  %v12520_v48 = vpop.permute.xlu0 %4346 }
 0x93d   : > { %v3359_v56 = vpop.permute.xlu1 %3358  ;;  %7779 = vmatprep.subr.bf16.mxu0 %v3667_v21  ;;  %v4362_v44 = vsel %vm406_vm2, %v4345_v25, %v12520_v48  ;;  %6151 = vmatprep.mubr.bf16.mxu1 %v12527_v59  ;;  %v12548_v25 = vld [vmem:[%s13356_s2 + $0x40] ss:$28 sps:$4 sm:$0xff]   ;;  %v14164_v21 = vld [vmem:[#allocation139_spill] sm:$0xff] }
 0x93e   : > { %6164 = vmatprep.subr.bf16.mxu1 %v4362_v44  ;;  %v3374_v6 = vsel %vm3360_vm0, %v14159_v8, %v3359_v56  ;;  %vm14163_vm0 = vmmov %vm14161_vm1  ;;  %v14165_v56 = vld [vmem:[#allocation79_spill] sm:$0xff]  ;;  %v14171_v8 = vld [vmem:[#allocation89_spill] sm:$0xff] }
 0x93f   : > { %v3442_v44 = vsel %vm3435_vm12, %v14165_v56, %v14164_v21  ;;  %vm14166_vm3 = vmmov %vm14163_vm0  ;;  %v14180_v21 = vld [vmem:[#allocation158_spill] sm:$0xff] }
 0x940   : > { %6165 = vmatpush1.bf16.msra.mxu1 %v4361_v12  ;;  %7780 = vmatpush3.bf16.msra.mxu0 %v3367_v27  ;;  %v3659_v49 = vpop.permute.xlu0 %3658  ;;  %v14168_v27 = vld [vmem:[#allocation141_spill] sm:$0xff]  ;;  %v14181_v56 = vld [vmem:[#allocation146_spill] sm:$0xff]  ;;  %vm14185_vm1 = vmmov %vm14182_vm10 }
 0x941   : > { %v4419_v36 = vpop.permute.xlu1 %4418  ;;  %6166 = vmatprep.subr.bf16.mxu1 %v4429_v54  ;;  %v3674_v37 = vsel %vm3660_vm14, %v12166_v11, %v3659_v49  ;;  %v3742_v11 = vsel %vm3735_vm15, %v14061_v14, %v14162_v0  ;;  %v4504_v12 = vsel %vm14169_vm5, %v14168_v27, %v14167_v17  ;;  %v14170_v54 = vld [vmem:[#allocation37_spill] sm:$0xff]  ;;  %vm14172_vm14 = vmmov %vm14169_vm5 }
 0x942   : > { %7781 = vmatprep.subr.bf16.mxu0 %v3674_v37  ;;  %v4435_v14 = vsel %vm14166_vm3, %v12116_v24, %v4419_v36  ;;  %v4503_v24 = vsel %vm14172_vm14, %v14171_v8, %v14168_v27  ;;  %v14176_v0 = vld [vmem:[#allocation145_spill] sm:$0xff]  ;;  %v14192_v8 = vld [vmem:[#allocation147_spill] sm:$0xff] }
 0x943   : > { %6152 = vmatmul.mubr.bf16.gmra.mrb[72].mxu1 %v12548_v25 }
 0x944   : > { %6167 = vmatpush1.bf16.msra.mxu1 %v4428_v16  ;;  %7782 = vmatpush3.bf16.msra.mxu0 %v3374_v6  ;;  %v12554_v32 = vpop.permute.xlu0 %4420 }
 0x945   : > { %v3434_v29 = vpop.permute.xlu1 %3433  ;;  %7783 = vmatprep.subr.bf16.mxu0 %v3742_v11  ;;  %v4436_v34 = vsel %vm14163_vm0, %v4419_v36, %v12554_v32  ;;  %6194 = vmatprep.mubr.bf16.mxu1 %v12561_v15  ;;  %v14173_v36 = vld [vmem:[#allocation157_spill] sm:$0xff]  ;;  %vm14187_vm0 = vmmov %vm14185_vm1 }
 0x946   : > { %6168 = vmatprep.subr.bf16.mxu1 %v4436_v34  ;;  %v3449_v37 = vsel %vm3435_vm12, %v14170_v54, %v3434_v29  ;;  %v4117_v6 = vsel %vm14174_vm6, %v14115_v51, %v14173_v36  ;;  %vm14177_vm12 = vcmask 728064   ;;  %v14178_v29 = vld [vmem:[#allocation44_spill] sm:$0xff]  ;;  %vm14188_vm3 = vmmov %vm14187_vm0  ;;  %vm14196_vm6 = vcmask 1039360  }
 0x947   : > { %v3817_v11 = vsel %vm14177_vm12, %v14070_v3, %v14176_v0  ;;  %vm14184_vm11 = vmmov %vm14177_vm12 }
 0x948   : > { %6169 = vmatpush1.bf16.msra.mxu1 %v4435_v14  ;;  %7784 = vmatpush3.bf16.msra.mxu0 %v3442_v44  ;;  %v3734_v57 = vpop.permute.xlu0 %3733  ;;  %v4579_v44 = vsel %vm14182_vm10, %v14181_v56, %v14180_v21  ;;  %vm14206_vm10 = vmmov %vm14196_vm6 }
 0x949   : > { %v4493_v49 = vpop.permute.xlu1 %4492  ;;  %6170 = vmatprep.subr.bf16.mxu1 %v4504_v12  ;;  %v3749_v60 = vsel %vm3735_vm15, %v12198_v4, %v3734_v57  ;;  %vm14175_vm15 = vmmov %vm14169_vm5  ;;  %vm14193_vm5 = vcmask 302080  }
 0x94a   : > { %7785 = vmatprep.subr.bf16.mxu0 %v3749_v60  ;;  %v4510_v34 = vsel %vm14179_vm8, %v14178_v29, %v4493_v49  ;;  %vm14195_vm14 = vmmov %vm14193_vm5  ;;  %v14200_v29 = vld [vmem:[#allocation48_spill] sm:$0xff]  ;;  %vm14205_vm8 = vcmask 236544  }
 0x94b   : > { %vm14201_vm12 = vmmov %vm14193_vm5 }
 0x94c   : > { %6171 = vmatpush1.bf16.msra.mxu1 %v4503_v24  ;;  %7786 = vmatpush3.bf16.msra.mxu0 %v3449_v37  ;;  %v12582_v9 = vpop.permute.xlu0 %4494 }
 0x94d   : > { %v3809_v16 = vpop.permute.xlu1 %3808  ;;  %7799 = vmatprep.subr.bf16.mxu0 %v4117_v6  ;;  %v4511_v4 = vsel %vm14175_vm15, %v4493_v49, %v12582_v9  ;;  %v14186_v49 = vld [vmem:[#allocation46_spill] sm:$0xff]  ;;  %vm14197_vm15 = vmmov %vm14193_vm5 }
 0x94e   : > { %6172 = vmatprep.subr.bf16.mxu1 %v4511_v4  ;;  %v3824_v3 = vsel %vm14184_vm11, %v12230_v7, %v3809_v16  ;;  %vm14209_vm11 = vmmov %vm14205_vm8 }
 0x94f   : > { %6301 = vmatmul.mubr.bf16.vlgmr.msra.gmra.mrb[44].mxu0 %v12243_v52  ;;  %v4578_v52 = vsel %vm14185_vm1, %v14056_v47, %v14181_v56  ;;  %v14190_v47 = vld [vmem:[#allocation161_spill] sm:$0xff]  ;;  %vm14211_vm1 = vmmov %vm14205_vm8 }
 0x950   : > { %6173 = vmatpush1.bf16.msra.mxu1 %v4510_v34  ;;  %7800 = vmatpush3.bf16.msra.mxu0 %v3817_v11  ;;  %v4109_v51 = vpop.permute.xlu0 %4108  ;;  %v8360_v54 = vunpack.i.l.bf16 %v14190_v47  ;;  %v14198_v11 = vld [vmem:[#allocation149_spill] sm:$0xff] }
 0x951   : > { %v12595_v14 = vpop.permute.xlu1 %4569  ;;  %6174 = vmatprep.subr.bf16.mxu1 %v4579_v44  ;;  %v4124_v57 = vsel %vm14183_vm4, %v12383_v18, %v4109_v51  ;;  %6308 = vmatprep.mubr.bf16.mxu0 %v12261_v38  ;;  %v14189_v18 = vld [vmem:[#allocation159_spill] sm:$0xff]  ;;  %v14202_v51 = vld [vmem:[#allocation153_spill] sm:$0xff]  ;;  %v14203_v44 = vld [vmem:[#allocation152_spill] sm:$0xff] }
 0x952   : > { %7801 = vmatprep.subr.bf16.mxu0 %v4124_v57  ;;  %v3892_v7 = vsel %vm3885_vm7, %v14082_v23, %v14189_v18  ;;  %v4207_v4 = vsel %vm14196_vm6, %v14134_v61, %v8360_v54  ;;  %v8365_v56 = vunpack.i.l.bf16 %v14202_v51  ;;  %v14204_v57 = vld [vmem:[#allocation162_spill] sm:$0xff]  ;;  %v14213_v54 = vld [vmem:[#allocation163_spill] sm:$0xff] }
 0x954   : > { %6175 = vmatpush1.bf16.msra.mxu1 %v4578_v52  ;;  %7802 = vmatpush3.bf16.msra.mxu0 %v3824_v3  ;;  %v4568_v27 = vpop.permute.xlu0 %4567  ;;  %v4729_v3 = vsel %vm14205_vm8, %v14204_v57, %v14203_v44 }
 0x955   : > { %v3884_v12 = vpop.permute.xlu1 %3883  ;;  %7803 = vmatprep.subr.bf16.mxu0 %v14055_v39  ;;  %v4585_v60 = vsel %vm14187_vm0, %v14186_v49, %v4568_v27  ;;  %v4586_v38 = vsel %vm14188_vm3, %v4568_v27, %v12595_v14  ;;  %v14191_v39 = vld [vmem:[#allocation160_spill] sm:$0xff]  ;;  %vm14212_vm0 = vmmov %vm14211_vm1  ;;  %vm14214_vm3 = vcmask 72704  }
 0x956   : > { %6176 = vmatprep.subr.bf16.mxu1 %v4586_v38  ;;  %v4654_v24 = vsel %vm14193_vm5, %v14192_v8, %v14191_v39  ;;  %v3899_v23 = vsel %vm3885_vm7, %v12274_v40, %v3884_v12  ;;  %vm14199_vm7 = vcmask 80896   ;;  %v14208_v12 = vld [vmem:[#allocation101_spill] sm:$0xff]  ;;  %v4282_v38 = vsel %vm4275_vm9, %v14145_v28, %v8365_v56 }
 0x957   : > { %6309 = vmatmul.mubr.bf16.gmra.mrb[48].mxu0 %v12290_v19  ;;  %v14194_v19 = vld [vmem:[#allocation97_spill] sm:$0xff]  ;;  %v3967_v40 = vsel %vm14199_vm7, %v14091_v33, %v14198_v11  ;;  %vm14207_vm4 = vmmov %vm14199_vm7  ;;  %v4728_v49 = vsel %vm14209_vm11, %v14208_v12, %v14204_v57  ;;  %vm14218_vm5 = vcmask 228352  }
 0x958   : > { %6177 = vmatpush1.bf16.msra.mxu1 %v4585_v60  ;;  %7804 = vmatpush3.bf16.msra.mxu0 %v3892_v7  ;;  %v12615_v37 = vpop.permute.xlu0 %4924  ;;  %v4653_v6 = vsel %vm14195_vm14, %v14194_v19, %v14192_v8  ;;  %v14210_v7 = vld [vmem:[#allocation39_spill] sm:$0xff]  ;;  %v4042_v8 = vsel %vm14214_vm3, %v14103_v42, %v14213_v54  ;;  %vm14220_vm14 = vmmov %vm14214_vm3  ;;  %v8386_v54 = vunpack.i.h.bf16 %v12414_v58 }
 0x959   : > { %v4643_v36 = vpop.permute.xlu1 %4642  ;;  %7805 = vmatprep.subr.bf16.mxu0 %v14005_v46  ;;  %6178 = vmatprep.subr.bf16.mxu1 %v4654_v24  ;;  %v14215_v24 = vld [vmem:[#allocation20_spill] sm:$0xff]  ;;  %v14217_v19 = vld [vmem:[#allocation155_spill] sm:$0xff]  ;;  %vm14222_vm6 = vmmov %vm14218_vm5 }
 0x95a   : > { %6349 = vmatprep.mubr.bf16.mxu0 %v12305_v2  ;;  %v8361_v2 = vunpack.i.h.bf16 %v14190_v47  ;;  %v4660_v34 = vsel %vm14201_vm12, %v14200_v29, %v4643_v36  ;;  %v8366_v47 = vunpack.i.h.bf16 %v14202_v51  ;;  %vm14225_vm7 = vmmov %vm14218_vm5 }
 0x95c   : > { %6179 = vmatpush1.bf16.msra.mxu1 %v4653_v6  ;;  %7806 = vmatpush3.bf16.msra.mxu0 %v3899_v23  ;;  %v4645_v16 = vpop.permute.xlu0 %4644  ;;  %v4214_v52 = vsel %vm14206_vm10, %v12464_v45, %v8361_v2  ;;  %v14216_v23 = vld [vmem:[#allocation13_spill] sm:$0xff]  ;;  %v14219_v2 = vld [vmem:[#allocation156_spill] sm:$0xff] }
 0x95d   : > { %v12629_v0 = vpop.permute.xlu1 %4926  ;;  %7807 = vmatprep.subr.bf16.mxu0 %v4207_v4  ;;  %v4661_v46 = vsel %vm14197_vm15, %v4643_v36, %v4645_v16  ;;  %v8370_v36 = vunpack.i.l.bf16 %v14215_v24  ;;  %v4803_v6 = vsel %vm14218_vm5, %v14217_v19, %v14216_v23  ;;  %v4289_v4 = vsel %vm4275_vm9, %v12489_v53, %v8366_v47  ;;  %vm14223_vm15 = vmmov %vm14201_vm12 }
 0x95e   : > { %6180 = vmatprep.subr.bf16.mxu1 %v4661_v46  ;;  %v8375_v11 = vunpack.i.l.bf16 %v14219_v2  ;;  %vm14224_vm9 = vmmov %vm14218_vm5  ;;  %vm14228_vm12 = vcmask 220160  }
 0x95f   : > { %v4655_v51 = vsel %vm14223_vm15, %v14191_v39, %v8370_v36  ;;  %vm14229_vm8 = vmmov %vm14223_vm15 }
 0x960   : > { %6181 = vmatpush1.bf16.msra.mxu1 %v4660_v34  ;;  %7808 = vmatpush3.bf16.msra.mxu0 %v3967_v40  ;;  %v3959_v61 = vpop.permute.xlu0 %3958  ;;  %v14221_v40 = vld [vmem:[#allocation105_spill] sm:$0xff]  ;;  %v4356_v57 = vsel %vm406_vm2, %v14150_v62, %v8375_v11  ;;  %v8385_v62 = vunpack.i.l.bf16 %v12414_v58  ;;  %vm14230_vm10 = vmmov %vm14228_vm12 }
 0x961   : > { %v12644_v27 = vpop.permute.xlu1 %4719  ;;  %v3974_v33 = vsel %vm14207_vm4, %v12318_v26, %v3959_v61  ;;  %6182 = vmatprep.subr.bf16.mxu1 %v4729_v3  ;;  %7809 = vmatprep.subr.bf16.mxu0 %v4214_v52  ;;  %v4802_v29 = vsel %vm14222_vm6, %v14221_v40, %v14217_v19  ;;  %v8371_v61 = vunpack.i.h.bf16 %v14215_v24  ;;  %v8380_v3 = vunpack.i.l.bf16 %v12433_v50  ;;  %v14226_v52 = vld [vmem:[#allocation31_spill] sm:$0xff]  ;;  %vm14231_vm4 = vmmov %vm14212_vm0 }
 0x962   : > { %vm14232_vm11 = vmmov %vm14230_vm10 }
 0x963   : > { %vm14236_vm3 = vmmov %vm14231_vm4 }
 0x964   : > { %6183 = vmatpush1.bf16.msra.mxu1 %v4728_v49  ;;  %7810 = vmatpush3.bf16.msra.mxu0 %v3974_v33  ;;  %v4718_v60 = vpop.permute.xlu0 %4717  ;;  %v14227_v33 = vld [vmem:[#allocation40_spill] sm:$0xff]  ;;  %v4662_v49 = vsel %vm14229_vm8, %v4645_v16, %v8371_v61  ;;  %v4730_v16 = vsel %vm14231_vm4, %v14203_v44, %v8380_v3  ;;  %vm14243_vm8 = vmmov %vm14222_vm6 }
 0x965   : > { %v4034_v18 = vpop.permute.xlu1 %4033  ;;  %v4735_v45 = vsel %vm14211_vm1, %v14210_v7, %v4718_v60  ;;  %7811 = vmatprep.subr.bf16.mxu0 %v4282_v38  ;;  %v4736_v26 = vsel %vm14212_vm0, %v4718_v60, %v12644_v27  ;;  %v4877_v12 = vsel %vm14228_vm12, %v14227_v33, %v14226_v52  ;;  %v8376_v60 = vunpack.i.h.bf16 %v14219_v2 }
 0x966   : > { %6184 = vmatprep.subr.bf16.mxu1 %v4736_v26  ;;  %v4049_v42 = vsel %vm14220_vm14, %v12350_v63, %v4034_v18  ;;  %v4876_v38 = vsel %vm14230_vm10, %v14097_v22, %v14227_v33  ;;  %vm14234_vm1 = vcmask 957440   ;;  %vm14235_vm0 = vcmask 154624  }
 0x967   : > { %v4430_v22 = vsel %vm14234_vm1, %v14156_v5, %v8385_v62  ;;  %v4952_v47 = vsel %vm14235_vm0, %v12615_v37, %v12629_v0  ;;  %vm14237_vm5 = vmmov %vm14234_vm1  ;;  %vm14242_vm12 = vcmask 146432  }
 0x968   : > { %6185 = vmatpush1.bf16.msra.mxu1 %v4735_v45  ;;  %7812 = vmatpush3.bf16.msra.mxu0 %v4042_v8  ;;  %v12662_v28 = vpop.permute.xlu0 %8388  ;;  %v8381_v45 = vunpack.i.h.bf16 %v12433_v50  ;;  %v4437_v5 = vsel %vm14237_vm5, %v12554_v32, %v8386_v54  ;;  %vm14238_vm14 = vmmov %vm14235_vm0 }
 0x969   : > { %v4793_v46 = vpop.permute.xlu1 %4792  ;;  %6186 = vmatprep.subr.bf16.mxu1 %v4803_v6  ;;  %7813 = vmatprep.subr.bf16.mxu0 %v4289_v4  ;;  %v8390_v26 = vunpack.i.l.bf16 %v12662_v28  ;;  %vm14239_vm15 = vmmov %vm14235_vm0  ;;  %v8391_v24 = vunpack.i.h.bf16 %v12662_v28 }
 0x96a   : > { %v4809_v63 = vsel %vm14225_vm7, %v12296_v30, %v4793_v46  ;;  %v4737_v50 = vsel %vm14236_vm3, %v12644_v27, %v8381_v45  ;;  %v12735_v27 = vld [vmem:[%s13356_s2 + $0x10] ss:$28 sps:$4 sm:$0xff]   ;;  %vm14241_vm7 = vcmask 318464   ;;  %vm14250_vm3 = vcmask 138240  }
 0x96b   : > { %v4804_v32 = vsel %vm14222_vm6, %v14216_v23, %v8390_v26  ;;  %vm14245_vm4 = vmmov %vm14241_vm7  ;;  %v12806_v26 = vld [vmem:[%s14261_s27] sm:$0xff] }
 0x96c   : > { %6187 = vmatpush1.bf16.msra.mxu1 %v4802_v29  ;;  %7814 = vmatpush3.bf16.msra.mxu0 %v4049_v42  ;;  %v12675_v34 = vpop.permute.xlu0 %4794  ;;  %v8490_v42 = vld [vmem:[%s13356_s2 + $0x48] ss:$28 sps:$4 sm:$0xff]  }
 0x96d   : > { %v12679_v53 = vpop.permute.xlu1 %8393  ;;  %7827 = vmatprep.subr.bf16.mxu0 %v4655_v51  ;;  %v4810_v56 = vsel %vm14224_vm9, %v4793_v46, %v12675_v34  ;;  %vm14240_vm9 = vmmov %vm14235_vm0  ;;  %v4811_v28 = vsel %vm14243_vm8, %v12675_v34, %v8391_v24  ;;  %vm14249_vm0 = vcmask 310272  }
 0x96e   : > { %6188 = vmatprep.subr.bf16.mxu1 %v4810_v56  ;;  %v8395_v8 = vunpack.i.l.bf16 %v12679_v53  ;;  %v8396_v36 = vunpack.i.h.bf16 %v12679_v53  ;;  %vm14253_vm6 = vmmov %vm14249_vm0 }
 0x96f   : > { %6350 = vmatmul.mubr.bf16.vlgmr.msra.gmra.mrb[52].mxu0 %v12511_v31  ;;  %v4363_v31 = vsel %vm406_vm2, %v12520_v48, %v8376_v60  ;;  %vm14233_vm2 = vmmov %vm14230_vm10 }
 0x970   : > { %6189 = vmatpush1.bf16.msra.mxu1 %v4809_v63  ;;  %7828 = vmatpush3.bf16.msra.mxu0 %v4356_v57  ;;  %v12690_v39 = vpop.permute.xlu0 %4999  ;;  %v4505_v23 = vsel %vm14241_vm7, %v14167_v17, %v8395_v8  ;;  %vm14244_vm10 = vmmov %vm14242_vm12  ;;  %v4512_v17 = vsel %vm14245_vm4, %v12582_v9, %v8396_v36 }
 0x971   : > { %v4867_v30 = vpop.permute.xlu1 %4866  ;;  %6190 = vmatprep.subr.bf16.mxu1 %v4877_v12  ;;  %7829 = vmatprep.subr.bf16.mxu0 %v4662_v49  ;;  %vm14256_vm7 = vmmov %vm14250_vm3 }
 0x972   : > { %6357 = vmatprep.mubr.bf16.mxu0 %v12527_v59  ;;  %v4883_v48 = vsel %vm14233_vm2, %v12334_v41, %v4867_v30  ;;  %vm14260_vm4 = vmmov %vm14250_vm3 }
 0x974   : > { %6191 = vmatpush1.bf16.msra.mxu1 %v4876_v38  ;;  %7830 = vmatpush3.bf16.msra.mxu0 %v4363_v31  ;;  %v12704_v18 = vpop.permute.xlu0 %4868  ;;  %v8491_v31 = vld [vmem:[%s13356_s2 + $0x18] ss:$28 sps:$4 sm:$0xff]  }
 0x975   : > { %v12708_v7 = vpop.permute.xlu1 %5001  ;;  %7831 = vmatprep.subr.bf16.mxu0 %v4730_v16  ;;  %v4884_v59 = vsel %vm14232_vm11, %v4867_v30, %v12704_v18  ;;  %vm14246_vm11 = vmmov %vm14233_vm2 }
 0x976   : > { %6192 = vmatprep.subr.bf16.mxu1 %v4884_v59  ;;  %v5026_v46 = vsel %vm14242_vm12, %v12690_v39, %v12708_v7  ;;  %vm14247_vm2 = vmmov %vm14244_vm10 }
 0x977   : > { %6358 = vmatmul.mubr.bf16.gmra.mrb[56].mxu0 %v12548_v25  ;;  %v4951_v25 = vsel %vm14238_vm14, %v14109_v55, %v12615_v37  ;;  %v8489_v37 = vld [vmem:[%s13356_s2 + $0x4c] ss:$28 sps:$4 sm:$0xff]   ;;  %vm14248_vm1 = vmmov %vm14247_vm2 }
 0x978   : > { %6193 = vmatpush1.bf16.msra.mxu1 %v4883_v48  ;;  %7832 = vmatpush3.bf16.msra.mxu0 %v4430_v22  ;;  %v8399_v44 = vpop.permute.xlu0 %8398  ;;  %vm14251_vm5 = vmmov %vm14246_vm11 }
 0x979   : > { %v4941_v41 = vpop.permute.xlu1 %4940  ;;  %6215 = vmatprep.subr.bf16.mxu1 %v4952_v47  ;;  %7833 = vmatprep.subr.bf16.mxu0 %v4737_v50  ;;  %v8400_v6 = vunpack.i.l.bf16 %v8399_v44  ;;  %v8401_v40 = vunpack.i.h.bf16 %v8399_v44  ;;  %vm14252_vm14 = vmmov %vm14250_vm3 }
 0x97a   : > { %6398 = vmatprep.mubr.bf16.mxu0 %v12561_v15  ;;  %v4958_v19 = vsel %vm14240_vm9, %v12366_v35, %v4941_v41  ;;  %v5025_v35 = vsel %vm14244_vm10, %v14121_v13, %v12690_v39  ;;  %vm14258_vm8 = vmmov %vm14248_vm1 }
 0x97b   : > { %6195 = vmatmul.mubr.bf16.vlgmr.msra.gmra.mrb[68].mxu1 %v12735_v27  ;;  %v4878_v34 = vsel %vm14246_vm11, %v14226_v52, %v8400_v6  ;;  %v4885_v57 = vsel %vm14251_vm5, %v12704_v18, %v8401_v40  ;;  %vm14259_vm10 = vmmov %vm14248_vm1  ;;  %vm14262_vm11 = vcmask 261120  }
 0x97c   : > { %6216 = vmatpush1.bf16.msra.mxu1 %v4951_v25  ;;  %7834 = vmatpush3.bf16.msra.mxu0 %v4437_v5  ;;  %v12738_v58 = vpop.permute.xlu0 %4942 }
 0x97d   : > { %v8404_v15 = vpop.permute.xlu1 %8403  ;;  %7835 = vmatprep.subr.bf16.mxu0 %v4804_v32  ;;  %v4959_v55 = vsel %vm14239_vm15, %v4941_v41, %v12738_v58  ;;  %6204 = vmatprep.mubr.bf16.mxu1 %v8489_v37  ;;  %vm14254_vm15 = vmmov %vm14240_vm9  ;;  %v14265_v32 = vld [vmem:[#allocation6_spill] sm:$0xff] }
 0x97e   : > { %6217 = vmatprep.subr.bf16.mxu1 %v4959_v55  ;;  %v8405_v11 = vunpack.i.l.bf16 %v8404_v15  ;;  %v8406_v9 = vunpack.i.h.bf16 %v8404_v15  ;;  %vm14255_vm9 = vmmov %vm14250_vm3  ;;  %v14266_v55 = vmov 0.0  }
 0x97f   : > { %vm14257_vm12 = vmmov %vm14254_vm15 }
 0x980   : > { %6218 = vmatpush1.bf16.msra.mxu1 %v4958_v19  ;;  %7836 = vmatpush3.bf16.msra.mxu0 %v4505_v23  ;;  %v5074_v4 = vpop.permute.xlu0 %5073  ;;  %v4580_v56 = vsel %vm14249_vm0, %v14180_v21, %v8405_v11 }
 0x981   : > { %v5016_v2 = vpop.permute.xlu1 %5015  ;;  %6219 = vmatprep.subr.bf16.mxu1 %v5026_v46  ;;  %7837 = vmatprep.subr.bf16.mxu0 %v4811_v28  ;;  %v5099_v39 = vsel %vm14252_vm14, %v14130_v43, %v5074_v4 }
 0x982   : > { %v5032_v53 = vsel %vm14248_vm1, %v12400_v10, %v5016_v2  ;;  %v4587_v10 = vsel %vm14253_vm6, %v12595_v14, %v8406_v9  ;;  %vm14268_vm1 = vmmov %vm14262_vm11 }
 0x983   : > { %6205 = vmatmul.mubr.bf16.gmra.mrb[72].mxu1 %v8490_v42  ;;  %vm14269_vm0 = vmmov %vm14268_vm1 }
 0x984   : > { %6220 = vmatpush1.bf16.msra.mxu1 %v5025_v35  ;;  %7838 = vmatpush3.bf16.msra.mxu0 %v4512_v17  ;;  %v5018_v29 = vpop.permute.xlu0 %5017  ;;  %vm14273_vm5 = vmmov %vm14269_vm0 }
 0x985   : > { %v5076_v51 = vpop.permute.xlu1 %5075  ;;  %7839 = vmatprep.subr.bf16.mxu0 %v4878_v34  ;;  %v5033_v13 = vsel %vm14247_vm2, %v5016_v2, %v5018_v29  ;;  %6247 = vmatprep.mubr.bf16.mxu1 %v13987_v20  ;;  %vm14263_vm2 = vmmov %vm14250_vm3  ;;  %v12867_v34 = vld [vmem:[%s14261_s27 + $0x8] sm:$0xff] }
 0x986   : > { %6221 = vmatprep.subr.bf16.mxu1 %v5033_v13  ;;  %v5100_v63 = vsel %vm14250_vm3, %v5074_v4, %v5076_v51  ;;  %v12883_v13 = vld [vmem:[%s14261_s27 + $0x18] sm:$0xff]  ;;  %vm14270_vm3 = vmmov %vm14269_vm0 }
 0x987   : > { %vm14274_vm14 = vmmov %vm14269_vm0 }
 0x988   : > { %6222 = vmatpush1.bf16.msra.mxu1 %v5032_v53  ;;  %7840 = vmatpush3.bf16.msra.mxu0 %v4580_v56  ;;  %v4929_v61 = vpop.permute.xlu0 %4928  ;;  %vm14275_vm6 = vmmov %vm14269_vm0 }
 0x989   : > { %v5090_v3 = vpop.permute.xlu1 %5089  ;;  %6223 = vmatprep.subr.bf16.mxu1 %v5100_v63  ;;  %7841 = vmatprep.subr.bf16.mxu0 %v4885_v57  ;;  %v4953_v52 = vsel %vm14254_vm15, %v12629_v0, %v4929_v61  ;;  %vm14276_vm15 = vmmov %vm14269_vm0 }
 0x98a   : > { %v5106_v60 = vsel %vm14256_vm7, %v12438_v1, %v5090_v3  ;;  %vm14282_vm7 = vmmov %vm14269_vm0 }
 0x98c   : > { %6224 = vmatpush1.bf16.msra.mxu1 %v5099_v39  ;;  %7842 = vmatpush3.bf16.msra.mxu0 %v4587_v10  ;;  %v5092_v21 = vpop.permute.xlu0 %5091  ;;  %v14271_v10 = vld [vmem:[#allocation8_spill] sm:$0xff] }
 0x98d   : > { %v4945_v33 = vpop.permute.xlu1 %4944  ;;  %7907 = vmatprep.subr.bf16.mxu0 %v4953_v52  ;;  %v5107_v12 = vsel %vm14255_vm9, %v5090_v3, %v5092_v21  ;;  %vm14280_vm9 = vmmov %vm14269_vm0 }
 0x98e   : > { %v5825_v49 = vpop.f32.mrb[60].mxu1  ;;  %6225 = vmatprep.subr.bf16.mxu1 %v5107_v12  ;;  %v4960_v14 = vsel %vm14257_vm12, %v12738_v58, %v4945_v33  ;;  %vm14283_vm12 = vmmov %vm14269_vm0 }
 0x98f   : > { %v5827_v30 = vpop.f32.mrb[61].mxu1  ;;  %6399 = vmatmul.mubr.bf16.vlgmr.msra.gmra.mrb[60].mxu0 %v12735_v27  ;;  %v14264_v27 = vld [vmem:[#allocation7_spill] sm:$0xff] }
 0x990   : > { %v5829_v43 = vpop.f32.mrb[62].mxu1  ;;  %6226 = vmatpush1.bf16.msra.mxu1 %v5106_v60  ;;  %7908 = vmatpush3.bf16.msra.mxu0 %v4953_v52  ;;  %v5004_v62 = vpop.permute.xlu0 %5003  ;;  %v14272_v52 = vld [vmem:[#allocation9_spill] sm:$0xff] }
 0x991   : > { %v5831_v0 = vpop.f32.mrb[63].mxu1  ;;  %7909 = vmatprep.subr.bf16.mxu0 %v4960_v14  ;;  %6406 = vmatprep.mubr.bf16.mxu0 %v8489_v37  ;;  %v5027_v1 = vsel %vm14258_vm8, %v12708_v7, %v5004_v62  ;;  %v5020_v38 = vpop.permute.xlu1 %5019  ;;  %v8492_v7 = vld [vmem:[%s13356_s2 + $0x50] ss:$28 sps:$4 sm:$0xff]   ;;  %vm14284_vm8 = vmmov %vm14269_vm0 }
 0x992   : > { %v5034_v45 = vsel %vm14259_vm10, %v5018_v29, %v5020_v38  ;;  %vm14285_vm10 = vmmov %vm14269_vm0 }
 0x993   : > { %7689 = vmatmul.mubr.msk.bf16.vlgmr.msra.gmra.mrb[68].mxu1 %vm5625_vm13, %v8491_v31 }
 0x994   : > { %7910 = vmatpush3.bf16.msra.mxu0 %v4960_v14  ;;  %6257 = vmatprep.mubr.bf16.mxu1 %v13987_v20  ;;  %v5078_v48 = vpop.permute.xlu0 %5077 }
 0x995   : > { %7911 = vmatprep.subr.bf16.mxu0 %v5027_v1  ;;  %v5101_v20 = vsel %vm14260_vm4, %v5076_v51, %v5078_v48  ;;  %v5094_v44 = vpop.permute.xlu1 %5093  ;;  %v12875_v51 = vld [vmem:[%s14261_s27 + $0x10] sm:$0xff]  ;;  %vm14286_vm4 = vmmov %vm14269_vm0 }
 0x996   : > { %v5835_v18 = vpop.f32.mrb[64].mxu1  ;;  %v5108_v47 = vsel %vm14263_vm2, %v5092_v21, %v5094_v44  ;;  %vm14288_vm2 = vmmov %vm14269_vm0 }
 0x997   : > { %v5837_v16 = vpop.f32.mrb[65].mxu1  ;;  %6407 = vmatmul.mubr.bf16.gmra.mrb[64].mxu0 %v8490_v42 }
 0x998   : > { %v5839_v59 = vpop.f32.mrb[66].mxu1  ;;  %7912 = vmatpush3.bf16.msra.mxu0 %v5027_v1  ;;  %7919 = vmatprep.mubr.msk.bf16.mxu0 %vm5625_vm13, %v8491_v31 }
 0x999   : > { %v5841_v22 = vpop.f32.mrb[67].mxu1  ;;  %7913 = vmatprep.subr.bf16.mxu0 %v5034_v45 }
 0x99b   : > { %7690 = vmatmul.mubr.msk.bf16.gmra.mrb[72].mxu1 %vm5625_vm13, %v8492_v7 }
 0x99c   : > { %7914 = vmatpush3.bf16.msra.mxu0 %v5034_v45  ;;  %7945 = vmatprep.mubr.msk.f32.mxu1 %vm14262_vm11, %v12806_v26 }
 0x99d   : > { %7915 = vmatprep.subr.bf16.mxu0 %v5101_v20 }
 0x9a0   : > { %7916 = vmatpush3.bf16.msra.mxu0 %v5101_v20 }
 0x9a1   : > { %7917 = vmatprep.subr.bf16.mxu0 %v5108_v47 }
 0x9a4   : > { %7918 = vmatpush3.bf16.msra.mxu0 %v5108_v47 }
 0x9a5   : > { %v12811_v50 = vpop.permute.xlu0 %5537 }
 0x9a6   : > { %v12813_v54 = vpop.permute.xlu1 %5542  ;;  %v12816_v41 = vadd.f32 %v5827_v30, %v12811_v50  ;;  %v12819_v5 = vadd.f32 %v5825_v49, %v12811_v50 }
 0x9a7   : > { %7920 = vmatmul.mubr.msk.bf16.vlgmr.msra.gmra.mrb[68].mxu0 %vm5625_vm13, %v8492_v7  ;;  %v12823_v25 = vadd.f32 %v5831_v0, %v12813_v54  ;;  %v12826_v8 = vadd.f32 %v5829_v43, %v12813_v54  ;;  %vm14267_vm13 = vmmov %vm14262_vm11 }
 0x9a8   : > { %v6465_v58 = vmul.f32 %v12816_v41, %v14264_v27  ;;  %v6464_v15 = vmul.f32 %v12819_v5, %v14265_v32  ;;  %6556 = vmatprep.mubr.f32.mxu0 %v14266_v55  ;;  %vm14287_vm11 = vmmov %vm14269_vm0 }
 0x9a9   : > { %v12833_v37 = vpop.permute.xlu0 %5552  ;;  %v6472_v24 = vmul.f32 %v12823_v25, %v14264_v27  ;;  %v6471_v36 = vmul.f32 %v12826_v8, %v14265_v32 }
 0x9aa   : > { %v12839_v19 = vpop.permute.xlu1 %5547  ;;  %v12842_v23 = vadd.f32 %v5841_v22, %v12833_v37  ;;  %v12845_v6 = vadd.f32 %v5839_v59, %v12833_v37 }
 0x9ab   : > { %v8015_v4 = vpack.c.bf16 %v6472_v24, %v6465_v58  ;;  %v8017_v46 = vpack.c.bf16 %v6471_v36, %v6464_v15  ;;  %v12848_v28 = vadd.f32 %v5837_v16, %v12839_v19  ;;  %v12851_v2 = vadd.f32 %v5835_v18, %v12839_v19 }
 0x9ac   : > { %v6486_v35 = vmul.f32 %v12842_v23, %v14264_v27  ;;  %v6485_v11 = vmul.f32 %v12845_v6, %v14265_v32 }
 0x9ad   : > { %8016 = vmatprep.subr.bf16.mxu0 %v8015_v4  ;;  %v6479_v17 = vmul.f32 %v12848_v28, %v14264_v27  ;;  %v6478_v42 = vmul.f32 %v12851_v2, %v14265_v32 }
 0x9ae   : > { %8018 = vmatpush1.bf16.msra.mxu0 %v8017_v46 }
 0x9af   : > { %v8019_v40 = vpack.c.bf16 %v6486_v35, %v6479_v17  ;;  %v8021_v29 = vpack.c.bf16 %v6485_v11, %v6478_v42 }
 0x9b1   : > { %8020 = vmatprep.subr.bf16.mxu0 %v8019_v40 }
 0x9b2   : > { %8022 = vmatpush1.bf16.msra.mxu0 %v8021_v29 }
 0x9b5   : > { %7693 = vmatmul.mubr.msk.f32.vlgmr.msra.gmra.mrb[72].mxu0 %vm14267_vm13, %v12806_v26  ;;  %vm14289_vm13 = vmmov %vm14269_vm0 }
 0x9b6   : > { %6562 = vmatprep.mubr.f32.mxu0 %v14266_v55 }
 0x9b9   : > { %7694 = vmatmul.mubr.msk.f32.gmra.mrb[74].mxu0 %vm14268_vm1, %v12867_v34  ;;  %vm14290_vm1 = vmmov %vm14269_vm0 }
 0x9ba   : > { %6568 = vmatprep.mubr.f32.mxu0 %v14266_v55 }
 0x9bd   : > { %7695 = vmatmul.mubr.msk.f32.gmra.mrb[76].mxu0 %vm14269_vm0, %v12875_v51 }
 0x9be   : > { %6574 = vmatprep.mubr.f32.mxu0 %v14266_v55 }
 0x9c1   : > { %7696 = vmatmul.mubr.msk.f32.gmra.mrb[78].mxu0 %vm14270_vm3, %v12883_v13  ;;  %vm14291_vm3 = vmmov %vm14269_vm0 }
 0x9c2   : > { %6645 = vmatprep.mubr.f32.mxu0 %v14266_v55 }
 0xa02   : > { %v6037_v9 = vpop.f32.mrb[36].mxu0 }
 0xa03   : > { %v6039_v53 = vpop.f32.mrb[37].mxu0  ;;  %v12892_v63 = vadd.f32 %v6037_v9, %v12811_v50 }
 0xa04   : > { %v12889_v56 = vadd.f32 %v6039_v53, %v12811_v50  ;;  %v6041_v61 = vpop.f32.mrb[38].mxu0 }
 0xa05   : > { %v12895_v57 = vadd.f32 %v6041_v61, %v12813_v54  ;;  %v6043_v3 = vpop.f32.mrb[39].mxu0  ;;  %v6466_v49 = vmul.f32 %v12892_v63, %v14271_v10 }
 0xa06   : > { %v12898_v39 = vadd.f32 %v6043_v3, %v12813_v54  ;;  %v6467_v33 = vmul.f32 %v12889_v56, %v14272_v52 }
 0xa07   : > { %v6473_v21 = vmul.f32 %v12895_v57, %v14271_v10 }
 0xa08   : > { %v6474_v12 = vmul.f32 %v12898_v39, %v14272_v52 }
 0xa09   : > { %v8025_v43 = vpack.c.bf16 %v6473_v21, %v6466_v49 }
 0xa0a   : > { %v6047_v60 = vpop.f32.mrb[40].mxu0  ;;  %v8023_v30 = vpack.c.bf16 %v6474_v12, %v6467_v33 }
 0xa0b   : > { %v6049_v14 = vpop.f32.mrb[41].mxu0  ;;  %v12912_v31 = vadd.f32 %v6047_v60, %v12839_v19 }
 0xa0c   : > { %v12909_v62 = vadd.f32 %v6049_v14, %v12839_v19  ;;  %v6051_v0 = vpop.f32.mrb[42].mxu0  ;;  %8024 = vmatprep.subr.bf16.mxu0 %v8023_v30 }
 0xa0d   : > { %v12915_v1 = vadd.f32 %v6051_v0, %v12833_v37  ;;  %v6053_v38 = vpop.f32.mrb[43].mxu0  ;;  %8026 = vmatpush1.bf16.msra.mxu0 %v8025_v43  ;;  %v6480_v48 = vmul.f32 %v12912_v31, %v14271_v10 }
 0xa0e   : > { %v12918_v18 = vadd.f32 %v6053_v38, %v12833_v37  ;;  %v6481_v59 = vmul.f32 %v12909_v62, %v14272_v52 }
 0xa0f   : > { %v6487_v16 = vmul.f32 %v12915_v1, %v14271_v10 }
 0xa10   : > { %v6488_v45 = vmul.f32 %v12918_v18, %v14272_v52 }
 0xa11   : > { %v8029_v7 = vpack.c.bf16 %v6487_v16, %v6480_v48 }
 0xa12   : > { %v8027_v22 = vpack.c.bf16 %v6488_v45, %v6481_v59 }
 0xa14   : > { %8028 = vmatprep.subr.bf16.mxu0 %v8027_v22 }
 0xa15   : > { %8030 = vmatpush1.bf16.msra.mxu0 %v8029_v7 }
 0xa18   : > { %7697 = vmatmul.mubr.msk.f32.vlgmr.msra.gmra.mrb[80].mxu0 %vm14273_vm5, %v12806_v26  ;;  %vm14292_vm5 = vmmov %vm14269_vm0 }
 0xa19   : > { %6651 = vmatprep.mubr.f32.mxu0 %v14266_v55 }
 0xa1c   : > { %7698 = vmatmul.mubr.msk.f32.gmra.mrb[82].mxu0 %vm14274_vm14, %v12867_v34  ;;  %vm14294_vm14 = vmmov %vm14269_vm0 }
 0xa1d   : > { %6657 = vmatprep.mubr.f32.mxu0 %v14266_v55 }
 0xa20   : > { %7699 = vmatmul.mubr.msk.f32.gmra.mrb[84].mxu0 %vm14275_vm6, %v12875_v51  ;;  %vm14295_vm6 = vmmov %vm14269_vm0 }
 0xa21   : > { %6663 = vmatprep.mubr.f32.mxu0 %v14266_v55 }
 0xa22   : > { %v7787_v20 = vpop.f32.mrb[44].mxu0 }
 0xa23   : > { %v7788_v44 = vpop.f32.mrb[45].mxu0 }
 0xa24   : > { %v7789_v47 = vadd.f32 %v7788_v44, %v7787_v20  ;;  %v7790_v58 = vpop.f32.mrb[46].mxu0  ;;  %7700 = vmatmul.mubr.msk.f32.gmra.mrb[86].mxu0 %vm14276_vm15, %v12883_v13  ;;  %vm14296_vm15 = vmmov %vm14269_vm0 }
 0xa25   : > { %v7791_v15 = vpop.f32.mrb[47].mxu0  ;;  %6734 = vmatprep.mubr.f32.mxu0 %v14266_v55 }
 0xa26   : > { %v7792_v24 = vadd.f32 %v7791_v15, %v7790_v58  ;;  %v6303_v29 = vadd.f32 %v7789_v47, %v12811_v50 }
 0xa28   : > { %v6306_v3 = vadd.f32 %v7792_v24, %v12813_v54 }
 0xa2a   : > { %v7793_v36 = vpop.f32.mrb[48].mxu0 }
 0xa2b   : > { %v7794_v4 = vpop.f32.mrb[49].mxu0 }
 0xa2c   : > { %v7795_v46 = vadd.f32 %v7794_v4, %v7793_v36  ;;  %v7796_v35 = vpop.f32.mrb[50].mxu0 }
 0xa2d   : > { %v7797_v11 = vpop.f32.mrb[51].mxu0 }
 0xa2e   : > { %v7798_v17 = vadd.f32 %v7797_v11, %v7796_v35  ;;  %v6311_v30 = vadd.f32 %v7795_v46, %v12839_v19 }
 0xa30   : > { %v6314_v38 = vadd.f32 %v7798_v17, %v12833_v37 }
 0xa42   : > { %v7815_v42 = vpop.f32.mrb[52].mxu0 }
 0xa43   : > { %v7816_v40 = vpop.f32.mrb[53].mxu0 }
 0xa44   : > { %v7817_v9 = vadd.f32 %v7816_v40, %v7815_v42  ;;  %v7818_v53 = vpop.f32.mrb[54].mxu0 }
 0xa45   : > { %v7819_v61 = vpop.f32.mrb[55].mxu0 }
 0xa46   : > { %v6352_v21 = vadd.f32 %v7817_v9, %v6303_v29  ;;  %v7820_v33 = vadd.f32 %v7819_v61, %v7818_v53  ;;  %v14277_v29 = vld [vmem:[#allocation11_spill] sm:$0xff]  ;;  %v14278_v61 = vld [vmem:[#allocation10_spill] sm:$0xff] }
 0xa48   : > { %v6355_v12 = vadd.f32 %v7820_v33, %v6306_v3 }
 0xa4a   : > { %v7821_v49 = vpop.f32.mrb[56].mxu0 }
 0xa4b   : > { %v7822_v60 = vpop.f32.mrb[57].mxu0 }
 0xa4c   : > { %v7823_v43 = vadd.f32 %v7822_v60, %v7821_v49  ;;  %v7824_v14 = vpop.f32.mrb[58].mxu0 }
 0xa4d   : > { %v7825_v0 = vpop.f32.mrb[59].mxu0 }
 0xa4e   : > { %v6360_v16 = vadd.f32 %v7823_v43, %v6311_v30  ;;  %v7826_v59 = vadd.f32 %v7825_v0, %v7824_v14 }
 0xa50   : > { %v6363_v45 = vadd.f32 %v7826_v59, %v6314_v38 }
 0xa62   : > { %v7843_v48 = vpop.f32.mrb[60].mxu0 }
 0xa63   : > { %v7844_v22 = vpop.f32.mrb[61].mxu0 }
 0xa64   : > { %v7845_v7 = vadd.f32 %v7844_v22, %v7843_v48  ;;  %v7846_v20 = vpop.f32.mrb[62].mxu0 }
 0xa65   : > { %v7847_v44 = vpop.f32.mrb[63].mxu0 }
 0xa66   : > { %v7848_v47 = vadd.f32 %v7847_v44, %v7846_v20  ;;  %v6249_v58 = vpop.f32.mrb[68].mxu1  ;;  %v6401_v15 = vadd.f32 %v7845_v7, %v6352_v21 }
 0xa67   : > { %v6251_v24 = vpop.f32.mrb[69].mxu1  ;;  %v12948_v35 = vadd.f32 %v6249_v58, %v12811_v50 }
 0xa68   : > { %v12945_v36 = vadd.f32 %v6251_v24, %v12811_v50  ;;  %v6253_v4 = vpop.f32.mrb[70].mxu1  ;;  %v6404_v46 = vadd.f32 %v7848_v47, %v6355_v12 }
 0xa69   : > { %v12951_v11 = vadd.f32 %v6253_v4, %v12813_v54  ;;  %v6255_v17 = vpop.f32.mrb[71].mxu1  ;;  %v6468_v12 = vmul.f32 %v12948_v35, %v14277_v29 }
 0xa6a   : > { %v12954_v42 = vadd.f32 %v6255_v17, %v12813_v54  ;;  %v7849_v40 = vpop.f32.mrb[64].mxu0  ;;  %v6469_v3 = vmul.f32 %v12945_v36, %v14278_v61 }
 0xa6b   : > { %v6475_v9 = vmul.f32 %v12951_v11, %v14277_v29  ;;  %v7850_v53 = vpop.f32.mrb[65].mxu0 }
 0xa6c   : > { %v6476_v21 = vmul.f32 %v12954_v42, %v14278_v61  ;;  %v7851_v50 = vadd.f32 %v7850_v53, %v7849_v40  ;;  %v7852_v33 = vpop.f32.mrb[66].mxu0 }
 0xa6d   : > { %v7853_v49 = vpop.f32.mrb[67].mxu0  ;;  %v8033_v14 = vpack.c.bf16 %v6475_v9, %v6468_v12 }
 0xa6e   : > { %v7854_v60 = vadd.f32 %v7853_v49, %v7852_v33  ;;  %v6259_v54 = vpop.f32.mrb[72].mxu1  ;;  %v8031_v30 = vpack.c.bf16 %v6476_v21, %v6469_v3  ;;  %v6409_v43 = vadd.f32 %v7851_v50, %v6360_v16  ;;  %v14281_v50 = vld [vmem:[#allocation12_spill] sm:$0xff] }
 0xa6f   : > { %v6261_v0 = vpop.f32.mrb[73].mxu1  ;;  %v12968_v22 = vadd.f32 %v6259_v54, %v12839_v19 }
 0xa70   : > { %v12965_v38 = vadd.f32 %v6261_v0, %v12839_v19  ;;  %v6263_v59 = vpop.f32.mrb[74].mxu1  ;;  %8032 = vmatprep.subr.bf16.mxu0 %v8031_v30  ;;  %v6412_v48 = vadd.f32 %v7854_v60, %v6363_v45 }
 0xa71   : > { %v12971_v7 = vadd.f32 %v6263_v59, %v12833_v37  ;;  %v6265_v20 = vpop.f32.mrb[75].mxu1  ;;  %8034 = vmatpush1.bf16.msra.mxu0 %v8033_v14  ;;  %v6482_v19 = vmul.f32 %v12968_v22, %v14277_v29 }
 0xa72   : > { %v12974_v44 = vadd.f32 %v6265_v20, %v12833_v37  ;;  %v6483_v47 = vmul.f32 %v12965_v38, %v14278_v61 }
 0xa73   : > { %14279 = vst [vmem:[#allocation41_spill] sm:$0xff] %v12971_v7  ;;  %v6489_v16 = vmul.f32 %v12971_v7, %v14277_v29 }
 0xa74   : > { %v6490_v45 = vmul.f32 %v12974_v44, %v14278_v61 }
 0xa75   : > { %v8037_v24 = vpack.c.bf16 %v6489_v16, %v6482_v19 }
 0xa76   : > { %v8035_v58 = vpack.c.bf16 %v6490_v45, %v6483_v47 }
 0xa78   : > { %8036 = vmatprep.subr.bf16.mxu0 %v8035_v58 }
 0xa79   : > { %8038 = vmatpush1.bf16.msra.mxu0 %v8037_v24 }
 0xa7a   : > { %v7921_v4 = vpop.f32.mrb[68].mxu0 }
 0xa7b   : > { %v12984_v17 = vadd.f32 %v7921_v4, %v6409_v43  ;;  %v6449_v37 = vpop.f32.mrb[69].mxu0 }
 0xa7c   : > { %v12986_v40 = vadd.f32 %v6449_v37, %v6401_v15  ;;  %v7922_v9 = vpop.f32.mrb[70].mxu0  ;;  %7701 = vmatmul.mubr.msk.f32.vlgmr.msra.gmra.mrb[88].mxu0 %vm14280_vm9, %v12806_v26  ;;  %vm14297_vm9 = vmmov %vm14269_vm0 }
 0xa7d   : > { %v12990_v53 = vadd.f32 %v7922_v9, %v6412_v48  ;;  %v6452_v3 = vpop.f32.mrb[71].mxu0  ;;  %6740 = vmatprep.mubr.f32.mxu0 %v14266_v55  ;;  %v6484_v49 = vmul.f32 %v12984_v17, %v14281_v50 }
 0xa7e   : > { %v12993_v21 = vadd.f32 %v6452_v3, %v6404_v46  ;;  %v6470_v33 = vmul.f32 %v12986_v40, %v14281_v50 }
 0xa7f   : > { %v6491_v12 = vmul.f32 %v12990_v53, %v14281_v50 }
 0xa80   : > { %v6477_v15 = vmul.f32 %v12993_v21, %v14281_v50  ;;  %7702 = vmatmul.mubr.msk.f32.gmra.mrb[90].mxu0 %vm14282_vm7, %v12867_v34  ;;  %vm14298_vm7 = vmmov %vm14269_vm0 }
 0xa81   : > { %6746 = vmatprep.mubr.f32.mxu0 %v14266_v55  ;;  %v8043_v46 = vpack.c.bf16 %v6491_v12, %v6484_v49 }
 0xa82   : > { %v8039_v60 = vpack.c.bf16 %v6477_v15, %v6470_v33 }
 0xa84   : > { %7703 = vmatmul.mubr.msk.f32.gmra.mrb[92].mxu0 %vm14283_vm12, %v12875_v51  ;;  %8040 = vmatprep.subr.bf16.mxu0 %v8039_v60  ;;  %vm14299_vm12 = vmmov %vm14269_vm0 }
 0xa85   : > { %8042 = vmatpush3.bf16.msra.mxu0 %v8039_v60  ;;  %6752 = vmatprep.mubr.f32.mxu0 %v14266_v55 }
 0xa86   : > { %8044 = vmatprep.subr.bf16.mxu0 %v8043_v46 }
 0xa88   : > { %7704 = vmatmul.mubr.msk.f32.gmra.mrb[94].mxu0 %vm14284_vm8, %v12883_v13  ;;  %v6558_v54 = vpop.f32.mrb[72].mxu0  ;;  %vm14300_vm8 = vmmov %vm14269_vm0 }
 0xa89   : > { %8046 = vmatpush3.bf16.msra.mxu0 %v8043_v46  ;;  %7931 = vmatprep.mubr.msk.f32.mxu0 %vm14285_vm10, %v12806_v26  ;;  %v6560_v30 = vpop.f32.mrb[73].mxu0  ;;  %vm14301_vm10 = vmmov %vm14269_vm0 }
 0xa8a   : > { %v6844_v43 = vadd.f32 %v6560_v30, %v6558_v54 }
 0xa8c   : > { %7932 = vmatmul.mubr.msk.f32.vlgmr.msra.gmra.mrb[96].mxu0 %vm14286_vm4, %v12867_v34  ;;  %v6564_v14 = vpop.f32.mrb[74].mxu0  ;;  %vm14302_vm4 = vmmov %vm14269_vm0 }
 0xa8d   : > { %7934 = vmatprep.mubr.msk.f32.mxu0 %vm14287_vm11, %v12875_v51  ;;  %v6566_v0 = vpop.f32.mrb[75].mxu0  ;;  %vm14303_vm11 = vmmov %vm14269_vm0 }
 0xa8e   : > { %v6852_v59 = vadd.f32 %v6566_v0, %v6564_v14 }
 0xa90   : > { %7935 = vmatmul.mubr.msk.f32.gmra.mrb[98].mxu0 %vm14288_vm2, %v12883_v13  ;;  %v6570_v48 = vpop.f32.mrb[76].mxu0 }
 0xa91   : > { %v6572_v20 = vpop.f32.mrb[77].mxu0  ;;  %7024 = vmatprep.mubr.f32.mxu0 %v14266_v55 }
 0xa92   : > { %v6860_v16 = vadd.f32 %v6572_v20, %v6570_v48 }
 0xa94   : > { %v6576_v47 = vpop.f32.mrb[78].mxu0 }
 0xa95   : > { %v6578_v45 = vpop.f32.mrb[79].mxu0 }
 0xa96   : > { %v6868_v19 = vadd.f32 %v6578_v45, %v6576_v47 }
 0xaeb   : > { %v6647_v58 = vpop.f32.mrb[80].mxu0 }
 0xaec   : > { %v6845_v24 = vadd.f32 %v6844_v43, %v6647_v58  ;;  %v6649_v4 = vpop.f32.mrb[81].mxu0 }
 0xaee   : > { %v6846_v37 = vadd.f32 %v6845_v24, %v6649_v4 }
 0xaef   : > { %v6653_v9 = vpop.f32.mrb[82].mxu0 }
 0xaf0   : > { %v6853_v3 = vadd.f32 %v6852_v59, %v6653_v9  ;;  %v6655_v33 = vpop.f32.mrb[83].mxu0 }
 0xaf2   : > { %v6854_v12 = vadd.f32 %v6853_v3, %v6655_v33 }
 0xaf3   : > { %v6659_v15 = vpop.f32.mrb[84].mxu0 }
 0xaf4   : > { %v6861_v49 = vadd.f32 %v6860_v16, %v6659_v15  ;;  %v6661_v60 = vpop.f32.mrb[85].mxu0 }
 0xaf6   : > { %v6862_v46 = vadd.f32 %v6861_v49, %v6661_v60 }
 0xaf7   : > { %v6665_v54 = vpop.f32.mrb[86].mxu0 }
 0xaf8   : > { %v6869_v30 = vadd.f32 %v6868_v19, %v6665_v54  ;;  %v6667_v14 = vpop.f32.mrb[87].mxu0 }
 0xafa   : > { %v6870_v0 = vadd.f32 %v6869_v30, %v6667_v14 }
 0xb4f   : > { %v6736_v48 = vpop.f32.mrb[88].mxu0 }
 0xb50   : > { %v6847_v20 = vadd.f32 %v6846_v37, %v6736_v48  ;;  %v6738_v7 = vpop.f32.mrb[89].mxu0 }
 0xb52   : > { %v6848_v47 = vadd.f32 %v6847_v20, %v6738_v7 }
 0xb53   : > { %v6742_v45 = vpop.f32.mrb[90].mxu0 }
 0xb54   : > { %v6855_v43 = vadd.f32 %v6854_v12, %v6742_v45  ;;  %v6744_v58 = vpop.f32.mrb[91].mxu0 }
 0xb56   : > { %v6856_v24 = vadd.f32 %v6855_v43, %v6744_v58 }
 0xb57   : > { %v6748_v4 = vpop.f32.mrb[92].mxu0 }
 0xb58   : > { %v6863_v59 = vadd.f32 %v6862_v46, %v6748_v4  ;;  %v6750_v9 = vpop.f32.mrb[93].mxu0 }
 0xb5a   : > { %v6864_v3 = vadd.f32 %v6863_v59, %v6750_v9 }
 0xb5b   : > { %v6754_v33 = vpop.f32.mrb[94].mxu0 }
 0xb5c   : > { %v6871_v16 = vadd.f32 %v6870_v0, %v6754_v33  ;;  %v6756_v15 = vpop.f32.mrb[95].mxu0 }
 0xb5e   : > { %v6872_v49 = vadd.f32 %v6871_v16, %v6756_v15 }
 0xb5f   : > { %v7933_v60 = vpop.f32.mrb[96].mxu0 }
 0xb60   : > { %v6857_v19 = vadd.f32 %v7933_v60, %v6856_v24  ;;  %v6825_v54 = vpop.f32.mrb[97].mxu0 }
 0xb61   : > { %v6849_v30 = vadd.f32 %v6848_v47, %v6825_v54 }
 0xb62   : > { %6858 = vadd.xlane.f32.xlu0 %v6857_v19 }
 0xb63   : > { %6850 = vadd.xlane.f32.xlu1 %v6849_v30  ;;  %v7936_v37 = vpop.f32.mrb[98].mxu0 }
 0xb64   : > { %v6873_v7 = vadd.f32 %v7936_v37, %v6872_v49  ;;  %v6835_v14 = vpop.f32.mrb[99].mxu0 }
 0xb65   : > { %v6865_v12 = vadd.f32 %v6864_v3, %v6835_v14 }
 0xb67   : > { %6874 = vadd.xlane.f32.xlu1 %v6873_v7  ;;  %6866 = vadd.xlane.f32.xlu0 %v6865_v12 }
 0xbef   : > { %v13020_v48 = vpop.xlane.xlu0 %6858 }
 0xbf0   : > { %v13022_v46 = vpop.xlane.xlu1 %6850  ;;  %v13026_v0 = vsub.f32 %v12823_v25, %v13020_v48  ;;  %v13030_v20 = vsub.f32 %v12993_v21, %v13020_v48  ;;  %v13034_v47 = vsub.f32 %v12826_v8, %v13020_v48  ;;  %v13038_v45 = vsub.f32 %v12898_v39, %v13020_v48 }
 0xbf1   : > { %v13042_v43 = vsub.f32 %v12816_v41, %v13022_v46  ;;  %v13046_v25 = vsub.f32 %v12986_v40, %v13022_v46  ;;  %v13050_v21 = vsub.f32 %v12819_v5, %v13022_v46  ;;  %v13054_v8 = vsub.f32 %v12889_v56, %v13022_v46 }
 0xbf2   : > { %v6912_v39 = vmul.f32 %v13026_v0, %v14264_v27  ;;  %v6917_v58 = vmul.f32 %v13030_v20, %v14281_v50  ;;  %v6911_v41 = vmul.f32 %v13034_v47, %v14265_v32  ;;  %v6914_v40 = vmul.f32 %v13038_v45, %v14272_v52 }
 0xbf3   : > { %v6905_v5 = vmul.f32 %v13042_v43, %v14264_v27  ;;  %v6910_v24 = vmul.f32 %v13046_v25, %v14281_v50  ;;  %v6904_v56 = vmul.f32 %v13050_v21, %v14265_v32  ;;  %v6907_v4 = vmul.f32 %v13054_v8, %v14272_v52 }
 0xbf4   : > { %v13072_v59 = vpop.xlane.xlu1 %6874  ;;  %v13074_v9 = vpop.xlane.xlu0 %6866  ;;  %v6940_v3 = vmul.f32 %v6912_v39, %v6912_v39  ;;  %v6945_v33 = vmul.f32 %v6917_v58, %v6917_v58  ;;  %v6939_v16 = vmul.f32 %v6911_v41, %v6911_v41  ;;  %v6942_v15 = vmul.f32 %v6914_v40, %v6914_v40 }
 0xbf5   : > { %v6933_v49 = vmul.f32 %v6905_v5, %v6905_v5  ;;  %v6938_v60 = vmul.f32 %v6910_v24, %v6910_v24  ;;  %v6932_v19 = vmul.f32 %v6904_v56, %v6904_v56  ;;  %v13078_v54 = vsub.f32 %v12848_v28, %v13074_v9 }
 0xbf6   : > { %v13082_v30 = vsub.f32 %v12842_v23, %v13072_v59  ;;  %v13086_v37 = vsub.f32 %v12984_v17, %v13074_v9  ;;  %v13090_v7 = vsub.f32 %v12990_v53, %v13072_v59  ;;  %v13094_v14 = vsub.f32 %v12851_v2, %v13074_v9 }
 0xbf7   : > { %v8047_v12 = vpack.c.bf16 %v6940_v3, %v6933_v49  ;;  %v8071_v39 = vpack.c.bf16 %v6945_v33, %v6938_v60  ;;  %v8049_v28 = vpack.c.bf16 %v6939_v16, %v6932_v19  ;;  %v6919_v58 = vmul.f32 %v13078_v54, %v14264_v27 }
 0xbf8   : > { %v6926_v23 = vmul.f32 %v13082_v30, %v14264_v27  ;;  %v6924_v17 = vmul.f32 %v13086_v37, %v14281_v50  ;;  %v6931_v53 = vmul.f32 %v13090_v7, %v14281_v50  ;;  %v13106_v41 = vsub.f32 %v12845_v6, %v13072_v59 }
 0xbf9   : > { %8048 = vmatprep.subr.bf16.mxu0 %v8047_v12  ;;  %8072 = vmatprep.subr.bf16.mxu1 %v8071_v39  ;;  %v6947_v2 = vmul.f32 %v6919_v58, %v6919_v58  ;;  %v6918_v40 = vmul.f32 %v13094_v14, %v14265_v32  ;;  %v6935_v5 = vmul.f32 %v6907_v4, %v6907_v4 }
 0xbfa   : > { %8050 = vmatpush1.bf16.msra.mxu0 %v8049_v28  ;;  %8074 = vmatpush3.bf16.msra.mxu1 %v8071_v39  ;;  %v6954_v24 = vmul.f32 %v6926_v23, %v6926_v23  ;;  %v6952_v56 = vmul.f32 %v6924_v17, %v6924_v17  ;;  %v6959_v3 = vmul.f32 %v6931_v53, %v6931_v53 }
 0xbfb   : > { %v6925_v33 = vmul.f32 %v13106_v41, %v14265_v32  ;;  %v6946_v16 = vmul.f32 %v6918_v40, %v6918_v40  ;;  %v8055_v49 = vpack.c.bf16 %v6942_v15, %v6935_v5  ;;  %v13114_v6 = vsub.f32 %v12892_v63, %v13022_v46 }
 0xbfc   : > { %v8051_v60 = vpack.c.bf16 %v6954_v24, %v6947_v2  ;;  %v8075_v19 = vpack.c.bf16 %v6959_v3, %v6952_v56  ;;  %v13118_v12 = vsub.f32 %v12895_v57, %v13020_v48  ;;  %v13122_v4 = vsub.f32 %v12909_v62, %v13074_v9 }
 0xbfd   : > { %v6953_v39 = vmul.f32 %v6925_v33, %v6925_v33  ;;  %v6906_v28 = vmul.f32 %v13114_v6, %v14271_v10  ;;  %v13128_v15 = vsub.f32 %v12918_v18, %v13072_v59  ;;  %v13132_v63 = vsub.f32 %v12912_v31, %v13074_v9 }
 0xbfe   : > { %8052 = vmatprep.subr.bf16.mxu0 %v8051_v60  ;;  %8076 = vmatprep.subr.bf16.mxu1 %v8075_v19  ;;  %v6913_v57 = vmul.f32 %v13118_v12, %v14271_v10  ;;  %v6921_v62 = vmul.f32 %v13122_v4, %v14272_v52  ;;  %v13140_v58 = vsub.f32 %v12915_v1, %v13072_v59 }
 0xbff   : > { %v8053_v23 = vpack.c.bf16 %v6953_v39, %v6946_v16  ;;  %8078 = vmatpush3.bf16.msra.mxu1 %v8075_v19  ;;  %v6934_v18 = vmul.f32 %v6906_v28, %v6906_v28  ;;  %v6928_v17 = vmul.f32 %v13128_v15, %v14272_v52  ;;  %v6920_v31 = vmul.f32 %v13132_v63, %v14271_v10 }
 0xc00   : > { %v6941_v53 = vmul.f32 %v6913_v57, %v6913_v57  ;;  %v6949_v2 = vmul.f32 %v6921_v62, %v6921_v62  ;;  %v6927_v40 = vmul.f32 %v13140_v58, %v14271_v10  ;;  %v13150_v5 = vsub.f32 %v12945_v36, %v13022_v46 }
 0xc01   : > { %8054 = vmatpush1.bf16.msra.mxu0 %v8053_v23  ;;  %v6956_v1 = vmul.f32 %v6928_v17, %v6928_v17  ;;  %v13154_v24 = vsub.f32 %v12954_v42, %v13020_v48  ;;  %v6948_v33 = vmul.f32 %v6920_v31, %v6920_v31  ;;  %v13167_v39 = vsub.f32 %v12948_v35, %v13022_v46 }
 0xc02   : > { %8056 = vmatprep.subr.bf16.mxu0 %v8055_v49  ;;  %v6909_v56 = vmul.f32 %v13150_v5, %v14278_v61  ;;  %v8057_v3 = vpack.c.bf16 %v6941_v53, %v6934_v18  ;;  %v6955_v16 = vmul.f32 %v6927_v40, %v6927_v40  ;;  %7946 = vmatmul.mubr.msk.f32.vlgmr.msra.gmra.mrb[76].mxu1 %vm14289_vm13, %v12867_v34 }
 0xc03   : > { %v6916_v60 = vmul.f32 %v13154_v24, %v14278_v61  ;;  %v8059_v36 = vpack.c.bf16 %v6956_v1, %v6949_v2  ;;  %v13171_v28 = vsub.f32 %v12951_v11, %v13020_v48  ;;  %7948 = vmatprep.mubr.msk.f32.mxu1 %vm14269_vm0, %v12875_v51  ;;  %v13179_v62 = vsub.f32 %v12965_v38, %v13074_v9 }
 0xc04   : > { %7709 = vmatmul.mubr.msk.f32.vlgmr.msra.gmra.mrb[100].mxu0 %vm14290_vm1, %v12806_v26  ;;  %v6937_v19 = vmul.f32 %v6909_v56, %v6909_v56  ;;  %v8061_v49 = vpack.c.bf16 %v6955_v16, %v6948_v33  ;;  %v13183_v23 = vsub.f32 %v12974_v44, %v13072_v59  ;;  %v6908_v35 = vmul.f32 %v13167_v39, %v14277_v29  ;;  %v14293_v44 = vld [vmem:[#allocation41_spill] sm:$0xff] }
 0xc05   : > { %8058 = vmatpush1.bf16.msra.mxu0 %v8057_v3  ;;  %7030 = vmatprep.mubr.f32.mxu0 %v14266_v55  ;;  %v6944_v42 = vmul.f32 %v6916_v60, %v6916_v60  ;;  %v6915_v11 = vmul.f32 %v13171_v28, %v14277_v29  ;;  %v13194_v38 = vsub.f32 %v12968_v22, %v13074_v9  ;;  %v8559_v33 = vmov 4  }
 0xc06   : > { %8060 = vmatprep.subr.bf16.mxu0 %v8059_v36  ;;  %7949 = vmatmul.mubr.msk.f32.gmra.mrb[78].mxu1 %vm14292_vm5, %v12883_v13  ;;  %v13198_v48 = vsub.f32 %v14293_v44, %v13072_v59  ;;  %v6923_v46 = vmul.f32 %v13179_v62, %v14278_v61  ;;  %v6930_v18 = vmul.f32 %v13183_v23, %v14278_v61 }
 0xc07   : > { %v8063_v57 = vpack.c.bf16 %v6944_v42, %v6937_v19  ;;  %v6936_v17 = vmul.f32 %v6908_v35, %v6908_v35  ;;  %v6943_v31 = vmul.f32 %v6915_v11, %v6915_v11  ;;  %v6922_v22 = vmul.f32 %v13194_v38, %v14277_v29  ;;  %8410 = vset.pattern.permute.xlu1 %v8559_v33 }
 0xc08   : > { %7710 = vmatmul.mubr.msk.f32.gmra.mrb[102].mxu0 %vm14291_vm3, %v12867_v34  ;;  %v6929_v59 = vmul.f32 %v13198_v48, %v14277_v29  ;;  %v6951_v9 = vmul.f32 %v6923_v46, %v6923_v46  ;;  %v6958_v53 = vmul.f32 %v6930_v18, %v6930_v18  ;;  %8409 = vset.pattern.permute.xlu0 %v8559_v33 }
 0xc09   : > { %8062 = vmatpush1.bf16.msra.mxu0 %v8061_v49  ;;  %7036 = vmatprep.mubr.f32.mxu0 %v14266_v55  ;;  %v8065_v2 = vpack.c.bf16 %v6943_v31, %v6936_v17  ;;  %v6950_v40 = vmul.f32 %v6922_v22, %v6922_v22 }
 0xc0a   : > { %8064 = vmatprep.subr.bf16.mxu0 %v8063_v57  ;;  %v6957_v1 = vmul.f32 %v6929_v59, %v6929_v59  ;;  %v8067_v56 = vpack.c.bf16 %v6958_v53, %v6951_v9 }
 0xc0c   : > { %7711 = vmatmul.mubr.msk.f32.gmra.mrb[104].mxu0 %vm14294_vm14, %v12875_v51  ;;  %v8069_v3 = vpack.c.bf16 %v6957_v1, %v6950_v40 }
 0xc0d   : > { %7042 = vmatprep.mubr.f32.mxu0 %v14266_v55 }
 0xc10   : > { %7712 = vmatmul.mubr.msk.f32.gmra.mrb[106].mxu0 %vm14295_vm6, %v12883_v13 }
 0xc11   : > { %7113 = vmatprep.mubr.f32.mxu0 %v14266_v55 }
 0xc14   : > { %7713 = vmatmul.mubr.msk.f32.vlgmr.msra.gmra.mrb[108].mxu0 %vm14296_vm15, %v12806_v26 }
 0xc15   : > { %8066 = vmatpush1.bf16.msra.mxu0 %v8065_v2  ;;  %7119 = vmatprep.mubr.f32.mxu0 %v14266_v55 }
 0xc16   : > { %8068 = vmatprep.subr.bf16.mxu0 %v8067_v56 }
 0xc18   : > { %7714 = vmatmul.mubr.msk.f32.gmra.mrb[110].mxu0 %vm14297_vm9, %v12867_v34 }
 0xc19   : > { %8070 = vmatpush1.bf16.msra.mxu0 %v8069_v3  ;;  %7125 = vmatprep.mubr.f32.mxu0 %v14266_v55 }
 0xc1c   : > { %7715 = vmatmul.mubr.msk.f32.gmra.mrb[112].mxu0 %vm14298_vm7, %v12875_v51 }
 0xc1d   : > { %7131 = vmatprep.mubr.f32.mxu0 %v14266_v55 }
 0xc20   : > { %7716 = vmatmul.mubr.msk.f32.gmra.mrb[114].mxu0 %vm14299_vm12, %v12883_v13 }
 0xc21   : > { %7202 = vmatprep.mubr.f32.mxu0 %v14266_v55 }
 0xc24   : > { %7717 = vmatmul.mubr.msk.f32.vlgmr.msra.gmra.mrb[116].mxu0 %vm14300_vm8, %v12806_v26 }
 0xc25   : > { %7208 = vmatprep.mubr.f32.mxu0 %v14266_v55 }
 0xc28   : > { %7718 = vmatmul.mubr.msk.f32.gmra.mrb[118].mxu0 %vm14301_vm10, %v12867_v34 }
 0xc29   : > { %7214 = vmatprep.mubr.f32.mxu0 %v14266_v55 }
 0xc2c   : > { %7719 = vmatmul.mubr.msk.f32.gmra.mrb[120].mxu0 %vm14302_vm4, %v12875_v51 }
 0xc2d   : > { %7220 = vmatprep.mubr.f32.mxu0 %v14266_v55 }
 0xc30   : > { %7720 = vmatmul.mubr.msk.f32.gmra.mrb[122].mxu0 %vm14303_vm11, %v12883_v13 }
 0xcd5   : > { %v7947_v16 = vpop.f32.mrb[76].mxu1 }
 0xcd6   : > { %v7293_v60 = vpop.f32.mrb[77].mxu1 }
 0xcd7   : > { %v7026_v26 = vpop.f32.mrb[100].mxu0 }
 0xcd8   : > { %v7028_v36 = vpop.f32.mrb[101].mxu0 }
 0xcd9   : > { %v7312_v19 = vadd.f32 %v7028_v36, %v7026_v26  ;;  %v7950_v57 = vpop.f32.mrb[78].mxu1 }
 0xcda   : > { %v7303_v35 = vpop.f32.mrb[79].mxu1 }
 0xcdb   : > { %v7032_v42 = vpop.f32.mrb[102].mxu0 }
 0xcdc   : > { %v7034_v34 = vpop.f32.mrb[103].mxu0 }
 0xcdd   : > { %v7320_v49 = vadd.f32 %v7034_v34, %v7032_v42 }
 0xcdf   : > { %v7038_v11 = vpop.f32.mrb[104].mxu0 }
 0xce0   : > { %v7040_v51 = vpop.f32.mrb[105].mxu0 }
 0xce1   : > { %v7328_v44 = vadd.f32 %v7040_v51, %v7038_v11 }
 0xce3   : > { %v7044_v55 = vpop.f32.mrb[106].mxu0 }
 0xce4   : > { %v7046_v46 = vpop.f32.mrb[107].mxu0 }
 0xce5   : > { %v7336_v18 = vadd.f32 %v7046_v46, %v7044_v55 }
 0xce7   : > { %v7115_v13 = vpop.f32.mrb[108].mxu0 }
 0xce8   : > { %v7313_v17 = vadd.f32 %v7312_v19, %v7115_v13  ;;  %v7117_v31 = vpop.f32.mrb[109].mxu0 }
 0xcea   : > { %v7314_v22 = vadd.f32 %v7313_v17, %v7117_v31 }
 0xceb   : > { %v7121_v59 = vpop.f32.mrb[110].mxu0 }
 0xcec   : > { %v7321_v9 = vadd.f32 %v7320_v49, %v7121_v59  ;;  %v7123_v53 = vpop.f32.mrb[111].mxu0 }
 0xcee   : > { %v7322_v2 = vadd.f32 %v7321_v9, %v7123_v53 }
 0xcef   : > { %v7127_v40 = vpop.f32.mrb[112].mxu0 }
 0xcf0   : > { %v7329_v1 = vadd.f32 %v7328_v44, %v7127_v40  ;;  %v7129_v56 = vpop.f32.mrb[113].mxu0 }
 0xcf2   : > { %v7330_v3 = vadd.f32 %v7329_v1, %v7129_v56 }
 0xcf3   : > { %v7133_v33 = vpop.f32.mrb[114].mxu0 }
 0xcf4   : > { %v7337_v26 = vadd.f32 %v7336_v18, %v7133_v33  ;;  %v7135_v36 = vpop.f32.mrb[115].mxu0 }
 0xcf6   : > { %v7338_v42 = vadd.f32 %v7337_v26, %v7135_v36 }
 0xcf7   : > { %v7204_v34 = vpop.f32.mrb[116].mxu0 }
 0xcf8   : > { %v7315_v11 = vadd.f32 %v7314_v22, %v7204_v34  ;;  %v7206_v51 = vpop.f32.mrb[117].mxu0 }
 0xcfa   : > { %v7316_v55 = vadd.f32 %v7315_v11, %v7206_v51 }
 0xcfb   : > { %v7210_v46 = vpop.f32.mrb[118].mxu0 }
 0xcfc   : > { %v7323_v19 = vadd.f32 %v7322_v2, %v7210_v46  ;;  %v7317_v13 = vadd.f32 %v7316_v55, %v7293_v60  ;;  %v7212_v17 = vpop.f32.mrb[119].mxu0  ;;  %v8497_v60 = vld [vmem:[%s13358_s4 + $0x8] sm:$0xff]  ;;  %v8499_v2 = vld [vmem:[%s13358_s4 + $0x18] sm:$0xff] }
 0xcfe   : > { %v7324_v31 = vadd.f32 %v7323_v19, %v7212_v17  ;;  %7318 = vadd.xlane.f32.xlu0 %v7317_v13 }
 0xcff   : > { %v7216_v49 = vpop.f32.mrb[120].mxu0 }
 0xd00   : > { %v7325_v59 = vadd.f32 %v7947_v16, %v7324_v31  ;;  %v7331_v9 = vadd.f32 %v7330_v3, %v7216_v49  ;;  %v7218_v44 = vpop.f32.mrb[121].mxu0  ;;  %v8498_v16 = vld [vmem:[%s13358_s4 + $0x10] sm:$0xff] }
 0xd02   : > { %v7332_v53 = vadd.f32 %v7331_v9, %v7218_v44  ;;  %7326 = vadd.xlane.f32.xlu1 %v7325_v59 }
 0xd03   : > { %v7222_v40 = vpop.f32.mrb[122].mxu0 }
 0xd04   : > { %v7339_v18 = vadd.f32 %v7338_v42, %v7222_v40  ;;  %v7333_v1 = vadd.f32 %v7332_v53, %v7303_v35  ;;  %v7224_v56 = vpop.f32.mrb[123].mxu0  ;;  %v8500_v35 = vld [vmem:[%s13358_s4] sm:$0xff] }
 0xd06   : > { %v7340_v33 = vadd.f32 %v7339_v18, %v7224_v56  ;;  %7334 = vadd.xlane.f32.xlu0 %v7333_v1 }
 0xd08   : > { %v7341_v22 = vadd.f32 %v7950_v57, %v7340_v33  ;;  %v8560_v57 = vmov 5  }
 0xd13   : > { %7385 = vperm.xlu1 %8410, %v8497_v60  }
 0xd17   : > { %7389 = vperm.xlu1 %8410, %v8498_v16  }
 0xd1b   : > { %7393 = vperm.xlu1 %8410, %v8499_v2  }
 0xd1c   : > { %7381 = vperm.xlu0 %8409, %v8500_v35  }
 0xd1f   : > { %8411 = vset.pattern.permute.xlu1 %v8560_v57 }
 0xd20   : > { %7425 = vperm.xlu1 %8411, %v8500_v35   ;;  %8412 = vset.pattern.permute.xlu0 %v8560_v57 }
 0xd24   : > { %7429 = vperm.xlu1 %8411, %v8497_v60  }
 0xd28   : > { %7433 = vperm.xlu1 %8411, %v8498_v16  }
 0xd4c   : > { %7342 = vadd.xlane.f32.xlu1 %v7341_v22 }
 0xd5d   : > { %7437 = vperm.xlu1 %8411, %v8499_v2  }
 0xd8b   : > { %v7319_v3 = vpop.xlane.xlu0 %7318 }
 0xd8c   : > { %v7344_v26 = vadd.f32 1e-05, %v7319_v3 }
 0xd8e   : > { %8466 = vrsqrt.f32 %v7344_v26 }
 0xd8f   : > { %v7327_v36 = vpop.xlane.xlu1 %7326 }
 0xd90   : > { %v7345_v42 = vadd.f32 1e-05, %v7327_v36 }
 0xd92   : > { %8468 = vrsqrt.f32 %v7345_v42 }
 0xd93   : > { %v7386_v34 = vpop.permute.xlu1 %7385  ;;  %v7335_v11 = vpop.xlane.xlu0 %7334 }
 0xd94   : > { %v7346_v51 = vadd.f32 1e-05, %v7335_v11 }
 0xd96   : > { %8470 = vrsqrt.f32 %v7346_v51 }
 0xd97   : > { %v7390_v55 = vpop.permute.xlu1 %7389 }
 0xd98   : > { %v8467_v46 = vpop.eup %8466 }
 0xd99   : > { %v7352_v19 = vmul.f32 %v8467_v46, %v13050_v21  ;;  %v7353_v13 = vmul.f32 %v8467_v46, %v13042_v43  ;;  %v7354_v17 = vmul.f32 %v8467_v46, %v13114_v6  ;;  %v7355_v31 = vmul.f32 %v8467_v46, %v13054_v8 }
 0xd9a   : > { %v7356_v49 = vmul.f32 %v8467_v46, %v13167_v39  ;;  %v7357_v9 = vmul.f32 %v8467_v46, %v13150_v5  ;;  %v7358_v44 = vmul.f32 %v8467_v46, %v13046_v25 }
 0xd9b   : > { %v13254_v59 = vpop.permute.xlu1 %7393  ;;  %v7382_v53 = vpop.permute.xlu0 %7381 }
 0xd9c   : > { %v8469_v40 = vpop.eup %8468  ;;  %v7396_v18 = vmul.f32 %v7382_v53, %v7352_v19  ;;  %v7397_v1 = vmul.f32 %v7382_v53, %v7353_v13  ;;  %v7398_v56 = vmul.f32 %v7382_v53, %v7354_v17  ;;  %v7399_v21 = vmul.f32 %v7382_v53, %v7355_v31 }
 0xd9d   : > { %v7359_v43 = vmul.f32 %v8469_v40, %v13034_v47  ;;  %v7360_v6 = vmul.f32 %v8469_v40, %v13026_v0  ;;  %v7361_v8 = vmul.f32 %v8469_v40, %v13118_v12  ;;  %v7362_v39 = vmul.f32 %v8469_v40, %v13038_v45 }
 0xd9e   : > { %v7363_v33 = vmul.f32 %v8469_v40, %v13171_v28  ;;  %v7364_v5 = vmul.f32 %v8469_v40, %v13154_v24  ;;  %v7365_v25 = vmul.f32 %v8469_v40, %v13030_v20  ;;  %v7400_v22 = vmul.f32 %v7382_v53, %v7356_v49 }
 0xd9f   : > { %v7403_v60 = vmul.f32 %v7386_v34, %v7359_v43  ;;  %v7404_v16 = vmul.f32 %v7386_v34, %v7360_v6  ;;  %v7405_v2 = vmul.f32 %v7386_v34, %v7361_v8  ;;  %v7406_v35 = vmul.f32 %v7386_v34, %v7362_v39  ;;  %v7426_v57 = vpop.permute.xlu1 %7425 }
 0xda0   : > { %v8471_v3 = vpop.eup %8470  ;;  %v7407_v47 = vmul.f32 %v7386_v34, %v7363_v33  ;;  %v7408_v0 = vmul.f32 %v7386_v34, %v7364_v5  ;;  %v7409_v26 = vmul.f32 %v7386_v34, %v7365_v25  ;;  %v7401_v12 = vmul.f32 %v7382_v53, %v7357_v9 }
 0xda1   : > { %v7366_v45 = vmul.f32 %v8471_v3, %v13094_v14  ;;  %v7367_v28 = vmul.f32 %v8471_v3, %v13078_v54  ;;  %v7368_v24 = vmul.f32 %v8471_v3, %v13132_v63  ;;  %v7369_v20 = vmul.f32 %v8471_v3, %v13122_v4 }
 0xda2   : > { %v7370_v36 = vmul.f32 %v8471_v3, %v13194_v38  ;;  %v7371_v42 = vmul.f32 %v8471_v3, %v13179_v62  ;;  %v7372_v11 = vmul.f32 %v8471_v3, %v13086_v37  ;;  %v7402_v51 = vmul.f32 %v7382_v53, %v7358_v44 }
 0xda3   : > { %v7410_v46 = vmul.f32 %v7390_v55, %v7366_v45  ;;  %v7411_v19 = vmul.f32 %v7390_v55, %v7367_v28  ;;  %v7412_v13 = vmul.f32 %v7390_v55, %v7368_v24  ;;  %v13272_v34 = vmul.f32 %v7390_v55, %v7369_v20  ;;  %v7430_v14 = vpop.permute.xlu1 %7429 }
 0xda4   : > { %v7414_v17 = vmul.f32 %v7390_v55, %v7370_v36  ;;  %v7415_v54 = vmul.f32 %v7390_v55, %v7371_v42  ;;  %v7416_v31 = vmul.f32 %v7390_v55, %v7372_v11  ;;  %v7440_v63 = vadd.f32 %v7426_v57, %v7396_v18 }
 0xda5   : > { %v7441_v49 = vadd.f32 %v7426_v57, %v7397_v1  ;;  %v7442_v4 = vadd.f32 %v7426_v57, %v7398_v56  ;;  %v7443_v9 = vadd.f32 %v7426_v57, %v7399_v21  ;;  %v7444_v38 = vadd.f32 %v7426_v57, %v7400_v22 }
 0xda6   : > { %v7445_v40 = vadd.f32 %v7426_v57, %v7401_v12  ;;  %v7446_v62 = vadd.f32 %v7426_v57, %v7402_v51  ;;  %v7468_v43 = vmax.f32 %v7440_v63, 0.0  ;;  %v7447_v37 = vadd.f32 %v7430_v14, %v7403_v60 }
 0xda7   : > { %v7469_v44 = vmax.f32 %v7441_v49, 0.0  ;;  %v7470_v53 = vmax.f32 %v7442_v4, 0.0  ;;  %v7471_v6 = vmax.f32 %v7443_v9, 0.0  ;;  %v7472_v55 = vmax.f32 %v7444_v38, 0.0  ;;  %v7434_v25 = vpop.permute.xlu1 %7433 }
 0xda8   : > { %v7473_v18 = vmax.f32 %v7445_v40, 0.0  ;;  %v7474_v1 = vmax.f32 %v7446_v62, 0.0  ;;  %v7496_v56 = vmul.f32 %v7468_v43, %v14265_v32  ;;  %v7448_v21 = vadd.f32 %v7430_v14, %v7404_v16 }
 0xda9   : > { %v7497_v8 = vmul.f32 %v7469_v44, %v14264_v27  ;;  %v7498_v39 = vmul.f32 %v7470_v53, %v14271_v10  ;;  %v7499_v33 = vmul.f32 %v7471_v6, %v14272_v52  ;;  %v7500_v5 = vmul.f32 %v7472_v55, %v14277_v29 }
 0xdaa   : > { %v7501_v22 = vmul.f32 %v7473_v18, %v14278_v61  ;;  %v7502_v60 = vmul.f32 %v7474_v1, %v14281_v50  ;;  %7524 = vst [vmem:[%s13278_s30] sm:$0xff] %v7496_v56  ;;  %v7449_v57 = vadd.f32 %v7430_v14, %v7405_v2  ;;  %v7450_v3 = vadd.f32 %v7430_v14, %v7406_v35 }
 0xdab   : > { %7525 = vst [vmem:[%s13278_s30 + $0x8] sm:$0xff] %v7497_v8  ;;  %7526 = vst [vmem:[%s13278_s30 + $0x10] sm:$0xff] %v7498_v39  ;;  %v7451_v16 = vadd.f32 %v7430_v14, %v7407_v47  ;;  %v7452_v12 = vadd.f32 %v7430_v14, %v7408_v0  ;;  %v7453_v45 = vadd.f32 %v7430_v14, %v7409_v26  ;;  %v7475_v28 = vmax.f32 %v7447_v37, 0.0 }
 0xdac   : > { %7527 = vst [vmem:[%s13278_s30 + $0x18] sm:$0xff] %v7499_v33  ;;  %7528 = vst [vmem:[%s13278_s30 + $0x20] sm:$0xff] %v7500_v5  ;;  %v7476_v24 = vmax.f32 %v7448_v21, 0.0  ;;  %v7477_v20 = vmax.f32 %v7449_v57, 0.0  ;;  %v7478_v36 = vmax.f32 %v7450_v3, 0.0  ;;  %v7454_v42 = vadd.f32 %v7434_v25, %v7410_v46 }
 0xdad   : > { %7529 = vst [vmem:[%s13278_s30 + $0x28] sm:$0xff] %v7501_v22  ;;  %7530 = vst [vmem:[%s13278_s30 + $0x30] sm:$0xff] %v7502_v60  ;;  %v7479_v2 = vmax.f32 %v7451_v16, 0.0  ;;  %v7480_v35 = vmax.f32 %v7452_v12, 0.0  ;;  %v7481_v11 = vmax.f32 %v7453_v45, 0.0  ;;  %v7503_v51 = vmul.f32 %v7475_v28, %v14265_v32 }
 0xdae   : > { %v7504_v47 = vmul.f32 %v7476_v24, %v14264_v27  ;;  %v7505_v0 = vmul.f32 %v7477_v20, %v14271_v10  ;;  %v7506_v26 = vmul.f32 %v7478_v36, %v14272_v52  ;;  %v7455_v14 = vadd.f32 %v7434_v25, %v7411_v19 }
 0xdaf   : > { %v7507_v63 = vmul.f32 %v7479_v2, %v14277_v29  ;;  %v7508_v46 = vmul.f32 %v7480_v35, %v14278_v61  ;;  %v7509_v49 = vmul.f32 %v7481_v11, %v14281_v50  ;;  %7531 = vst [vmem:[%s13278_s30 + $0x38] sm:$0xff] %v7503_v51  ;;  %v7456_v4 = vadd.f32 %v7434_v25, %v7412_v13 }
 0xdb0   : > { %7532 = vst [vmem:[%s13278_s30 + $0x40] sm:$0xff] %v7504_v47  ;;  %7533 = vst [vmem:[%s13278_s30 + $0x48] sm:$0xff] %v7505_v0  ;;  %v7457_v9 = vadd.f32 %v7434_v25, %v13272_v34  ;;  %v7458_v38 = vadd.f32 %v7434_v25, %v7414_v17  ;;  %v7459_v40 = vadd.f32 %v7434_v25, %v7415_v54  ;;  %v7482_v19 = vmax.f32 %v7454_v42, 0.0 }
 0xdb1   : > { %7534 = vst [vmem:[%s13278_s30 + $0x50] sm:$0xff] %v7506_v26  ;;  %v7460_v62 = vadd.f32 %v7434_v25, %v7416_v31  ;;  %7535 = vst [vmem:[%s13278_s30 + $0x58] sm:$0xff] %v7507_v63  ;;  %v7483_v43 = vmax.f32 %v7455_v14, 0.0  ;;  %v7484_v37 = vmax.f32 %v7456_v4, 0.0 }
 0xdb2   : > { %7536 = vst [vmem:[%s13278_s30 + $0x60] sm:$0xff] %v7508_v46  ;;  %7537 = vst [vmem:[%s13278_s30 + $0x68] sm:$0xff] %v7509_v49  ;;  %v7485_v13 = vmax.f32 %v7457_v9, 0.0  ;;  %v7486_v44 = vmax.f32 %v7458_v38, 0.0  ;;  %v7487_v53 = vmax.f32 %v7459_v40, 0.0  ;;  %v7510_v17 = vmul.f32 %v7482_v19, %v14265_v32 }
 0xdb3   : > { %v7488_v34 = vmax.f32 %v7460_v62, 0.0  ;;  %v7511_v54 = vmul.f32 %v7483_v43, %v14264_v27  ;;  %v7512_v31 = vmul.f32 %v7484_v37, %v14271_v10 }
 0xdb4   : > { %v7513_v6 = vmul.f32 %v7485_v13, %v14272_v52  ;;  %v7514_v55 = vmul.f32 %v7486_v44, %v14277_v29  ;;  %v7515_v18 = vmul.f32 %v7487_v53, %v14278_v61  ;;  %7538 = vst [vmem:[%s13278_s30 + $0x70] sm:$0xff] %v7510_v17 }
 0xdb5   : > { %v7516_v1 = vmul.f32 %v7488_v34, %v14281_v50  ;;  %7539 = vst [vmem:[%s13278_s30 + $0x78] sm:$0xff] %v7511_v54  ;;  %7540 = vst [vmem:[%s13278_s30 + $0x80] sm:$0xff] %v7512_v31 }
 0xdb6   : > { %7541 = vst [vmem:[%s13278_s30 + $0x88] sm:$0xff] %v7513_v6  ;;  %7542 = vst [vmem:[%s13278_s30 + $0x90] sm:$0xff] %v7514_v55 }
 0xdb7   : > { %7543 = vst [vmem:[%s13278_s30 + $0x98] sm:$0xff] %v7515_v18  ;;  %7544 = vst [vmem:[%s13278_s30 + $0xa0] sm:$0xff] %v7516_v1 }
 0xdd9   : > { %v7343_v56 = vpop.xlane.xlu1 %7342 }
 0xdda   : > { %v7347_v21 = vadd.f32 1e-05, %v7343_v56 }
 0xddc   : > { %8472 = vrsqrt.f32 %v7347_v21 }
 0xddd   : > { %v7438_v45 = vpop.permute.xlu1 %7437 }
 0xde6   : > { %v8473_v8 = vpop.eup %8472 }
 0xde7   : > { %v7373_v39 = vmul.f32 %v8473_v8, %v13106_v41  ;;  %v7374_v33 = vmul.f32 %v8473_v8, %v13082_v30  ;;  %v7375_v5 = vmul.f32 %v8473_v8, %v13140_v58  ;;  %v7376_v25 = vmul.f32 %v8473_v8, %v13128_v15 }
 0xde8   : > { %v7377_v22 = vmul.f32 %v8473_v8, %v13198_v48  ;;  %v7378_v60 = vmul.f32 %v8473_v8, %v13183_v23  ;;  %v7379_v57 = vmul.f32 %v8473_v8, %v13090_v7 }
 0xde9   : > { %v7417_v3 = vmul.f32 %v13254_v59, %v7373_v39  ;;  %v7418_v16 = vmul.f32 %v13254_v59, %v7374_v33  ;;  %v7419_v12 = vmul.f32 %v13254_v59, %v7375_v5  ;;  %v7420_v41 = vmul.f32 %v13254_v59, %v7376_v25 }
 0xdea   : > { %v7421_v30 = vmul.f32 %v13254_v59, %v7377_v22  ;;  %v7422_v58 = vmul.f32 %v13254_v59, %v7378_v60  ;;  %v7423_v15 = vmul.f32 %v13254_v59, %v7379_v57 }
 0xdeb   : > { %v7461_v48 = vadd.f32 %v7438_v45, %v7417_v3  ;;  %v7462_v28 = vadd.f32 %v7438_v45, %v7418_v16  ;;  %v7463_v23 = vadd.f32 %v7438_v45, %v7419_v12  ;;  %v7464_v24 = vadd.f32 %v7438_v45, %v7420_v41 }
 0xdec   : > { %v7465_v7 = vadd.f32 %v7438_v45, %v7421_v30  ;;  %v7466_v20 = vadd.f32 %v7438_v45, %v7422_v58  ;;  %v7467_v36 = vadd.f32 %v7438_v45, %v7423_v15 }
 0xded   : > { %v7489_v42 = vmax.f32 %v7461_v48, 0.0  ;;  %v7490_v2 = vmax.f32 %v7462_v28, 0.0  ;;  %v7491_v35 = vmax.f32 %v7463_v23, 0.0  ;;  %v7492_v11 = vmax.f32 %v7464_v24, 0.0 }
 0xdee   : > { %v7493_v51 = vmax.f32 %v7465_v7, 0.0  ;;  %v7494_v59 = vmax.f32 %v7466_v20, 0.0  ;;  %v7495_v47 = vmax.f32 %v7467_v36, 0.0 }
 0xdef   : > { %v7517_v0 = vmul.f32 %v7489_v42, %v14265_v32  ;;  %v7518_v26 = vmul.f32 %v7490_v2, %v14264_v27  ;;  %v7519_v14 = vmul.f32 %v7491_v35, %v14271_v10  ;;  %v7520_v63 = vmul.f32 %v7492_v11, %v14272_v52 }
 0xdf0   : > { %v7521_v46 = vmul.f32 %v7493_v51, %v14277_v29  ;;  %v7522_v49 = vmul.f32 %v7494_v59, %v14278_v61  ;;  %v7523_v4 = vmul.f32 %v7495_v47, %v14281_v50 }
 0xdf1   : > { %7545 = vst [vmem:[%s13278_s30 + $0xa8] sm:$0xff] %v7517_v0  ;;  %7546 = vst [vmem:[%s13278_s30 + $0xb0] sm:$0xff] %v7518_v26 }
 0xdf2   : > { %7547 = vst [vmem:[%s13278_s30 + $0xb8] sm:$0xff] %v7519_v14  ;;  %7548 = vst [vmem:[%s13278_s30 + $0xc0] sm:$0xff] %v7520_v63 }
 0xdf3   : > { %7549 = vst [vmem:[%s13278_s30 + $0xc8] sm:$0xff] %v7521_v46  ;;  %7550 = vst [vmem:[%s13278_s30 + $0xd0] sm:$0xff] %v7522_v49 }
 0xdf4   : > { %7551 = vst [vmem:[%s13278_s30 + $0xd8] sm:$0xff] %v7523_v4 }
 0xdf5 PF: > { %s14306_s15 = sld [smem:[#allocation4_spill]] }
 0xdfb   : > { %s16_s21 = sadd.s32 1, %s14306_s15  }
 0xdfc   : > { %p13_p4 = scmp.ge.s32.totalorder %s16_s21, 4  }
 0xdfe   :  { %15 = sbr.rel (!%p13_p4) target bundleno = 6 (0x6), region = 74 }

</bundles_post_ra>
